<compile_context>
chip_gen: v7x
topology: tpu7x:2x2x1
jax: 0.10.0
libtpu: 0.0.40
codegen_flags: <defaults>
</compile_context>

<pallas_src>
import functools

import jax
import jax.numpy as jnp
from jax.experimental import pallas as pl
from jax.experimental.pallas import tpu as pltpu


_CPAD = 128  # classifier weight output channels padded to one lane width (MXU)


def _lrelu(v, neg_slope):
    return jnp.where(v >= 0, v, neg_slope * v)


def _store_act_im2col(s_ref, a, *, W, HW, notfirst, notlast):
    """Store f32 activation `a` (HW, C) into the flat, haloed scratch as
    [left | centre | right] bf16 channel blocks (store-side dx-im2col).

    s_ref : ((H+2)*W, 3*C) bf16; interior rows are [W : W+HW].
    """
    C = a.shape[-1]
    dt = s_ref.dtype
    # roll(shift=1): row p <- a[p-1] (dx=0 tap); wrap at p==0 is masked.
    left = jnp.where(notfirst, pltpu.roll(a, shift=1, axis=0), 0.0)
    # roll(shift=HW-1) == roll(shift=-1): row p <- a[p+1] (dx=2 tap);
    # wrap at p==HW-1 is masked.
    right = jnp.where(notlast, pltpu.roll(a, shift=HW - 1, axis=0), 0.0)
    s_ref[W:W + HW, 0:C] = left.astype(dt)
    s_ref[W:W + HW, C:2 * C] = a.astype(dt)
    s_ref[W:W + HW, 2 * C:3 * C] = right.astype(dt)


def _conv3x3_flat(s_ref, w_ref, b_ref, *, W, HW, neg_slope, apply_lrelu):
    """3x3 'same' conv reading a flat, dx-im2col'd, row-haloed activation.

    s_ref : ((H+2)*W, 3*Cin) bf16   (halo rows zero, interior written)
    w_ref : (3, 3*Cin, Cout) bf16   (row block dy, rows ordered (dx, cin))
    b_ref : (1, Cout) f32 or None
    returns (HW, Cout) f32
    """
    acc = None
    for dy in range(3):
        tap = s_ref[dy * W:dy * W + HW, :]          # aligned (HW, 3*Cin) slice
        d = jax.lax.dot_general(tap, w_ref[dy],
                                (((1,), (0,)), ((), ())),
                                preferred_element_type=jnp.float32)
        acc = d if acc is None else acc + d
    if b_ref is not None:
        acc = acc + b_ref[...]
    if apply_lrelu:
        acc = _lrelu(acc, neg_slope)
    return acc


def _disc_kernel(x_ref, w1_ref, b1_ref, w2_ref, b2_ref, w3_ref, b3_ref,
                 w4_ref, b4_ref, o_ref, s1_ref, s2_ref, s3_ref,
                 *, H, W, neg_slope):
    HW = H * W

    # Column-edge masks for the shifted (dx=0 / dx=2) taps; shared by all layers.
    col = jax.lax.broadcasted_iota(jnp.int32, (HW, 1), 0) % W
    notfirst = col != 0
    notlast = col != (W - 1)

    # Zero only the top/bottom halo row bands of each scratch, every step
    # (cheap; interior rows are fully overwritten below; megacore-safe).
    for sref in (s1_ref, s2_ref, s3_ref):
        Ck = sref.shape[-1]
        z = jnp.zeros((W, Ck), sref.dtype)
        sref[0:W, :] = z
        sref[(H + 1) * W:(H + 2) * W, :] = z

    # ---- conv1: single im2col matmul (patches built wrapper-side), K=9*Cin ----
    a1 = jax.lax.dot_general(x_ref[0], w1_ref[...], (((1,), (0,)), ((), ())),
                             preferred_element_type=jnp.float32)
    a1 = _lrelu(a1 + b1_ref[...], neg_slope)
    _store_act_im2col(s1_ref, a1, W=W, HW=HW, notfirst=notfirst, notlast=notlast)

    # ---- conv2 + LeakyReLU ----
    a2 = _conv3x3_flat(s1_ref, w2_ref, b2_ref, W=W, HW=HW,
                       neg_slope=neg_slope, apply_lrelu=True)
    _store_act_im2col(s2_ref, a2, W=W, HW=HW, notfirst=notfirst, notlast=notlast)

    # ---- conv3 + LeakyReLU ----
    a3 = _conv3x3_flat(s2_ref, w3_ref, b3_ref, W=W, HW=HW,
                       neg_slope=neg_slope, apply_lrelu=True)
    _store_act_im2col(s3_ref, a3, W=W, HW=HW, notfirst=notfirst, notlast=notlast)

    # ---- classifier: MXU matmul with lane-padded Cout; keep only channel 0 ----
    a4 = _conv3x3_flat(s3_ref, w4_ref, None, W=W, HW=HW,
                       neg_slope=neg_slope, apply_lrelu=False)
    o_ref[0] = (a4[:, 0:1] + b4_ref[...]).astype(o_ref.dtype)


def fc_discriminator_img(params, x_nchw):
    """Forward pass matching FCDiscriminator_img. Input/output are NCHW."""
    x = jnp.transpose(x_nchw, (0, 2, 3, 1))                   # NCHW -> NHWC
    B, H, W, Cin = x.shape
    HW = H * W
    assert W % 8 == 0 and HW % 8 == 0, (H, W)

    # im2col of the (tiny-Cin) network input for conv1: (B, HW, 9*Cin),
    # tap order (dy, dx, cin) matching w1.reshape(9*Cin, C1).
    xp = jnp.pad(x, ((0, 0), (1, 1), (1, 1), (0, 0)))
    patches = jnp.concatenate(
        [xp[:, dy:dy + H, dx:dx + W, :] for dy in range(3) for dx in range(3)],
        axis=-1).reshape(B, HW, 9 * Cin).astype(jnp.bfloat16)

    w1, b1 = params["conv1"]
    w2, b2 = params["conv2"]
    w3, b3 = params["conv3"]
    w4, b4 = params["classifier"]
    C1, C2 = w1.shape[-1], w2.shape[-1]

    # (3,3,Cin,Cout) -> (3, 3*Cin, Cout): per-dy weight with rows ordered
    # (dx, cin), matching the [left|centre|right] scratch channel blocks.
    w1m = w1.reshape(9 * Cin, C1).astype(jnp.bfloat16)
    w2m = w2.reshape(3, 3 * C1, C2).astype(jnp.bfloat16)
    w3m = w3.reshape(3, 3 * C2, C2).astype(jnp.bfloat16)
    w4m = (jnp.zeros((3, 3 * C2, _CPAD), jnp.float32)
           .at[:, :, 0].set(w4.reshape(3, 3 * C2))).astype(jnp.bfloat16)

    kernel = functools.partial(_disc_kernel, H=H, W=W, neg_slope=0.2)

    out = pl.pallas_call(
        kernel,
        out_shape=jax.ShapeDtypeStruct((B, HW, 1), jnp.float32),
        grid_spec=pltpu.PrefetchScalarGridSpec(
            num_scalar_prefetch=0,
            grid=(B,),
            in_specs=[
                pl.BlockSpec((1, HW, 9 * Cin), lambda b: (b, 0, 0)),
                pl.BlockSpec((9 * Cin, C1), lambda b: (0, 0)),
                pl.BlockSpec((1, C1), lambda b: (0, 0)),
                pl.BlockSpec((3, 3 * C1, C2), lambda b: (0, 0, 0)),
                pl.BlockSpec((1, C2), lambda b: (0, 0)),
                pl.BlockSpec((3, 3 * C2, C2), lambda b: (0, 0, 0)),
                pl.BlockSpec((1, C2), lambda b: (0, 0)),
                pl.BlockSpec((3, 3 * C2, _CPAD), lambda b: (0, 0, 0)),
                pl.BlockSpec((1, 1), lambda b: (0, 0)),
            ],
            out_specs=pl.BlockSpec((1, HW, 1), lambda b: (b, 0, 0)),
            scratch_shapes=[
                pltpu.VMEM(((H + 2) * W, 3 * C1), jnp.bfloat16),
                pltpu.VMEM(((H + 2) * W, 3 * C2), jnp.bfloat16),
                pltpu.VMEM(((H + 2) * W, 3 * C2), jnp.bfloat16),
            ],
        ),
        compiler_params=pltpu.CompilerParams(
            dimension_semantics=("parallel",)),
    )(patches,
      w1m, b1.reshape(1, C1).astype(jnp.float32),
      w2m, b2.reshape(1, C2).astype(jnp.float32),
      w3m, b3.reshape(1, C2).astype(jnp.float32),
      w4m, b4.reshape(1, 1).astype(jnp.float32))

    y = out.reshape(B, H, W, 1)
    return jnp.transpose(y, (0, 3, 1, 2))                     # NHWC -> NCHW


def init_params(key, in_channels, ndf1=256, ndf2=128):
    """Deterministic synthetic params. Weights HWIO, biases (Cout,)."""
    def conv_init(k, cin, cout):
        kw, kb = jax.random.split(k)
        fan_in = cin * 9
        scale = 1.0 / jnp.sqrt(fan_in)
        w = jax.random.uniform(kw, (3, 3, cin, cout), jnp.float32, -scale, scale)
        b = jax.random.uniform(kb, (cout,), jnp.float32, -scale, scale)
        return w, b

    k1, k2, k3, k4 = jax.random.split(key, 4)
    return {
        "conv1": conv_init(k1, in_channels, ndf1),
        "conv2": conv_init(k2, ndf1, ndf2),
        "conv3": conv_init(k3, ndf2, ndf2),
        "classifier": conv_init(k4, ndf2, 1),
    }


def _reference_forward(params, x_nchw):
    """Pure-JAX f32 reference (lax.conv) for correctness checking."""
    x = jnp.transpose(x_nchw, (0, 2, 3, 1))

    def conv(x, w, b):
        y = jax.lax.conv_general_dilated(
            x, w, window_strides=(1, 1), padding="SAME",
            dimension_numbers=("NHWC", "HWIO", "NHWC"))
        return y + b

    def lrelu(v):
        return jnp.where(v >= 0, v, 0.2 * v)

    x = lrelu(conv(x, *params["conv1"]))
    x = lrelu(conv(x, *params["conv2"]))
    x = lrelu(conv(x, *params["conv3"]))
    x = conv(x, *params["classifier"])
    return jnp.transpose(x, (0, 3, 1, 2))


if __name__ == "__main__":
    key = jax.random.PRNGKey(0)
    k_params, k_x = jax.random.split(key)

    B, C_IN, H, W = 2, 4, 16, 16
    params = init_params(k_params, C_IN, ndf1=256, ndf2=128)
    x = jax.random.normal(k_x, (B, C_IN, H, W), jnp.float32)

    out = jax.block_until_ready(fc_discriminator_img(params, x))
    ref = jax.block_until_ready(_reference_forward(params, x))

    assert out.shape == (B, 1, H, W), out.shape
    max_err = float(jnp.max(jnp.abs(out - ref)))
    # bf16 MXU operands with f32 accumulation: expected |err| ~1e-3 at this scale.
    assert jnp.allclose(out, ref, atol=1e-2, rtol=1e-2), max_err

    print("KERNEL_OK")
</pallas_src>

<mosaic_0001>
module attributes {stable_mosaic.version = 11 : i64} {
  func.func @_disc_kernel(%arg0: i32, %arg1: memref<1x256x36xbf16, #tpu.memory_space<vmem>>, %arg2: memref<36x256xbf16, #tpu.memory_space<vmem>>, %arg3: memref<1x256xf32, #tpu.memory_space<vmem>>, %arg4: memref<3x768x128xbf16, #tpu.memory_space<vmem>>, %arg5: memref<1x128xf32, #tpu.memory_space<vmem>>, %arg6: memref<3x384x128xbf16, #tpu.memory_space<vmem>>, %arg7: memref<1x128xf32, #tpu.memory_space<vmem>>, %arg8: memref<3x384x128xbf16, #tpu.memory_space<vmem>>, %arg9: memref<1x1xf32, #tpu.memory_space<vmem>>, %arg10: memref<1x256x1xf32, #tpu.memory_space<vmem>>, %arg11: memref<288x768xbf16, #tpu.memory_space<vmem>>, %arg12: memref<288x384xbf16, #tpu.memory_space<vmem>>, %arg13: memref<288x384xbf16, #tpu.memory_space<vmem>>) attributes {dimension_semantics = [#tpu.dimension_semantics<parallel>], iteration_bounds = array<i64: 2>, scalar_prefetch = 0 : i64, scratch_operands = 3 : i64, tpu.core_type = #tpu.core_type<tc>, window_params = [{transform_indices = @transform_0, window_bounds = array<i64: 1, 256, 36>}, {pipeline_mode = #tpu.pipeline_mode<synchronous>, transform_indices = @transform_1, window_bounds = array<i64: 36, 256>}, {pipeline_mode = #tpu.pipeline_mode<synchronous>, transform_indices = @transform_2, window_bounds = array<i64: 1, 256>}, {pipeline_mode = #tpu.pipeline_mode<synchronous>, transform_indices = @transform_3, window_bounds = array<i64: 3, 768, 128>}, {pipeline_mode = #tpu.pipeline_mode<synchronous>, transform_indices = @transform_4, window_bounds = array<i64: 1, 128>}, {pipeline_mode = #tpu.pipeline_mode<synchronous>, transform_indices = @transform_5, window_bounds = array<i64: 3, 384, 128>}, {pipeline_mode = #tpu.pipeline_mode<synchronous>, transform_indices = @transform_6, window_bounds = array<i64: 1, 128>}, {pipeline_mode = #tpu.pipeline_mode<synchronous>, transform_indices = @transform_7, window_bounds = array<i64: 3, 384, 128>}, {pipeline_mode = #tpu.pipeline_mode<synchronous>, transform_indices = @transform_8, window_bounds = array<i64: 1, 1>}, {transform_indices = @transform_9, window_bounds = array<i64: 1, 256, 1>}]} {
    %0 = tpu.iota {dimensions = array<i32: 0>} : vector<256x1xi32>
    %c16_i32 = arith.constant 16 : i32
    %c0_i32 = arith.constant 0 : i32
    %1 = arith.cmpi eq, %c16_i32, %c0_i32 : i32
    %c1_i32 = arith.constant 1 : i32
    %2 = arith.select %1, %c1_i32, %c16_i32 : i32
    %3 = vector.broadcast %2 : i32 to vector<256x1xi32>
    %4 = arith.remsi %0, %3 : vector<256x1xi32>
    %c0_i32_0 = arith.constant 0 : i32
    %5 = vector.broadcast %c0_i32_0 : i32 to vector<256x1xi32>
    %6 = arith.cmpi ne, %4, %5 : vector<256x1xi32>
    %c0_i32_1 = arith.constant 0 : i32
    %7 = vector.broadcast %c0_i32_1 : i32 to vector<256x1xi32>
    %8 = arith.cmpi slt, %4, %7 : vector<256x1xi32>
    %c0_i32_2 = arith.constant 0 : i32
    %9 = arith.cmpi slt, %2, %c0_i32_2 : i32
    %10 = vector.broadcast %9 : i1 to vector<256x1xi1>
    %11 = vector.broadcast %10 : vector<256x1xi1> to vector<256x1xi1>
    %12 = arith.xori %8, %11 : vector<256x1xi1>
    %13 = arith.andi %12, %6 : vector<256x1xi1>
    %14 = vector.broadcast %2 : i32 to vector<256x1xi32>
    %15 = arith.addi %4, %14 : vector<256x1xi32>
    %16 = arith.select %13, %15, %4 : vector<256x1xi1>, vector<256x1xi32>
    %c0_i32_3 = arith.constant 0 : i32
    %17 = vector.broadcast %c0_i32_3 : i32 to vector<256x1xi32>
    %18 = arith.cmpi ne, %16, %17 : vector<256x1xi32>
    %c15_i32 = arith.constant 15 : i32
    %19 = vector.broadcast %c15_i32 : i32 to vector<256x1xi32>
    %20 = arith.cmpi ne, %16, %19 : vector<256x1xi32>
    %cst = arith.constant 0.000000e+00 : bf16
    %21 = vector.broadcast %cst : bf16 to vector<16x768xbf16>
    %c0 = arith.constant 0 : index
    %c0_4 = arith.constant 0 : index
    %22 = vector.load %arg11[%c0, %c0_4] : memref<288x768xbf16, #tpu.memory_space<vmem>>, vector<16x768xbf16>
    tpu.vector_store %arg11[%c0, %c0_4], %21 {strides = array<i32>} : memref<288x768xbf16, #tpu.memory_space<vmem>>, vector<16x768xbf16>,
    %c272 = arith.constant 272 : index
    %c0_5 = arith.constant 0 : index
    %23 = vector.load %arg11[%c272, %c0_5] : memref<288x768xbf16, #tpu.memory_space<vmem>>, vector<16x768xbf16>
    tpu.vector_store %arg11[%c272, %c0_5], %21 {strides = array<i32>} : memref<288x768xbf16, #tpu.memory_space<vmem>>, vector<16x768xbf16>,
    %cst_6 = arith.constant 0.000000e+00 : bf16
    %24 = vector.broadcast %cst_6 : bf16 to vector<16x384xbf16>
    %c0_7 = arith.constant 0 : index
    %c0_8 = arith.constant 0 : index
    %25 = vector.load %arg12[%c0_7, %c0_8] : memref<288x384xbf16, #tpu.memory_space<vmem>>, vector<16x384xbf16>
    tpu.vector_store %arg12[%c0_7, %c0_8], %24 {strides = array<i32>} : memref<288x384xbf16, #tpu.memory_space<vmem>>, vector<16x384xbf16>,
    %c272_9 = arith.constant 272 : index
    %c0_10 = arith.constant 0 : index
    %26 = vector.load %arg12[%c272_9, %c0_10] : memref<288x384xbf16, #tpu.memory_space<vmem>>, vector<16x384xbf16>
    tpu.vector_store %arg12[%c272_9, %c0_10], %24 {strides = array<i32>} : memref<288x384xbf16, #tpu.memory_space<vmem>>, vector<16x384xbf16>,
    %cst_11 = arith.constant 0.000000e+00 : bf16
    %27 = vector.broadcast %cst_11 : bf16 to vector<16x384xbf16>
    %c0_12 = arith.constant 0 : index
    %c0_13 = arith.constant 0 : index
    %28 = vector.load %arg13[%c0_12, %c0_13] : memref<288x384xbf16, #tpu.memory_space<vmem>>, vector<16x384xbf16>
    tpu.vector_store %arg13[%c0_12, %c0_13], %27 {strides = array<i32>} : memref<288x384xbf16, #tpu.memory_space<vmem>>, vector<16x384xbf16>,
    %c272_14 = arith.constant 272 : index
    %c0_15 = arith.constant 0 : index
    %29 = vector.load %arg13[%c272_14, %c0_15] : memref<288x384xbf16, #tpu.memory_space<vmem>>, vector<16x384xbf16>
    tpu.vector_store %arg13[%c272_14, %c0_15], %27 {strides = array<i32>} : memref<288x384xbf16, #tpu.memory_space<vmem>>, vector<16x384xbf16>,
    %c0_16 = arith.constant 0 : index
    %c0_17 = arith.constant 0 : index
    %c0_18 = arith.constant 0 : index
    %30 = vector.load %arg1[%c0_16, %c0_17, %c0_18] : memref<1x256x36xbf16, #tpu.memory_space<vmem>>, vector<1x256x36xbf16>
    %31 = vector.shape_cast %30 : vector<1x256x36xbf16> to vector<256x36xbf16>
    %c0_19 = arith.constant 0 : index
    %c0_20 = arith.constant 0 : index
    %32 = vector.load %arg2[%c0_19, %c0_20] : memref<36x256xbf16, #tpu.memory_space<vmem>>, vector<36x256xbf16>
    %cst_21 = arith.constant dense<0.000000e+00> : vector<256x256xf32>
    %33 = tpu.matmul %31, %32, %cst_21 {dimension_numbers = #tpu.dot_dimension_numbers<[1], [0], [0], [1], [0, 0, 1, 1], [], []>} : vector<256x36xbf16>, vector<36x256xbf16>, vector<256x256xf32> -> vector<256x256xf32>
    %c0_22 = arith.constant 0 : index
    %c0_23 = arith.constant 0 : index
    %34 = vector.load %arg3[%c0_22, %c0_23] : memref<1x256xf32, #tpu.memory_space<vmem>>, vector<1x256xf32>
    %35 = vector.broadcast %34 : vector<1x256xf32> to vector<256x256xf32>
    %36 = arith.addf %33, %35 : vector<256x256xf32>
    %cst_24 = arith.constant 0.000000e+00 : f32
    %37 = vector.broadcast %cst_24 : f32 to vector<256x256xf32>
    %38 = arith.cmpf oge, %36, %37 : vector<256x256xf32>
    %cst_25 = arith.constant 2.000000e-01 : f32
    %39 = vector.broadcast %cst_25 : f32 to vector<256x256xf32>
    %40 = arith.mulf %39, %36 : vector<256x256xf32>
    %41 = arith.select %38, %36, %40 : vector<256x256xi1>, vector<256x256xf32>
    %c1_i32_26 = arith.constant 1 : i32
    %42 = tpu.dynamic_rotate %41 by %c1_i32_26 dim 0 : vector<256x256xf32>, i32 -> vector<256x256xf32>
    %cst_27 = arith.constant 0.000000e+00 : f32
    %43 = vector.shape_cast %18 : vector<256x1xi1> to vector<256x1xi1>
    %44 = vector.broadcast %43 : vector<256x1xi1> to vector<256x256xi1>
    %45 = vector.broadcast %cst_27 : f32 to vector<256x256xf32>
    %46 = arith.select %44, %42, %45 : vector<256x256xi1>, vector<256x256xf32>
    %c255_i32 = arith.constant 255 : i32
    %47 = tpu.dynamic_rotate %41 by %c255_i32 dim 0 : vector<256x256xf32>, i32 -> vector<256x256xf32>
    %cst_28 = arith.constant 0.000000e+00 : f32
    %48 = vector.shape_cast %20 : vector<256x1xi1> to vector<256x1xi1>
    %49 = vector.broadcast %48 : vector<256x1xi1> to vector<256x256xi1>
    %50 = vector.broadcast %cst_28 : f32 to vector<256x256xf32>
    %51 = arith.select %49, %47, %50 : vector<256x256xi1>, vector<256x256xf32>
    %52 = arith.truncf %46 : vector<256x256xf32> to vector<256x256xbf16>
    %c16 = arith.constant 16 : index
    %c0_29 = arith.constant 0 : index
    %53 = vector.load %arg11[%c16, %c0_29] : memref<288x768xbf16, #tpu.memory_space<vmem>>, vector<256x256xbf16>
    tpu.vector_store %arg11[%c16, %c0_29], %52 {strides = array<i32>} : memref<288x768xbf16, #tpu.memory_space<vmem>>, vector<256x256xbf16>,
    %54 = arith.truncf %41 : vector<256x256xf32> to vector<256x256xbf16>
    %c16_30 = arith.constant 16 : index
    %c256 = arith.constant 256 : index
    %55 = vector.load %arg11[%c16_30, %c256] : memref<288x768xbf16, #tpu.memory_space<vmem>>, vector<256x256xbf16>
    tpu.vector_store %arg11[%c16_30, %c256], %54 {strides = array<i32>} : memref<288x768xbf16, #tpu.memory_space<vmem>>, vector<256x256xbf16>,
    %56 = arith.truncf %51 : vector<256x256xf32> to vector<256x256xbf16>
    %c16_31 = arith.constant 16 : index
    %c512 = arith.constant 512 : index
    %57 = vector.load %arg11[%c16_31, %c512] : memref<288x768xbf16, #tpu.memory_space<vmem>>, vector<256x256xbf16>
    tpu.vector_store %arg11[%c16_31, %c512], %56 {strides = array<i32>} : memref<288x768xbf16, #tpu.memory_space<vmem>>, vector<256x256xbf16>,
    %c0_32 = arith.constant 0 : index
    %c0_33 = arith.constant 0 : index
    %58 = vector.load %arg11[%c0_32, %c0_33] : memref<288x768xbf16, #tpu.memory_space<vmem>>, vector<256x768xbf16>
    %c0_34 = arith.constant 0 : index
    %c0_35 = arith.constant 0 : index
    %c0_36 = arith.constant 0 : index
    %59 = vector.load %arg4[%c0_34, %c0_35, %c0_36] : memref<3x768x128xbf16, #tpu.memory_space<vmem>>, vector<1x768x128xbf16>
    %60 = vector.shape_cast %59 : vector<1x768x128xbf16> to vector<768x128xbf16>
    %cst_37 = arith.constant dense<0.000000e+00> : vector<256x128xf32>
    %61 = tpu.matmul %58, %60, %cst_37 {dimension_numbers = #tpu.dot_dimension_numbers<[1], [0], [0], [1], [0, 0, 1, 1], [], []>} : vector<256x768xbf16>, vector<768x128xbf16>, vector<256x128xf32> -> vector<256x128xf32>
    %c16_38 = arith.constant 16 : index
    %c0_39 = arith.constant 0 : index
    %62 = vector.load %arg11[%c16_38, %c0_39] : memref<288x768xbf16, #tpu.memory_space<vmem>>, vector<256x768xbf16>
    %c1 = arith.constant 1 : index
    %c0_40 = arith.constant 0 : index
    %c0_41 = arith.constant 0 : index
    %63 = vector.load %arg4[%c1, %c0_40, %c0_41] : memref<3x768x128xbf16, #tpu.memory_space<vmem>>, vector<1x768x128xbf16>
    %64 = vector.shape_cast %63 : vector<1x768x128xbf16> to vector<768x128xbf16>
    %cst_42 = arith.constant dense<0.000000e+00> : vector<256x128xf32>
    %65 = tpu.matmul %62, %64, %cst_42 {dimension_numbers = #tpu.dot_dimension_numbers<[1], [0], [0], [1], [0, 0, 1, 1], [], []>} : vector<256x768xbf16>, vector<768x128xbf16>, vector<256x128xf32> -> vector<256x128xf32>
    %66 = arith.addf %61, %65 : vector<256x128xf32>
    %c32 = arith.constant 32 : index
    %c0_43 = arith.constant 0 : index
    %67 = vector.load %arg11[%c32, %c0_43] : memref<288x768xbf16, #tpu.memory_space<vmem>>, vector<256x768xbf16>
    %c2 = arith.constant 2 : index
    %c0_44 = arith.constant 0 : index
    %c0_45 = arith.constant 0 : index
    %68 = vector.load %arg4[%c2, %c0_44, %c0_45] : memref<3x768x128xbf16, #tpu.memory_space<vmem>>, vector<1x768x128xbf16>
    %69 = vector.shape_cast %68 : vector<1x768x128xbf16> to vector<768x128xbf16>
    %cst_46 = arith.constant dense<0.000000e+00> : vector<256x128xf32>
    %70 = tpu.matmul %67, %69, %cst_46 {dimension_numbers = #tpu.dot_dimension_numbers<[1], [0], [0], [1], [0, 0, 1, 1], [], []>} : vector<256x768xbf16>, vector<768x128xbf16>, vector<256x128xf32> -> vector<256x128xf32>
    %71 = arith.addf %66, %70 : vector<256x128xf32>
    %c0_47 = arith.constant 0 : index
    %c0_48 = arith.constant 0 : index
    %72 = vector.load %arg5[%c0_47, %c0_48] : memref<1x128xf32, #tpu.memory_space<vmem>>, vector<1x128xf32>
    %73 = vector.broadcast %72 : vector<1x128xf32> to vector<256x128xf32>
    %74 = arith.addf %71, %73 : vector<256x128xf32>
    %cst_49 = arith.constant 0.000000e+00 : f32
    %75 = vector.broadcast %cst_49 : f32 to vector<256x128xf32>
    %76 = arith.cmpf oge, %74, %75 : vector<256x128xf32>
    %cst_50 = arith.constant 2.000000e-01 : f32
    %77 = vector.broadcast %cst_50 : f32 to vector<256x128xf32>
    %78 = arith.mulf %77, %74 : vector<256x128xf32>
    %79 = arith.select %76, %74, %78 : vector<256x128xi1>, vector<256x128xf32>
    %c1_i32_51 = arith.constant 1 : i32
    %80 = tpu.dynamic_rotate %79 by %c1_i32_51 dim 0 : vector<256x128xf32>, i32 -> vector<256x128xf32>
    %cst_52 = arith.constant 0.000000e+00 : f32
    %81 = vector.shape_cast %18 : vector<256x1xi1> to vector<256x1xi1>
    %82 = vector.broadcast %81 : vector<256x1xi1> to vector<256x128xi1>
    %83 = vector.broadcast %cst_52 : f32 to vector<256x128xf32>
    %84 = arith.select %82, %80, %83 : vector<256x128xi1>, vector<256x128xf32>
    %c255_i32_53 = arith.constant 255 : i32
    %85 = tpu.dynamic_rotate %79 by %c255_i32_53 dim 0 : vector<256x128xf32>, i32 -> vector<256x128xf32>
    %cst_54 = arith.constant 0.000000e+00 : f32
    %86 = vector.shape_cast %20 : vector<256x1xi1> to vector<256x1xi1>
    %87 = vector.broadcast %86 : vector<256x1xi1> to vector<256x128xi1>
    %88 = vector.broadcast %cst_54 : f32 to vector<256x128xf32>
    %89 = arith.select %87, %85, %88 : vector<256x128xi1>, vector<256x128xf32>
    %90 = arith.truncf %84 : vector<256x128xf32> to vector<256x128xbf16>
    %c16_55 = arith.constant 16 : index
    %c0_56 = arith.constant 0 : index
    %91 = vector.load %arg12[%c16_55, %c0_56] : memref<288x384xbf16, #tpu.memory_space<vmem>>, vector<256x128xbf16>
    tpu.vector_store %arg12[%c16_55, %c0_56], %90 {strides = array<i32>} : memref<288x384xbf16, #tpu.memory_space<vmem>>, vector<256x128xbf16>,
    %92 = arith.truncf %79 : vector<256x128xf32> to vector<256x128xbf16>
    %c16_57 = arith.constant 16 : index
    %c128 = arith.constant 128 : index
    %93 = vector.load %arg12[%c16_57, %c128] : memref<288x384xbf16, #tpu.memory_space<vmem>>, vector<256x128xbf16>
    tpu.vector_store %arg12[%c16_57, %c128], %92 {strides = array<i32>} : memref<288x384xbf16, #tpu.memory_space<vmem>>, vector<256x128xbf16>,
    %94 = arith.truncf %89 : vector<256x128xf32> to vector<256x128xbf16>
    %c16_58 = arith.constant 16 : index
    %c256_59 = arith.constant 256 : index
    %95 = vector.load %arg12[%c16_58, %c256_59] : memref<288x384xbf16, #tpu.memory_space<vmem>>, vector<256x128xbf16>
    tpu.vector_store %arg12[%c16_58, %c256_59], %94 {strides = array<i32>} : memref<288x384xbf16, #tpu.memory_space<vmem>>, vector<256x128xbf16>,
    %c0_60 = arith.constant 0 : index
    %c0_61 = arith.constant 0 : index
    %96 = vector.load %arg12[%c0_60, %c0_61] : memref<288x384xbf16, #tpu.memory_space<vmem>>, vector<256x384xbf16>
    %c0_62 = arith.constant 0 : index
    %c0_63 = arith.constant 0 : index
    %c0_64 = arith.constant 0 : index
    %97 = vector.load %arg6[%c0_62, %c0_63, %c0_64] : memref<3x384x128xbf16, #tpu.memory_space<vmem>>, vector<1x384x128xbf16>
    %98 = vector.shape_cast %97 : vector<1x384x128xbf16> to vector<384x128xbf16>
    %cst_65 = arith.constant dense<0.000000e+00> : vector<256x128xf32>
    %99 = tpu.matmul %96, %98, %cst_65 {dimension_numbers = #tpu.dot_dimension_numbers<[1], [0], [0], [1], [0, 0, 1, 1], [], []>} : vector<256x384xbf16>, vector<384x128xbf16>, vector<256x128xf32> -> vector<256x128xf32>
    %c16_66 = arith.constant 16 : index
    %c0_67 = arith.constant 0 : index
    %100 = vector.load %arg12[%c16_66, %c0_67] : memref<288x384xbf16, #tpu.memory_space<vmem>>, vector<256x384xbf16>
    %c1_68 = arith.constant 1 : index
    %c0_69 = arith.constant 0 : index
    %c0_70 = arith.constant 0 : index
    %101 = vector.load %arg6[%c1_68, %c0_69, %c0_70] : memref<3x384x128xbf16, #tpu.memory_space<vmem>>, vector<1x384x128xbf16>
    %102 = vector.shape_cast %101 : vector<1x384x128xbf16> to vector<384x128xbf16>
    %cst_71 = arith.constant dense<0.000000e+00> : vector<256x128xf32>
    %103 = tpu.matmul %100, %102, %cst_71 {dimension_numbers = #tpu.dot_dimension_numbers<[1], [0], [0], [1], [0, 0, 1, 1], [], []>} : vector<256x384xbf16>, vector<384x128xbf16>, vector<256x128xf32> -> vector<256x128xf32>
    %104 = arith.addf %99, %103 : vector<256x128xf32>
    %c32_72 = arith.constant 32 : index
    %c0_73 = arith.constant 0 : index
    %105 = vector.load %arg12[%c32_72, %c0_73] : memref<288x384xbf16, #tpu.memory_space<vmem>>, vector<256x384xbf16>
    %c2_74 = arith.constant 2 : index
    %c0_75 = arith.constant 0 : index
    %c0_76 = arith.constant 0 : index
    %106 = vector.load %arg6[%c2_74, %c0_75, %c0_76] : memref<3x384x128xbf16, #tpu.memory_space<vmem>>, vector<1x384x128xbf16>
    %107 = vector.shape_cast %106 : vector<1x384x128xbf16> to vector<384x128xbf16>
    %cst_77 = arith.constant dense<0.000000e+00> : vector<256x128xf32>
    %108 = tpu.matmul %105, %107, %cst_77 {dimension_numbers = #tpu.dot_dimension_numbers<[1], [0], [0], [1], [0, 0, 1, 1], [], []>} : vector<256x384xbf16>, vector<384x128xbf16>, vector<256x128xf32> -> vector<256x128xf32>
    %109 = arith.addf %104, %108 : vector<256x128xf32>
    %c0_78 = arith.constant 0 : index
    %c0_79 = arith.constant 0 : index
    %110 = vector.load %arg7[%c0_78, %c0_79] : memref<1x128xf32, #tpu.memory_space<vmem>>, vector<1x128xf32>
    %111 = vector.broadcast %110 : vector<1x128xf32> to vector<256x128xf32>
    %112 = arith.addf %109, %111 : vector<256x128xf32>
    %cst_80 = arith.constant 0.000000e+00 : f32
    %113 = vector.broadcast %cst_80 : f32 to vector<256x128xf32>
    %114 = arith.cmpf oge, %112, %113 : vector<256x128xf32>
    %cst_81 = arith.constant 2.000000e-01 : f32
    %115 = vector.broadcast %cst_81 : f32 to vector<256x128xf32>
    %116 = arith.mulf %115, %112 : vector<256x128xf32>
    %117 = arith.select %114, %112, %116 : vector<256x128xi1>, vector<256x128xf32>
    %c1_i32_82 = arith.constant 1 : i32
    %118 = tpu.dynamic_rotate %117 by %c1_i32_82 dim 0 : vector<256x128xf32>, i32 -> vector<256x128xf32>
    %cst_83 = arith.constant 0.000000e+00 : f32
    %119 = vector.shape_cast %18 : vector<256x1xi1> to vector<256x1xi1>
    %120 = vector.broadcast %119 : vector<256x1xi1> to vector<256x128xi1>
    %121 = vector.broadcast %cst_83 : f32 to vector<256x128xf32>
    %122 = arith.select %120, %118, %121 : vector<256x128xi1>, vector<256x128xf32>
    %c255_i32_84 = arith.constant 255 : i32
    %123 = tpu.dynamic_rotate %117 by %c255_i32_84 dim 0 : vector<256x128xf32>, i32 -> vector<256x128xf32>
    %cst_85 = arith.constant 0.000000e+00 : f32
    %124 = vector.shape_cast %20 : vector<256x1xi1> to vector<256x1xi1>
    %125 = vector.broadcast %124 : vector<256x1xi1> to vector<256x128xi1>
    %126 = vector.broadcast %cst_85 : f32 to vector<256x128xf32>
    %127 = arith.select %125, %123, %126 : vector<256x128xi1>, vector<256x128xf32>
    %128 = arith.truncf %122 : vector<256x128xf32> to vector<256x128xbf16>
    %c16_86 = arith.constant 16 : index
    %c0_87 = arith.constant 0 : index
    %129 = vector.load %arg13[%c16_86, %c0_87] : memref<288x384xbf16, #tpu.memory_space<vmem>>, vector<256x128xbf16>
    tpu.vector_store %arg13[%c16_86, %c0_87], %128 {strides = array<i32>} : memref<288x384xbf16, #tpu.memory_space<vmem>>, vector<256x128xbf16>,
    %130 = arith.truncf %117 : vector<256x128xf32> to vector<256x128xbf16>
    %c16_88 = arith.constant 16 : index
    %c128_89 = arith.constant 128 : index
    %131 = vector.load %arg13[%c16_88, %c128_89] : memref<288x384xbf16, #tpu.memory_space<vmem>>, vector<256x128xbf16>
    tpu.vector_store %arg13[%c16_88, %c128_89], %130 {strides = array<i32>} : memref<288x384xbf16, #tpu.memory_space<vmem>>, vector<256x128xbf16>,
    %132 = arith.truncf %127 : vector<256x128xf32> to vector<256x128xbf16>
    %c16_90 = arith.constant 16 : index
    %c256_91 = arith.constant 256 : index
    %133 = vector.load %arg13[%c16_90, %c256_91] : memref<288x384xbf16, #tpu.memory_space<vmem>>, vector<256x128xbf16>
    tpu.vector_store %arg13[%c16_90, %c256_91], %132 {strides = array<i32>} : memref<288x384xbf16, #tpu.memory_space<vmem>>, vector<256x128xbf16>,
    %c0_92 = arith.constant 0 : index
    %c0_93 = arith.constant 0 : index
    %134 = vector.load %arg13[%c0_92, %c0_93] : memref<288x384xbf16, #tpu.memory_space<vmem>>, vector<256x384xbf16>
    %c0_94 = arith.constant 0 : index
    %c0_95 = arith.constant 0 : index
    %c0_96 = arith.constant 0 : index
    %135 = vector.load %arg8[%c0_94, %c0_95, %c0_96] : memref<3x384x128xbf16, #tpu.memory_space<vmem>>, vector<1x384x128xbf16>
    %136 = vector.shape_cast %135 : vector<1x384x128xbf16> to vector<384x128xbf16>
    %cst_97 = arith.constant dense<0.000000e+00> : vector<256x128xf32>
    %137 = tpu.matmul %134, %136, %cst_97 {dimension_numbers = #tpu.dot_dimension_numbers<[1], [0], [0], [1], [0, 0, 1, 1], [], []>} : vector<256x384xbf16>, vector<384x128xbf16>, vector<256x128xf32> -> vector<256x128xf32>
    %c16_98 = arith.constant 16 : index
    %c0_99 = arith.constant 0 : index
    %138 = vector.load %arg13[%c16_98, %c0_99] : memref<288x384xbf16, #tpu.memory_space<vmem>>, vector<256x384xbf16>
    %c1_100 = arith.constant 1 : index
    %c0_101 = arith.constant 0 : index
    %c0_102 = arith.constant 0 : index
    %139 = vector.load %arg8[%c1_100, %c0_101, %c0_102] : memref<3x384x128xbf16, #tpu.memory_space<vmem>>, vector<1x384x128xbf16>
    %140 = vector.shape_cast %139 : vector<1x384x128xbf16> to vector<384x128xbf16>
    %cst_103 = arith.constant dense<0.000000e+00> : vector<256x128xf32>
    %141 = tpu.matmul %138, %140, %cst_103 {dimension_numbers = #tpu.dot_dimension_numbers<[1], [0], [0], [1], [0, 0, 1, 1], [], []>} : vector<256x384xbf16>, vector<384x128xbf16>, vector<256x128xf32> -> vector<256x128xf32>
    %142 = arith.addf %137, %141 : vector<256x128xf32>
    %c32_104 = arith.constant 32 : index
    %c0_105 = arith.constant 0 : index
    %143 = vector.load %arg13[%c32_104, %c0_105] : memref<288x384xbf16, #tpu.memory_space<vmem>>, vector<256x384xbf16>
    %c2_106 = arith.constant 2 : index
    %c0_107 = arith.constant 0 : index
    %c0_108 = arith.constant 0 : index
    %144 = vector.load %arg8[%c2_106, %c0_107, %c0_108] : memref<3x384x128xbf16, #tpu.memory_space<vmem>>, vector<1x384x128xbf16>
    %145 = vector.shape_cast %144 : vector<1x384x128xbf16> to vector<384x128xbf16>
    %cst_109 = arith.constant dense<0.000000e+00> : vector<256x128xf32>
    %146 = tpu.matmul %143, %145, %cst_109 {dimension_numbers = #tpu.dot_dimension_numbers<[1], [0], [0], [1], [0, 0, 1, 1], [], []>} : vector<256x384xbf16>, vector<384x128xbf16>, vector<256x128xf32> -> vector<256x128xf32>
    %147 = arith.addf %142, %146 : vector<256x128xf32>
    %148 = vector.extract_strided_slice %147 {offsets = [0, 0], sizes = [256, 1], strides = [1, 1]} : vector<256x128xf32> to vector<256x1xf32>
    %c0_110 = arith.constant 0 : index
    %c0_111 = arith.constant 0 : index
    %149 = vector.load %arg9[%c0_110, %c0_111] : memref<1x1xf32, #tpu.memory_space<vmem>>, vector<1x1xf32>
    %150 = vector.broadcast %149 : vector<1x1xf32> to vector<256x1xf32>
    %151 = arith.addf %148, %150 : vector<256x1xf32>
    %c0_112 = arith.constant 0 : index
    %c0_113 = arith.constant 0 : index
    %c0_114 = arith.constant 0 : index
    %152 = vector.load %arg10[%c0_112, %c0_113, %c0_114] : memref<1x256x1xf32, #tpu.memory_space<vmem>>, vector<1x256x1xf32>
    %153 = vector.shape_cast %152 : vector<1x256x1xf32> to vector<256x1xf32>
    %154 = vector.shape_cast %151 : vector<256x1xf32> to vector<1x256x1xf32>
    tpu.vector_store %arg10[%c0_112, %c0_113, %c0_114], %154 {strides = array<i32>} : memref<1x256x1xf32, #tpu.memory_space<vmem>>, vector<1x256x1xf32>,
    return
  }
  func.func @transform_0(%arg0: i32) -> (i32, i32, i32) {
    %c0_i32 = arith.constant 0 : i32
    %c0_i32_0 = arith.constant 0 : i32
    %c0_i32_1 = arith.constant 0 : i32
    return %arg0, %c0_i32, %c0_i32_0 : i32, i32, i32
  }
  func.func @transform_1(%arg0: i32) -> (i32, i32) {
    %c0_i32 = arith.constant 0 : i32
    %c0_i32_0 = arith.constant 0 : i32
    %c0_i32_1 = arith.constant 0 : i32
    return %c0_i32, %c0_i32_0 : i32, i32
  }
  func.func @transform_2(%arg0: i32) -> (i32, i32) {
    %c0_i32 = arith.constant 0 : i32
    %c0_i32_0 = arith.constant 0 : i32
    %c0_i32_1 = arith.constant 0 : i32
    return %c0_i32, %c0_i32_0 : i32, i32
  }
  func.func @transform_3(%arg0: i32) -> (i32, i32, i32) {
    %c0_i32 = arith.constant 0 : i32
    %c0_i32_0 = arith.constant 0 : i32
    %c0_i32_1 = arith.constant 0 : i32
    %c0_i32_2 = arith.constant 0 : i32
    return %c0_i32, %c0_i32_0, %c0_i32_1 : i32, i32, i32
  }
  func.func @transform_4(%arg0: i32) -> (i32, i32) {
    %c0_i32 = arith.constant 0 : i32
    %c0_i32_0 = arith.constant 0 : i32
    %c0_i32_1 = arith.constant 0 : i32
    return %c0_i32, %c0_i32_0 : i32, i32
  }
  func.func @transform_5(%arg0: i32) -> (i32, i32, i32) {
    %c0_i32 = arith.constant 0 : i32
    %c0_i32_0 = arith.constant 0 : i32
    %c0_i32_1 = arith.constant 0 : i32
    %c0_i32_2 = arith.constant 0 : i32
    return %c0_i32, %c0_i32_0, %c0_i32_1 : i32, i32, i32
  }
  func.func @transform_6(%arg0: i32) -> (i32, i32) {
    %c0_i32 = arith.constant 0 : i32
    %c0_i32_0 = arith.constant 0 : i32
    %c0_i32_1 = arith.constant 0 : i32
    return %c0_i32, %c0_i32_0 : i32, i32
  }
  func.func @transform_7(%arg0: i32) -> (i32, i32, i32) {
    %c0_i32 = arith.constant 0 : i32
    %c0_i32_0 = arith.constant 0 : i32
    %c0_i32_1 = arith.constant 0 : i32
    %c0_i32_2 = arith.constant 0 : i32
    return %c0_i32, %c0_i32_0, %c0_i32_1 : i32, i32, i32
  }
  func.func @transform_8(%arg0: i32) -> (i32, i32) {
    %c0_i32 = arith.constant 0 : i32
    %c0_i32_0 = arith.constant 0 : i32
    %c0_i32_1 = arith.constant 0 : i32
    return %c0_i32, %c0_i32_0 : i32, i32
  }
  func.func @transform_9(%arg0: i32) -> (i32, i32, i32) {
    %c0_i32 = arith.constant 0 : i32
    %c0_i32_0 = arith.constant 0 : i32
    %c0_i32_1 = arith.constant 0 : i32
    return %arg0, %c0_i32, %c0_i32_0 : i32, i32, i32
  }
}

</mosaic_0001>

<bundles_post_ra>
// kernel: tpu_custom_call.1
= control target key start
LH: loop header
LB: loop body
LE: loop exit
PB: predicated region body
PF: predicated region fallthrough
CT: control target
= control target key end

     0   :  { %s19058_s0 = inlined_call_operand.vmem [shape: bf16[2,256,36], index: 0, kind: input, shape index: {}]   ;;  %s19059_s1 = inlined_call_operand.vmem [shape: bf16[36,256], index: 1, kind: input, shape index: {}]   ;;  %s19060_s2 = inlined_call_operand.vmem [shape: f32[1,256], index: 2, kind: input, shape index: {}]   ;;  %s19061_s3 = inlined_call_operand.hbm [shape: bf16[3,768,128], index: 3, kind: input, shape index: {}]   ;;  %s19062_s4 = inlined_call_operand.vmem [shape: f32[1,128], index: 4, kind: input, shape index: {}]   ;;  %s19063_s5 = inlined_call_operand.hbm [shape: bf16[3,384,128], index: 5, kind: input, shape index: {}]   ;;  %s19064_s6 = inlined_call_operand.vmem [shape: f32[1,128], index: 6, kind: input, shape index: {}]   ;;  %s19065_s7 = inlined_call_operand.hbm [shape: bf16[3,384,128], index: 7, kind: input, shape index: {}]   ;;  %s19066_s8 = inlined_call_operand.<no memory space> [shape: f32[1,1], index: 8, kind: input, shape index: {}]   ;;  %s19067_s9 = inlined_call_operand.vmem [shape: f32[2,256,1], index: 9, kind: output, shape index: {}]  }
   0x1   :  { %v14_v0 = vstv %s19066_s8 }
   0x2   :  { %15 = vst [vmem:[#allocation5] sm:$0x1] %v14_v0 }
   0x3   :  { %16 = vsyncpa [#allocation7], 0 }
   0x4   :  { %17 = vsyncpa [#allocation9], 0  ;;  %s13790_s11 = smov 0  }
   0x5 LB: > { %s13796_s12 = sadd.s32 4294967295, %s13728_s11   ;;  %p9375_p0 = scmp.ge.s32.totalorder %s13728_s11, 1  ;;  %s13728_s11 = sphi %s13790_s11, %s23_s11  }
   0x6   : > { %p248_p1 = scmp.lt.s32.totalorder %s13728_s11, 3  ;;  %p19068_p2 = scmp.eq.s32.totalorder %s13796_s12, 0 }
   0x7   : > { %s13730_s13 = smov [#allocation8]   ;;  %s13731_s15 = smov [#allocation6]  }
   0x8   : > { %p13801_p3 = pnand %p9375_p0, %p248_p1  ;;  %s282_s14 = sshll.u32 %s13730_s13, 4  ;;  %s283_s14 = int_to_ptr.vmem [resolvable:$true] %s282_s14 }
   0x9   : > { %s266_s16 = sshll.u32 %s13731_s15, 4  ;;  %s13732_s18 = smov [#allocation10]   ;;  %s13813_s16 = int_to_ptr.vmem [resolvable:$true] %s266_s16 }
   0xa   : > { %s19611_s8 = scalar_select %p13801_p3, 1, 0 }
   0xb   : > { %p13286_p4 = pneg %p13801_p3  ;;  %s298_s19 = sshll.u32 %s13732_s18, 4  ;;  %s13815_s19 = int_to_ptr.vmem [resolvable:$true] %s298_s19 }
   0xc   : > { %s13630_s22 = scalar_lea.hbm %s19063_s5, 9216 }
   0xd   : > { %p13809_p5 = pnand %p19068_p2, %p13286_p4  ;;  %p13631_p6 = scmp.ne.s32.totalorder %s19063_s5, %s13630_s22 }
   0xe   : > { %p13637_p10 = scmp.lt.u32.totalorder %s13630_s22, %s19063_s5 }
   0xf   : > { %p13825_p7 = pneg %p13809_p5 }
  0x11   : > { %p13633_p8 = pnand %p13825_p7, %p13631_p6 }
  0x13   : > { %p13634_p9 = pneg %p13633_p8 }
  0x15   : > { %p13639_p11 = pnand %p13637_p10, %p13634_p9 }
  0x17   : > { %13642 = shalt.err (!%p13639_p11)
}
  0x18   : > { %s13643_s28 = scalar_lea.vmem %s283_s14, 9216  ;;  %p13651_p1 = scmp.lt.s32.totalorder %s283_s14, %s283_s14 }
  0x19   : > { %p13644_p12 = scmp.ne.s32.totalorder %s283_s14, %s13643_s28  ;;  %p13652_p4 = scmp.lt.s32.totalorder %s13643_s28, %s13643_s28 }
  0x1b   : > { %p13646_p13 = pnand %p13644_p12, %p13825_p7  ;;  %p13653_p2 = por %p13652_p4, %p13651_p1 }
  0x1d   : > { %p13647_p0 = pneg %p13646_p13 }
  0x1f   : > { %p13654_p3 = pnand %p13653_p2, %p13647_p0 }
  0x21   : > { %13657 = shalt.err (!%p13654_p3)
}
  0x22   : > { %s13733_s29 = smov 64   ;;  %s13734_s30 = smov 4  }
  0x23   : > { %13292 = dma.hbm_to_vmem [thread:$0]  (!%p13809_p5), %s19063_s5, 9216, %s283_s14, [#allocation9], %s13733_s29, %s13733_s29, %s13734_s30  }
  0x24   : > { %s13658_s20 = scalar_lea.hbm %s19061_s3, 18432 }
  0x25   : > { %p13659_p2 = scmp.ne.s32.totalorder %s19061_s3, %s13658_s20  ;;  %p13665_p8 = scmp.lt.u32.totalorder %s13658_s20, %s19061_s3 }
  0x27   : > { %p13661_p3 = pnand %p13659_p2, %p13825_p7 }
  0x29   : > { %p13662_p6 = pneg %p13661_p3 }
  0x2b   : > { %p13667_p9 = pnand %p13665_p8, %p13662_p6 }
  0x2d   : > { %13670 = shalt.err (!%p13667_p9)
}
  0x2e   : > { %s13671_s14 = scalar_lea.vmem %s13813_s16, 18432  ;;  %p13679_p13 = scmp.lt.s32.totalorder %s13813_s16, %s13813_s16 }
  0x2f   : > { %p13672_p10 = scmp.ne.s32.totalorder %s13813_s16, %s13671_s14  ;;  %p13680_p0 = scmp.lt.s32.totalorder %s13671_s14, %s13671_s14 }
  0x31   : > { %p13674_p11 = pnand %p13672_p10, %p13825_p7  ;;  %p13681_p1 = por %p13680_p0, %p13679_p13 }
  0x33   : > { %p13675_p12 = pneg %p13674_p11 }
  0x35   : > { %p13682_p4 = pnand %p13681_p1, %p13675_p12 }
  0x37   : > { %13685 = shalt.err (!%p13682_p4)
}
  0x38   : > { %13289 = dma.hbm_to_vmem [thread:$0]  (!%p13809_p5), %s19061_s3, 18432, %s13813_s16, [#allocation7], %s13733_s29, %s13733_s29, %s13734_s30  }
  0x39   : > { %s13686_s13 = scalar_lea.hbm %s19065_s7, 9216 }
  0x3a   : > { %p13687_p2 = scmp.ne.s32.totalorder %s19065_s7, %s13686_s13  ;;  %p13693_p8 = scmp.lt.u32.totalorder %s13686_s13, %s19065_s7 }
  0x3c   : > { %p13689_p3 = pnand %p13687_p2, %p13825_p7 }
  0x3e   : > { %p13690_p6 = pneg %p13689_p3 }
  0x40   : > { %p13695_p9 = pnand %p13693_p8, %p13690_p6 }
  0x42   : > { %13698 = shalt.err (!%p13695_p9)
}
  0x43   : > { %s13699_s16 = scalar_lea.vmem %s13815_s19, 9216  ;;  %p13707_p13 = scmp.lt.s32.totalorder %s13815_s19, %s13815_s19 }
  0x44   : > { %p13700_p10 = scmp.ne.s32.totalorder %s13815_s19, %s13699_s16  ;;  %p13708_p0 = scmp.lt.s32.totalorder %s13699_s16, %s13699_s16 }
  0x46   : > { %p13702_p11 = pnand %p13700_p10, %p13825_p7  ;;  %p13709_p1 = por %p13708_p0, %p13707_p13 }
  0x48   : > { %p13703_p12 = pneg %p13702_p11 }
  0x4a   : > { %p13710_p4 = pnand %p13709_p1, %p13703_p12 }
  0x4c   : > { %13713 = shalt.err (!%p13710_p4)
}
  0x4d   : > { %13295 = dma.hbm_to_vmem [thread:$0]  (!%p13809_p5), %s19065_s7, 9216, %s13815_s19, [#allocation9], %s13733_s29, %s13733_s29, %s13734_s30  }
  0x4e   : > { %p19614_p2 = scmp.ne.s32.totalorder %s19611_s8, 0 }
  0x50   : > { %325 = sbr.rel (%p19614_p2) target bundleno = 2293 (0x8f5), region = 56 }
  0x57   : > { %p19615_p7 = scmp.eq.s32.totalorder %s13796_s12, 0 }
  0x59   : > { %13719 = dma.done.wait (%p19615_p7), [#allocation7], 18432   ;;  %p19616_p3 = pmov %p19615_p7 }
  0x5b   : > { %13721 = vsyncadd (%p19616_p3), [#allocation7], 4294948864  ;;  %p19617_p6 = pmov %p19616_p3 }
  0x5c   : > { %p19618_p8 = pmov %p19616_p3 }
  0x5d   : > { %13723 = dma.done.wait (%p19617_p6), [#allocation9], 18432  }
  0x5e   : > { %13725 = vsyncadd (%p19618_p8), [#allocation9], 4294948864  ;;  %p369_p9 = scmp.lt.s32.totalorder %s13796_s12, 1  ;;  %v19070_v1 = vmov 0   ;;  %v13317_v2 = vld [vmem:[%s19059_s1 + $0x4] ss:$8 sps:$4 sm:$0xff]   ;;  %v380_v42 = vlaneseq }
  0x5f   : > { %1127 = vmatprep.mubr.bf16.mxu0 %v19070_v1  ;;  %v13319_v3 = vld [vmem:[%s19059_s1] ss:$8 sps:$4 sm:$0xff]   ;;  %1095 = vmatprep.subr.bf16.mxu0 %v13317_v2  ;;  %v13320_v4 = vld [vmem:[%s19059_s1 + $0x14] ss:$8 sps:$4 sm:$0xff]   ;;  %v13322_v6 = vld [vmem:[%s19059_s1 + $0x10] ss:$8 sps:$4 sm:$0xff]  }
  0x60   : > { %s20845_s12 = smov (!%p369_p9, %s13796_s12), 1  ;;  %v921_v5 = vld [vmem:[%s19059_s1 + $0x20] sm:$0x33]  ;;  %1096 = vmatpush1.bf16.msra.mxu0 %v13319_v3  ;;  %vm1088_vm0 = vcmask 1041408   ;;  %vm1039_vm1 = vcmask 293888   ;;  %v13343_v27 = vld [vmem:[#allocation6 + $0x1c8] sm:$0xff]  }
  0x61   : > { %s9720_s8 = sshll.u32 %s20845_s12, 7  ;;  %1097 = vmatprep.subr.bf16.mxu0 %v13320_v4  ;;  %v9409_v7 = vcombine.high %v921_v5, %v921_v5  ;;  %v9408_v8 = vcombine.low %v921_v5, %v921_v5  ;;  %v13341_v23 = vld [vmem:[#allocation6 + $0x1c0] sm:$0xff]   ;;  %v13344_v28 = vld [vmem:[#allocation6 + $0x188] sm:$0xff]   ;;  %v13345_v30 = vld [vmem:[#allocation6 + $0x1d0] sm:$0xff]   ;;  %v13979_v44 = vshrl.u32 %v380_v42, 7  ;;  %s9721_s19 = sshll.u32 %s20845_s12, 8 }
  0x62   : > { %s13927_s10 = scalar_lea.vmem %s19058_s0, %s9720_s8  ;;  %v13342_v24 = vld [vmem:[#allocation6 + $0x180] sm:$0xff]   ;;  %12938 = vmatprep.subr.bf16.mxu1 %v13341_v23  ;;  %v13346_v31 = vld [vmem:[#allocation6 + $0x190] sm:$0xff]   ;;  %v13347_v32 = vld [vmem:[#allocation6 + $0x1d8] sm:$0xff]   ;;  %s18896_s30 = scalar_lea.vmem %s19067_s9, %s9721_s19 }
  0x63   : > { %v1090_v9 = vsel %vm1088_vm0, %v9408_v8, 0  ;;  %v13325_v10 = vld [vmem:[%s13927_s10] sm:$0xff]   ;;  %v13326_v11 = vld [vmem:[%s13927_s10 + $0x8] sm:$0xff]   ;;  %v13327_v12 = vld [vmem:[%s13927_s10 + $0x10] sm:$0xff]   ;;  %12946 = vmatpush3.bf16.msra.mxu1 %v13342_v24  ;;  %19619 = vst [vmem:[#allocation13_spill] sm:$0xff] %v13979_v44  ;;  %v926_v45 = vsub.s32 0, %v13979_v44 }
  0x64   : > { %1098 = vmatpush1.bf16.msra.mxu0 %v13322_v6  ;;  %v13328_v13 = vld [vmem:[%s13927_s10 + $0x18] sm:$0xff]   ;;  %v13329_v14 = vld [vmem:[%s13927_s10 + $0x20] sm:$0xff]   ;;  %v13330_v15 = vld [vmem:[%s13927_s10 + $0x28] sm:$0xff]   ;;  %12939 = vmatprep.subr.bf16.mxu1 %v13343_v27  ;;  %vm19159_vm4 = vcmp.lt.s32.totalorder %v13979_v44, 1  ;;  %vm19155_vm6 = vcmp.lt.s32.totalorder %v13979_v44, 7 }
  0x65   : > { %9410 = vmatprep.subr.msk.bf16.mxu0 %vm1088_vm0, %v9409_v7  ;;  %v13331_v16 = vld [vmem:[%s13927_s10 + $0x30] sm:$0xff]   ;;  %v13332_v17 = vld [vmem:[%s13927_s10 + $0x38] sm:$0xff]   ;;  %v13333_v18 = vld [vmem:[%s13927_s10 + $0x40] sm:$0xff]  }
  0x66   : > { %v13334_v19 = vld [vmem:[%s13927_s10 + $0x48] sm:$0xff]   ;;  %v13335_v20 = vld [vmem:[%s13927_s10 + $0x50] sm:$0xff]   ;;  %v13336_v21 = vld [vmem:[%s13927_s10 + $0x58] sm:$0xff]  }
  0x67   : > { %v13337_v22 = vld [vmem:[%s13927_s10 + $0x60] sm:$0xff]   ;;  %v13338_v25 = vld [vmem:[%s13927_s10 + $0x68] sm:$0xff]   ;;  %v13339_v26 = vld [vmem:[%s13927_s10 + $0x70] sm:$0xff]   ;;  %12947 = vmatpush3.bf16.msra.mxu1 %v13344_v28 }
  0x68   : > { %1100 = vmatpush1.bf16.msra.mxu0 %v1090_v9  ;;  %v13340_v29 = vld [vmem:[%s13927_s10 + $0x78] sm:$0xff]   ;;  %12940 = vmatprep.subr.bf16.mxu1 %v13345_v30  ;;  %v13349_v34 = vld [vmem:[#allocation6 + $0x1e0] sm:$0xff]   ;;  %v13351_v36 = vld [vmem:[#allocation6 + $0x1e8] sm:$0xff]  }
  0x69   : > { %10826 = vmatprep.subr.bf16.mxu0 %v13341_v23  ;;  %v13348_v33 = vld [vmem:[#allocation6 + $0x198] sm:$0xff]   ;;  %v13350_v35 = vld [vmem:[#allocation6 + $0x1a0] sm:$0xff]   ;;  %v13352_v37 = vld [vmem:[#allocation6 + $0x1a8] sm:$0xff]  }
  0x6a   : > { %v13353_v38 = vld [vmem:[#allocation6 + $0x1f0] sm:$0xff]   ;;  %v13355_v40 = vld [vmem:[#allocation6 + $0x1f8] sm:$0xff]   ;;  %v13357_v43 = vld [vmem:[#allocation6 + $0x2c0] sm:$0xff]  }
  0x6b   : > { %9411 = vmatmul.mubr.msk.bf16.vlgmr.msra.gmra.mrb[0].mxu0 %vm1039_vm1, %v13325_v10  ;;  %12948 = vmatpush3.bf16.msra.mxu1 %v13346_v31  ;;  %v13354_v39 = vld [vmem:[#allocation6 + $0x1b0] sm:$0xff]   ;;  %v13356_v41 = vld [vmem:[#allocation6 + $0x1b8] sm:$0xff]   ;;  %v13369_v58 = vld [vmem:[#allocation6 + $0x240] sm:$0xff]  }
  0x6c   : > { %1137 = vmatprep.mubr.bf16.mxu0 %v19070_v1  ;;  %10827 = vmatpush3.bf16.msra.mxu0 %v13342_v24  ;;  %v922_v46 = vld [vmem:[%s19060_s2] sm:$0x3] }
  0x6d   : > { %10828 = vmatprep.subr.bf16.mxu0 %v13343_v27  ;;  %12941 = vmatprep.subr.bf16.mxu1 %v13347_v32  ;;  %v13985_v47 = vrot.slane %v922_v46, %v926_v45  ;;  %v14051_v27 = vadd.s32 176, %v13979_v44 }
  0x6f   : > { %12949 = vmatpush3.bf16.msra.mxu1 %v13348_v33  ;;  %19620 = vst [vmem:[#allocation14_spill] sm:$0xff] %v13985_v47 }
  0x70   : > { %10829 = vmatpush3.bf16.msra.mxu0 %v13344_v28  ;;  %12942 = vmatprep.subr.bf16.mxu1 %v13349_v34  ;;  %v14054_v28 = vadd.s32 192, %v13979_v44 }
  0x71   : > { %10830 = vmatprep.subr.bf16.mxu0 %v13345_v30 }
  0x73   : > { %9412 = vmatmul.mubr.msk.bf16.gmra.mrb[4].mxu0 %vm1039_vm1, %v13326_v11  ;;  %12950 = vmatpush3.bf16.msra.mxu1 %v13350_v35 }
  0x74   : > { %1147 = vmatprep.mubr.bf16.mxu0 %v19070_v1  ;;  %10831 = vmatpush3.bf16.msra.mxu0 %v13346_v31 }
  0x75   : > { %10832 = vmatprep.subr.bf16.mxu0 %v13347_v32  ;;  %12943 = vmatprep.subr.bf16.mxu1 %v13351_v36 }
  0x77   : > { %12951 = vmatpush3.bf16.msra.mxu1 %v13352_v37 }
  0x78   : > { %10833 = vmatpush3.bf16.msra.mxu0 %v13348_v33  ;;  %12944 = vmatprep.subr.bf16.mxu1 %v13353_v38 }
  0x79   : > { %10834 = vmatprep.subr.bf16.mxu0 %v13349_v34 }
  0x7b   : > { %9413 = vmatmul.mubr.msk.bf16.gmra.mrb[8].mxu0 %vm1039_vm1, %v13327_v12  ;;  %12952 = vmatpush3.bf16.msra.mxu1 %v13354_v39 }
  0x7c   : > { %1157 = vmatprep.mubr.bf16.mxu0 %v19070_v1  ;;  %10835 = vmatpush3.bf16.msra.mxu0 %v13350_v35  ;;  %v14066_v35 = vadd.s32 224, %v13979_v44 }
  0x7d   : > { %10836 = vmatprep.subr.bf16.mxu0 %v13351_v36  ;;  %12945 = vmatprep.subr.bf16.mxu1 %v13355_v40 }
  0x7f   : > { %12953 = vmatpush3.bf16.msra.mxu1 %v13356_v41 }
  0x80   : > { %10837 = vmatpush3.bf16.msra.mxu0 %v13352_v37  ;;  %11050 = vmatprep.subr.bf16.mxu1 %v13357_v43 }
  0x81   : > { %10838 = vmatprep.subr.bf16.mxu0 %v13353_v38 }
  0x83   : > { %9414 = vmatmul.mubr.msk.bf16.gmra.mrb[12].mxu0 %vm1039_vm1, %v13328_v13 }
  0x84   : > { %1167 = vmatprep.mubr.bf16.mxu0 %v19070_v1  ;;  %10839 = vmatpush3.bf16.msra.mxu0 %v13354_v39 }
  0x85   : > { %10840 = vmatprep.subr.bf16.mxu0 %v13355_v40 }
  0x88   : > { %10841 = vmatpush3.bf16.msra.mxu0 %v13356_v41 }
  0x89   : > { %10938 = vmatprep.subr.bf16.mxu0 %v13369_v58 }
  0x8b   : > { %9415 = vmatmul.mubr.msk.bf16.gmra.mrb[16].mxu0 %vm1039_vm1, %v13329_v14 }
  0x8c   : > { %1177 = vmatprep.mubr.bf16.mxu0 %v19070_v1 }
  0x93   : > { %9416 = vmatmul.mubr.msk.bf16.gmra.mrb[20].mxu0 %vm1039_vm1, %v13330_v15 }
  0x94   : > { %1187 = vmatprep.mubr.bf16.mxu0 %v19070_v1 }
  0x9b   : > { %9417 = vmatmul.mubr.msk.bf16.gmra.mrb[24].mxu0 %vm1039_vm1, %v13331_v16  ;;  %v930_v16 = vsub.s32 1, %v13979_v44 }
  0x9c   : > { %1197 = vmatprep.mubr.bf16.mxu0 %v19070_v1 }
  0xa3   : > { %9418 = vmatmul.mubr.msk.bf16.gmra.mrb[28].mxu0 %vm1039_vm1, %v13332_v17  ;;  %v14031_v17 = vrot.slane %v922_v46, %v930_v16 }
  0xa4   : > { %1207 = vmatprep.mubr.bf16.mxu0 %v19070_v1 }
  0xab   : > { %9419 = vmatmul.mubr.msk.bf16.gmra.mrb[32].mxu0 %vm1039_vm1, %v13333_v18 }
  0xac   : > { %1217 = vmatprep.mubr.bf16.mxu0 %v19070_v1 }
  0xb3   : > { %9420 = vmatmul.mubr.msk.bf16.gmra.mrb[36].mxu0 %vm1039_vm1, %v13334_v19 }
  0xb4   : > { %1227 = vmatprep.mubr.bf16.mxu0 %v19070_v1 }
  0xbb   : > { %9421 = vmatmul.mubr.msk.bf16.gmra.mrb[40].mxu0 %vm1039_vm1, %v13335_v20 }
  0xbc   : > { %1237 = vmatprep.mubr.bf16.mxu0 %v19070_v1 }
  0xc3   : > { %9422 = vmatmul.mubr.msk.bf16.gmra.mrb[44].mxu0 %vm1039_vm1, %v13336_v21 }
  0xc4   : > { %1247 = vmatprep.mubr.bf16.mxu0 %v19070_v1 }
  0xcb   : > { %9423 = vmatmul.mubr.msk.bf16.gmra.mrb[48].mxu0 %vm1039_vm1, %v13337_v22 }
  0xcc   : > { %1257 = vmatprep.mubr.bf16.mxu0 %v19070_v1 }
  0xd3   : > { %9424 = vmatmul.mubr.msk.bf16.gmra.mrb[52].mxu0 %vm1039_vm1, %v13338_v25  ;;  %v14045_v25 = vadd.s32 144, %v13979_v44 }
  0xd4   : > { %1267 = vmatprep.mubr.bf16.mxu0 %v19070_v1 }
  0xdb   : > { %9425 = vmatmul.mubr.msk.bf16.gmra.mrb[56].mxu0 %vm1039_vm1, %v13339_v26  ;;  %v14048_v26 = vadd.s32 160, %v13979_v44 }
  0xdc   : > { %1277 = vmatprep.mubr.bf16.mxu0 %v19070_v1 }
  0xe3   : > { %9426 = vmatmul.mubr.msk.bf16.gmra.mrb[60].mxu0 %vm1039_vm1, %v13340_v29  ;;  %v14057_v29 = vadd.s32 208, %v13979_v44 }
 0x13e   : > { %v1129_v48 = vpop.f32.mrb[0].mxu0 }
 0x13f   : > { %v1130_v49 = vadd.f32 %v1129_v48, %v13985_v47  ;;  %v1131_v50 = vpop.f32.mrb[1].mxu0 }
 0x140   : > { %v1133_v51 = vpop.f32.mrb[2].mxu0  ;;  %v1132_v22 = vadd.f32 %v1131_v50, %v14031_v17  ;;  %v14083_v50 = vadd.s32 240, %v13979_v44 }
 0x141   : > { %vm1288_vm2 = vcmp.ge.f32.partialorder %v1130_v49, 0.0  ;;  %v1352_v52 = vmul.f32 0.2, %v1130_v49  ;;  %v1134_v53 = vadd.f32 %v1133_v51, %v13985_v47  ;;  %v1135_v54 = vpop.f32.mrb[3].mxu0 }
 0x142   : > { %v1136_v23 = vadd.f32 %v1135_v54, %v14031_v17  ;;  %v1353_v30 = vmul.f32 0.2, %v1132_v22  ;;  %vm1289_vm5 = vcmp.ge.f32.partialorder %v1132_v22, 0.0 }
 0x143   : > { %v13989_v55 = vsel %vm1288_vm2, %v1130_v49, %v1352_v52  ;;  %vm1290_vm3 = vcmp.ge.f32.partialorder %v1134_v53, 0.0  ;;  %v1354_v56 = vmul.f32 0.2, %v1134_v53 }
 0x144   : > { %v19072_v59 = vrot.slane %v13989_v55, 7  ;;  %v1355_v31 = vmul.f32 0.2, %v1136_v23  ;;  %vm1291_vm7 = vcmp.ge.f32.partialorder %v1136_v23, 0.0  ;;  %v14078_v46 = vsel %vm1289_vm5, %v1132_v22, %v1353_v30 }
 0x145   : > { %v13991_v57 = vsel %vm1290_vm3, %v1134_v53, %v1354_v56  ;;  %v19073_v54 = vrot.slane %v13989_v55, 1 }
 0x146   : > { %v19075_v60 = vrot.slane %v13991_v57, 7  ;;  %v13998_v61 = vpack.c.bf16 %v13991_v57, %v13989_v55  ;;  %v1139_v62 = vpop.f32.mrb[4].mxu0  ;;  %v14080_v48 = vsel %vm1291_vm7, %v1136_v23, %v1355_v31  ;;  %v1739_v51 = vrot.slane %v13991_v57, 1 }
 0x147   : > { %v1141_v63 = vpop.f32.mrb[5].mxu0  ;;  %v1140_v24 = vadd.f32 %v1139_v62, %v13985_v47  ;;  %19624 = vst [vmem:[#allocation18_spill] sm:$0xff] %v14080_v48 }
 0x148   : > { %19621 = vst [vmem:[#allocation15_spill] sm:$0xff] %v13998_v61  ;;  %v14006_v0 = vsel %vm19159_vm4, %v19072_v59, %v19075_v60  ;;  %v1143_v2 = vpop.f32.mrb[6].mxu0  ;;  %v1142_v37 = vadd.f32 %v1141_v63, %v14031_v17  ;;  %v19074_v63 = vrot.slane %v14078_v46, 7  ;;  %v1862_v31 = vsel %vm19155_vm6, %v19073_v54, %v1739_v51 }
 0x149   : > { %v1145_v3 = vpop.f32.mrb[7].mxu0  ;;  %v1356_v36 = vmul.f32 0.2, %v1140_v24  ;;  %vm1292_vm8 = vcmp.ge.f32.partialorder %v1140_v24, 0.0  ;;  %v1144_v52 = vadd.f32 %v1143_v2, %v13985_v47 }
 0x14a   : > { %v1146_v32 = vadd.f32 %v1145_v3, %v14031_v17  ;;  %v1357_v58 = vmul.f32 0.2, %v1142_v37  ;;  %v1483_v3 = vrot.slane %v14080_v48, 7  ;;  %vm1293_vm10 = vcmp.ge.f32.partialorder %v1142_v37, 0.0 }
 0x14b   : > { %v14089_v56 = vsel %vm1292_vm8, %v1140_v24, %v1356_v36  ;;  %v14102_v24 = vadd.s32 16, %v13979_v44  ;;  %v1358_v1 = vmul.f32 0.2, %v1144_v52  ;;  %vm1294_vm11 = vcmp.ge.f32.partialorder %v1144_v52, 0.0 }
 0x14c   : > { %v1359_v49 = vmul.f32 0.2, %v1146_v32  ;;  %vm1295_vm9 = vcmp.ge.f32.partialorder %v1146_v32, 0.0  ;;  %19625 = vst [vmem:[#allocation19_spill] sm:$0xff] %v14089_v56  ;;  %v19077_v36 = vrot.slane %v14089_v56, 1  ;;  %v14114_v59 = vsel %vm1293_vm10, %v1142_v37, %v1357_v58 }
 0x14d   : > { %19629 = vst [vmem:[#allocation23_spill] sm:$0xff] %v14114_v59  ;;  %v1484_v37 = vrot.slane %v14089_v56, 7  ;;  %v14134_v58 = vadd.s32 8, %v13979_v44  ;;  %v1485_v42 = vrot.slane %v14114_v59, 7  ;;  %v14141_v40 = vsel %vm1294_vm11, %v1144_v52, %v1358_v1 }
 0x14e   : > { %v1149_v4 = vpop.f32.mrb[8].mxu0  ;;  %v14096_v2 = vsel %vm1295_vm9, %v1146_v32, %v1359_v49  ;;  %v1740_v49 = vrot.slane %v14080_v48, 1  ;;  %19632 = vst [vmem:[#allocation26_spill] sm:$0xff] %v14141_v40 }
 0x14f   : > { %v14008_v5 = vpop.f32.mrb[9].mxu0  ;;  %v1150_v16 = vadd.f32 %v1149_v4, %v13985_v47  ;;  %19626 = vst [vmem:[#allocation20_spill] sm:$0xff] %v14096_v2  ;;  %v19634_v61 = vrot.slane %v14096_v2, 7 }
 0x150   : > { %v14010_v6 = vpop.f32.mrb[10].mxu0  ;;  %v1152_v4 = vadd.f32 %v14008_v5, %v14031_v17  ;;  %v14129_v5 = vsel %vm19159_vm4, %v19074_v63, %v1483_v3 }
 0x151   : > { %v14012_v7 = vpop.f32.mrb[11].mxu0  ;;  %v1154_v30 = vadd.f32 %v14010_v6, %v13985_v47  ;;  %v1360_v53 = vmul.f32 0.2, %v1150_v16  ;;  %vm1296_vm12 = vcmp.ge.f32.partialorder %v1150_v16, 0.0 }
 0x152   : > { %v1156_v45 = vadd.f32 %v14012_v7, %v14031_v17  ;;  %v1860_v7 = vsel %vm19155_vm6, %v1739_v51, %v19077_v36  ;;  %v1361_v39 = vmul.f32 0.2, %v1152_v4  ;;  %vm1297_vm13 = vcmp.ge.f32.partialorder %v1152_v4, 0.0 }
 0x153   : > { %vm1298_vm14 = vcmp.ge.f32.partialorder %v1154_v30, 0.0  ;;  %v1362_v60 = vmul.f32 0.2, %v1154_v30  ;;  %v14144_v22 = vsel %vm1296_vm12, %v1150_v16, %v1360_v53  ;;  %v1602_v51 = vsel %vm19159_vm4, %v1485_v42, %v19634_v61  ;;  %v13359_v61 = vld [vmem:[#allocation6 + $0x2c8] sm:$0xff]  }
 0x154   : > { %19633 = vst [vmem:[#allocation27_spill] sm:$0xff] %v14144_v22  ;;  %v1363_v6 = vmul.f32 0.2, %v1156_v45  ;;  %v14152_v36 = vpack.c.bf16 %v1860_v7, %v1862_v31  ;;  %vm1299_vm15 = vcmp.ge.f32.partialorder %v1156_v45, 0.0  ;;  %v14159_v16 = vsel %vm1297_vm13, %v1152_v4, %v1361_v39 }
 0x155   : > { %19637 = vst [vmem:[#allocation30_spill] sm:$0xff] %v14159_v16  ;;  %v14168_v7 = vsel %vm1298_vm14, %v1154_v30, %v1362_v60  ;;  %v19643_v4 = vrot.slane %v14078_v46, 1 }
 0x156   : > { %v14014_v8 = vpop.f32.mrb[12].mxu0  ;;  %19635 = vst [vmem:[#allocation28_spill] sm:$0xff] %v14152_v36  ;;  %19639 = vst [vmem:[#allocation32_spill] sm:$0xff] %v14168_v7  ;;  %v14177_v53 = vsel %vm1299_vm15, %v1156_v45, %v1363_v6  ;;  %v19644_v6 = vrot.slane %v14141_v40, 7  ;;  %vm19208_vm15 = vmmov 1  }
 0x157   : > { %v14016_v9 = vpop.f32.mrb[13].mxu0  ;;  %v1160_v54 = vadd.f32 %v14014_v8, %v13985_v47  ;;  %v1604_v8 = vsel %vm19159_vm4, %v1483_v3, %v1485_v42  ;;  %19642 = vst [vmem:[#allocation34_spill] sm:$0xff] %v14177_v53  ;;  %v1863_v45 = vsel %vm19155_vm6, %v19643_v4, %v1740_v49  ;;  %v19080_v30 = vrot.slane %v14177_v53, 7 }
 0x158   : > { %v14018_v10 = vpop.f32.mrb[14].mxu0  ;;  %v14170_v1 = vpack.c.bf16 %v1602_v51, %v1604_v8  ;;  %v1162_v3 = vadd.f32 %v14016_v9, %v14031_v17  ;;  %v1601_v9 = vsel %vm19159_vm4, %v1484_v37, %v19644_v6 }
 0x159   : > { %v14020_v11 = vpop.f32.mrb[15].mxu0  ;;  %v1364_v42 = vmul.f32 0.2, %v1160_v54  ;;  %vm1300_vm0 = vcmp.ge.f32.partialorder %v1160_v54, 0.0  ;;  %v14207_v4 = vadd.f32 %v14018_v10, %v13985_v47  ;;  %v14223_v10 = vadd.s32 32, %v13979_v44 }
 0x15a   : > { %19640 = vst [vmem:[#allocation33_spill] sm:$0xff] %v14170_v1  ;;  %vm1301_vm1 = vcmp.ge.f32.partialorder %v1162_v3, 0.0  ;;  %v14211_v6 = vadd.f32 %v14020_v11, %v14031_v17 }
 0x15b   : > { %vm1302_vm11 = vcmp.ge.f32.partialorder %v14207_v4, 0.0 }
 0x15e   : > { %v14022_v12 = vpop.f32.mrb[16].mxu0 }
 0x15f   : > { %v14024_v13 = vpop.f32.mrb[17].mxu0 }
 0x160   : > { %v14026_v14 = vpop.f32.mrb[18].mxu0 }
 0x161   : > { %v14028_v15 = vpop.f32.mrb[19].mxu0 }
 0x166   : > { %v14033_v18 = vpop.f32.mrb[20].mxu0 }
 0x167   : > { %v14035_v19 = vpop.f32.mrb[21].mxu0 }
 0x168   : > { %v14037_v20 = vpop.f32.mrb[22].mxu0 }
 0x169   : > { %v14039_v21 = vpop.f32.mrb[23].mxu0 }
 0x16e   : > { %v14060_v33 = vpop.f32.mrb[24].mxu0 }
 0x16f   : > { %v14063_v34 = vpop.f32.mrb[25].mxu0 }
 0x170   : > { %v14069_v38 = vpop.f32.mrb[26].mxu0 }
 0x171   : > { %19622 = vst [vmem:[#allocation16_spill] sm:$0xff] %v14069_v38  ;;  %v14073_v41 = vpop.f32.mrb[27].mxu0  ;;  %v14370_v38 = vadd.f32 %v14022_v12, %v13985_v47 }
 0x172   : > { %19623 = vst [vmem:[#allocation17_spill] sm:$0xff] %v14073_v41 }
 0x176   : > { %v14098_v23 = vpop.f32.mrb[28].mxu0 }
 0x177   : > { %19627 = vst [vmem:[#allocation21_spill] sm:$0xff] %v14098_v23  ;;  %v14111_v32 = vpop.f32.mrb[29].mxu0 }
 0x178   : > { %19628 = vst [vmem:[#allocation22_spill] sm:$0xff] %v14111_v32  ;;  %v14118_v62 = vpop.f32.mrb[30].mxu0 }
 0x179   : > { %19630 = vst [vmem:[#allocation24_spill] sm:$0xff] %v14118_v62  ;;  %v14123_v43 = vpop.f32.mrb[31].mxu0 }
 0x17a   : > { %19631 = vst [vmem:[#allocation25_spill] sm:$0xff] %v14123_v43 }
 0x17e   : > { %v14156_v63 = vpop.f32.mrb[32].mxu0 }
 0x17f   : > { %19636 = vst [vmem:[#allocation29_spill] sm:$0xff] %v14156_v63  ;;  %v14161_v48 = vpop.f32.mrb[33].mxu0  ;;  %v19641_v63 = vrot.slane %v14114_v59, 1 }
 0x180   : > { %19638 = vst [vmem:[#allocation31_spill] sm:$0xff] %v14161_v48  ;;  %v1213_v52 = vpop.f32.mrb[34].mxu0  ;;  %v14203_v48 = vsel %vm1300_vm0, %v1160_v54, %v1364_v42  ;;  %v19649_v42 = vand.u32 15, %v14045_v25 }
 0x181   : > { %v1861_v39 = vsel %vm19155_vm6, %v1740_v49, %v19641_v63  ;;  %v1215_v31 = vpop.f32.mrb[35].mxu0  ;;  %v1214_v51 = vadd.f32 %v1213_v52, %v13985_v47  ;;  %v19646_v52 = vrot.slane %v13991_v57, 7  ;;  %19647 = vst [vmem:[#allocation36_spill] sm:$0xff] %v14203_v48  ;;  %v1365_v49 = vmul.f32 0.2, %v1162_v3  ;;  %v13358_v48 = vld [vmem:[#allocation6 + $0x280] sm:$0xff]  }
 0x182   : > { %v1216_v63 = vadd.f32 %v1215_v31, %v14031_v17  ;;  %v14196_v60 = vpack.c.bf16 %v1861_v39, %v1863_v45  ;;  %vm14218_vm3 = vcmp.ne.s32.totalorder %v19649_v42, 0 }
 0x183   : > { %v1603_v31 = vsel %vm19159_vm4, %v19646_v52, %v1484_v37  ;;  %v1386_v39 = vmul.f32 0.2, %v1214_v51  ;;  %vm1322_vm2 = vcmp.ge.f32.partialorder %v1214_v51, 0.0  ;;  %v14236_v42 = vsel %vm1301_vm1, %v1162_v3, %v1365_v49  ;;  %vm14289_vm0 = vmpackc.low %vm19208_vm15, %vm14218_vm3 }
 0x184   : > { %19645 = vst [vmem:[#allocation35_spill] sm:$0xff] %v14196_v60  ;;  %v14213_v57 = vpack.c.bf16 %v1601_v9, %v1603_v31  ;;  %v1387_v37 = vmul.f32 0.2, %v1216_v63  ;;  %vm1323_vm5 = vcmp.ge.f32.partialorder %v1216_v63, 0.0  ;;  %19653 = vst [vmem:[#allocation38_spill] sm:$0xff] %v14236_v42  ;;  %vm1303_vm3 = vcmp.ge.f32.partialorder %v14211_v6, 0.0 }
 0x185   : > { %v14240_v43 = vsel %vm1322_vm2, %v1214_v51, %v1386_v39 }
 0x186   : > { %v1219_v45 = vpop.f32.mrb[36].mxu0  ;;  %19648 = vst [vmem:[#allocation37_spill] sm:$0xff] %v14213_v57  ;;  %19654 = vst [vmem:[#allocation39_spill] sm:$0xff] %v14240_v43  ;;  %v14243_v32 = vsel %vm1323_vm5, %v1216_v63, %v1387_v37  ;;  %v13363_v63 = vld [vmem:[#allocation6 + $0x2d8] sm:$0xff]  }
 0x187   : > { %v1220_v52 = vadd.f32 %v1219_v45, %v13985_v47  ;;  %v1221_v54 = vpop.f32.mrb[37].mxu0  ;;  %v19652_v45 = vrot.slane %v14159_v16, 7  ;;  %19655 = vst [vmem:[#allocation40_spill] sm:$0xff] %v14243_v32 }
 0x188   : > { %v1222_v9 = vadd.f32 %v1221_v54, %v14031_v17  ;;  %v1223_v31 = vpop.f32.mrb[38].mxu0 }
 0x189   : > { %v14233_v25 = vsel %vm19159_vm4, %v19652_v45, %v19080_v30  ;;  %vm1324_vm7 = vcmp.ge.f32.partialorder %v1220_v52, 0.0  ;;  %v1388_v8 = vmul.f32 0.2, %v1220_v52  ;;  %v1224_v62 = vadd.f32 %v1223_v31, %v13985_v47  ;;  %v1225_v11 = vpop.f32.mrb[39].mxu0 }
 0x18a   : > { %vm1325_vm8 = vcmp.ge.f32.partialorder %v1222_v9, 0.0  ;;  %v1389_v54 = vmul.f32 0.2, %v1222_v9  ;;  %v1226_v23 = vadd.f32 %v1225_v11, %v14031_v17 }
 0x18b   : > { %v14245_v36 = vsel %vm1324_vm7, %v1220_v52, %v1388_v8  ;;  %vm1326_vm9 = vcmp.ge.f32.partialorder %v1224_v62, 0.0  ;;  %v1390_v45 = vmul.f32 0.2, %v1224_v62 }
 0x18c   : > { %19656 = vst [vmem:[#allocation41_spill] sm:$0xff] %v14245_v36  ;;  %v1516_v49 = vrot.slane %v14245_v36, 7  ;;  %v14249_v30 = vsel %vm1325_vm8, %v1222_v9, %v1389_v54  ;;  %vm1327_vm10 = vcmp.ge.f32.partialorder %v1226_v23, 0.0  ;;  %v1391_v39 = vmul.f32 0.2, %v1226_v23 }
 0x18d   : > { %19657 = vst [vmem:[#allocation42_spill] sm:$0xff] %v14249_v30  ;;  %v14252_v51 = vsel %vm1326_vm9, %v1224_v62, %v1390_v45  ;;  %v1517_v11 = vrot.slane %v14249_v30, 7  ;;  %v1366_v54 = vmul.f32 0.2, %v14207_v4  ;;  %v19660_v36 = vand.u32 15, %v14048_v26 }
 0x18e   : > { %19658 = vst [vmem:[#allocation43_spill] sm:$0xff] %v14252_v51  ;;  %v1518_v37 = vrot.slane %v14252_v51, 7  ;;  %v1229_v52 = vpop.f32.mrb[40].mxu0  ;;  %v14261_v3 = vsel %vm1327_vm10, %v1226_v23, %v1391_v39  ;;  %v19663_v9 = vrot.slane %v14243_v32, 7  ;;  %v19664_v39 = vrot.slane %v14240_v43, 7 }
 0x18f   : > { %19659 = vst [vmem:[#allocation44_spill] sm:$0xff] %v14261_v3  ;;  %v1230_v62 = vadd.f32 %v1229_v52, %v13985_v47  ;;  %v1231_v45 = vpop.f32.mrb[41].mxu0  ;;  %vm14266_vm12 = vcmp.ne.s32.totalorder %v19660_v36, 0  ;;  %v1519_v31 = vrot.slane %v14261_v3, 7 }
 0x190   : > { %v1232_v8 = vadd.f32 %v1231_v45, %v14031_v17  ;;  %v1233_v51 = vpop.f32.mrb[42].mxu0  ;;  %v1572_v23 = vsel %vm19159_vm4, %v19663_v9, %v1517_v11  ;;  %v1571_v52 = vsel %vm19159_vm4, %v19664_v39, %v1516_v49  ;;  %v1569_v45 = vsel %vm19159_vm4, %v1516_v49, %v1518_v37  ;;  %vm14355_vm9 = vmpackc.low %vm19208_vm15, %vm14266_vm12 }
 0x191   : > { %vm1328_vm13 = vcmp.ge.f32.partialorder %v1230_v62, 0.0  ;;  %v1392_v26 = vmul.f32 0.2, %v1230_v62  ;;  %v1234_v36 = vadd.f32 %v1233_v51, %v13985_v47  ;;  %v1235_v30 = vpop.f32.mrb[43].mxu0  ;;  %v1570_v9 = vsel %vm19159_vm4, %v1517_v11, %v1519_v31 }
 0x192   : > { %vm1329_vm14 = vcmp.ge.f32.partialorder %v1232_v8, 0.0  ;;  %v1393_v3 = vmul.f32 0.2, %v1232_v8  ;;  %v1236_v32 = vadd.f32 %v1235_v30, %v14031_v17  ;;  %v19665_v39 = vmov 0 }
 0x193   : > { %v19666_v39 = vsel %vm14289_vm0, 4294967295, %v19665_v39  ;;  %v14293_v51 = vsel %vm1328_vm13, %v1230_v62, %v1392_v26  ;;  %vm1330_vm1 = vcmp.ge.f32.partialorder %v1234_v36, 0.0  ;;  %v1394_v43 = vmul.f32 0.2, %v1234_v36 }
 0x194   : > { %19667 = vst [vmem:[#allocation45_spill] sm:$0xff] %v19666_v39  ;;  %19668 = vst [vmem:[#allocation46_spill] sm:$0xff] %v14293_v51  ;;  %v14295_v49 = vpack.c.bf16 %v1570_v9, %v1572_v23  ;;  %v1520_v30 = vrot.slane %v14293_v51, 7  ;;  %v14298_v57 = vsel %vm1329_vm14, %v1232_v8, %v1393_v3  ;;  %vm1331_vm2 = vcmp.ge.f32.partialorder %v1236_v32, 0.0 }
 0x195   : > { %19670 = vst [vmem:[#allocation48_spill] sm:$0xff] %v14298_v57  ;;  %v14300_v11 = vpack.c.bf16 %v1569_v45, %v1571_v52  ;;  %v1521_v53 = vrot.slane %v14298_v57, 7  ;;  %v14304_v42 = vsel %vm1330_vm1, %v1234_v36, %v1394_v43  ;;  %v1395_v62 = vmul.f32 0.2, %v1236_v32  ;;  %v13367_v52 = vld [vmem:[#allocation6 + $0x2e8] sm:$0xff]  }
 0x196   : > { %19669 = vst [vmem:[#allocation47_spill] sm:$0xff] %v14295_v49  ;;  %19672 = vst [vmem:[#allocation50_spill] sm:$0xff] %v14304_v42  ;;  %9778 = vmatprep.mubr.msk.bf16.mxu1 %vm14289_vm0, %v14295_v49  ;;  %v1367_v23 = vmul.f32 0.2, %v14211_v6  ;;  %v1239_v8 = vpop.f32.mrb[44].mxu0  ;;  %v19673_v26 = vrot.slane %v14159_v16, 7  ;;  %v14324_v45 = vsel %vm1302_vm11, %v14207_v4, %v1366_v54 }
 0x197   : > { %19671 = vst [vmem:[#allocation49_spill] sm:$0xff] %v14300_v11  ;;  %9781 = vmatmul.mubr.msk.bf16.vlgmr.msra.gmra.mrb[0].mxu1 %vm14289_vm0, %v14300_v11  ;;  %v19674_v43 = vrot.slane %v14096_v2, 7  ;;  %19675 = vst [vmem:[#allocation51_spill] sm:$0xff] %v14324_v45  ;;  %v14326_v9 = vsel %vm1331_vm2, %v1236_v32, %v1395_v62  ;;  %v1240_v3 = vadd.f32 %v1239_v8, %v13985_v47  ;;  %v1241_v11 = vpop.f32.mrb[45].mxu0  ;;  %v19677_v39 = vand.u32 15, %v14051_v27  ;;  %v13360_v49 = vld [vmem:[#allocation6 + $0x288] sm:$0xff]  }
 0x198   : > { %19676 = vst [vmem:[#allocation52_spill] sm:$0xff] %v14326_v9  ;;  %11051 = vmatpush3.bf16.msra.mxu1 %v13358_v48  ;;  %v1242_v4 = vadd.f32 %v1241_v11, %v14031_v17  ;;  %v1243_v32 = vpop.f32.mrb[46].mxu0  ;;  %v1568_v54 = vsel %vm19159_vm4, %v1519_v31, %v1521_v53  ;;  %v1567_v27 = vsel %vm19159_vm4, %v1518_v37, %v1520_v30  ;;  %v19680_v51 = vrot.slane %v14304_v42, 7 }
 0x199   : > { %v1600_v36 = vsel %vm19159_vm4, %v19674_v43, %v19673_v26  ;;  %vm14331_vm5 = vcmp.ne.s32.totalorder %v19677_v39, 0  ;;  %v14336_v26 = vadd.s32 24, %v13979_v44  ;;  %v1523_v43 = vrot.slane %v14326_v9, 7  ;;  %11052 = vmatprep.subr.bf16.mxu1 %v13359_v61  ;;  %v13361_v39 = vld [vmem:[#allocation6 + $0x2d0] sm:$0xff]   ;;  %v1245_v8 = vpop.f32.mrb[47].mxu0 }
 0x19a   : > { %vm1332_vm7 = vcmp.ge.f32.partialorder %v1240_v3, 0.0  ;;  %v1396_v62 = vmul.f32 0.2, %v1240_v3  ;;  %v1244_v48 = vadd.f32 %v1243_v32, %v13985_v47  ;;  %v1565_v9 = vsel %vm19159_vm4, %v1520_v30, %v19680_v51  ;;  %v13362_v51 = vld [vmem:[#allocation6 + $0x290] sm:$0xff]   ;;  %vm14432_vm1 = vmpackc.low %vm19208_vm15, %vm14331_vm5 }
 0x19b   : > { %vm1333_vm8 = vcmp.ge.f32.partialorder %v1242_v4, 0.0  ;;  %v1397_v11 = vmul.f32 0.2, %v1242_v4  ;;  %v1246_v57 = vadd.f32 %v1245_v8, %v14031_v17  ;;  %v1566_v31 = vsel %vm19159_vm4, %v1521_v53, %v1523_v43 }
 0x19c   : > { %v19681_v37 = vmov 0  ;;  %v14359_v61 = vsel %vm1332_vm7, %v1240_v3, %v1396_v62  ;;  %vm1334_vm10 = vcmp.ge.f32.partialorder %v1244_v48, 0.0  ;;  %v1398_v32 = vmul.f32 0.2, %v1244_v48  ;;  %11053 = vmatpush3.bf16.msra.mxu1 %v13360_v49 }
 0x19d   : > { %v19682_v37 = vsel %vm14355_vm9, 4294967295, %v19681_v37  ;;  %19684 = vst [vmem:[#allocation54_spill] sm:$0xff] %v14359_v61  ;;  %v14361_v41 = vpack.c.bf16 %v1566_v31, %v1568_v54  ;;  %v1524_v30 = vrot.slane %v14359_v61, 7  ;;  %v14364_v8 = vsel %vm1333_vm8, %v1242_v4, %v1397_v11  ;;  %11054 = vmatprep.subr.bf16.mxu1 %v13361_v39 }
 0x19e   : > { %19683 = vst [vmem:[#allocation53_spill] sm:$0xff] %v19682_v37  ;;  %19686 = vst [vmem:[#allocation56_spill] sm:$0xff] %v14364_v8  ;;  %vm1335_vm11 = vcmp.ge.f32.partialorder %v1246_v57, 0.0  ;;  %v14366_v53 = vpack.c.bf16 %v1565_v9, %v1567_v27  ;;  %v1525_v3 = vrot.slane %v14364_v8, 7  ;;  %v14373_v62 = vsel %vm1334_vm10, %v1244_v48, %v1398_v32  ;;  %v1249_v4 = vpop.f32.mrb[48].mxu0 }
 0x19f   : > { %19685 = vst [vmem:[#allocation55_spill] sm:$0xff] %v14361_v41  ;;  %19688 = vst [vmem:[#allocation58_spill] sm:$0xff] %v14373_v62  ;;  %v1399_v54 = vmul.f32 0.2, %v1246_v57  ;;  %9784 = vmatprep.mubr.msk.bf16.mxu1 %vm14355_vm9, %v14361_v41  ;;  %v14384_v12 = vpack.c.bf16 %v14233_v25, %v1600_v36  ;;  %v19690_v27 = vrot.slane %v14159_v16, 1  ;;  %v19691_v39 = vrot.slane %v14096_v2, 1 }
 0x1a0   : > { %19687 = vst [vmem:[#allocation57_spill] sm:$0xff] %v14366_v53  ;;  %9787 = vmatmul.mubr.msk.bf16.gmra.mrb[4].mxu1 %vm14355_vm9, %v14366_v53  ;;  %v14397_v11 = vsel %vm1303_vm3, %v14211_v6, %v1367_v23  ;;  %v14401_v31 = vadd.f32 %v14024_v13, %v14031_v17  ;;  %v1250_v36 = vadd.f32 %v1249_v4, %v13985_v47  ;;  %v1251_v32 = vpop.f32.mrb[49].mxu0  ;;  %v19694_v49 = vand.u32 15, %v14054_v28  ;;  %v13365_v28 = vld [vmem:[#allocation6 + $0x2e0] sm:$0xff]  }
 0x1a1   : > { %19689 = vst [vmem:[#allocation59_spill] sm:$0xff] %v14384_v12  ;;  %v14392_v48 = vsel %vm19155_vm6, %v19691_v39, %v19690_v27  ;;  %19692 = vst [vmem:[#allocation60_spill] sm:$0xff] %v14397_v11  ;;  %v14404_v25 = vsel %vm1335_vm11, %v1246_v57, %v1399_v54  ;;  %11055 = vmatpush3.bf16.msra.mxu1 %v13362_v51  ;;  %v13364_v39 = vld [vmem:[#allocation6 + $0x298] sm:$0xff]   ;;  %v1252_v23 = vadd.f32 %v1251_v32, %v14031_v17  ;;  %v1253_v13 = vpop.f32.mrb[50].mxu0 }
 0x1a2   : > { %19693 = vst [vmem:[#allocation61_spill] sm:$0xff] %v14404_v25  ;;  %vm14409_vm12 = vcmp.ne.s32.totalorder %v19694_v49, 0  ;;  %v1527_v6 = vrot.slane %v14404_v25, 7  ;;  %v1564_v57 = vsel %vm19159_vm4, %v1523_v43, %v1525_v3  ;;  %v19697_v54 = vrot.slane %v14304_v42, 7  ;;  %11056 = vmatprep.subr.bf16.mxu1 %v13363_v63  ;;  %v1255_v9 = vpop.f32.mrb[51].mxu0 }
 0x1a3   : > { %vm1336_vm13 = vcmp.ge.f32.partialorder %v1250_v36, 0.0  ;;  %v1400_v49 = vmul.f32 0.2, %v1250_v36  ;;  %v1254_v51 = vadd.f32 %v1253_v13, %v13985_v47  ;;  %v19698_v53 = vrot.slane %v14373_v62, 7  ;;  %vm14490_vm11 = vmpackc.low %vm19208_vm15, %vm14409_vm12 }
 0x1a4   : > { %v1563_v4 = vsel %vm19159_vm4, %v19697_v54, %v1524_v30  ;;  %vm1337_vm14 = vcmp.ge.f32.partialorder %v1252_v23, 0.0  ;;  %v1401_v37 = vmul.f32 0.2, %v1252_v23  ;;  %v1256_v43 = vadd.f32 %v1255_v9, %v14031_v17 }
 0x1a5   : > { %v1561_v32 = vsel %vm19159_vm4, %v1524_v30, %v19698_v53  ;;  %v1562_v41 = vsel %vm19159_vm4, %v1525_v3, %v1527_v6  ;;  %v19699_v63 = vmov 0  ;;  %v14436_v13 = vsel %vm1336_vm13, %v1250_v36, %v1400_v49  ;;  %11057 = vmatpush3.bf16.msra.mxu1 %v13364_v39  ;;  %v13366_v30 = vld [vmem:[#allocation6 + $0x2a0] sm:$0xff]  }
 0x1a6   : > { %v19700_v63 = vsel %vm14432_vm1, 4294967295, %v19699_v63  ;;  %19702 = vst [vmem:[#allocation63_spill] sm:$0xff] %v14436_v13  ;;  %vm1338_vm2 = vcmp.ge.f32.partialorder %v1254_v51, 0.0  ;;  %v1402_v54 = vmul.f32 0.2, %v1254_v51  ;;  %v14438_v25 = vpack.c.bf16 %v1562_v41, %v1564_v57  ;;  %11058 = vmatprep.subr.bf16.mxu1 %v13365_v28 }
 0x1a7   : > { %19701 = vst [vmem:[#allocation62_spill] sm:$0xff] %v19700_v63  ;;  %v1528_v53 = vrot.slane %v14436_v13, 7  ;;  %v14441_v9 = vsel %vm1337_vm14, %v1252_v23, %v1401_v37  ;;  %vm1339_vm3 = vcmp.ge.f32.partialorder %v1256_v43, 0.0  ;;  %v14443_v3 = vpack.c.bf16 %v1561_v32, %v1563_v4  ;;  %v1259_v23 = vpop.f32.mrb[52].mxu0  ;;  %v13368_v37 = vld [vmem:[#allocation6 + $0x2a8] sm:$0xff]   ;;  %v13373_v13 = vld [vmem:[#allocation6 + $0x2f8] sm:$0xff]  }
 0x1a8   : > { %19703 = vst [vmem:[#allocation64_spill] sm:$0xff] %v14438_v25  ;;  %19704 = vst [vmem:[#allocation65_spill] sm:$0xff] %v14441_v9  ;;  %v1529_v36 = vrot.slane %v14441_v9, 7  ;;  %v14447_v49 = vsel %vm1338_vm2, %v1254_v51, %v1402_v54  ;;  %v1403_v61 = vmul.f32 0.2, %v1256_v43  ;;  %9790 = vmatprep.mubr.msk.bf16.mxu1 %vm14432_vm1, %v14438_v25  ;;  %vm1304_vm5 = vcmp.ge.f32.partialorder %v14370_v38, 0.0 }
 0x1a9   : > { %19705 = vst [vmem:[#allocation66_spill] sm:$0xff] %v14443_v3  ;;  %19706 = vst [vmem:[#allocation67_spill] sm:$0xff] %v14447_v49  ;;  %v1530_v39 = vrot.slane %v14447_v49, 7  ;;  %9793 = vmatmul.mubr.msk.bf16.gmra.mrb[8].mxu1 %vm14432_vm1, %v14443_v3  ;;  %v1368_v57 = vmul.f32 0.2, %v14370_v38  ;;  %v1260_v51 = vadd.f32 %v1259_v23, %v13985_v47  ;;  %v1261_v32 = vpop.f32.mrb[53].mxu0  ;;  %v14506_v9 = vadd.f32 %v14026_v14, %v13985_v47 }
 0x1aa   : > { %v14461_v4 = vmul.f32 0.2, %v14401_v31  ;;  %v14464_v28 = vsel %vm1339_vm3, %v1256_v43, %v1403_v61  ;;  %v19708_v54 = vand.u32 15, %v14057_v29  ;;  %11059 = vmatpush3.bf16.msra.mxu1 %v13366_v30  ;;  %v1262_v3 = vadd.f32 %v1261_v32, %v14031_v17  ;;  %v1263_v63 = vpop.f32.mrb[54].mxu0  ;;  %v13371_v29 = vld [vmem:[#allocation6 + $0x2f0] sm:$0xff]  }
 0x1ab   : > { %19707 = vst [vmem:[#allocation68_spill] sm:$0xff] %v14464_v28  ;;  %v1531_v41 = vrot.slane %v14464_v28, 7  ;;  %v1560_v61 = vsel %vm19159_vm4, %v1527_v6, %v1529_v36  ;;  %v19711_v43 = vrot.slane %v14373_v62, 7  ;;  %11060 = vmatprep.subr.bf16.mxu1 %v13367_v52  ;;  %vm1340_vm8 = vcmp.ge.f32.partialorder %v1260_v51, 0.0  ;;  %v1265_v25 = vpop.f32.mrb[55].mxu0 }
 0x1ac   : > { %vm14469_vm7 = vcmp.ne.s32.totalorder %v19708_v54, 0  ;;  %v1404_v54 = vmul.f32 0.2, %v1260_v51  ;;  %v1264_v30 = vadd.f32 %v1263_v63, %v13985_v47  ;;  %v1557_v49 = vsel %vm19159_vm4, %v1528_v53, %v1530_v39 }
 0x1ad   : > { %v1559_v23 = vsel %vm19159_vm4, %v19711_v43, %v1528_v53  ;;  %vm1341_vm10 = vcmp.ge.f32.partialorder %v1262_v3, 0.0  ;;  %v1405_v32 = vmul.f32 0.2, %v1262_v3  ;;  %v1266_v28 = vadd.f32 %v1265_v25, %v14031_v17  ;;  %v13372_v25 = vld [vmem:[#allocation6 + $0x2b0] sm:$0xff]  }
 0x1ae   : > { %v1558_v6 = vsel %vm19159_vm4, %v1529_v36, %v1531_v41  ;;  %v19712_v52 = vmov 0  ;;  %vm1305_vm13 = vcmp.ge.f32.partialorder %v14401_v31, 0.0  ;;  %v14495_v63 = vsel %vm1340_vm8, %v1260_v51, %v1404_v54  ;;  %11061 = vmatpush3.bf16.msra.mxu1 %v13368_v37  ;;  %v1269_v37 = vpop.f32.mrb[56].mxu0  ;;  %vm14562_vm8 = vmpackc.low %vm19208_vm15, %vm14469_vm7 }
 0x1af   : > { %v19713_v52 = vsel %vm14490_vm11, 4294967295, %v19712_v52  ;;  %vm1342_vm14 = vcmp.ge.f32.partialorder %v1264_v30, 0.0  ;;  %v1406_v53 = vmul.f32 0.2, %v1264_v30  ;;  %v14497_v43 = vpack.c.bf16 %v1558_v6, %v1560_v61  ;;  %11062 = vmatprep.subr.bf16.mxu1 %v13371_v29  ;;  %v13374_v6 = vld [vmem:[#allocation6 + $0x2b8] sm:$0xff]  }
 0x1b0   : > { %19714 = vst [vmem:[#allocation69_spill] sm:$0xff] %v19713_v52  ;;  %v1532_v62 = vrot.slane %v14495_v63, 7  ;;  %v14500_v36 = vsel %vm1341_vm10, %v1262_v3, %v1405_v32  ;;  %vm1343_vm2 = vcmp.ge.f32.partialorder %v1266_v28, 0.0  ;;  %v14502_v27 = vpack.c.bf16 %v1557_v49, %v1559_v23  ;;  %v1271_v32 = vpop.f32.mrb[57].mxu0 }
 0x1b1   : > { %19715 = vst [vmem:[#allocation70_spill] sm:$0xff] %v14497_v43  ;;  %v1533_v51 = vrot.slane %v14500_v36, 7  ;;  %v14509_v54 = vsel %vm1342_vm14, %v1264_v30, %v1406_v53  ;;  %v1407_v61 = vmul.f32 0.2, %v1266_v28  ;;  %9796 = vmatprep.mubr.msk.bf16.mxu1 %vm14490_vm11, %v14497_v43  ;;  %v14517_v3 = vsel %vm1304_vm5, %v14370_v38, %v1368_v57 }
 0x1b2   : > { %19716 = vst [vmem:[#allocation71_spill] sm:$0xff] %v14502_v27  ;;  %v14521_v49 = vadd.f32 %v14028_v15, %v14031_v17  ;;  %v1534_v14 = vrot.slane %v14509_v54, 7  ;;  %9799 = vmatmul.mubr.msk.bf16.gmra.mrb[12].mxu1 %vm14490_vm11, %v14502_v27  ;;  %v1270_v30 = vadd.f32 %v1269_v37, %v13985_v47  ;;  %v1555_v38 = vsel %vm19159_vm4, %v1530_v39, %v1532_v62  ;;  %v1273_v37 = vpop.f32.mrb[58].mxu0 }
 0x1b3   : > { %v14528_v29 = vsel %vm1343_vm2, %v1266_v28, %v1407_v61  ;;  %v19717_v15 = vand.u32 15, %v14066_v35  ;;  %11063 = vmatpush3.bf16.msra.mxu1 %v13372_v25  ;;  %v19720_v53 = vrot.slane %v14096_v2, 1  ;;  %v19721_v23 = vrot.slane %v14114_v59, 1  ;;  %v1275_v43 = vpop.f32.mrb[59].mxu0 }
 0x1b4   : > { %v1535_v61 = vrot.slane %v14528_v29, 7  ;;  %v1272_v39 = vadd.f32 %v1271_v32, %v14031_v17  ;;  %v1556_v35 = vsel %vm19159_vm4, %v1531_v41, %v1533_v51  ;;  %v1553_v25 = vsel %vm19159_vm4, %v1532_v62, %v1534_v14  ;;  %11064 = vmatprep.subr.bf16.mxu1 %v13373_v13 }
 0x1b5   : > { %vm14535_vm12 = vcmp.ne.s32.totalorder %v19717_v15, 0  ;;  %v14545_v28 = vsel %vm19155_vm6, %v19721_v23, %v19720_v53  ;;  %v13391_v15 = vld [vmem:[#allocation6 + $0xc0] sm:$0xff]   ;;  %vm1344_vm3 = vcmp.ge.f32.partialorder %v1270_v30, 0.0  ;;  %v1408_v27 = vmul.f32 0.2, %v1270_v30 }
 0x1b6   : > { %v1274_v52 = vadd.f32 %v1273_v37, %v13985_v47  ;;  %v14554_v23 = vpack.c.bf16 %v1553_v25, %v1555_v38  ;;  %vm1345_vm5 = vcmp.ge.f32.partialorder %v1272_v39, 0.0  ;;  %v1409_v53 = vmul.f32 0.2, %v1272_v39  ;;  %vm14632_vm6 = vmpackc.low %vm19208_vm15, %vm14535_vm12 }
 0x1b7   : > { %v1276_v32 = vadd.f32 %v1275_v43, %v14031_v17  ;;  %v1554_v8 = vsel %vm19159_vm4, %v1533_v51, %v1535_v61  ;;  %v19723_v62 = vmov 0  ;;  %v14566_v13 = vsel %vm1344_vm3, %v1270_v30, %v1408_v27  ;;  %11065 = vmatpush3.bf16.msra.mxu1 %v13374_v6 }
 0x1b8   : > { %19722 = vst [vmem:[#allocation72_spill] sm:$0xff] %v14554_v23  ;;  %v19724_v62 = vsel %vm14562_vm8, 4294967295, %v19723_v62  ;;  %vm1346_vm10 = vcmp.ge.f32.partialorder %v1274_v52, 0.0  ;;  %v1410_v41 = vmul.f32 0.2, %v1274_v52  ;;  %v14568_v38 = vpack.c.bf16 %v1554_v8, %v1556_v35  ;;  %11274 = vmatprep.subr.bf16.mxu1 %v13391_v15 }
 0x1b9   : > { %19725 = vst [vmem:[#allocation73_spill] sm:$0xff] %v19724_v62  ;;  %v1536_v43 = vrot.slane %v14566_v13, 7  ;;  %v14572_v25 = vsel %vm1345_vm5, %v1272_v39, %v1409_v53  ;;  %vm1347_vm14 = vcmp.ge.f32.partialorder %v1276_v32, 0.0  ;;  %v1411_v27 = vmul.f32 0.2, %v1276_v32 }
 0x1ba   : > { %19726 = vst [vmem:[#allocation74_spill] sm:$0xff] %v14568_v38  ;;  %v1537_v51 = vrot.slane %v14572_v25, 7  ;;  %v14576_v2 = vsel %vm1346_vm10, %v1274_v52, %v1410_v41  ;;  %9802 = vmatprep.mubr.msk.bf16.mxu1 %vm14562_vm8, %v14568_v38  ;;  %v14585_v8 = vsel %vm1305_vm13, %v14401_v31, %v14461_v4  ;;  %v1279_v52 = vpop.f32.mrb[60].mxu0  ;;  %v19727_v39 = vand.u32 15, %v13979_v44 }
 0x1bb   : > { %v1538_v30 = vrot.slane %v14576_v2, 7  ;;  %9805 = vmatmul.mubr.msk.bf16.gmra.mrb[16].mxu1 %vm14562_vm8, %v14554_v23  ;;  %v1551_v6 = vsel %vm19159_vm4, %v1534_v14, %v1536_v43  ;;  %v1370_v31 = vmul.f32 0.2, %v14506_v9  ;;  %v14601_v4 = vsel %vm1347_vm14, %v1276_v32, %v1411_v27  ;;  %v1281_v53 = vpop.f32.mrb[61].mxu0 }
 0x1bc   : > { %vm14596_vm2 = vcmp.ne.s32.totalorder %v19727_v39, 0  ;;  %19730 = vst [vmem:[#allocation75_spill] sm:$0xff] %v14601_v4  ;;  %v1280_v15 = vadd.f32 %v1279_v52, %v13985_v47  ;;  %v1552_v41 = vsel %vm19159_vm4, %v1535_v61, %v1537_v51  ;;  %v19731_v42 = vand.u32 15, %v14083_v50  ;;  %v1283_v32 = vpop.f32.mrb[62].mxu0 }
 0x1bd   : > { %v1539_v39 = vrot.slane %v14601_v4, 7  ;;  %v1282_v37 = vadd.f32 %v1281_v53, %v14031_v17  ;;  %v1549_v27 = vsel %vm19159_vm4, %v1536_v43, %v1538_v30  ;;  %v1284_v61 = vadd.f32 %v1283_v32, %v13985_v47  ;;  %v1285_v23 = vpop.f32.mrb[63].mxu0 }
 0x1be   : > { %vm14608_vm13 = vcmp.ne.s32.totalorder %v19731_v42, 0  ;;  %vm1348_vm5 = vcmp.ge.f32.partialorder %v1280_v15, 0.0  ;;  %v1412_v52 = vmul.f32 0.2, %v1280_v15  ;;  %v14618_v50 = vpack.c.bf16 %v1549_v27, %v1551_v6 }
 0x1bf   : > { %v19735_v42 = vand.u32 15, %v14102_v24  ;;  %vm1349_vm14 = vcmp.ge.f32.partialorder %v1282_v37, 0.0  ;;  %v1413_v38 = vmul.f32 0.2, %v1282_v37  ;;  %v1286_v53 = vadd.f32 %v1285_v23, %v14031_v17 }
 0x1c0   : > { %19734 = vst [vmem:[#allocation76_spill] sm:$0xff] %v14618_v50  ;;  %v1550_v43 = vsel %vm19159_vm4, %v1537_v51, %v1539_v39  ;;  %v19738_v32 = vmov 0  ;;  %v19741_v24 = vand.u32 15, %v14134_v58  ;;  %v14642_v27 = vsel %vm1348_vm5, %v1280_v15, %v1412_v52 }
 0x1c1   : > { %vm14622_vm10 = vcmp.ne.s32.totalorder %v19735_v42, 0  ;;  %v19739_v32 = vsel %vm14632_vm6, 4294967295, %v19738_v32  ;;  %vm1350_vm7 = vcmp.ge.f32.partialorder %v1284_v61, 0.0  ;;  %v1414_v23 = vmul.f32 0.2, %v1284_v61 }
 0x1c2   : > { %19740 = vst [vmem:[#allocation77_spill] sm:$0xff] %v19739_v32  ;;  %vm14638_vm3 = vcmp.ne.s32.totalorder %v19741_v24, 15  ;;  %v14644_v42 = vpack.c.bf16 %v1550_v43, %v1552_v41  ;;  %v1371_v51 = vmul.f32 0.2, %v14521_v49  ;;  %v1540_v57 = vrot.slane %v14642_v27, 7  ;;  %v19803_v32 = vld [vmem:[#allocation37_spill] sm:$0xff] }
 0x1c3   : > { %v14648_v59 = vsel %vm1349_vm14, %v1282_v37, %v1413_v38  ;;  %vm1351_vm12 = vcmp.ge.f32.partialorder %v1286_v53, 0.0  ;;  %v1180_v58 = vadd.f32 %v14033_v18, %v13985_v47  ;;  %v14653_v4 = vsel %vm1350_vm7, %v1284_v61, %v1414_v23 }
 0x1c4   : > { %19744 = vst [vmem:[#allocation78_spill] sm:$0xff] %v14644_v42  ;;  %v1541_v24 = vrot.slane %v14648_v59, 7  ;;  %v1415_v15 = vmul.f32 0.2, %v1286_v53  ;;  %9808 = vmatprep.mubr.msk.bf16.mxu1 %vm14632_vm6, %v14644_v42  ;;  %v1182_v52 = vadd.f32 %v14035_v19, %v14031_v17  ;;  %v1542_v38 = vrot.slane %v14653_v4, 7 }
 0x1c5   : > { %9811 = vmatmul.mubr.msk.bf16.gmra.mrb[20].mxu1 %vm14632_vm6, %v14618_v50  ;;  %v1547_v18 = vsel %vm19159_vm4, %v1538_v30, %v1540_v57  ;;  %vm19745_vm7 = vcmp.ge.f32.partialorder %v14506_v9, 0.0  ;;  %vm19746_vm5 = vcmp.ge.f32.partialorder %v14521_v49, 0.0  ;;  %v19747_v41 = vrot.slane %v13989_v55, 7 }
 0x1c6   : > { %v14671_v61 = vsel %vm19745_vm7, %v14506_v9, %v1370_v31  ;;  %v14673_v43 = vsel %vm1351_vm12, %v1286_v53, %v1415_v15  ;;  %v1548_v19 = vsel %vm19159_vm4, %v1539_v39, %v1541_v24  ;;  %v14680_v23 = vsel %vm19746_vm5, %v14521_v49, %v1371_v51  ;;  %vm14701_vm7 = vmpackc.low %vm19208_vm15, %vm14596_vm2  ;;  %v19795_v53 = vld [vmem:[#allocation38_spill] sm:$0xff] }
 0x1c7   : > { %v1607_v30 = vsel %vm19159_vm4, %v1542_v38, %v19747_v41  ;;  %v1543_v37 = vrot.slane %v14673_v43, 7  ;;  %v1545_v9 = vsel %vm19159_vm4, %v1540_v57, %v1542_v38  ;;  %v19748_v31 = vand.u32 15, %v14223_v10  ;;  %vm14718_vm2 = vmpackc.low %vm19208_vm15, %vm14608_vm13 }
 0x1c8   : > { %v1372_v39 = vmul.f32 0.2, %v1180_v58  ;;  %v14696_v49 = vpack.c.bf16 %v14006_v0, %v1607_v30  ;;  %v19752_v51 = vmov 0  ;;  %v14705_v15 = vpack.c.bf16 %v1545_v9, %v1547_v18  ;;  %v13370_v9 = vld [vmem:[#allocation6 + $0x200] sm:$0xff]   ;;  %vm14732_vm12 = vmpackc.low %vm19208_vm15, %vm14622_vm10 }
 0x1c9   : > { %vm14691_vm14 = vcmp.ne.s32.totalorder %v19748_v31, 0  ;;  %v19753_v51 = vsel %vm14701_vm7, 4294967295, %v19752_v51  ;;  %v1373_v57 = vmul.f32 0.2, %v1182_v52  ;;  %v1184_v10 = vadd.f32 %v14037_v20, %v13985_v47  ;;  %vm14770_vm10 = vmpackc.low %vm14638_vm3, %vm19208_vm15  ;;  %v19804_v31 = vld [vmem:[#allocation28_spill] sm:$0xff] }
 0x1ca   : > { %19751 = vst [vmem:[#allocation79_spill] sm:$0xff] %v14696_v49  ;;  %19754 = vst [vmem:[#allocation80_spill] sm:$0xff] %v19753_v51  ;;  %v19756_v41 = vrot.slane %v14078_v46, 7  ;;  %v1546_v0 = vsel %vm19159_vm4, %v1541_v24, %v1543_v37  ;;  %v19757_v35 = vmov 0  ;;  %v1186_v18 = vadd.f32 %v14039_v21, %v14031_v17  ;;  %v13375_v24 = vld [vmem:[#allocation6 + $0x248] sm:$0xff]  }
 0x1cb   : > { %19755 = vst [vmem:[#allocation81_spill] sm:$0xff] %v14705_v15  ;;  %v19758_v35 = vsel %vm14718_vm2, 4294967295, %v19757_v35  ;;  %v14727_v30 = vpack.c.bf16 %v1546_v0, %v1548_v19  ;;  %v19762_v14 = vmov 0  ;;  %v14744_v21 = vpack.c.bf16 %v14392_v48, %v14545_v28  ;;  %v13395_v51 = vld [vmem:[#allocation6 + $0xc8] sm:$0xff]  }
 0x1cc   : > { %v1608_v38 = vsel %vm19159_vm4, %v1543_v37, %v19756_v41  ;;  %19759 = vst [vmem:[#allocation82_spill] sm:$0xff] %v19758_v35  ;;  %v19763_v14 = vsel %vm14732_vm12, 4294967295, %v19762_v14  ;;  %v19765_v37 = vand.u32 15, %v14336_v26  ;;  %v19770_v62 = vrot.slane %v14144_v22, 7  ;;  %v13392_v35 = vld [vmem:[#allocation6 + $0x80] sm:$0xff]  }
 0x1cd   : > { %v14725_v20 = vpack.c.bf16 %v14129_v5, %v1608_v38  ;;  %19761 = vst [vmem:[#allocation84_spill] sm:$0xff] %v14727_v30  ;;  %19764 = vst [vmem:[#allocation85_spill] sm:$0xff] %v19763_v14  ;;  %v19769_v5 = vrot.slane %v14168_v7, 7  ;;  %v19772_v38 = vrot.slane %v14141_v40, 7  ;;  %9814 = vmatprep.mubr.msk.bf16.mxu1 %vm14718_vm2, %v14727_v30  ;;  %v19773_v28 = vmov 0  ;;  %v19785_v30 = vld [vmem:[#allocation16_spill] sm:$0xff] }
 0x1ce   : > { %vm14738_vm13 = vcmp.ne.s32.totalorder %v19765_v37, 15  ;;  %19768 = vst [vmem:[#allocation86_spill] sm:$0xff] %v14744_v21  ;;  %v19771_v41 = vmov %v19770_v62  ;;  %v19774_v28 = vsel %vm14770_vm10, 4294967295, %v19773_v28  ;;  %vm19779_vm5 = vcmp.ge.f32.partialorder %v1180_v58, 0.0  ;;  %9817 = vmatmul.mubr.msk.bf16.gmra.mrb[24].mxu1 %vm14718_vm2, %v14705_v15 }
 0x1cf   : > { %19760 = vst [vmem:[#allocation83_spill] sm:$0xff] %v14725_v20  ;;  %v1597_v19 = vsel %vm19159_vm4, %v19770_v62, %v19769_v5  ;;  %v1599_v26 = vsel %vm19159_vm4, %v19772_v38, %v19771_v41  ;;  %9724 = vmatprep.mubr.msk.bf16.mxu0 %vm14701_vm7, %v14725_v20  ;;  %19775 = vst [vmem:[#allocation87_spill] sm:$0xff] %v19774_v28  ;;  %v19776_v5 = vrot.slane %v14144_v22, 1  ;;  %v19777_v62 = vrot.slane %v14141_v40, 1  ;;  %v13396_v20 = vld [vmem:[#allocation6 + $0x88] sm:$0xff]  }
 0x1d0   : > { %vm19778_vm4 = vcmp.lt.s32.totalorder %v13979_v44, 7  ;;  %v14781_v38 = vsel %vm19779_vm5, %v1180_v58, %v1372_v39  ;;  %vm19780_vm6 = vcmp.ge.f32.partialorder %v1182_v52, 0.0  ;;  %v1374_v0 = vmul.f32 0.2, %v1184_v10  ;;  %9727 = vmatmul.mubr.msk.bf16.vlgmr.msra.gmra.mrb[64].mxu0 %vm14701_vm7, %v14696_v49  ;;  %9820 = vmatprep.mubr.msk.bf16.mxu1 %vm14770_vm10, %v14196_v60  ;;  %vm14837_vm2 = vmpackc.low %vm14738_vm13, %vm19208_vm15  ;;  %v13379_v49 = vld [vmem:[#allocation6 + $0x258] sm:$0xff]   ;;  %v13383_v40 = vld [vmem:[#allocation6 + $0x268] sm:$0xff]  }
 0x1d1   : > { %v1856_v41 = vsel %vm19778_vm4, %v19777_v62, %v19776_v5  ;;  %v14784_v37 = vsel %vm19780_vm6, %v1182_v52, %v1373_v57  ;;  %v1190_v6 = vadd.f32 %v14060_v33, %v13985_v47  ;;  %vm1310_vm4 = vcmp.ge.f32.partialorder %v1184_v10, 0.0  ;;  %10939 = vmatpush3.bf16.msra.mxu0 %v13370_v9  ;;  %9730 = vmatprep.mubr.msk.bf16.mxu0 %vm14732_vm12, %v14170_v1  ;;  %v13376_v33 = vld [vmem:[#allocation6 + $0x208] sm:$0xff]   ;;  %v13377_v5 = vld [vmem:[#allocation6 + $0x250] sm:$0xff]  }
 0x1d2   : > { %v1375_v58 = vmul.f32 0.2, %v1186_v18  ;;  %v1192_v52 = vadd.f32 %v14063_v34, %v14031_v17  ;;  %vm1311_vm6 = vcmp.ge.f32.partialorder %v1186_v18, 0.0  ;;  %10940 = vmatprep.subr.bf16.mxu0 %v13375_v24  ;;  %v14803_v39 = vpack.c.bf16 %v1597_v19, %v1599_v26  ;;  %v19799_v1 = vld [vmem:[#allocation34_spill] sm:$0xff] }
 0x1d3   : > { %v19782_v57 = vmov %v19777_v62  ;;  %v19783_v62 = vrot.slane %v14089_v56, 1  ;;  %vm19784_vm3 = vcmp.lt.s32.totalorder %v13979_v44, 7  ;;  %v387_v9 = vadd.s32 48, %v13979_v44  ;;  %v13400_v56 = vld [vmem:[#allocation6 + $0x90] sm:$0xff]  }
 0x1d4   : > { %19781 = vst [vmem:[#allocation88_spill] sm:$0xff] %v14803_v39  ;;  %v386_v24 = vadd.s32 40, %v13979_v44  ;;  %v14817_v19 = vsel %vm1310_vm4, %v1184_v10, %v1374_v0  ;;  %v1376_v26 = vmul.f32 0.2, %v1190_v6  ;;  %v1194_v60 = vadd.f32 %v19785_v30, %v13985_v47 }
 0x1d5   : > { %v1858_v34 = vsel %vm19784_vm3, %v19783_v62, %v19782_v57  ;;  %v19786_v57 = vld [vmem:[#allocation17_spill] sm:$0xff]  ;;  %v14825_v48 = vsel %vm1311_vm6, %v1186_v18, %v1375_v58  ;;  %vm1312_vm5 = vcmp.ge.f32.partialorder %v1190_v6, 0.0  ;;  %v1377_v15 = vmul.f32 0.2, %v1192_v52  ;;  %vm14830_vm3 = vmpackc.low %vm19208_vm15, %vm14691_vm14  ;;  %10941 = vmatpush3.bf16.msra.mxu0 %v13376_v33  ;;  %v13378_v33 = vld [vmem:[#allocation6 + $0x210] sm:$0xff]  }
 0x1d6   : > { %v1196_v62 = vadd.f32 %v19786_v57, %v14031_v17  ;;  %v19787_v10 = vmov 0  ;;  %vm1313_vm4 = vcmp.ge.f32.partialorder %v1192_v52, 0.0  ;;  %v19790_v30 = vmov 0  ;;  %10942 = vmatprep.subr.bf16.mxu0 %v13377_v5  ;;  %9823 = vmatmul.mubr.msk.bf16.vlgmr.msra.gmra.mrb[28].mxu1 %vm14770_vm10, %v19804_v31 }
 0x1d7   : > { %v19788_v10 = vsel %vm14830_vm3, 4294967295, %v19787_v10  ;;  %v19791_v30 = vsel %vm14837_vm2, 4294967295, %v19790_v30  ;;  %v14841_v18 = vpack.c.bf16 %v1856_v41, %v1858_v34  ;;  %v459_v0 = vand.u32 15, %v387_v9  ;;  %9826 = vmatprep.mubr.msk.bf16.mxu1 %vm14837_vm2, %v14744_v21  ;;  %11275 = vmatpush3.bf16.msra.mxu1 %v13392_v35 }
 0x1d8   : > { %19789 = vst [vmem:[#allocation16_spill] sm:$0xff] %v19788_v10  ;;  %19792 = vst [vmem:[#allocation17_spill] sm:$0xff] %v19791_v30  ;;  %v19794_v58 = vrot.slane %v14397_v11, 7  ;;  %v19796_v57 = vrot.slane %v19795_v53, 7  ;;  %vm19797_vm14 = vcmp.lt.s32.totalorder %v13979_v44, 1  ;;  %v19800_v41 = vrot.slane %v19799_v1, 7  ;;  %9733 = vmatmul.mubr.msk.bf16.gmra.mrb[68].mxu0 %vm14732_vm12, %v19803_v32  ;;  %11276 = vmatprep.subr.bf16.mxu1 %v13395_v51 }
 0x1d9   : > { %19793 = vst [vmem:[#allocation89_spill] sm:$0xff] %v14841_v18  ;;  %vm19801_vm13 = vmmov %vm19797_vm14  ;;  %v452_v9 = vand.u32 15, %v386_v24  ;;  %v14859_v5 = vsel %vm1312_vm5, %v1190_v6, %v1376_v26  ;;  %vm1314_vm6 = vcmp.ge.f32.partialorder %v1194_v60, 0.0  ;;  %v19805_v24 = vld [vmem:[#allocation22_spill] sm:$0xff]  ;;  %9736 = vmatprep.mubr.msk.bf16.mxu0 %vm14830_vm3, %v14384_v12  ;;  %vm14879_vm5 = vcmp.ne.s32.totalorder %v459_v0, 0  ;;  %10943 = vmatpush3.bf16.msra.mxu0 %v13378_v33  ;;  %v19815_v12 = vld [vmem:[#allocation21_spill] sm:$0xff] }
 0x1da   : > { %v1594_v50 = vsel %vm19797_vm14, %v19796_v57, %v19794_v58  ;;  %v19798_v42 = vmov %v19796_v57  ;;  %19802 = vst [vmem:[#allocation90_spill] sm:$0xff] %v14859_v5  ;;  %v1378_v58 = vmul.f32 0.2, %v1194_v60  ;;  %v1379_v57 = vmul.f32 0.2, %v1196_v62  ;;  %10944 = vmatprep.subr.bf16.mxu0 %v13379_v49  ;;  %v13407_v5 = vld [vmem:[#allocation6 + $0xe8] sm:$0xff]  }
 0x1db   : > { %v1596_v34 = vsel %vm19801_vm13, %v19800_v41, %v19798_v42  ;;  %v14868_v42 = vsel %vm1313_vm4, %v1192_v52, %v1377_v15  ;;  %vm1315_vm14 = vcmp.ge.f32.partialorder %v1196_v62, 0.0  ;;  %v1202_v41 = vadd.f32 %v19805_v24, %v14031_v17  ;;  %v13380_v24 = vld [vmem:[#allocation6 + $0x218] sm:$0xff]   ;;  %11277 = vmatpush3.bf16.msra.mxu1 %v13396_v20 }
 0x1dc   : > { %v14883_v15 = vpack.c.bf16 %v1594_v50, %v1596_v34  ;;  %v389_v52 = vadd.s32 64, %v13979_v44  ;;  %vm14887_vm4 = vcmp.ne.s32.totalorder %v452_v9, 15  ;;  %v19811_v6 = vrot.slane %v19795_v53, 1  ;;  %v13381_v34 = vld [vmem:[#allocation6 + $0x260] sm:$0xff]  }
 0x1dd   : > { %v19812_v0 = vrot.slane %v19799_v1, 1  ;;  %vm19813_vm13 = vcmp.lt.s32.totalorder %v13979_v44, 7  ;;  %v388_v33 = vadd.s32 56, %v13979_v44  ;;  %v14901_v9 = vsel %vm1314_vm6, %v1194_v60, %v1378_v58  ;;  %vm14930_vm10 = vmpackc.low %vm14887_vm4, %vm19208_vm15  ;;  %10945 = vmatpush3.bf16.msra.mxu0 %v13380_v24 }
 0x1de   : > { %19808 = vst [vmem:[#allocation22_spill] sm:$0xff] %v14883_v15  ;;  %19814 = vst [vmem:[#allocation91_spill] sm:$0xff] %v14901_v9  ;;  %v14904_v21 = vsel %vm1315_vm14, %v1196_v62, %v1379_v57  ;;  %v14908_v32 = vadd.f32 %v19815_v12, %v13985_v47  ;;  %v19817_v51 = vmov 0  ;;  %v19820_v60 = vrot.slane %v19799_v1, 1  ;;  %10946 = vmatprep.subr.bf16.mxu0 %v13381_v34  ;;  %9829 = vmatmul.mubr.msk.bf16.gmra.mrb[32].mxu1 %vm14837_vm2, %v14841_v18  ;;  %v13401_v18 = vld [vmem:[#allocation6 + $0xd8] sm:$0xff]  }
 0x1df   : > { %v1853_v50 = vsel %vm19813_vm13, %v19812_v0, %v19811_v6  ;;  %v1381_v6 = vmul.f32 0.2, %v1202_v41  ;;  %v19816_v0 = vld [vmem:[#allocation25_spill] sm:$0xff]  ;;  %vm14917_vm13 = vmpackc.low %vm19208_vm15, %vm14879_vm5  ;;  %v19821_v62 = vrot.slane %v14159_v16, 1  ;;  %vm19822_vm6 = vcmp.lt.s32.totalorder %v13979_v44, 7  ;;  %v19831_v16 = vld [vmem:[#allocation24_spill] sm:$0xff] }
 0x1e0   : > { %v14912_v49 = vadd.f32 %v19816_v0, %v14031_v17  ;;  %v19818_v51 = vsel %vm14917_vm13, 4294967295, %v19817_v51  ;;  %vm1317_vm14 = vcmp.ge.f32.partialorder %v1202_v41, 0.0  ;;  %v19823_v58 = vmov 0  ;;  %v19828_v0 = vld [vmem:[#allocation36_spill] sm:$0xff]  ;;  %9739 = vmatmul.mubr.msk.bf16.gmra.mrb[72].mxu0 %vm14830_vm3, %v14803_v39 }
 0x1e1   : > { %19819 = vst [vmem:[#allocation21_spill] sm:$0xff] %v19818_v51  ;;  %v1855_v12 = vsel %vm19822_vm6, %v19821_v62, %v19820_v60  ;;  %v19824_v58 = vsel %vm14930_vm10, 4294967295, %v19823_v58  ;;  %v19827_v26 = vrot.slane %v14324_v45, 7  ;;  %v19829_v31 = vrot.slane %v19828_v0, 7  ;;  %v13382_v60 = vld [vmem:[#allocation6 + $0x220] sm:$0xff]   ;;  %v13399_v62 = vld [vmem:[#allocation6 + $0xd0] sm:$0xff]   ;;  %9742 = vmatprep.mubr.msk.bf16.mxu0 %vm14917_vm13, %v14883_v15 }
 0x1e2   : > { %19825 = vst [vmem:[#allocation25_spill] sm:$0xff] %v19824_v58  ;;  %v14934_v57 = vpack.c.bf16 %v1853_v50, %v1855_v12  ;;  %vm19830_vm5 = vcmp.lt.s32.totalorder %v13979_v44, 1  ;;  %v473_v14 = vand.u32 15, %v389_v52  ;;  %v14946_v50 = vadd.f32 %v19831_v16, %v13985_v47  ;;  %10947 = vmatpush3.bf16.msra.mxu0 %v13382_v60  ;;  %11278 = vmatprep.subr.bf16.mxu1 %v13399_v62  ;;  %v13385_v62 = vld [vmem:[#allocation6 + $0x270] sm:$0xff]   ;;  %v13389_v47 = vld [vmem:[#allocation6 + $0x40] sm:$0xff]  }
 0x1e3   : > { %v1593_v35 = vsel %vm19830_vm5, %v19829_v31, %v19827_v26  ;;  %v466_v12 = vand.u32 15, %v388_v33  ;;  %v19832_v20 = vmov %v19829_v31  ;;  %v19833_v31 = vrot.slane %v14168_v7, 7  ;;  %vm19834_vm4 = vmmov %vm19830_vm5  ;;  %10948 = vmatprep.subr.bf16.mxu0 %v13383_v40  ;;  %11279 = vmatpush3.bf16.msra.mxu1 %v13400_v56 }
 0x1e4   : > { %19826 = vst [vmem:[#allocation92_spill] sm:$0xff] %v14934_v57  ;;  %v19835_v52 = vrot.slane %v19828_v0, 1  ;;  %v19836_v24 = vrot.slane %v14168_v7, 1  ;;  %v19838_v26 = vrot.slane %v14144_v22, 1  ;;  %vm19839_vm5 = vmmov %vm19822_vm6  ;;  %v391_v1 = vadd.s32 80, %v13979_v44  ;;  %9832 = vmatprep.mubr.msk.bf16.mxu1 %vm14930_vm10, %v14934_v57  ;;  %11280 = vmatprep.subr.bf16.mxu1 %v13401_v18 }
 0x1e5   : > { %v1595_v16 = vsel %vm19834_vm4, %v19833_v31, %v19832_v20  ;;  %v14974_v30 = vsel %vm1317_vm14, %v1202_v41, %v1381_v6  ;;  %v14977_v20 = vmul.f32 0.2, %v14912_v49  ;;  %vm19844_vm14 = vmmov %vm19834_vm4  ;;  %vm14993_vm4 = vcmp.ne.s32.totalorder %v473_v14, 0  ;;  %v13384_v14 = vld [vmem:[#allocation6 + $0x228] sm:$0xff]  }
 0x1e6   : > { %v1852_v33 = vsel %vm19822_vm6, %v19836_v24, %v19835_v52  ;;  %v19837_v34 = vmov %v19836_v24  ;;  %19840 = vst [vmem:[#allocation24_spill] sm:$0xff] %v14974_v30  ;;  %v14985_v31 = vpack.c.bf16 %v1593_v35, %v1595_v16  ;;  %v19842_v52 = vrot.slane %v14680_v23, 7  ;;  %vm19849_vm6 = vmmov %vm19839_vm5  ;;  %10949 = vmatpush3.bf16.msra.mxu0 %v13384_v14 }
 0x1e7   : > { %v1854_v28 = vsel %vm19839_vm5, %v19838_v26, %v19837_v34  ;;  %v19843_v24 = vrot.slane %v14585_v8, 7  ;;  %v19847_v34 = vrot.slane %v14585_v8, 1  ;;  %v19848_v26 = vrot.slane %v14397_v11, 1  ;;  %vm19852_vm5 = vmmov %vm19844_vm14  ;;  %10950 = vmatprep.subr.bf16.mxu0 %v13385_v62 }
 0x1e8   : > { %19841 = vst [vmem:[#allocation93_spill] sm:$0xff] %v14985_v31  ;;  %v19850_v35 = vrot.slane %v14671_v61, 7  ;;  %v19851_v16 = vrot.slane %v14517_v3, 7  ;;  %v19854_v39 = vrot.slane %v14585_v8, 7  ;;  %v19855_v10 = vrot.slane %v14397_v11, 7  ;;  %9745 = vmatmul.mubr.msk.bf16.gmra.mrb[76].mxu0 %vm14917_vm13, %v14985_v31  ;;  %v13408_v31 = vld [vmem:[#allocation6 + $0xa8] sm:$0xff]  }
 0x1e9   : > { %v1590_v41 = vsel %vm19844_vm14, %v19843_v24, %v19842_v52  ;;  %v1849_v57 = vsel %vm19849_vm6, %v19848_v26, %v19847_v34  ;;  %v390_v52 = vadd.s32 72, %v13979_v44  ;;  %v15010_v24 = vpack.c.bf16 %v1852_v33, %v1854_v28  ;;  %vm19856_vm14 = vmmov %vm19852_vm5 }
 0x1ea   : > { %v1589_v15 = vsel %vm19852_vm5, %v19851_v16, %v19850_v35  ;;  %v1592_v34 = vsel %vm19856_vm14, %v19855_v10, %v19854_v39  ;;  %vm15018_vm6 = vcmp.ne.s32.totalorder %v466_v12, 15  ;;  %v19859_v35 = vrot.slane %v14517_v3, 1 }
 0x1eb   : > { %19853 = vst [vmem:[#allocation94_spill] sm:$0xff] %v15010_v24  ;;  %v19860_v16 = vrot.slane %v14324_v45, 1  ;;  %vm19861_vm5 = vcmp.lt.s32.totalorder %v13979_v44, 7  ;;  %v15028_v28 = vpack.c.bf16 %v1590_v41, %v1592_v34  ;;  %v19863_v33 = vrot.slane %v14397_v11, 1  ;;  %9835 = vmatmul.mubr.msk.bf16.gmra.mrb[36].mxu1 %vm14930_vm10, %v15010_v24 }
 0x1ec   : > { %v19864_v39 = vrot.slane %v19795_v53, 1  ;;  %vm19865_vm14 = vmmov %vm19861_vm5  ;;  %v19866_v12 = vrot.slane %v14517_v3, 7  ;;  %v19867_v7 = vrot.slane %v14324_v45, 7  ;;  %vm19868_vm15 = vcmp.lt.s32.totalorder %v13979_v44, 1  ;;  %v13405_v45 = vld [vmem:[#allocation6 + $0xe0] sm:$0xff]  }
 0x1ed   : > { %v1848_v60 = vsel %vm19861_vm5, %v19860_v16, %v19859_v35  ;;  %19862 = vst [vmem:[#allocation95_spill] sm:$0xff] %v15028_v28  ;;  %v487_v35 = vand.u32 15, %v391_v1  ;;  %v1794_v40 = vrot.slane %v14572_v25, 1  ;;  %vm19869_vm2 = vmmov 1  }
 0x1ee   : > { %v1851_v10 = vsel %vm19865_vm14, %v19864_v39, %v19863_v33  ;;  %v1591_v22 = vsel %vm19868_vm15, %v19867_v7, %v19866_v12  ;;  %vm15047_vm8 = vmpackc.low %vm19869_vm2, %vm14993_vm4  ;;  %v19870_v56 = vmov 0  ;;  %v19875_v1 = vrot.slane %v19828_v0, 1  ;;  %v13402_v12 = vld [vmem:[#allocation6 + $0x98] sm:$0xff]  }
 0x1ef   : > { %v19871_v56 = vsel %vm15047_vm8, 4294967295, %v19870_v56  ;;  %v15051_v41 = vpack.c.bf16 %v1849_v57, %v1851_v10  ;;  %v15053_v34 = vpack.c.bf16 %v1589_v15, %v1591_v22  ;;  %vm19876_vm15 = vmmov %vm19861_vm5  ;;  %v1792_v18 = vrot.slane %v14528_v29, 1  ;;  %v13386_v10 = vld [vmem:[#allocation6 + $0x230] sm:$0xff]   ;;  %9748 = vmatprep.mubr.msk.bf16.mxu0 %vm15047_vm8, %v15028_v28  ;;  %11281 = vmatpush3.bf16.msra.mxu1 %v13402_v12 }
 0x1f0   : > { %19872 = vst [vmem:[#allocation96_spill] sm:$0xff] %v19871_v56  ;;  %v1850_v7 = vsel %vm19876_vm15, %v19875_v1, %v19860_v16  ;;  %vm15065_vm4 = vmpackc.low %vm15018_vm6, %vm19869_vm2  ;;  %v19877_v6 = vmov 0  ;;  %v19881_v22 = vrot.slane %v14825_v48, 7  ;;  %v19882_v15 = vrot.slane %v14784_v37, 7  ;;  %10951 = vmatpush3.bf16.msra.mxu0 %v13386_v10  ;;  %11282 = vmatprep.subr.bf16.mxu1 %v13405_v45 }
 0x1f1   : > { %19873 = vst [vmem:[#allocation97_spill] sm:$0xff] %v15051_v41  ;;  %19874 = vst [vmem:[#allocation98_spill] sm:$0xff] %v15053_v34  ;;  %v19878_v6 = vsel %vm15065_vm4, 4294967295, %v19877_v6  ;;  %v15069_v57 = vpack.c.bf16 %v1848_v60, %v1850_v7  ;;  %vm19883_vm14 = vcmp.lt.s32.totalorder %v13979_v44, 1  ;;  %v480_v39 = vand.u32 15, %v390_v52  ;;  %v13387_v7 = vld [vmem:[#allocation6 + $0x278] sm:$0xff]   ;;  %9838 = vmatprep.mubr.msk.bf16.mxu1 %vm15065_vm4, %v15051_v41  ;;  %9751 = vmatmul.mubr.msk.bf16.gmra.mrb[80].mxu0 %vm15047_vm8, %v15053_v34 }
 0x1f2   : > { %19879 = vst [vmem:[#allocation99_spill] sm:$0xff] %v19878_v6  ;;  %v1586_v33 = vsel %vm19883_vm14, %v19882_v15, %v19881_v22  ;;  %v1791_v1 = vrot.slane %v14509_v54, 1  ;;  %v1793_v60 = vrot.slane %v14566_v13, 1  ;;  %v1795_v0 = vrot.slane %v14576_v2, 1  ;;  %vm19888_vm15 = vmmov %vm19883_vm14  ;;  %v13388_v41 = vld [vmem:[#allocation6 + $0x238] sm:$0xff]   ;;  %10952 = vmatprep.subr.bf16.mxu0 %v13387_v7  ;;  %v20064_v34 = vld [vmem:[#allocation26_spill] sm:$0xff] }
 0x1f3   : > { %19880 = vst [vmem:[#allocation100_spill] sm:$0xff] %v15069_v57  ;;  %v1798_v11 = vrot.slane %v14648_v59, 1  ;;  %vm15089_vm6 = vcmp.ne.s32.totalorder %v487_v35, 0  ;;  %v19886_v14 = vmov %v19882_v15  ;;  %v19887_v62 = vrot.slane %v14680_v23, 7  ;;  %v19889_v15 = vld [vmem:[#allocation75_spill] sm:$0xff]  ;;  %vm19892_vm14 = vmmov %vm19861_vm5  ;;  %9841 = vmatmul.mubr.msk.bf16.gmra.mrb[40].mxu1 %vm15065_vm4, %v15069_v57 }
 0x1f4   : > { %v1796_v16 = vrot.slane %v19889_v15, 1  ;;  %v1797_v26 = vrot.slane %v14642_v27, 1  ;;  %v19890_v35 = vrot.slane %v14784_v37, 1  ;;  %v19891_v24 = vrot.slane %v14680_v23, 1  ;;  %vm19897_vm10 = vmmov %vm19892_vm14  ;;  %10953 = vmatpush3.bf16.msra.mxu0 %v13388_v41  ;;  %v19926_v41 = vld [vmem:[#allocation31_spill] sm:$0xff] }
 0x1f5   : > { %v1588_v22 = vsel %vm19888_vm15, %v19887_v62, %v19886_v14  ;;  %vm19893_vm15 = vmmov %vm19861_vm5  ;;  %v1800_v62 = vrot.slane %v14673_v43, 1  ;;  %vm15116_vm5 = vcmp.ne.s32.totalorder %v480_v39, 15  ;;  %v393_v28 = vadd.s32 96, %v13979_v44  ;;  %11162 = vmatprep.subr.bf16.mxu0 %v13389_v47 }
 0x1f6   : > { %v1845_v58 = vsel %vm19892_vm14, %v19891_v24, %v19890_v35  ;;  %v1809_v14 = vsel %vm19893_vm15, %v1792_v18, %v1794_v40  ;;  %v19896_v51 = vrot.slane %v14500_v36, 1  ;;  %v13406_v24 = vld [vmem:[#allocation6 + $0xa0] sm:$0xff]   ;;  %v392_v35 = vadd.s32 88, %v13979_v44  ;;  %vm19899_vm14 = vmmov %vm19897_vm10 }
 0x1f7   : > { %v1808_v39 = vsel %vm19899_vm14, %v1791_v1, %v1793_v60  ;;  %v19900_v30 = vrot.slane %v14495_v63, 1  ;;  %vm19901_vm15 = vmmov %vm19897_vm10  ;;  %v19903_v12 = vrot.slane %v14585_v8, 1  ;;  %v19906_v45 = vmov 0  ;;  %11283 = vmatpush3.bf16.msra.mxu1 %v13406_v24 }
 0x1f8   : > { %v1811_v53 = vsel %vm19897_vm10, %v19896_v51, %v1792_v18  ;;  %v1799_v51 = vrot.slane %v14653_v4, 1  ;;  %v19902_v18 = vrot.slane %v14680_v23, 1  ;;  %vm19905_vm14 = vmmov %vm19897_vm10  ;;  %v19912_v52 = vmov 0  ;;  %11284 = vmatprep.subr.bf16.mxu1 %v13407_v5 }
 0x1f9   : > { %v15126_v9 = vpack.c.bf16 %v1809_v14, %v1811_v53  ;;  %v1810_v10 = vsel %vm19901_vm15, %v19900_v30, %v1791_v1  ;;  %v1805_v14 = vsel %vm19905_vm14, %v1796_v16, %v1798_v11  ;;  %vm15148_vm15 = vmpackc.low %vm19869_vm2, %vm15089_vm6  ;;  %v15152_v30 = vpack.c.bf16 %v1586_v33, %v1588_v22 }
 0x1fa   : > { %v1847_v53 = vsel %vm19897_vm10, %v19903_v12, %v19902_v18  ;;  %v15141_v7 = vpack.c.bf16 %v1808_v39, %v1810_v10  ;;  %v19907_v45 = vsel %vm15148_vm15, 4294967295, %v19906_v45  ;;  %vm19911_vm11 = vmmov %vm19897_vm10  ;;  %v1804_v39 = vsel %vm19897_vm10, %v1795_v0, %v1797_v26 }
 0x1fb   : > { %19898 = vst [vmem:[#allocation75_spill] sm:$0xff] %v15126_v9  ;;  %19908 = vst [vmem:[#allocation102_spill] sm:$0xff] %v19907_v45  ;;  %v15154_v1 = vpack.c.bf16 %v1845_v58, %v1847_v53  ;;  %v1807_v9 = vsel %vm19911_vm11, %v1794_v40, %v1796_v16  ;;  %v19915_v10 = vrot.slane %v14817_v19, 7  ;;  %v19916_v33 = vrot.slane %v14781_v38, 7  ;;  %9754 = vmatprep.mubr.msk.bf16.mxu0 %vm15148_vm15, %v15152_v30 }
 0x1fc   : > { %19904 = vst [vmem:[#allocation101_spill] sm:$0xff] %v15141_v7  ;;  %19909 = vst [vmem:[#allocation103_spill] sm:$0xff] %v15152_v30  ;;  %vm19917_vm6 = vcmp.lt.s32.totalorder %v13979_v44, 1  ;;  %v501_v22 = vand.u32 15, %v393_v28  ;;  %v15173_v40 = vpack.c.bf16 %v1805_v14, %v1807_v9  ;;  %v494_v18 = vand.u32 15, %v392_v35  ;;  %v13409_v9 = vld [vmem:[#allocation6 + $0xf0] sm:$0xff]   ;;  %11285 = vmatpush3.bf16.msra.mxu1 %v13408_v31 }
 0x1fd   : > { %19910 = vst [vmem:[#allocation104_spill] sm:$0xff] %v15154_v1  ;;  %vm15163_vm14 = vmpackc.low %vm15116_vm5, %vm19869_vm2  ;;  %v1585_v58 = vsel %vm19917_vm6, %v19916_v33, %v19915_v10  ;;  %v19922_v7 = vrot.slane %v14078_v46, 1  ;;  %v1380_v5 = vmul.f32 0.2, %v14908_v32  ;;  %v19936_v10 = vrot.slane %v14781_v38, 1  ;;  %11286 = vmatprep.subr.bf16.mxu1 %v13409_v9  ;;  %v13423_v30 = vld [vmem:[#allocation6 + $0x340] sm:$0xff]  }
 0x1fe   : > { %v19913_v52 = vsel %vm15163_vm14, 4294967295, %v19912_v52  ;;  %19918 = vst [vmem:[#allocation106_spill] sm:$0xff] %v15173_v40  ;;  %vm19919_vm11 = vmmov %vm19897_vm10  ;;  %9844 = vmatprep.mubr.msk.bf16.mxu1 %vm15163_vm14, %v15154_v1  ;;  %v394_v31 = vadd.s32 104, %v13979_v44  ;;  %v15267_v9 = vpack.c.bf16 %v14509_v54, %v14495_v63  ;;  %v15290_v54 = vpack.c.bf16 %v14653_v4, %v14642_v27 }
 0x1ff   : > { %19914 = vst [vmem:[#allocation105_spill] sm:$0xff] %v19913_v52  ;;  %v1806_v16 = vsel %vm19919_vm11, %v1793_v60, %v1795_v0  ;;  %vm19921_vm5 = vmmov %vm19897_vm10  ;;  %vm19924_vm11 = vcmp.ge.f32.partialorder %v14912_v49, 0.0  ;;  %v15205_v60 = vadd.f32 %v19926_v41, %v14031_v17  ;;  %v19965_v4 = vmov 0 }
 0x200   : > { %v15177_v12 = vpack.c.bf16 %v1804_v39, %v1806_v16  ;;  %v1803_v53 = vsel %vm19921_vm5, %v1798_v11, %v1800_v62  ;;  %vm19923_vm10 = vmmov %vm19921_vm5  ;;  %v15190_v0 = vsel %vm19924_vm11, %v14912_v49, %v14977_v20  ;;  %v1802_v11 = vsel %vm19921_vm5, %v1797_v26, %v1799_v51  ;;  %v13410_v39 = vld [vmem:[#allocation6 + $0xb0] sm:$0xff]   ;;  %19950 = vst [vmem:[#allocation111_spill] sm:$0xff] %v15267_v9 }
 0x201   : > { %v1865_v28 = vsel %vm19923_vm10, %v1800_v62, %v19922_v7  ;;  %v19927_v49 = vmov %v19916_v33  ;;  %v19928_v20 = vrot.slane %v14671_v61, 7  ;;  %vm19929_vm10 = vmmov %vm19917_vm6  ;;  %v19930_v62 = vrot.slane %v13989_v55, 1  ;;  %19957 = vst [vmem:[#allocation116_spill] sm:$0xff] %v15290_v54  ;;  %11287 = vmatpush3.bf16.msra.mxu1 %v13410_v39  ;;  %v20071_v54 = vld [vmem:[#allocation54_spill] sm:$0xff] }
 0x202   : > { %19920 = vst [vmem:[#allocation107_spill] sm:$0xff] %v15177_v12  ;;  %v15198_v47 = vpack.c.bf16 %v1865_v28, %v1803_v53  ;;  %vm19931_vm11 = vmmov %vm19921_vm5  ;;  %vm15225_vm5 = vcmp.ne.s32.totalorder %v501_v22, 0  ;;  %v395_v7 = vadd.s32 112, %v13979_v44  ;;  %v19937_v33 = vrot.slane %v14671_v61, 1  ;;  %v13411_v53 = vld [vmem:[#allocation6 + $0xf8] sm:$0xff]  }
 0x203   : > { %v1587_v26 = vsel %vm19929_vm10, %v19928_v20, %v19927_v49  ;;  %v1864_v17 = vsel %vm19931_vm11, %v1799_v51, %v19930_v62  ;;  %vm19938_vm10 = vmmov %vm19931_vm11  ;;  %vm15244_vm6 = vcmp.ne.s32.totalorder %v494_v18, 15  ;;  %v19944_v28 = vrot.slane %v14904_v21, 7  ;;  %11288 = vmatprep.subr.bf16.mxu1 %v13411_v53 }
 0x204   : > { %19925 = vst [vmem:[#allocation108_spill] sm:$0xff] %v15198_v47  ;;  %v15223_v24 = vpack.c.bf16 %v1585_v58, %v1587_v26  ;;  %v15230_v14 = vpack.c.bf16 %v1864_v17, %v1802_v11  ;;  %v1844_v55 = vsel %vm19938_vm10, %v19937_v33, %v19936_v10  ;;  %v19939_v51 = vmov %v19937_v33  ;;  %vm19941_vm11 = vmmov %vm19938_vm10 }
 0x205   : > { %v19940_v58 = vrot.slane %v14517_v3, 1  ;;  %v19945_v11 = vrot.slane %v14868_v42, 7  ;;  %vm19946_vm10 = vcmp.lt.s32.totalorder %v13979_v44, 1  ;;  %v19947_v49 = vrot.slane %v14868_v42, 1  ;;  %vm15272_vm4 = vmpackc.low %vm19869_vm2, %vm15225_vm5 }
 0x206   : > { %19932 = vst [vmem:[#allocation31_spill] sm:$0xff] %v15223_v24  ;;  %19935 = vst [vmem:[#allocation109_spill] sm:$0xff] %v15230_v14  ;;  %v19948_v20 = vrot.slane %v14825_v48, 1  ;;  %v15263_v26 = vpack.c.bf16 %v14528_v29, %v14500_v36  ;;  %v19951_v62 = vmov 0  ;;  %v15278_v17 = vpack.c.bf16 %v19889_v15, %v14572_v25  ;;  %9757 = vmatmul.mubr.msk.bf16.gmra.mrb[84].mxu0 %vm15148_vm15, %v15223_v24 }
 0x207   : > { %v1846_v22 = vsel %vm19941_vm11, %v19940_v58, %v19939_v51  ;;  %v1582_v41 = vsel %vm19946_vm10, %v19945_v11, %v19944_v28  ;;  %v19952_v62 = vsel %vm15272_vm4, 4294967295, %v19951_v62  ;;  %v15282_v10 = vpack.c.bf16 %v14576_v2, %v14566_v13  ;;  %vm19961_vm5 = vmmov %vm19946_vm10  ;;  %v19970_v28 = vld [vmem:[#allocation90_spill] sm:$0xff] }
 0x208   : > { %v1841_v18 = vsel %vm19941_vm11, %v19948_v20, %v19947_v49  ;;  %19949 = vst [vmem:[#allocation110_spill] sm:$0xff] %v15263_v26  ;;  %19953 = vst [vmem:[#allocation112_spill] sm:$0xff] %v19952_v62  ;;  %v15286_v29 = vpack.c.bf16 %v14673_v43, %v14648_v59  ;;  %v15292_v35 = vpack.c.bf16 %v1844_v55, %v1846_v22  ;;  %v19959_v33 = vmov %v19945_v11  ;;  %v13412_v43 = vld [vmem:[#allocation6 + $0xb8] sm:$0xff]   ;;  %v20040_v62 = vld [vmem:[#allocation18_spill] sm:$0xff] }
 0x209   : > { %19954 = vst [vmem:[#allocation113_spill] sm:$0xff] %v15278_v17  ;;  %19955 = vst [vmem:[#allocation114_spill] sm:$0xff] %v15282_v10  ;;  %v19960_v51 = vrot.slane %v14825_v48, 7  ;;  %v19962_v2 = vmov %v19948_v20  ;;  %v19963_v13 = vrot.slane %v14784_v37, 1  ;;  %v515_v27 = vand.u32 15, %v395_v7  ;;  %v19971_v49 = vld [vmem:[#allocation24_spill] sm:$0xff]  ;;  %11289 = vmatpush3.bf16.msra.mxu1 %v13412_v43 }
 0x20a   : > { %19956 = vst [vmem:[#allocation115_spill] sm:$0xff] %v15286_v29  ;;  %19958 = vst [vmem:[#allocation117_spill] sm:$0xff] %v15292_v35  ;;  %v1382_v15 = vmul.f32 0.2, %v14946_v50  ;;  %v508_v22 = vand.u32 15, %v394_v31  ;;  %v1504_v11 = vrot.slane %v19970_v28, 7  ;;  %9847 = vmatmul.mubr.msk.bf16.gmra.mrb[44].mxu1 %vm15163_vm14, %v15292_v35  ;;  %11498 = vmatprep.subr.bf16.mxu1 %v13423_v30 }
 0x20b   : > { %v1584_v25 = vsel %vm19961_vm5, %v19960_v51, %v19959_v33  ;;  %vm19964_vm10 = vmmov %vm19941_vm11  ;;  %v1511_v16 = vrot.slane %v15190_v0, 7  ;;  %v1764_v7 = vrot.slane %v14904_v21, 1  ;;  %vm19972_vm5 = vcmp.ge.f32.partialorder %v14908_v32, 0.0  ;;  %v13398_v30 = vld [vmem:[#allocation6 + $0x10] sm:$0xff]  }
 0x20c   : > { %v1843_v59 = vsel %vm19964_vm10, %v19963_v13, %v19962_v2  ;;  %vm15309_vm11 = vmpackc.low %vm15244_vm6, %vm19869_vm2  ;;  %v15314_v55 = vpack.c.bf16 %v1582_v41, %v1584_v25  ;;  %vm1318_vm6 = vcmp.ge.f32.partialorder %v14946_v50, 0.0  ;;  %v15332_v39 = vsel %vm19972_vm5, %v14908_v32, %v1380_v5  ;;  %v19973_v41 = vld [vmem:[#allocation91_spill] sm:$0xff] }
 0x20d   : > { %v19966_v4 = vsel %vm15309_vm11, 4294967295, %v19965_v4  ;;  %v15316_v58 = vpack.c.bf16 %v1841_v18, %v1843_v59  ;;  %v1509_v31 = vrot.slane %v19971_v49, 7  ;;  %v1385_v53 = vmul.f32 0.2, %v15205_v60  ;;  %v20081_v17 = vld [vmem:[#allocation27_spill] sm:$0xff] }
 0x20e   : > { %19967 = vst [vmem:[#allocation118_spill] sm:$0xff] %v19966_v4  ;;  %19968 = vst [vmem:[#allocation119_spill] sm:$0xff] %v15314_v55  ;;  %9760 = vmatprep.mubr.msk.bf16.mxu0 %vm15272_vm4, %v15314_v55  ;;  %vm1321_vm10 = vcmp.ge.f32.partialorder %v15205_v60, 0.0  ;;  %v19974_v18 = vrot.slane %v19973_v41, 7  ;;  %vm19975_vm14 = vcmp.lt.s32.totalorder %v13979_v44, 1  ;;  %vm15347_vm5 = vcmp.ne.s32.totalorder %v515_v27, 0 }
 0x20f   : > { %19969 = vst [vmem:[#allocation120_spill] sm:$0xff] %v15316_v58  ;;  %9850 = vmatprep.mubr.msk.bf16.mxu1 %vm15309_vm11, %v15316_v58  ;;  %v397_v33 = vadd.s32 128, %v13979_v44  ;;  %v15353_v51 = vsel %vm1318_vm6, %v14946_v50, %v1382_v15  ;;  %v19978_v25 = vrot.slane %v19970_v28, 1  ;;  %v19979_v2 = vrot.slane %v14817_v19, 1  ;;  %v19981_v27 = vld [vmem:[#allocation14_spill] sm:$0xff]  ;;  %vm19984_vm6 = vmmov %vm19975_vm14 }
 0x210   : > { %v1581_v32 = vsel %vm19975_vm14, %v1504_v11, %v19974_v18  ;;  %vm19980_vm1 = vcmp.lt.s32.totalorder %v13979_v44, 7  ;;  %vm842_vm9 = vcmp.ne.s32.totalorder %v508_v22, 15  ;;  %v396_v59 = vadd.s32 120, %v13979_v44  ;;  %v19982_v18 = vld [vmem:[#allocation29_spill] sm:$0xff] }
 0x211   : > { %v1840_v13 = vsel %vm19980_vm1, %v19979_v2, %v19978_v25  ;;  %v1210_v20 = vadd.f32 %v19982_v18, %v19981_v27  ;;  %v19983_v58 = vrot.slane %v14817_v19, 7  ;;  %v1578_v50 = vsel %vm19984_vm6, %v1509_v31, %v1511_v16  ;;  %vm19986_vm0 = vmmov %vm19980_vm1 }
 0x212   : > { %v19985_v15 = vrot.slane %v19971_v49, 1  ;;  %v1765_v22 = vrot.slane %v15332_v39, 1  ;;  %v15376_v25 = vsel %vm1321_vm10, %v15205_v60, %v1385_v53  ;;  %v19988_v27 = vrot.slane %v14817_v19, 1  ;;  %vm19990_vm1 = vmmov %vm19986_vm0 }
 0x213   : > { %v1583_v43 = vsel %vm19975_vm14, %v19983_v58, %v1504_v11  ;;  %v19989_v18 = vrot.slane %v14781_v38, 1  ;;  %vm15389_vm14 = vmpackc.low %vm19869_vm2, %vm15347_vm5  ;;  %v19991_v11 = vmov 0  ;;  %v19995_v60 = vrot.slane %v14904_v21, 7 }
 0x214   : > { %v1837_v35 = vsel %vm19986_vm0, %v1764_v7, %v19985_v15  ;;  %v15378_v2 = vpack.c.bf16 %v1581_v32, %v1583_v43  ;;  %v19992_v11 = vsel %vm15389_vm14, 4294967295, %v19991_v11  ;;  %vm19996_vm0 = vmmov %vm19984_vm6  ;;  %v19997_v32 = vrot.slane %v14868_v42, 1 }
 0x215   : > { %v1842_v58 = vsel %vm19990_vm1, %v19989_v18, %v19988_v27  ;;  %19993 = vst [vmem:[#allocation24_spill] sm:$0xff] %v19992_v11  ;;  %v1580_v53 = vsel %vm19996_vm0, %v19995_v60, %v1509_v31  ;;  %vm19998_vm10 = vmmov %vm19990_vm1  ;;  %v19999_v5 = vmov 0  ;;  %v529_v27 = vand.u32 15, %v397_v33 }
 0x216   : > { %19987 = vst [vmem:[#allocation90_spill] sm:$0xff] %v15378_v2  ;;  %v15393_v15 = vpack.c.bf16 %v1840_v13, %v1842_v58  ;;  %v1839_v43 = vsel %vm19998_vm10, %v19997_v32, %v1764_v7  ;;  %vm15404_vm6 = vmpackc.low %vm842_vm9, %vm19869_vm2  ;;  %v1510_v18 = vrot.slane %v15353_v51, 7  ;;  %v15409_v13 = vpack.c.bf16 %v1578_v50, %v1580_v53  ;;  %9763 = vmatmul.mubr.msk.bf16.gmra.mrb[88].mxu0 %vm15272_vm4, %v15378_v2 }
 0x217   : > { %v20000_v5 = vsel %vm15404_vm6, 4294967295, %v19999_v5  ;;  %v15411_v58 = vpack.c.bf16 %v1837_v35, %v1839_v43  ;;  %v522_v52 = vand.u32 15, %v396_v59  ;;  %v1384_v1 = vmul.f32 0.2, %v1210_v20  ;;  %vm20004_vm1 = vmmov %vm19996_vm0  ;;  %v20006_v43 = vld [vmem:[#allocation40_spill] sm:$0xff] }
 0x218   : > { %19994 = vst [vmem:[#allocation91_spill] sm:$0xff] %v15393_v15  ;;  %20001 = vst [vmem:[#allocation14_spill] sm:$0xff] %v20000_v5  ;;  %v1770_v31 = vrot.slane %v15376_v25, 1  ;;  %9853 = vmatmul.mubr.msk.bf16.gmra.mrb[48].mxu1 %vm15309_vm11, %v15393_v15  ;;  %v1763_v7 = vrot.slane %v19973_v41, 1  ;;  %v1508_v33 = vrot.slane %v15332_v39, 7  ;;  %vm1320_vm9 = vcmp.ge.f32.partialorder %v1210_v20, 0.0  ;;  %9766 = vmatprep.mubr.msk.bf16.mxu0 %vm15389_vm14, %v15409_v13 }
 0x219   : > { %20002 = vst [vmem:[#allocation29_spill] sm:$0xff] %v15409_v13  ;;  %20003 = vst [vmem:[#allocation121_spill] sm:$0xff] %v15411_v58  ;;  %9856 = vmatprep.mubr.msk.bf16.mxu1 %vm15404_vm6, %v15411_v58  ;;  %v1768_v35 = vrot.slane %v15190_v0, 1  ;;  %v1513_v59 = vrot.slane %v15376_v25, 7  ;;  %vm813_vm5 = vcmp.ne.s32.totalorder %v529_v27, 0  ;;  %v398_v53 = vadd.s32 136, %v13979_v44 }
 0x21a   : > { %v1577_v50 = vsel %vm20004_vm1, %v1508_v33, %v1510_v18  ;;  %vm20005_vm0 = vmmov %vm19998_vm10  ;;  %vm844_vm10 = vcmp.ne.s32.totalorder %v522_v52, 15  ;;  %v15435_v32 = vsel %vm1320_vm9, %v1210_v20, %v1384_v1  ;;  %v20007_v15 = vrot.slane %v20006_v43, 7 }
 0x21b   : > { %v1836_v60 = vsel %vm20005_vm0, %v1763_v7, %v1765_v22  ;;  %vm20008_vm11 = vmmov %vm20004_vm1  ;;  %v20010_v27 = vrot.slane %v19973_v41, 7  ;;  %v20011_v6 = vrot.slane %v19970_v28, 1  ;;  %v20012_v1 = vmov 0 }
 0x21c   : > { %v1574_v58 = vsel %vm20008_vm11, %v1513_v59, %v20007_v15  ;;  %vm20009_vm4 = vmmov %vm20005_vm0  ;;  %v20018_v2 = vrot.slane %v19971_v49, 1  ;;  %v1781_v29 = vrot.slane %v20071_v54, 1 }
 0x21d   : > { %v1833_v4 = vsel %vm20009_vm4, %v1768_v35, %v1770_v31  ;;  %v1579_v57 = vsel %vm20004_vm1, %v20010_v27, %v1508_v33  ;;  %v1838_v52 = vsel %vm20005_vm0, %v20011_v6, %v1763_v7  ;;  %vm15452_vm9 = vmpackc.low %vm19869_vm2, %vm813_vm5  ;;  %v20020_v6 = vmov 0 }
 0x21e   : > { %v20013_v1 = vsel %vm15452_vm9, 4294967295, %v20012_v1  ;;  %v15456_v20 = vpack.c.bf16 %v1577_v50, %v1579_v57  ;;  %v15458_v15 = vpack.c.bf16 %v1836_v60, %v1838_v52  ;;  %vm20017_vm4 = vmmov %vm20004_vm1  ;;  %v1769_v7 = vrot.slane %v15435_v32, 1  ;;  %v20025_v60 = vld [vmem:[#allocation42_spill] sm:$0xff] }
 0x21f   : > { %20014 = vst [vmem:[#allocation40_spill] sm:$0xff] %v20013_v1  ;;  %v1576_v13 = vsel %vm20017_vm4, %v1511_v16, %v1513_v59  ;;  %vm20019_vm11 = vmmov %vm20005_vm0  ;;  %v536_v50 = vand.u32 15, %v398_v53  ;;  %v1774_v52 = vrot.slane %v20025_v60, 1  ;;  %v1767_v16 = vrot.slane %v15353_v51, 1 }
 0x220   : > { %20015 = vst [vmem:[#allocation122_spill] sm:$0xff] %v15456_v20  ;;  %20016 = vst [vmem:[#allocation123_spill] sm:$0xff] %v15458_v15  ;;  %v1835_v33 = vsel %vm20019_vm11, %v20018_v2, %v1768_v35  ;;  %v15472_v27 = vpack.c.bf16 %v1574_v58, %v1576_v13  ;;  %9769 = vmatmul.mubr.msk.bf16.gmra.mrb[92].mxu0 %vm15389_vm14, %v15456_v20  ;;  %9859 = vmatmul.mubr.msk.bf16.gmra.mrb[52].mxu1 %vm15404_vm6, %v15458_v15  ;;  %v1512_v2 = vrot.slane %v15435_v32, 7  ;;  %v20026_v13 = vld [vmem:[#allocation39_spill] sm:$0xff]  ;;  %v20039_v20 = vld [vmem:[#allocation41_spill] sm:$0xff] }
 0x221   : > { %vm15467_vm1 = vmpackc.low %vm844_vm10, %vm19869_vm2  ;;  %v15474_v57 = vpack.c.bf16 %v1833_v4, %v1835_v33  ;;  %v1772_v4 = vrot.slane %v20006_v43, 1  ;;  %v20027_v58 = vrot.slane %v20026_v13, 7  ;;  %v400_v33 = vadd.s32 152, %v13979_v44 }
 0x222   : > { %v20021_v6 = vsel %vm15467_vm1, 4294967295, %v20020_v6  ;;  %20023 = vst [vmem:[#allocation125_spill] sm:$0xff] %v15472_v27  ;;  %9772 = vmatprep.mubr.msk.bf16.mxu0 %vm15452_vm9, %v15472_v27  ;;  %vm20028_vm5 = vmmov %vm20017_vm4  ;;  %v1773_v11 = vrot.slane %v20039_v20, 1 }
 0x223   : > { %20022 = vst [vmem:[#allocation124_spill] sm:$0xff] %v20021_v6  ;;  %20024 = vst [vmem:[#allocation126_spill] sm:$0xff] %v15474_v57  ;;  %9862 = vmatprep.mubr.msk.bf16.mxu1 %vm15467_vm1, %v15474_v57  ;;  %v1573_v35 = vsel %vm20028_vm5, %v1512_v2, %v20027_v58  ;;  %v20048_v6 = vld [vmem:[#allocation23_spill] sm:$0xff] }
 0x224   : > { %vm20029_vm10 = vmmov %vm20005_vm0  ;;  %vm846_vm0 = vcmp.ne.s32.totalorder %v536_v50, 15  ;;  %v20036_v50 = vmov 0 }
 0x225   : > { %v1832_v59 = vsel %vm20029_vm10, %v1767_v16, %v1769_v7  ;;  %vm20030_vm4 = vmmov %vm20029_vm10 }
 0x226   : > { %v1829_v53 = vsel %vm20030_vm4, %v1772_v4, %v1774_v52  ;;  %vm20031_vm11 = vmmov %vm20028_vm5 }
 0x227   : > { %v1575_v15 = vsel %vm20031_vm11, %v1510_v18, %v1512_v2  ;;  %vm20032_vm6 = vmmov %vm20030_vm4  ;;  %v15519_v18 = vpack.c.bf16 %v20040_v62, %v14078_v46  ;;  %v20043_v46 = vld [vmem:[#allocation44_spill] sm:$0xff] }
 0x228   : > { %v1834_v57 = vsel %vm20032_vm6, %v1765_v22, %v1767_v16  ;;  %v15505_v5 = vpack.c.bf16 %v1573_v35, %v1575_v15  ;;  %vm20035_vm5 = vmmov %vm20030_vm4  ;;  %v550_v22 = vand.u32 15, %v400_v33  ;;  %v20042_v15 = vld [vmem:[#allocation48_spill] sm:$0xff]  ;;  %v1776_v62 = vrot.slane %v20043_v46, 1 }
 0x229   : > { %v15507_v27 = vpack.c.bf16 %v1832_v59, %v1834_v57  ;;  %v1831_v58 = vsel %vm20035_vm5, %v1770_v31, %v1772_v4  ;;  %vm15512_vm10 = vmpackc.low %vm846_vm0, %vm19869_vm2  ;;  %v1771_v31 = vrot.slane %v20026_v13, 1  ;;  %v1778_v57 = vrot.slane %v20042_v15, 1  ;;  %v13390_v59 = vld [vmem:[#allocation6] sm:$0xff]  }
 0x22a   : > { %20033 = vst [vmem:[#allocation42_spill] sm:$0xff] %v15505_v5  ;;  %v20037_v50 = vsel %vm15512_vm10, 4294967295, %v20036_v50  ;;  %v15521_v2 = vpack.c.bf16 %v1829_v53, %v1831_v58  ;;  %9775 = vmatmul.mubr.msk.bf16.gmra.mrb[96].mxu0 %vm15452_vm9, %v15505_v5  ;;  %vm20044_vm6 = vmmov %vm20030_vm4  ;;  %v402_v4 = vadd.s32 168, %v13979_v44  ;;  %vm848_vm0 = vcmp.ne.s32.totalorder %v550_v22, 15  ;;  %v13393_v58 = vld [vmem:[#allocation6 + $0x48] sm:$0xff]   ;;  %v20049_v5 = vld [vmem:[#allocation20_spill] sm:$0xff] }
 0x22b   : > { %20034 = vst [vmem:[#allocation39_spill] sm:$0xff] %v15507_v27  ;;  %20038 = vst [vmem:[#allocation127_spill] sm:$0xff] %v20037_v50  ;;  %9865 = vmatmul.mubr.msk.bf16.gmra.mrb[56].mxu1 %vm15467_vm1, %v15507_v27  ;;  %2962 = vmatprep.mubr.bf16.mxu0 %v15519_v18  ;;  %v1828_v16 = vsel %vm20044_vm6, %v1771_v31, %v1773_v11  ;;  %v1830_v35 = vsel %vm20030_vm4, %v1769_v7, %v1771_v31  ;;  %v20047_v27 = vld [vmem:[#allocation46_spill] sm:$0xff]  ;;  %v20052_v22 = vmov 0  ;;  %v20055_v31 = vld [vmem:[#allocation56_spill] sm:$0xff] }
 0x22c   : > { %20041 = vst [vmem:[#allocation41_spill] sm:$0xff] %v15521_v2  ;;  %9868 = vmatprep.mubr.msk.bf16.mxu1 %vm15512_vm10, %v15521_v2  ;;  %vm20045_vm11 = vmmov %vm20030_vm4  ;;  %v15543_v33 = vpack.c.bf16 %v1828_v16, %v1830_v35  ;;  %v1777_v2 = vrot.slane %v20047_v27, 1  ;;  %v15548_v1 = vpack.c.bf16 %v20049_v5, %v20048_v6  ;;  %v564_v7 = vand.u32 15, %v402_v4  ;;  %v20056_v16 = vld [vmem:[#allocation15_spill] sm:$0xff] }
 0x22d   : > { %v1825_v53 = vsel %vm20045_vm11, %v1776_v62, %v1778_v57  ;;  %vm20051_vm5 = vmmov %vm20030_vm4  ;;  %v1782_v24 = vrot.slane %v20055_v31, 1  ;;  %v20058_v5 = vld [vmem:[#allocation43_spill] sm:$0xff] }
 0x22e   : > { %20046 = vst [vmem:[#allocation18_spill] sm:$0xff] %v15543_v33  ;;  %20050 = vst [vmem:[#allocation48_spill] sm:$0xff] %v15548_v1  ;;  %v1827_v55 = vsel %vm20051_vm5, %v1774_v52, %v1776_v62  ;;  %v1775_v6 = vrot.slane %v20058_v5, 1  ;;  %v13394_v52 = vld [vmem:[#allocation6 + $0x8] sm:$0xff]   ;;  %v20059_v62 = vld [vmem:[#allocation52_spill] sm:$0xff] }
 0x22f   : > { %vm15553_vm6 = vmpackc.low %vm848_vm0, %vm19869_vm2  ;;  %v15562_v35 = vpack.c.bf16 %v1825_v53, %v1827_v55  ;;  %v1780_v45 = vrot.slane %v20059_v62, 1  ;;  %v13397_v4 = vld [vmem:[#allocation6 + $0x50] sm:$0xff]   ;;  %v404_v55 = vadd.s32 184, %v13979_v44 }
 0x230   : > { %v20053_v22 = vsel %vm15553_vm6, 4294967295, %v20052_v22  ;;  %vm20060_vm0 = vmmov %vm20030_vm4  ;;  %vm850_vm4 = vcmp.ne.s32.totalorder %v564_v7, 15  ;;  %v20063_v50 = vld [vmem:[#allocation19_spill] sm:$0xff]  ;;  %v20068_v7 = vmov 0 }
 0x231   : > { %20054 = vst [vmem:[#allocation44_spill] sm:$0xff] %v20053_v22  ;;  %20057 = vst [vmem:[#allocation46_spill] sm:$0xff] %v15562_v35 }
 0x232   : > { %2963 = vmatmul.mubr.bf16.vlgmr.msra.gmra.mrb[100].mxu0 %v20056_v16  ;;  %vm20061_vm11 = vmmov %vm20060_vm0 }
 0x233   : > { %9871 = vmatmul.mubr.msk.bf16.gmra.mrb[60].mxu1 %vm15512_vm10, %v15543_v33  ;;  %11163 = vmatpush3.bf16.msra.mxu0 %v13390_v59  ;;  %v1824_v33 = vsel %vm20060_vm0, %v1775_v6, %v1777_v2  ;;  %v1821_v59 = vsel %vm20061_vm11, %v1780_v45, %v1782_v24  ;;  %vm20062_vm5 = vmmov %vm20060_vm0 }
 0x234   : > { %2970 = vmatprep.mubr.bf16.mxu0 %v15548_v1  ;;  %9874 = vmatprep.mubr.msk.bf16.mxu1 %vm15553_vm6, %v15562_v35  ;;  %v1826_v53 = vsel %vm20062_vm5, %v1773_v11, %v1775_v6  ;;  %v15579_v35 = vpack.c.bf16 %v20064_v34, %v20063_v50  ;;  %vm20067_vm10 = vmmov %vm20060_vm0  ;;  %v20072_v11 = vld [vmem:[#allocation30_spill] sm:$0xff]  ;;  %v578_v50 = vand.u32 15, %v404_v55  ;;  %v13404_v55 = vld [vmem:[#allocation6 + $0x18] sm:$0xff]  }
 0x235   : > { %11164 = vmatprep.subr.bf16.mxu0 %v13393_v58  ;;  %v15581_v58 = vpack.c.bf16 %v1824_v33, %v1826_v53  ;;  %v1823_v56 = vsel %vm20067_vm10, %v1778_v57, %v1780_v45  ;;  %vm15586_vm0 = vmpackc.low %vm850_vm4, %vm19869_vm2  ;;  %v20073_v6 = vld [vmem:[#allocation34_spill] sm:$0xff]  ;;  %v13403_v33 = vld [vmem:[#allocation6 + $0x58] sm:$0xff]  }
 0x236   : > { %20065 = vst [vmem:[#allocation23_spill] sm:$0xff] %v15579_v35  ;;  %v20069_v7 = vsel %vm15586_vm0, 4294967295, %v20068_v7  ;;  %v15595_v34 = vpack.c.bf16 %v1821_v59, %v1823_v56  ;;  %v20076_v53 = vld [vmem:[#allocation65_spill] sm:$0xff]  ;;  %v20077_v45 = vld [vmem:[#allocation50_spill] sm:$0xff]  ;;  %vm20079_vm10 = vmmov %vm20062_vm5  ;;  %vm852_vm4 = vcmp.ne.s32.totalorder %v578_v50, 15  ;;  %v20086_v50 = vmov 0 }
 0x237   : > { %11165 = vmatpush3.bf16.msra.mxu0 %v13394_v52  ;;  %20066 = vst [vmem:[#allocation20_spill] sm:$0xff] %v15581_v58  ;;  %20070 = vst [vmem:[#allocation56_spill] sm:$0xff] %v20069_v7  ;;  %v15593_v52 = vpack.c.bf16 %v20073_v6, %v20072_v11  ;;  %v1786_v10 = vrot.slane %v20076_v53, 1  ;;  %v1779_v57 = vrot.slane %v20077_v45, 1  ;;  %v20078_v56 = vld [vmem:[#allocation61_spill] sm:$0xff]  ;;  %v406_v11 = vadd.s32 200, %v13979_v44 }
 0x238   : > { %11166 = vmatprep.subr.bf16.mxu0 %v13397_v4  ;;  %20075 = vst [vmem:[#allocation43_spill] sm:$0xff] %v15595_v34  ;;  %v1784_v4 = vrot.slane %v20078_v56, 1  ;;  %v13413_v6 = vld [vmem:[#allocation6 + $0x60] sm:$0xff]   ;;  %vm20080_vm11 = vmmov %vm20062_vm5  ;;  %v20089_v53 = vld [vmem:[#allocation63_spill] sm:$0xff] }
 0x239   : > { %20074 = vst [vmem:[#allocation15_spill] sm:$0xff] %v15593_v52  ;;  %v1820_v59 = vsel %vm20079_vm10, %v1779_v57, %v1781_v29  ;;  %v1822_v22 = vsel %vm20062_vm5, %v1777_v2, %v1779_v57  ;;  %vm15624_vm10 = vmpackc.low %vm852_vm4, %vm19869_vm2  ;;  %v1785_v54 = vrot.slane %v20089_v53, 1  ;;  %v20091_v2 = vld [vmem:[#allocation60_spill] sm:$0xff]  ;;  %v20100_v7 = vld [vmem:[#allocation51_spill] sm:$0xff] }
 0x23a   : > { %2971 = vmatmul.mubr.bf16.gmra.mrb[104].mxu0 %v15579_v35  ;;  %v20087_v50 = vsel %vm15624_vm10, 4294967295, %v20086_v50 }
 0x23b   : > { %9877 = vmatmul.mubr.msk.bf16.gmra.mrb[64].mxu1 %vm15553_vm6, %v15581_v58  ;;  %2978 = vmatprep.mubr.bf16.mxu0 %v15593_v52  ;;  %v1817_v58 = vsel %vm20080_vm11, %v1784_v4, %v1786_v10  ;;  %vm20085_vm6 = vmmov %vm20062_vm5  ;;  %20088 = vst [vmem:[#allocation26_spill] sm:$0xff] %v20087_v50  ;;  %v20090_v52 = vld [vmem:[#allocation38_spill] sm:$0xff] }
 0x23c   : > { %9880 = vmatprep.mubr.msk.bf16.mxu1 %vm15586_vm0, %v15595_v34  ;;  %11167 = vmatpush3.bf16.msra.mxu0 %v13398_v30  ;;  %v20082_v34 = vld [vmem:[#allocation32_spill] sm:$0xff]  ;;  %v15619_v30 = vpack.c.bf16 %v1820_v59, %v1822_v22  ;;  %v1819_v26 = vsel %vm20085_vm6, %v1782_v24, %v1784_v4  ;;  %v15631_v57 = vpack.c.bf16 %v20091_v2, %v20090_v52  ;;  %v592_v22 = vand.u32 15, %v406_v11  ;;  %v20094_v24 = vld [vmem:[#allocation58_spill] sm:$0xff]  ;;  %vm20096_vm6 = vmmov %vm20062_vm5 }
 0x23d   : > { %11168 = vmatprep.subr.bf16.mxu0 %v13403_v33  ;;  %v15617_v9 = vpack.c.bf16 %v20082_v34, %v20081_v17  ;;  %v13414_v33 = vld [vmem:[#allocation6 + $0x20] sm:$0xff]   ;;  %v15633_v17 = vpack.c.bf16 %v1817_v58, %v1819_v26  ;;  %v13415_v34 = vld [vmem:[#allocation6 + $0x68] sm:$0xff]   ;;  %v1783_v4 = vrot.slane %v20094_v24, 1  ;;  %v20095_v52 = vld [vmem:[#allocation68_spill] sm:$0xff]  ;;  %v408_v59 = vadd.s32 216, %v13979_v44 }
 0x23e   : > { %20084 = vst [vmem:[#allocation19_spill] sm:$0xff] %v15619_v30  ;;  %20092 = vst [vmem:[#allocation30_spill] sm:$0xff] %v15631_v57  ;;  %v1788_v26 = vrot.slane %v20095_v52, 1  ;;  %v13416_v58 = vld [vmem:[#allocation6 + $0x28] sm:$0xff]   ;;  %vm854_vm4 = vcmp.ne.s32.totalorder %v592_v22, 15  ;;  %v13417_v11 = vld [vmem:[#allocation6 + $0x70] sm:$0xff]  }
 0x23f   : > { %20083 = vst [vmem:[#allocation52_spill] sm:$0xff] %v15617_v9  ;;  %20093 = vst [vmem:[#allocation34_spill] sm:$0xff] %v15633_v17 }
 0x240   : > { %11169 = vmatpush3.bf16.msra.mxu0 %v13404_v55  ;;  %v1816_v55 = vsel %vm20096_vm6, %v1783_v4, %v1785_v54  ;;  %vm20098_vm11 = vmmov %vm20062_vm5 }
 0x241   : > { %11170 = vmatprep.subr.bf16.mxu0 %v13413_v6  ;;  %v20097_v6 = vrot.slane %v14500_v36, 1  ;;  %vm20103_vm6 = vmmov %vm20062_vm5  ;;  %v13418_v36 = vld [vmem:[#allocation6 + $0x30] sm:$0xff]  }
 0x242   : > { %2979 = vmatmul.mubr.bf16.gmra.mrb[108].mxu0 %v15617_v9  ;;  %v1815_v22 = vsel %vm20103_vm6, %v1786_v10, %v1788_v26  ;;  %v20109_v10 = vld [vmem:[#allocation67_spill] sm:$0xff] }
 0x243   : > { %9883 = vmatmul.mubr.msk.bf16.gmra.mrb[68].mxu1 %vm15586_vm0, %v15619_v30  ;;  %2986 = vmatprep.mubr.bf16.mxu0 %v15631_v57  ;;  %v1813_v2 = vsel %vm20098_vm11, %v1788_v26, %v20097_v6  ;;  %v20099_v30 = vld [vmem:[#allocation36_spill] sm:$0xff]  ;;  %vm15663_vm0 = vmpackc.low %vm854_vm4, %vm19869_vm2  ;;  %v15669_v6 = vpack.c.bf16 %v14680_v23, %v14585_v8  ;;  %v20110_v23 = vrot.slane %v14495_v63, 1  ;;  %v410_v26 = vadd.s32 232, %v13979_v44 }
 0x244   : > { %9886 = vmatprep.mubr.msk.bf16.mxu1 %vm15624_vm10, %v15633_v17  ;;  %11171 = vmatpush3.bf16.msra.mxu0 %v13414_v33  ;;  %v1818_v17 = vsel %vm20062_vm5, %v1781_v29, %v1783_v4  ;;  %v15656_v33 = vpack.c.bf16 %v20100_v7, %v20099_v30  ;;  %v15671_v29 = vpack.c.bf16 %v1813_v2, %v1815_v22  ;;  %v606_v7 = vand.u32 15, %v408_v59  ;;  %v13419_v30 = vld [vmem:[#allocation6 + $0x78] sm:$0xff]   ;;  %vm20111_vm4 = vmmov %vm20062_vm5 }
 0x245   : > { %11172 = vmatprep.subr.bf16.mxu0 %v13415_v34  ;;  %v15658_v53 = vpack.c.bf16 %v1816_v55, %v1818_v17  ;;  %v20104_v34 = vmov 0  ;;  %20107 = vst [vmem:[#allocation32_spill] sm:$0xff] %v15669_v6  ;;  %v1787_v17 = vrot.slane %v20109_v10, 1  ;;  %v13420_v8 = vld [vmem:[#allocation6 + $0x38] sm:$0xff]   ;;  %vm20112_vm5 = vmmov %vm20111_vm4  ;;  %v15691_v59 = vpack.c.bf16 %v14671_v61, %v14517_v3  ;;  %v20119_v3 = vld [vmem:[#allocation75_spill] sm:$0xff] }
 0x246   : > { %20101 = vst [vmem:[#allocation50_spill] sm:$0xff] %v15656_v33  ;;  %v20105_v34 = vsel %vm15663_vm0, 4294967295, %v20104_v34  ;;  %20108 = vst [vmem:[#allocation38_spill] sm:$0xff] %v15671_v29  ;;  %vm856_vm11 = vcmp.ne.s32.totalorder %v606_v7, 15  ;;  %v20115_v63 = vmov 0  ;;  %v15702_v2 = vpack.c.bf16 %v14825_v48, %v14784_v37  ;;  %v20125_v7 = vld [vmem:[#allocation101_spill] sm:$0xff] }
 0x247   : > { %20102 = vst [vmem:[#allocation61_spill] sm:$0xff] %v15658_v53  ;;  %20106 = vst [vmem:[#allocation27_spill] sm:$0xff] %v20105_v34  ;;  %v1812_v4 = vsel %vm20111_vm4, %v1787_v17, %v20110_v23  ;;  %v1814_v55 = vsel %vm20112_vm5, %v1785_v54, %v1787_v17  ;;  %v620_v22 = vand.u32 15, %v410_v26  ;;  %v412_v61 = vadd.s32 248, %v13979_v44  ;;  %v13440_v17 = vld [vmem:[#allocation6 + $0x328] sm:$0xff]   ;;  %v13444_v26 = vld [vmem:[#allocation6 + $0x338] sm:$0xff]  }
 0x248   : > { %11173 = vmatpush3.bf16.msra.mxu0 %v13416_v58  ;;  %v13421_v58 = vld [vmem:[#allocation6 + $0x140] sm:$0xff]   ;;  %20113 = vst [vmem:[#allocation60_spill] sm:$0xff] %v15691_v59  ;;  %vm15696_vm6 = vmpackc.low %vm856_vm11, %vm19869_vm2  ;;  %v15715_v37 = vpack.c.bf16 %v14817_v19, %v14781_v38  ;;  %v20121_v48 = vmov 0  ;;  %v15724_v54 = vpack.c.bf16 %v14904_v21, %v14868_v42  ;;  %v15736_v38 = vpack.c.bf16 %v19973_v41, %v19970_v28  ;;  %v13426_v44 = vld [vmem:[#allocation6 + $0x108] sm:$0xff]  }
 0x249   : > { %11174 = vmatprep.subr.bf16.mxu0 %v13417_v11  ;;  %v15693_v11 = vpack.c.bf16 %v1812_v4, %v1814_v55  ;;  %v20116_v63 = vsel %vm15696_vm6, 4294967295, %v20115_v63  ;;  %20118 = vst [vmem:[#allocation36_spill] sm:$0xff] %v15702_v2  ;;  %vm858_vm4 = vcmp.ne.s32.totalorder %v620_v22, 15  ;;  %v20127_v21 = vmov 0  ;;  %v13443_v4 = vld [vmem:[#allocation6 + $0x378] sm:$0xff]  }
 0x24a   : > { %2987 = vmatmul.mubr.bf16.gmra.mrb[112].mxu0 %v15656_v33  ;;  %20117 = vst [vmem:[#allocation68_spill] sm:$0xff] %v20116_v63  ;;  %20120 = vst [vmem:[#allocation51_spill] sm:$0xff] %v15715_v37  ;;  %v15745_v19 = vpack.c.bf16 %v15190_v0, %v19971_v49  ;;  %v15757_v42 = vpack.c.bf16 %v15353_v51, %v15332_v39  ;;  %v15761_v0 = vpack.c.bf16 %v20006_v43, %v15376_v25  ;;  %v20133_v28 = vmov 0   ;;  %v13424_v39 = vld [vmem:[#allocation6 + $0x300] sm:$0xff]   ;;  %v13427_v51 = vld [vmem:[#allocation6 + $0x348] sm:$0xff]  }
 0x24b   : > { %9889 = vmatmul.mubr.msk.bf16.gmra.mrb[72].mxu1 %vm15624_vm10, %v15658_v53  ;;  %2994 = vmatprep.mubr.bf16.mxu0 %v15669_v6  ;;  %20114 = vst [vmem:[#allocation58_spill] sm:$0xff] %v15693_v11  ;;  %vm15718_vm11 = vmpackc.low %vm858_vm4, %vm19869_vm2  ;;  %v15771_v49 = vpack.c.bf16 %v20026_v13, %v15435_v32  ;;  %v15775_v41 = vpack.c.bf16 %v20043_v46, %v20025_v60  ;;  %v13428_v25 = vld [vmem:[#allocation6 + $0x308] sm:$0xff]   ;;  %v13431_v43 = vld [vmem:[#allocation6 + $0x350] sm:$0xff]  }
 0x24c   : > { %9892 = vmatprep.mubr.msk.bf16.mxu1 %vm15663_vm0, %v15671_v29  ;;  %11175 = vmatpush3.bf16.msra.mxu0 %v13418_v36  ;;  %v20122_v48 = vsel %vm15718_vm11, 4294967295, %v20121_v48  ;;  %20124 = vst [vmem:[#allocation128_spill] sm:$0xff] %v15724_v54  ;;  %v634_v36 = vand.u32 15, %v412_v61  ;;  %20126 = vst [vmem:[#allocation129_spill] sm:$0xff] %v15736_v38  ;;  %v15783_v32 = vpack.c.bf16 %v20058_v5, %v20039_v20  ;;  %v13432_v60 = vld [vmem:[#allocation6 + $0x310] sm:$0xff]   ;;  %v13433_v46 = vld [vmem:[#allocation6 + $0x358] sm:$0xff]  }
 0x24d   : > { %11176 = vmatprep.subr.bf16.mxu0 %v13419_v30  ;;  %20123 = vst [vmem:[#allocation67_spill] sm:$0xff] %v20122_v48  ;;  %20130 = vst [vmem:[#allocation131_spill] sm:$0xff] %v15745_v19  ;;  %v15787_v13 = vpack.c.bf16 %v20059_v62, %v20042_v15  ;;  %v13437_v20 = vld [vmem:[#allocation6 + $0x360] sm:$0xff]   ;;  %v15795_v5 = vpack.c.bf16 %v20077_v45, %v20047_v27  ;;  %v15799_v62 = vpack.c.bf16 %v20078_v56, %v20055_v31  ;;  %v20140_v30 = vld [vmem:[#allocation15_spill] sm:$0xff] }
 0x24e   : > { %vm860_vm5 = vcmp.ne.s32.totalorder %v634_v36, 15  ;;  %20131 = vst [vmem:[#allocation132_spill] sm:$0xff] %v15757_v42  ;;  %20132 = vst [vmem:[#allocation133_spill] sm:$0xff] %v15761_v0  ;;  %v13438_v15 = vld [vmem:[#allocation6 + $0x320] sm:$0xff]   ;;  %v13441_v27 = vld [vmem:[#allocation6 + $0x370] sm:$0xff]  }
 0x24f   : > { %vm15739_vm4 = vmpackc.low %vm860_vm5, %vm19869_vm2  ;;  %20134 = vst [vmem:[#allocation134_spill] sm:$0xff] %v15771_v49  ;;  %v20141_v45 = vld [vmem:[#allocation54_spill] sm:$0xff]  ;;  %v13442_v31 = vld [vmem:[#allocation6 + $0x330] sm:$0xff]  }
 0x250   : > { %11177 = vmatpush3.bf16.msra.mxu0 %v13420_v8  ;;  %v20128_v21 = vsel %vm15739_vm4, 4294967295, %v20127_v21  ;;  %20135 = vst [vmem:[#allocation135_spill] sm:$0xff] %v15775_v41  ;;  %20136 = vst [vmem:[#allocation136_spill] sm:$0xff] %v15783_v32  ;;  %v15807_v8 = vpack.c.bf16 %v20094_v24, %v20141_v45  ;;  %v20143_v56 = vld [vmem:[#allocation65_spill] sm:$0xff]  ;;  %v20146_v61 = vld [vmem:[#allocation63_spill] sm:$0xff] }
 0x251   : > { %11386 = vmatprep.subr.bf16.mxu0 %v13421_v58  ;;  %20129 = vst [vmem:[#allocation130_spill] sm:$0xff] %v20128_v21  ;;  %20137 = vst [vmem:[#allocation137_spill] sm:$0xff] %v15787_v13  ;;  %v15811_v23 = vpack.c.bf16 %v20095_v52, %v20143_v56  ;;  %v15821_v36 = vpack.c.bf16 %v20109_v10, %v20146_v61  ;;  %v20152_v10 = vld [vmem:[#allocation111_spill] sm:$0xff]  ;;  %v13435_v21 = vld [vmem:[#allocation6 + $0x158] sm:$0xff]  }
 0x252   : > { %2995 = vmatmul.mubr.bf16.gmra.mrb[116].mxu0 %v15691_v59  ;;  %20138 = vst [vmem:[#allocation138_spill] sm:$0xff] %v15795_v5  ;;  %20139 = vst [vmem:[#allocation139_spill] sm:$0xff] %v15799_v62  ;;  %v20181_v48 = vld [vmem:[#allocation98_spill] sm:$0xff]  ;;  %v20186_v34 = vld [vmem:[#allocation112_spill] sm:$0xff] }
 0x253   : > { %9895 = vmatmul.mubr.msk.bf16.gmra.mrb[76].mxu1 %vm15663_vm0, %v15693_v11  ;;  %3002 = vmatprep.mubr.bf16.mxu0 %v15702_v2  ;;  %20142 = vst [vmem:[#allocation54_spill] sm:$0xff] %v15807_v8  ;;  %20144 = vst [vmem:[#allocation65_spill] sm:$0xff] %v15811_v23  ;;  %v20184_v11 = vld [vmem:[#allocation31_spill] sm:$0xff]  ;;  %vm20187_vm2 = vnez %v20186_v34 }
 0x254   : > { %9898 = vmatprep.mubr.msk.bf16.mxu1 %vm15696_vm6, %v20119_v3  ;;  %20147 = vst [vmem:[#allocation63_spill] sm:$0xff] %v15821_v36 }
 0x25a   : > { %3003 = vmatmul.mubr.bf16.gmra.mrb[120].mxu0 %v15715_v37 }
 0x25b   : > { %9901 = vmatmul.mubr.msk.bf16.gmra.mrb[80].mxu1 %vm15696_vm6, %v20125_v7  ;;  %3010 = vmatprep.mubr.bf16.mxu0 %v15724_v54 }
 0x25c   : > { %9904 = vmatprep.mubr.msk.bf16.mxu1 %vm15718_vm11, %v15173_v40 }
 0x262   : > { %3011 = vmatmul.mubr.bf16.gmra.mrb[124].mxu0 %v15736_v38 }
 0x263   : > { %9907 = vmatmul.mubr.msk.bf16.gmra.mrb[84].mxu1 %vm15718_vm11, %v15177_v12  ;;  %3018 = vmatprep.mubr.bf16.mxu0 %v15745_v19 }
 0x264   : > { %9910 = vmatprep.mubr.msk.bf16.mxu1 %vm15739_vm4, %v15198_v47 }
 0x26a   : > { %3019 = vmatmul.mubr.bf16.gmra.mrb[128].mxu0 %v15757_v42  ;;  %v10896_v24 = vpop.f32.mrb[0].mxu1 }
 0x26b   : > { %9913 = vmatmul.mubr.msk.bf16.gmra.mrb[88].mxu1 %vm15739_vm4, %v15230_v14  ;;  %3026 = vmatprep.mubr.bf16.mxu0 %v15761_v0  ;;  %v10897_v58 = vpop.f32.mrb[1].mxu1 }
 0x26c   : > { %3733 = vmatprep.mubr.bf16.mxu1 %v20133_v28  ;;  %v15817_v55 = vadd.f32 %v10897_v58, %v10896_v24  ;;  %v10899_v22 = vpop.f32.mrb[2].mxu1 }
 0x26d   : > { %v10900_v52 = vpop.f32.mrb[3].mxu1 }
 0x26e   : > { %20145 = vst [vmem:[#allocation140_spill] sm:$0xff] %v15817_v55 }
 0x272   : > { %3027 = vmatmul.mubr.bf16.gmra.mrb[132].mxu0 %v15771_v49 }
 0x273   : > { %3734 = vmatmul.mubr.bf16.vlgmr.msra.gmra.mrb[92].mxu1 %v20133_v28  ;;  %3034 = vmatprep.mubr.bf16.mxu0 %v15775_v41 }
 0x274   : > { %3741 = vmatprep.mubr.bf16.mxu1 %v15519_v18  ;;  %11499 = vmatpush3.bf16.msra.mxu1 %v13424_v39  ;;  %v13434_v18 = vld [vmem:[#allocation6 + $0x318] sm:$0xff]   ;;  %v15823_v39 = vadd.f32 %v10900_v52, %v10899_v22 }
 0x275   : > { %11500 = vmatprep.subr.bf16.mxu1 %v13427_v51  ;;  %v20149_v51 = vld [vmem:[#allocation110_spill] sm:$0xff] }
 0x276   : > { %20148 = vst [vmem:[#allocation141_spill] sm:$0xff] %v15823_v39 }
 0x278   : > { %11501 = vmatpush3.bf16.msra.mxu1 %v13428_v25  ;;  %v10902_v25 = vpop.f32.mrb[4].mxu1 }
 0x279   : > { %11502 = vmatprep.subr.bf16.mxu1 %v13431_v43  ;;  %v10903_v43 = vpop.f32.mrb[5].mxu1 }
 0x27a   : > { %3035 = vmatmul.mubr.bf16.gmra.mrb[136].mxu0 %v15783_v32 }
 0x27b   : > { %3742 = vmatmul.mubr.bf16.gmra.mrb[96].mxu1 %v20056_v16  ;;  %3042 = vmatprep.mubr.bf16.mxu0 %v15787_v13  ;;  %v13439_v16 = vld [vmem:[#allocation6 + $0x368] sm:$0xff]  }
 0x27c   : > { %3749 = vmatprep.mubr.bf16.mxu1 %v15548_v1  ;;  %11503 = vmatpush3.bf16.msra.mxu1 %v13432_v60  ;;  %v15829_v60 = vadd.f32 %v10903_v43, %v10902_v25  ;;  %v20160_v43 = vld [vmem:[#allocation116_spill] sm:$0xff] }
 0x27d   : > { %11504 = vmatprep.subr.bf16.mxu1 %v13433_v46  ;;  %v10905_v46 = vpop.f32.mrb[6].mxu1 }
 0x27e   : > { %20150 = vst [vmem:[#allocation142_spill] sm:$0xff] %v15829_v60  ;;  %v13464_v60 = vld [vmem:[#allocation6 + $0x410] sm:$0xff]  }
 0x280   : > { %11505 = vmatpush3.bf16.msra.mxu1 %v13434_v18  ;;  %v10906_v18 = vpop.f32.mrb[7].mxu1 }
 0x281   : > { %11506 = vmatprep.subr.bf16.mxu1 %v13437_v20  ;;  %v15831_v20 = vadd.f32 %v10906_v18, %v10905_v46 }
 0x282   : > { %3043 = vmatmul.mubr.bf16.gmra.mrb[140].mxu0 %v15795_v5 }
 0x283   : > { %3750 = vmatmul.mubr.bf16.gmra.mrb[100].mxu1 %v15579_v35  ;;  %3050 = vmatprep.mubr.bf16.mxu0 %v15799_v62  ;;  %20151 = vst [vmem:[#allocation143_spill] sm:$0xff] %v15831_v20 }
 0x284   : > { %3757 = vmatprep.mubr.bf16.mxu1 %v20140_v30  ;;  %11507 = vmatpush3.bf16.msra.mxu1 %v13438_v15  ;;  %v20153_v15 = vld [vmem:[#allocation113_spill] sm:$0xff] }
 0x285   : > { %11508 = vmatprep.subr.bf16.mxu1 %v13439_v16  ;;  %v10908_v16 = vpop.f32.mrb[8].mxu1 }
 0x288   : > { %11509 = vmatpush3.bf16.msra.mxu1 %v13440_v17  ;;  %v10909_v17 = vpop.f32.mrb[9].mxu1 }
 0x289   : > { %11510 = vmatprep.subr.bf16.mxu1 %v13441_v27  ;;  %v15837_v27 = vadd.f32 %v10909_v17, %v10908_v16  ;;  %v10911_v45 = vpop.f32.mrb[10].mxu1 }
 0x28a   : > { %3051 = vmatmul.mubr.bf16.gmra.mrb[144].mxu0 %v15807_v8 }
 0x28b   : > { %3758 = vmatmul.mubr.bf16.gmra.mrb[104].mxu1 %v15617_v9  ;;  %3058 = vmatprep.mubr.bf16.mxu0 %v15811_v23  ;;  %20154 = vst [vmem:[#allocation144_spill] sm:$0xff] %v15837_v27 }
 0x28c   : > { %3765 = vmatprep.mubr.bf16.mxu1 %v15631_v57  ;;  %11511 = vmatpush3.bf16.msra.mxu1 %v13442_v31  ;;  %v10912_v31 = vpop.f32.mrb[11].mxu1 }
 0x28d   : > { %11512 = vmatprep.subr.bf16.mxu1 %v13443_v4  ;;  %v15839_v56 = vadd.f32 %v10912_v31, %v10911_v45  ;;  %v20156_v4 = vld [vmem:[#allocation114_spill] sm:$0xff]  ;;  %v10914_v24 = vpop.f32.mrb[12].mxu1  ;;  %v13422_v45 = vld [vmem:[#allocation6 + $0x100] sm:$0xff]  }
 0x28e   : > { %v10915_v58 = vpop.f32.mrb[13].mxu1 }
 0x28f   : > { %20155 = vst [vmem:[#allocation145_spill] sm:$0xff] %v15839_v56  ;;  %v15845_v22 = vadd.f32 %v10915_v58, %v10914_v24  ;;  %v10917_v52 = vpop.f32.mrb[14].mxu1  ;;  %v13425_v24 = vld [vmem:[#allocation6 + $0x148] sm:$0xff]  }
 0x290   : > { %11513 = vmatpush3.bf16.msra.mxu1 %v13444_v26  ;;  %v20157_v26 = vld [vmem:[#allocation115_spill] sm:$0xff]  ;;  %v10918_v61 = vpop.f32.mrb[15].mxu1 }
 0x291   : > { %20158 = vst [vmem:[#allocation146_spill] sm:$0xff] %v15845_v22  ;;  %v15847_v25 = vadd.f32 %v10918_v61, %v10917_v52  ;;  %v10920_v46 = vpop.f32.mrb[16].mxu1  ;;  %v20163_v52 = vld [vmem:[#allocation83_spill] sm:$0xff]  ;;  %v20191_v22 = vld [vmem:[#allocation122_spill] sm:$0xff] }
 0x292   : > { %3059 = vmatmul.mubr.bf16.gmra.mrb[148].mxu0 %v15821_v36  ;;  %v10921_v18 = vpop.f32.mrb[17].mxu1 }
 0x293   : > { %3766 = vmatmul.mubr.bf16.gmra.mrb[108].mxu1 %v15656_v33  ;;  %3066 = vmatprep.mubr.bf16.mxu0 %v20149_v51  ;;  %20159 = vst [vmem:[#allocation147_spill] sm:$0xff] %v15847_v25  ;;  %v15853_v16 = vadd.f32 %v10921_v18, %v10920_v46  ;;  %v10923_v17 = vpop.f32.mrb[18].mxu1  ;;  %v13429_v46 = vld [vmem:[#allocation6 + $0x150] sm:$0xff]   ;;  %v13455_v18 = vld [vmem:[#allocation6 + $0x440] sm:$0xff]   ;;  %v13459_v25 = vld [vmem:[#allocation6 + $0x448] sm:$0xff]  }
 0x294   : > { %3773 = vmatprep.mubr.bf16.mxu1 %v15669_v6  ;;  %v10924_v31 = vpop.f32.mrb[19].mxu1  ;;  %11722 = vmatprep.subr.bf16.mxu1 %v13455_v18  ;;  %v13450_v6 = vld [vmem:[#allocation6 + $0x130] sm:$0xff]  }
 0x295   : > { %20161 = vst [vmem:[#allocation148_spill] sm:$0xff] %v15853_v16  ;;  %v15855_v58 = vadd.f32 %v10924_v31, %v10923_v17 }
 0x297   : > { %20162 = vst [vmem:[#allocation149_spill] sm:$0xff] %v15855_v58 }
 0x29a   : > { %3067 = vmatmul.mubr.bf16.gmra.mrb[152].mxu0 %v20152_v10 }
 0x29b   : > { %3774 = vmatmul.mubr.bf16.gmra.mrb[112].mxu1 %v15691_v59  ;;  %3074 = vmatprep.mubr.bf16.mxu0 %v20153_v15 }
 0x29c   : > { %3781 = vmatprep.mubr.bf16.mxu1 %v15702_v2 }
 0x2a2   : > { %3075 = vmatmul.mubr.bf16.gmra.mrb[156].mxu0 %v20156_v4 }
 0x2a3   : > { %3782 = vmatmul.mubr.bf16.gmra.mrb[116].mxu1 %v15715_v37  ;;  %3082 = vmatprep.mubr.bf16.mxu0 %v20157_v26 }
 0x2a4   : > { %3789 = vmatprep.mubr.bf16.mxu1 %v15724_v54 }
 0x2aa   : > { %3083 = vmatmul.mubr.bf16.gmra.mrb[160].mxu0 %v20160_v43  ;;  %v10926_v43 = vpop.f32.mrb[20].mxu1 }
 0x2ab   : > { %3790 = vmatmul.mubr.bf16.gmra.mrb[120].mxu1 %v15736_v38  ;;  %3572 = vmatprep.mubr.bf16.mxu0 %v20133_v28  ;;  %v10927_v26 = vpop.f32.mrb[21].mxu1  ;;  %v13446_v38 = vld [vmem:[#allocation6 + $0x120] sm:$0xff]  }
 0x2ac   : > { %3797 = vmatprep.mubr.bf16.mxu1 %v15745_v19  ;;  %v15863_v17 = vadd.f32 %v10927_v26, %v10926_v43  ;;  %v10929_v31 = vpop.f32.mrb[22].mxu1  ;;  %v10842_v26 = vpop.f32.mrb[64].mxu0 }
 0x2ad   : > { %v10930_v14 = vpop.f32.mrb[23].mxu1 }
 0x2ae   : > { %20165 = vst [vmem:[#allocation83_spill] sm:$0xff] %v15863_v17  ;;  %v10932_v43 = vpop.f32.mrb[24].mxu1  ;;  %v13456_v17 = vld [vmem:[#allocation6 + $0x400] sm:$0xff]  }
 0x2af   : > { %v10933_v18 = vpop.f32.mrb[25].mxu1 }
 0x2b0   : > { %v15877_v61 = vadd.f32 %v10933_v18, %v10932_v43 }
 0x2b2   : > { %3573 = vmatmul.mubr.bf16.vlgmr.msra.gmra.mrb[164].mxu0 %v20133_v28 }
 0x2b3   : > { %3798 = vmatmul.mubr.bf16.gmra.mrb[124].mxu1 %v15757_v42  ;;  %11387 = vmatpush3.bf16.msra.mxu0 %v13422_v45  ;;  %v13430_v45 = vld [vmem:[#allocation6 + $0x110] sm:$0xff]   ;;  %v15865_v42 = vadd.f32 %v10930_v14, %v10929_v31  ;;  %v13445_v14 = vld [vmem:[#allocation6 + $0x160] sm:$0xff]  }
 0x2b4   : > { %9916 = vmatprep.mubr.msk.bf16.mxu0 %vm14701_vm7, %v20163_v52  ;;  %3805 = vmatprep.mubr.bf16.mxu1 %v15761_v0  ;;  %v20167_v52 = vld [vmem:[#allocation79_spill] sm:$0xff] }
 0x2b5   : > { %11388 = vmatprep.subr.bf16.mxu0 %v13425_v24  ;;  %20166 = vst [vmem:[#allocation150_spill] sm:$0xff] %v15865_v42  ;;  %v20168_v24 = vld [vmem:[#allocation33_spill] sm:$0xff]  ;;  %20170 = vst [vmem:[#allocation79_spill] sm:$0xff] %v15877_v61 }
 0x2b7   : > { %11389 = vmatpush3.bf16.msra.mxu0 %v13426_v44  ;;  %v13436_v44 = vld [vmem:[#allocation6 + $0x118] sm:$0xff]  }
 0x2b8   : > { %11390 = vmatprep.subr.bf16.mxu0 %v13429_v46  ;;  %v10843_v46 = vpop.f32.mrb[65].mxu0 }
 0x2b9   : > { %v15875_v31 = vadd.f32 %v10843_v46, %v10842_v26  ;;  %v20173_v26 = vld [vmem:[#allocation59_spill] sm:$0xff] }
 0x2ba   : > { %9919 = vmatmul.mubr.msk.bf16.gmra.mrb[168].mxu0 %vm14701_vm7, %v20167_v52  ;;  %v10845_v52 = vpop.f32.mrb[66].mxu0 }
 0x2bb   : > { %3806 = vmatmul.mubr.bf16.gmra.mrb[128].mxu1 %v15771_v49  ;;  %9922 = vmatprep.mubr.msk.bf16.mxu0 %vm14732_vm12, %v20168_v24  ;;  %v10935_v49 = vpop.f32.mrb[26].mxu1  ;;  %v10846_v47 = vpop.f32.mrb[67].mxu0 }
 0x2bc   : > { %3813 = vmatprep.mubr.bf16.mxu1 %v15775_v41  ;;  %11391 = vmatpush3.bf16.msra.mxu0 %v13430_v45  ;;  %v10936_v19 = vpop.f32.mrb[27].mxu1  ;;  %v15879_v54 = vadd.f32 %v10846_v47, %v10845_v52  ;;  %v13447_v41 = vld [vmem:[#allocation6 + $0x168] sm:$0xff]   ;;  %v10848_v47 = vpop.f32.mrb[68].mxu0 }
 0x2bd   : > { %11392 = vmatprep.subr.bf16.mxu0 %v13435_v21  ;;  %v15881_v45 = vadd.f32 %v10936_v19, %v10935_v49  ;;  %v20172_v21 = vld [vmem:[#allocation37_spill] sm:$0xff]  ;;  %v11066_v46 = vpop.f32.mrb[28].mxu1  ;;  %v13449_v19 = vld [vmem:[#allocation6 + $0x170] sm:$0xff]   ;;  %v10849_v49 = vpop.f32.mrb[69].mxu0 }
 0x2be   : > { %v15891_v18 = vadd.f32 %v10849_v49, %v10848_v47  ;;  %v10851_v37 = vpop.f32.mrb[70].mxu0  ;;  %v20176_v47 = vld [vmem:[#allocation22_spill] sm:$0xff] }
 0x2bf   : > { %20171 = vst [vmem:[#allocation33_spill] sm:$0xff] %v15881_v45  ;;  %v10852_v2 = vpop.f32.mrb[71].mxu0  ;;  %v20188_v45 = vld [vmem:[#allocation90_spill] sm:$0xff] }
 0x2c0   : > { %11393 = vmatpush3.bf16.msra.mxu0 %v13436_v44  ;;  %v13448_v44 = vld [vmem:[#allocation6 + $0x128] sm:$0xff]   ;;  %v15895_v33 = vadd.f32 %v10852_v2, %v10851_v37  ;;  %v10854_v2 = vpop.f32.mrb[72].mxu0 }
 0x2c1   : > { %11394 = vmatprep.subr.bf16.mxu0 %v13445_v14  ;;  %v11067_v14 = vpop.f32.mrb[29].mxu1 }
 0x2c2   : > { %9925 = vmatmul.mubr.msk.bf16.gmra.mrb[172].mxu0 %vm14732_vm12, %v20172_v21  ;;  %v15893_v52 = vadd.f32 %v11067_v14, %v11066_v46 }
 0x2c3   : > { %3814 = vmatmul.mubr.bf16.gmra.mrb[132].mxu1 %v15783_v32  ;;  %9928 = vmatprep.mubr.msk.bf16.mxu0 %vm14830_vm3, %v20173_v26  ;;  %v11069_v32 = vpop.f32.mrb[30].mxu1 }
 0x2c4   : > { %3821 = vmatprep.mubr.bf16.mxu1 %v15787_v13  ;;  %11395 = vmatpush3.bf16.msra.mxu0 %v13446_v38  ;;  %v11070_v59 = vpop.f32.mrb[31].mxu1  ;;  %v13451_v13 = vld [vmem:[#allocation6 + $0x178] sm:$0xff]  }
 0x2c5   : > { %11396 = vmatprep.subr.bf16.mxu0 %v13447_v41  ;;  %v15897_v38 = vadd.f32 %v11070_v59, %v11069_v32  ;;  %v20175_v41 = vld [vmem:[#allocation88_spill] sm:$0xff]  ;;  %v11072_v37 = vpop.f32.mrb[32].mxu1  ;;  %v13453_v59 = vld [vmem:[#allocation6 + $0x3c0] sm:$0xff]   ;;  %v10855_v32 = vpop.f32.mrb[73].mxu0 }
 0x2c6   : > { %v15907_v49 = vadd.f32 %v10855_v32, %v10854_v2  ;;  %v10857_v57 = vpop.f32.mrb[74].mxu0  ;;  %v20214_v2 = vld [vmem:[#allocation66_spill] sm:$0xff] }
 0x2c7   : > { %v10858_v9 = vpop.f32.mrb[75].mxu0 }
 0x2c8   : > { %11397 = vmatpush3.bf16.msra.mxu0 %v13448_v44  ;;  %v13452_v44 = vld [vmem:[#allocation6 + $0x138] sm:$0xff]   ;;  %v15911_v35 = vadd.f32 %v10858_v9, %v10857_v57 }
 0x2c9   : > { %11398 = vmatprep.subr.bf16.mxu0 %v13449_v19  ;;  %v11073_v19 = vpop.f32.mrb[33].mxu1 }
 0x2ca   : > { %9931 = vmatmul.mubr.msk.bf16.gmra.mrb[176].mxu0 %vm14830_vm3, %v20175_v41  ;;  %v15909_v14 = vadd.f32 %v11073_v19, %v11072_v37  ;;  %v10860_v37 = vpop.f32.mrb[76].mxu0 }
 0x2cb   : > { %3822 = vmatmul.mubr.bf16.gmra.mrb[136].mxu1 %v15795_v5  ;;  %9934 = vmatprep.mubr.msk.bf16.mxu0 %vm14917_vm13, %v20176_v47  ;;  %v11075_v5 = vpop.f32.mrb[34].mxu1 }
 0x2cc   : > { %3829 = vmatprep.mubr.bf16.mxu1 %v15799_v62  ;;  %11399 = vmatpush3.bf16.msra.mxu0 %v13450_v6  ;;  %v11076_v30 = vpop.f32.mrb[35].mxu1  ;;  %v20178_v6 = vld [vmem:[#allocation93_spill] sm:$0xff] }
 0x2cd   : > { %11400 = vmatprep.subr.bf16.mxu0 %v13451_v13  ;;  %v15913_v62 = vadd.f32 %v11076_v30, %v11075_v5  ;;  %v20179_v13 = vld [vmem:[#allocation95_spill] sm:$0xff]  ;;  %v11078_v32 = vpop.f32.mrb[36].mxu1 }
 0x2ce   : > { %v11079_v9 = vpop.f32.mrb[37].mxu1 }
 0x2cf   : > { %v15925_v5 = vadd.f32 %v11079_v9, %v11078_v32 }
 0x2d0   : > { %11401 = vmatpush3.bf16.msra.mxu0 %v13452_v44  ;;  %v10861_v44 = vpop.f32.mrb[77].mxu0 }
 0x2d1   : > { %11610 = vmatprep.subr.bf16.mxu0 %v13453_v59  ;;  %v15923_v57 = vadd.f32 %v10861_v44, %v10860_v37  ;;  %v10863_v30 = vpop.f32.mrb[78].mxu0  ;;  %v11081_v59 = vpop.f32.mrb[38].mxu1 }
 0x2d2   : > { %9937 = vmatmul.mubr.msk.bf16.gmra.mrb[180].mxu0 %vm14917_vm13, %v20178_v6  ;;  %v10864_v19 = vpop.f32.mrb[79].mxu0  ;;  %v11082_v1 = vpop.f32.mrb[39].mxu1 }
 0x2d3   : > { %3830 = vmatmul.mubr.bf16.gmra.mrb[140].mxu1 %v15807_v8  ;;  %9940 = vmatprep.mubr.msk.bf16.mxu0 %vm15047_vm8, %v20179_v13  ;;  %v15927_v12 = vadd.f32 %v10864_v19, %v10863_v30  ;;  %v15929_v8 = vadd.f32 %v11082_v1, %v11081_v59  ;;  %v10866_v37 = vpop.f32.mrb[80].mxu0  ;;  %v11084_v32 = vpop.f32.mrb[40].mxu1 }
 0x2d4   : > { %3837 = vmatprep.mubr.bf16.mxu1 %v15811_v23  ;;  %v20182_v23 = vld [vmem:[#allocation103_spill] sm:$0xff]  ;;  %v10867_v44 = vpop.f32.mrb[81].mxu0  ;;  %v11085_v9 = vpop.f32.mrb[41].mxu1 }
 0x2d5   : > { %v15939_v30 = vadd.f32 %v10867_v44, %v10866_v37  ;;  %v15941_v1 = vadd.f32 %v11085_v9, %v11084_v32  ;;  %v10869_v59 = vpop.f32.mrb[82].mxu0  ;;  %v11087_v19 = vpop.f32.mrb[42].mxu1 }
 0x2d6   : > { %v10870_v7 = vpop.f32.mrb[83].mxu0  ;;  %v11088_v63 = vpop.f32.mrb[43].mxu1 }
 0x2d7   : > { %v15943_v3 = vadd.f32 %v10870_v7, %v10869_v59 }
 0x2d9   : > { %v10872_v37 = vpop.f32.mrb[84].mxu0 }
 0x2da   : > { %9943 = vmatmul.mubr.msk.bf16.gmra.mrb[184].mxu0 %vm15047_vm8, %v20181_v48  ;;  %v10873_v44 = vpop.f32.mrb[85].mxu0 }
 0x2db   : > { %3838 = vmatmul.mubr.bf16.gmra.mrb[144].mxu1 %v15821_v36  ;;  %9946 = vmatprep.mubr.msk.bf16.mxu0 %vm15148_vm15, %v20182_v23  ;;  %v15945_v36 = vadd.f32 %v11088_v63, %v11087_v19  ;;  %v15955_v7 = vadd.f32 %v10873_v44, %v10872_v37  ;;  %v10875_v59 = vpop.f32.mrb[86].mxu0 }
 0x2dc   : > { %3845 = vmatprep.mubr.bf16.mxu1 %v20149_v51  ;;  %v20185_v51 = vld [vmem:[#allocation119_spill] sm:$0xff]  ;;  %v10876_v29 = vpop.f32.mrb[87].mxu0 }
 0x2dd   : > { %v11090_v32 = vpop.f32.mrb[44].mxu1  ;;  %v15959_v50 = vadd.f32 %v10876_v29, %v10875_v59 }
 0x2de   : > { %v11091_v9 = vpop.f32.mrb[45].mxu1 }
 0x2df   : > { %v15957_v63 = vadd.f32 %v11091_v9, %v11090_v32  ;;  %v11093_v19 = vpop.f32.mrb[46].mxu1 }
 0x2e0   : > { %v11094_v53 = vpop.f32.mrb[47].mxu1 }
 0x2e2   : > { %9949 = vmatmul.mubr.msk.bf16.gmra.mrb[188].mxu0 %vm15148_vm15, %v20184_v11 }
 0x2e3   : > { %3846 = vmatmul.mubr.bf16.gmra.mrb[148].mxu1 %v20152_v10  ;;  %9952 = vmatprep.mubr.msk.bf16.mxu0 %vm20187_vm2, %v20185_v51  ;;  %v15961_v10 = vadd.f32 %v11094_v53, %v11093_v19 }
 0x2e4   : > { %3853 = vmatprep.mubr.bf16.mxu1 %v20153_v15  ;;  %v20189_v15 = vld [vmem:[#allocation29_spill] sm:$0xff] }
 0x2e9   : > { %v10878_v37 = vpop.f32.mrb[88].mxu0 }
 0x2ea   : > { %9955 = vmatmul.mubr.msk.bf16.gmra.mrb[192].mxu0 %vm20187_vm2, %v20188_v45  ;;  %v10879_v29 = vpop.f32.mrb[89].mxu0 }
 0x2eb   : > { %3854 = vmatmul.mubr.bf16.gmra.mrb[152].mxu1 %v20156_v4  ;;  %9958 = vmatprep.mubr.msk.bf16.mxu0 %vm15389_vm14, %v20189_v15  ;;  %v11096_v32 = vpop.f32.mrb[48].mxu1  ;;  %v15973_v53 = vadd.f32 %v10879_v29, %v10878_v37  ;;  %v10881_v59 = vpop.f32.mrb[90].mxu0  ;;  %v13463_v29 = vld [vmem:[#allocation6 + $0x450] sm:$0xff]  }
 0x2ec   : > { %10096 = vmatprep.mubr.msk.bf16.mxu1 %vm14732_vm12, %v20168_v24  ;;  %v11097_v44 = vpop.f32.mrb[49].mxu1  ;;  %v10882_v42 = vpop.f32.mrb[91].mxu0  ;;  %v20192_v24 = vld [vmem:[#allocation125_spill] sm:$0xff] }
 0x2ed   : > { %v15975_v9 = vadd.f32 %v11097_v44, %v11096_v32  ;;  %v11099_v19 = vpop.f32.mrb[50].mxu1  ;;  %v15977_v58 = vadd.f32 %v10882_v42, %v10881_v59  ;;  %v13460_v42 = vld [vmem:[#allocation6 + $0x408] sm:$0xff]  }
 0x2ee   : > { %v11100_v4 = vpop.f32.mrb[51].mxu1 }
 0x2ef   : > { %v15979_v16 = vadd.f32 %v11100_v4, %v11099_v19 }
 0x2f2   : > { %9961 = vmatmul.mubr.msk.bf16.gmra.mrb[196].mxu0 %vm15389_vm14, %v20191_v22 }
 0x2f3   : > { %10099 = vmatmul.mubr.msk.bf16.vlgmr.msra.gmra.mrb[156].mxu1 %vm14732_vm12, %v20172_v21  ;;  %9964 = vmatprep.mubr.msk.bf16.mxu0 %vm15452_vm9, %v20192_v24  ;;  %v10884_v4 = vpop.f32.mrb[92].mxu0  ;;  %v11102_v32 = vpop.f32.mrb[52].mxu1 }
 0x2f4   : > { %10102 = vmatprep.mubr.msk.bf16.mxu1 %vm14830_vm3, %v20173_v26  ;;  %11723 = vmatpush3.bf16.msra.mxu1 %v13456_v17  ;;  %v10885_v44 = vpop.f32.mrb[93].mxu0  ;;  %v11103_v59 = vpop.f32.mrb[53].mxu1  ;;  %v13465_v26 = vld [vmem:[#allocation6 + $0x458] sm:$0xff]  }
 0x2f5   : > { %11724 = vmatprep.subr.bf16.mxu1 %v13459_v25  ;;  %v15993_v19 = vadd.f32 %v10885_v44, %v10884_v4  ;;  %v15995_v0 = vadd.f32 %v11103_v59, %v11102_v32  ;;  %v10887_v21 = vpop.f32.mrb[94].mxu0  ;;  %v11105_v56 = vpop.f32.mrb[54].mxu1  ;;  %v20198_v25 = vld [vmem:[#allocation42_spill] sm:$0xff]  ;;  %v20199_v4 = vld [vmem:[#allocation47_spill] sm:$0xff]  ;;  %v20200_v32 = vld [vmem:[#allocation45_spill] sm:$0xff] }
 0x2f6   : > { %v10888_v27 = vpop.f32.mrb[95].mxu0  ;;  %v11106_v20 = vpop.f32.mrb[55].mxu1  ;;  %vm20201_vm5 = vnez %v20200_v32 }
 0x2f7   : > { %20194 = vst [vmem:[#allocation37_spill] sm:$0xff] %v15993_v19  ;;  %20195 = vst [vmem:[#allocation59_spill] sm:$0xff] %v15995_v0  ;;  %v15997_v39 = vadd.f32 %v10888_v27, %v10887_v21  ;;  %v15999_v17 = vadd.f32 %v11106_v20, %v11105_v56  ;;  %v13466_v20 = vld [vmem:[#allocation6 + $0x418] sm:$0xff]   ;;  %v13470_v19 = vld [vmem:[#allocation6 + $0x420] sm:$0xff]  }
 0x2f8   : > { %11725 = vmatpush3.bf16.msra.mxu1 %v13460_v42  ;;  %v13469_v42 = vld [vmem:[#allocation6 + $0x460] sm:$0xff]   ;;  %v13475_v0 = vld [vmem:[#allocation6 + $0x478] sm:$0xff]  }
 0x2f9   : > { %20196 = vst [vmem:[#allocation88_spill] sm:$0xff] %v15997_v39  ;;  %20197 = vst [vmem:[#allocation22_spill] sm:$0xff] %v15999_v17  ;;  %11726 = vmatprep.subr.bf16.mxu1 %v13463_v29 }
 0x2fa   : > { %9967 = vmatmul.mubr.msk.bf16.gmra.mrb[200].mxu0 %vm15452_vm9, %v20198_v25 }
 0x2fb   : > { %10105 = vmatmul.mubr.msk.bf16.gmra.mrb[160].mxu1 %vm14830_vm3, %v20175_v41  ;;  %9970 = vmatprep.mubr.msk.bf16.mxu0 %vm20201_vm5, %v20199_v4 }
 0x2fc   : > { %10108 = vmatprep.mubr.msk.bf16.mxu1 %vm14917_vm13, %v20176_v47  ;;  %11727 = vmatpush3.bf16.msra.mxu1 %v13464_v60  ;;  %v13471_v47 = vld [vmem:[#allocation6 + $0x468] sm:$0xff]  }
 0x2fd   : > { %v10890_v27 = vpop.f32.mrb[96].mxu0  ;;  %11728 = vmatprep.subr.bf16.mxu1 %v13465_v26  ;;  %v20206_v26 = vld [vmem:[#allocation49_spill] sm:$0xff] }
 0x2fe   : > { %v11108_v56 = vpop.f32.mrb[56].mxu1  ;;  %v10891_v29 = vpop.f32.mrb[97].mxu0 }
 0x2ff   : > { %v11109_v44 = vpop.f32.mrb[57].mxu1  ;;  %v16013_v59 = vadd.f32 %v10891_v29, %v10890_v27  ;;  %v10893_v41 = vpop.f32.mrb[98].mxu0  ;;  %v20207_v27 = vld [vmem:[#allocation55_spill] sm:$0xff] }
 0x300   : > { %v16015_v21 = vadd.f32 %v11109_v44, %v11108_v56  ;;  %v11111_v43 = vpop.f32.mrb[58].mxu1  ;;  %v10894_v55 = vpop.f32.mrb[99].mxu0  ;;  %11729 = vmatpush3.bf16.msra.mxu1 %v13466_v20  ;;  %v20208_v56 = vld [vmem:[#allocation53_spill] sm:$0xff]  ;;  %v13473_v20 = vld [vmem:[#allocation6 + $0x470] sm:$0xff]  }
 0x301   : > { %20202 = vst [vmem:[#allocation93_spill] sm:$0xff] %v16013_v59  ;;  %v11112_v39 = vpop.f32.mrb[59].mxu1  ;;  %v16017_v17 = vadd.f32 %v10894_v55, %v10893_v41  ;;  %11730 = vmatprep.subr.bf16.mxu1 %v13469_v42  ;;  %vm20209_vm3 = vnez %v20208_v56  ;;  %v13472_v55 = vld [vmem:[#allocation6 + $0x428] sm:$0xff]  }
 0x302   : > { %20203 = vst [vmem:[#allocation95_spill] sm:$0xff] %v16015_v21  ;;  %v16019_v60 = vadd.f32 %v11112_v39, %v11111_v43  ;;  %9973 = vmatmul.mubr.msk.bf16.gmra.mrb[204].mxu0 %vm20201_vm5, %v20206_v26 }
 0x303   : > { %20204 = vst [vmem:[#allocation98_spill] sm:$0xff] %v16017_v17  ;;  %10111 = vmatmul.mubr.msk.bf16.gmra.mrb[164].mxu1 %vm14917_vm13, %v20178_v6  ;;  %9976 = vmatprep.mubr.msk.bf16.mxu0 %vm20209_vm3, %v20207_v27 }
 0x304   : > { %20205 = vst [vmem:[#allocation103_spill] sm:$0xff] %v16019_v60  ;;  %10114 = vmatprep.mubr.msk.bf16.mxu1 %vm15047_vm8, %v20179_v13  ;;  %11731 = vmatpush3.bf16.msra.mxu1 %v13470_v19  ;;  %v13474_v60 = vld [vmem:[#allocation6 + $0x430] sm:$0xff]  }
 0x305   : > { %v10954_v39 = vpop.f32.mrb[100].mxu0  ;;  %11732 = vmatprep.subr.bf16.mxu1 %v13471_v47  ;;  %v20210_v47 = vld [vmem:[#allocation57_spill] sm:$0xff] }
 0x306   : > { %v11114_v43 = vpop.f32.mrb[60].mxu1  ;;  %v10955_v42 = vpop.f32.mrb[101].mxu0 }
 0x307   : > { %v11115_v29 = vpop.f32.mrb[61].mxu1  ;;  %v10956_v44 = vadd.f32 %v10955_v42, %v10954_v39  ;;  %v10957_v6 = vpop.f32.mrb[102].mxu0 }
 0x308   : > { %v16033_v41 = vadd.f32 %v11115_v29, %v11114_v43  ;;  %v11117_v46 = vpop.f32.mrb[62].mxu1  ;;  %v10958_v17 = vpop.f32.mrb[103].mxu0  ;;  %11733 = vmatpush3.bf16.msra.mxu1 %v13472_v55  ;;  %v20211_v43 = vld [vmem:[#allocation64_spill] sm:$0xff]  ;;  %v20212_v55 = vld [vmem:[#allocation62_spill] sm:$0xff] }
 0x309   : > { %v11118_v59 = vpop.f32.mrb[63].mxu1  ;;  %v2965_v21 = vadd.f32 %v10956_v44, %v15875_v31  ;;  %v10959_v13 = vadd.f32 %v10958_v17, %v10957_v6  ;;  %11734 = vmatprep.subr.bf16.mxu1 %v13473_v20  ;;  %vm20213_vm13 = vnez %v20212_v55 }
 0x30a   : > { %v16036_v19 = vadd.f32 %v11118_v59, %v11117_v46  ;;  %9979 = vmatmul.mubr.msk.bf16.gmra.mrb[208].mxu0 %vm20209_vm3, %v20210_v47  ;;  %v13476_v46 = vld [vmem:[#allocation6 + $0x438] sm:$0xff]  }
 0x30b   : > { %10117 = vmatmul.mubr.msk.bf16.gmra.mrb[168].mxu1 %vm15047_vm8, %v20181_v48  ;;  %v2968_v39 = vadd.f32 %v10959_v13, %v15879_v54  ;;  %9982 = vmatprep.mubr.msk.bf16.mxu0 %vm20213_vm13, %v20211_v43  ;;  %v16052_v31 = vadd.f32 %v15893_v52, %v2965_v21 }
 0x30c   : > { %10120 = vmatprep.mubr.msk.bf16.mxu1 %vm15148_vm15, %v20182_v23  ;;  %11735 = vmatpush3.bf16.msra.mxu1 %v13474_v60 }
 0x30d   : > { %v10960_v17 = vpop.f32.mrb[104].mxu0  ;;  %11736 = vmatprep.subr.bf16.mxu1 %v13475_v0  ;;  %v16055_v48 = vadd.f32 %v15897_v38, %v2968_v39  ;;  %v20215_v38 = vld [vmem:[#allocation70_spill] sm:$0xff]  ;;  %v20216_v39 = vld [vmem:[#allocation69_spill] sm:$0xff] }
 0x30e   : > { %v11120_v59 = vpop.f32.mrb[64].mxu1  ;;  %v10961_v54 = vpop.f32.mrb[105].mxu0  ;;  %vm20217_vm8 = vnez %v20216_v39 }
 0x30f   : > { %v11121_v20 = vpop.f32.mrb[65].mxu1  ;;  %v10962_v42 = vadd.f32 %v10961_v54, %v10960_v17  ;;  %v10963_v44 = vpop.f32.mrb[106].mxu0 }
 0x310   : > { %v16057_v29 = vadd.f32 %v11121_v20, %v11120_v59  ;;  %v11123_v6 = vpop.f32.mrb[66].mxu1  ;;  %v10964_v13 = vpop.f32.mrb[107].mxu0  ;;  %11737 = vmatpush3.bf16.msra.mxu1 %v13476_v46 }
 0x311   : > { %v11124_v23 = vpop.f32.mrb[67].mxu1  ;;  %v2973_v52 = vadd.f32 %v10962_v42, %v15891_v18  ;;  %v10965_v21 = vadd.f32 %v10964_v13, %v10963_v44 }
 0x312   : > { %v16060_v60 = vadd.f32 %v11124_v23, %v11123_v6  ;;  %9985 = vmatmul.mubr.msk.bf16.gmra.mrb[212].mxu0 %vm20213_vm13, %v20214_v2 }
 0x313   : > { %10123 = vmatmul.mubr.msk.bf16.gmra.mrb[172].mxu1 %vm15148_vm15, %v20184_v11  ;;  %v2976_v0 = vadd.f32 %v10965_v21, %v15895_v33  ;;  %9988 = vmatprep.mubr.msk.bf16.mxu0 %vm20217_vm8, %v20215_v38  ;;  %v16076_v18 = vadd.f32 %v15909_v14, %v2973_v52  ;;  %v20218_v14 = vld [vmem:[#allocation71_spill] sm:$0xff]  ;;  %v20219_v52 = vld [vmem:[#allocation74_spill] sm:$0xff] }
 0x314   : > { %10126 = vmatprep.mubr.msk.bf16.mxu1 %vm20187_vm2, %v20185_v51 }
 0x315   : > { %v10966_v46 = vpop.f32.mrb[108].mxu0  ;;  %v16079_v59 = vadd.f32 %v15913_v62, %v2976_v0  ;;  %v20220_v0 = vld [vmem:[#allocation73_spill] sm:$0xff] }
 0x316   : > { %v11126_v17 = vpop.f32.mrb[68].mxu1  ;;  %v10967_v54 = vpop.f32.mrb[109].mxu0  ;;  %vm20221_vm15 = vnez %v20220_v0 }
 0x317   : > { %v11127_v11 = vpop.f32.mrb[69].mxu1  ;;  %v10968_v20 = vadd.f32 %v10967_v54, %v10966_v46  ;;  %v10969_v42 = vpop.f32.mrb[110].mxu0 }
 0x318   : > { %v16081_v33 = vadd.f32 %v11127_v11, %v11126_v17  ;;  %v11129_v44 = vpop.f32.mrb[70].mxu1  ;;  %v10970_v6 = vpop.f32.mrb[111].mxu0 }
 0x319   : > { %v11130_v13 = vpop.f32.mrb[71].mxu1  ;;  %v2981_v23 = vadd.f32 %v10968_v20, %v15907_v49  ;;  %v10971_v51 = vadd.f32 %v10970_v6, %v10969_v42 }
 0x31a   : > { %v16084_v21 = vadd.f32 %v11130_v13, %v11129_v44  ;;  %9991 = vmatmul.mubr.msk.bf16.gmra.mrb[216].mxu0 %vm20217_vm8, %v20218_v14 }
 0x31b   : > { %10129 = vmatmul.mubr.msk.bf16.gmra.mrb[176].mxu1 %vm20187_vm2, %v20188_v45  ;;  %v2984_v62 = vadd.f32 %v10971_v51, %v15911_v35  ;;  %9994 = vmatprep.mubr.msk.bf16.mxu0 %vm20221_vm15, %v20219_v52  ;;  %v16100_v49 = vadd.f32 %v15925_v5, %v2981_v23  ;;  %v20222_v5 = vld [vmem:[#allocation72_spill] sm:$0xff]  ;;  %v20223_v23 = vld [vmem:[#allocation78_spill] sm:$0xff] }
 0x31c   : > { %10132 = vmatprep.mubr.msk.bf16.mxu1 %vm15389_vm14, %v20189_v15 }
 0x31d   : > { %v10972_v46 = vpop.f32.mrb[112].mxu0  ;;  %v16103_v54 = vadd.f32 %v15929_v8, %v2984_v62  ;;  %v20224_v62 = vld [vmem:[#allocation77_spill] sm:$0xff] }
 0x31e   : > { %v11132_v17 = vpop.f32.mrb[72].mxu1  ;;  %v10973_v11 = vpop.f32.mrb[113].mxu0  ;;  %vm20225_vm2 = vnez %v20224_v62 }
 0x31f   : > { %v11133_v45 = vpop.f32.mrb[73].mxu1  ;;  %v10974_v20 = vadd.f32 %v10973_v11, %v10972_v46  ;;  %v10975_v42 = vpop.f32.mrb[114].mxu0 }
 0x320   : > { %v16105_v35 = vadd.f32 %v11133_v45, %v11132_v17  ;;  %v11135_v44 = vpop.f32.mrb[74].mxu1  ;;  %v10976_v6 = vpop.f32.mrb[115].mxu0 }
 0x321   : > { %v11136_v13 = vpop.f32.mrb[75].mxu1  ;;  %v2989_v51 = vadd.f32 %v10974_v20, %v15923_v57  ;;  %v10977_v15 = vadd.f32 %v10976_v6, %v10975_v42 }
 0x322   : > { %v16108_v34 = vadd.f32 %v11136_v13, %v11135_v44  ;;  %9997 = vmatmul.mubr.msk.bf16.gmra.mrb[220].mxu0 %vm20221_vm15, %v20222_v5 }
 0x323   : > { %10135 = vmatmul.mubr.msk.bf16.gmra.mrb[180].mxu1 %vm15389_vm14, %v20191_v22  ;;  %v2992_v8 = vadd.f32 %v10977_v15, %v15927_v12  ;;  %10000 = vmatprep.mubr.msk.bf16.mxu0 %vm20225_vm2, %v20223_v23  ;;  %v16124_v57 = vadd.f32 %v15941_v1, %v2989_v51  ;;  %v20226_v1 = vld [vmem:[#allocation76_spill] sm:$0xff] }
 0x324   : > { %10138 = vmatprep.mubr.msk.bf16.mxu1 %vm15452_vm9, %v20192_v24 }
 0x325   : > { %v10978_v46 = vpop.f32.mrb[116].mxu0  ;;  %v16127_v11 = vadd.f32 %v15945_v36, %v2992_v8 }
 0x326   : > { %v11138_v17 = vpop.f32.mrb[76].mxu1  ;;  %v10979_v45 = vpop.f32.mrb[117].mxu0 }
 0x327   : > { %v11139_v22 = vpop.f32.mrb[77].mxu1  ;;  %v10980_v20 = vadd.f32 %v10979_v45, %v10978_v46  ;;  %v10981_v42 = vpop.f32.mrb[118].mxu0 }
 0x328   : > { %v16129_v12 = vadd.f32 %v11139_v22, %v11138_v17  ;;  %v11141_v44 = vpop.f32.mrb[78].mxu1  ;;  %v10982_v6 = vpop.f32.mrb[119].mxu0 }
 0x329   : > { %v11142_v13 = vpop.f32.mrb[79].mxu1  ;;  %v2997_v15 = vadd.f32 %v10980_v20, %v15939_v30  ;;  %v10983_v24 = vadd.f32 %v10982_v6, %v10981_v42  ;;  %v13454_v42 = vld [vmem:[#allocation6 + $0x380] sm:$0xff]   ;;  %v13457_v6 = vld [vmem:[#allocation6 + $0x3c8] sm:$0xff]  }
 0x32a   : > { %v16132_v61 = vadd.f32 %v11142_v13, %v11141_v44  ;;  %10003 = vmatmul.mubr.msk.bf16.gmra.mrb[224].mxu0 %vm20225_vm2, %v20226_v1 }
 0x32b   : > { %10141 = vmatmul.mubr.msk.bf16.gmra.mrb[184].mxu1 %vm15452_vm9, %v20198_v25  ;;  %v3000_v36 = vadd.f32 %v10983_v24, %v15943_v3  ;;  %3894 = vmatprep.mubr.bf16.mxu0 %v20133_v28  ;;  %v16146_v30 = vadd.f32 %v15957_v63, %v2997_v15  ;;  %v20227_v24 = vld [vmem:[#allocation35_spill] sm:$0xff] }
 0x32c   : > { %10144 = vmatprep.mubr.msk.bf16.mxu1 %vm20201_vm5, %v20199_v4 }
 0x32d   : > { %v10984_v51 = vpop.f32.mrb[120].mxu0  ;;  %v16149_v46 = vadd.f32 %v15961_v10, %v3000_v36  ;;  %v20228_v36 = vld [vmem:[#allocation87_spill] sm:$0xff] }
 0x32e   : > { %v11144_v8 = vpop.f32.mrb[80].mxu1  ;;  %v10985_v17 = vpop.f32.mrb[121].mxu0  ;;  %vm20229_vm9 = vnez %v20228_v36 }
 0x32f   : > { %v11145_v45 = vpop.f32.mrb[81].mxu1  ;;  %v10986_v22 = vadd.f32 %v10985_v17, %v10984_v51  ;;  %v10987_v3 = vpop.f32.mrb[122].mxu0  ;;  %v13458_v51 = vld [vmem:[#allocation6 + $0x388] sm:$0xff]  }
 0x330   : > { %v16151_v25 = vadd.f32 %v11145_v45, %v11144_v8  ;;  %v11147_v20 = vpop.f32.mrb[82].mxu1  ;;  %v10988_v44 = vpop.f32.mrb[123].mxu0 }
 0x331   : > { %v11148_v4 = vpop.f32.mrb[83].mxu1  ;;  %v3005_v13 = vadd.f32 %v10986_v22, %v15955_v7  ;;  %v10989_v63 = vadd.f32 %v10988_v44, %v10987_v3  ;;  %v13461_v7 = vld [vmem:[#allocation6 + $0x3d0] sm:$0xff]  }
 0x332   : > { %v16154_v15 = vadd.f32 %v11148_v4, %v11147_v20  ;;  %3895 = vmatmul.mubr.bf16.vlgmr.msra.gmra.mrb[228].mxu0 %v20133_v28 }
 0x333   : > { %10147 = vmatmul.mubr.msk.bf16.gmra.mrb[188].mxu1 %vm20201_vm5, %v20206_v26  ;;  %v3008_v10 = vadd.f32 %v10989_v63, %v15959_v50  ;;  %11611 = vmatpush3.bf16.msra.mxu0 %v13454_v42  ;;  %v16165_v8 = vadd.f32 %v15975_v9, %v3005_v13  ;;  %v13462_v13 = vld [vmem:[#allocation6 + $0x390] sm:$0xff]  }
 0x334   : > { %10006 = vmatprep.mubr.msk.bf16.mxu0 %vm20229_vm9, %v20227_v24  ;;  %10150 = vmatprep.mubr.msk.bf16.mxu1 %vm20209_vm3, %v20207_v27  ;;  %v13467_v24 = vld [vmem:[#allocation6 + $0x3d8] sm:$0xff]  }
 0x335   : > { %20230 = vst [vmem:[#allocation31_spill] sm:$0xff] %v16165_v8  ;;  %11612 = vmatprep.subr.bf16.mxu0 %v13457_v6  ;;  %v10990_v17 = vpop.f32.mrb[124].mxu0  ;;  %v16171_v26 = vadd.f32 %v15979_v16, %v3008_v10  ;;  %v20232_v16 = vld [vmem:[#allocation28_spill] sm:$0xff] }
 0x336   : > { %v11150_v45 = vpop.f32.mrb[84].mxu1  ;;  %v10991_v50 = vpop.f32.mrb[125].mxu0 }
 0x337   : > { %20231 = vst [vmem:[#allocation119_spill] sm:$0xff] %v16171_v26  ;;  %v11151_v22 = vpop.f32.mrb[85].mxu1  ;;  %v10992_v3 = vadd.f32 %v10991_v50, %v10990_v17  ;;  %v10993_v42 = vpop.f32.mrb[126].mxu0  ;;  %11613 = vmatpush3.bf16.msra.mxu0 %v13458_v51  ;;  %v20233_v51 = vld [vmem:[#allocation86_spill] sm:$0xff]  ;;  %v20234_v17 = vld [vmem:[#allocation17_spill] sm:$0xff] }
 0x338   : > { %v16173_v20 = vadd.f32 %v11151_v22, %v11150_v45  ;;  %v11153_v44 = vpop.f32.mrb[86].mxu1  ;;  %v10994_v9 = vpop.f32.mrb[127].mxu0  ;;  %11614 = vmatprep.subr.bf16.mxu0 %v13461_v7  ;;  %vm20235_vm5 = vnez %v20234_v17  ;;  %v13468_v45 = vld [vmem:[#allocation6 + $0x398] sm:$0xff]   ;;  %v20302_v17 = vld [vmem:[#allocation83_spill] sm:$0xff] }
 0x339   : > { %v11154_v4 = vpop.f32.mrb[87].mxu1  ;;  %v3013_v27 = vadd.f32 %v10992_v3, %v15973_v53  ;;  %v10995_v6 = vadd.f32 %v10994_v9, %v10993_v42  ;;  %v20236_v53 = vld [vmem:[#allocation59_spill] sm:$0xff]  ;;  %v13477_v3 = vld [vmem:[#allocation6 + $0x3e0] sm:$0xff]  }
 0x33a   : > { %v16176_v63 = vadd.f32 %v11154_v4, %v11153_v44  ;;  %10009 = vmatmul.mubr.msk.bf16.gmra.mrb[232].mxu0 %vm20229_vm9, %v20232_v16 }
 0x33b   : > { %10153 = vmatmul.mubr.msk.bf16.gmra.mrb[192].mxu1 %vm20209_vm3, %v20210_v47  ;;  %v3016_v10 = vadd.f32 %v10995_v6, %v15977_v58  ;;  %10012 = vmatprep.mubr.msk.bf16.mxu0 %vm20235_vm5, %v20233_v51  ;;  %v16192_v7 = vadd.f32 %v20236_v53, %v3013_v27  ;;  %v20238_v47 = vld [vmem:[#allocation22_spill] sm:$0xff]  ;;  %v13478_v27 = vld [vmem:[#allocation6 + $0x3a0] sm:$0xff]  }
 0x33c   : > { %10156 = vmatprep.mubr.msk.bf16.mxu1 %vm20213_vm13, %v20211_v43  ;;  %11615 = vmatpush3.bf16.msra.mxu0 %v13462_v13  ;;  %v20240_v13 = vld [vmem:[#allocation37_spill] sm:$0xff] }
 0x33d   : > { %20237 = vst [vmem:[#allocation90_spill] sm:$0xff] %v16192_v7  ;;  %v10996_v50 = vpop.f32.mrb[128].mxu0  ;;  %11616 = vmatprep.subr.bf16.mxu0 %v13467_v24  ;;  %v16195_v42 = vadd.f32 %v20238_v47, %v3016_v10  ;;  %v13479_v24 = vld [vmem:[#allocation6 + $0x3e8] sm:$0xff]   ;;  %v20241_v10 = vld [vmem:[#allocation89_spill] sm:$0xff]  ;;  %v20243_v47 = vld [vmem:[#allocation92_spill] sm:$0xff] }
 0x33e   : > { %v11156_v22 = vpop.f32.mrb[88].mxu1  ;;  %v10997_v58 = vpop.f32.mrb[129].mxu0 }
 0x33f   : > { %20239 = vst [vmem:[#allocation29_spill] sm:$0xff] %v16195_v42  ;;  %v11157_v44 = vpop.f32.mrb[89].mxu1  ;;  %v10998_v9 = vadd.f32 %v10997_v58, %v10996_v50  ;;  %v10999_v6 = vpop.f32.mrb[130].mxu0  ;;  %v20242_v50 = vld [vmem:[#allocation88_spill] sm:$0xff]  ;;  %v13480_v58 = vld [vmem:[#allocation6 + $0x3a8] sm:$0xff]  }
 0x340   : > { %v16197_v4 = vadd.f32 %v11157_v44, %v11156_v22  ;;  %v11159_v16 = vpop.f32.mrb[90].mxu1  ;;  %v11000_v43 = vpop.f32.mrb[131].mxu0  ;;  %11617 = vmatpush3.bf16.msra.mxu0 %v13468_v45  ;;  %v20244_v45 = vld [vmem:[#allocation25_spill] sm:$0xff] }
 0x341   : > { %v11160_v56 = vpop.f32.mrb[91].mxu1  ;;  %v3021_v53 = vadd.f32 %v10998_v9, %v20240_v13  ;;  %v11001_v32 = vadd.f32 %v11000_v43, %v10999_v6  ;;  %11618 = vmatprep.subr.bf16.mxu0 %v13477_v3  ;;  %vm20245_vm3 = vnez %v20244_v45  ;;  %v13481_v6 = vld [vmem:[#allocation6 + $0x3f0] sm:$0xff]  }
 0x342   : > { %v16200_v37 = vadd.f32 %v11160_v56, %v11159_v16  ;;  %10015 = vmatmul.mubr.msk.bf16.gmra.mrb[236].mxu0 %vm20235_vm5, %v20241_v10  ;;  %v20246_v56 = vld [vmem:[#allocation95_spill] sm:$0xff] }
 0x343   : > { %10159 = vmatmul.mubr.msk.bf16.gmra.mrb[196].mxu1 %vm20213_vm13, %v20214_v2  ;;  %v3024_v22 = vadd.f32 %v11001_v32, %v20242_v50  ;;  %10018 = vmatprep.mubr.msk.bf16.mxu0 %vm20245_vm3, %v20243_v47  ;;  %v16216_v3 = vadd.f32 %v20246_v56, %v3021_v53  ;;  %v20248_v2 = vld [vmem:[#allocation103_spill] sm:$0xff] }
 0x344   : > { %10162 = vmatprep.mubr.msk.bf16.mxu1 %vm20217_vm8, %v20215_v38  ;;  %11619 = vmatpush3.bf16.msra.mxu0 %v13478_v27  ;;  %v13482_v53 = vld [vmem:[#allocation6 + $0x3b0] sm:$0xff]   ;;  %v20250_v27 = vld [vmem:[#allocation93_spill] sm:$0xff] }
 0x345   : > { %20247 = vst [vmem:[#allocation122_spill] sm:$0xff] %v16216_v3  ;;  %v11002_v44 = vpop.f32.mrb[132].mxu0  ;;  %11620 = vmatprep.subr.bf16.mxu0 %v13479_v24  ;;  %v16219_v16 = vadd.f32 %v20248_v2, %v3024_v22  ;;  %v13483_v24 = vld [vmem:[#allocation6 + $0x3f8] sm:$0xff]   ;;  %v20251_v22 = vld [vmem:[#allocation94_spill] sm:$0xff]  ;;  %v20253_v2 = vld [vmem:[#allocation97_spill] sm:$0xff] }
 0x346   : > { %v11290_v9 = vpop.f32.mrb[92].mxu1  ;;  %v11003_v32 = vpop.f32.mrb[133].mxu0  ;;  %v20309_v45 = vld [vmem:[#allocation79_spill] sm:$0xff] }
 0x347   : > { %20249 = vst [vmem:[#allocation125_spill] sm:$0xff] %v16219_v16  ;;  %v11291_v43 = vpop.f32.mrb[93].mxu1  ;;  %v11004_v13 = vadd.f32 %v11003_v32, %v11002_v44  ;;  %v11005_v50 = vpop.f32.mrb[134].mxu0  ;;  %v20252_v44 = vld [vmem:[#allocation98_spill] sm:$0xff] }
 0x348   : > { %v16221_v55 = vadd.f32 %v11291_v43, %v11290_v9  ;;  %v11293_v40 = vpop.f32.mrb[94].mxu1  ;;  %v11006_v38 = vpop.f32.mrb[135].mxu0  ;;  %11621 = vmatpush3.bf16.msra.mxu0 %v13480_v58  ;;  %v20254_v58 = vld [vmem:[#allocation99_spill] sm:$0xff] }
 0x349   : > { %v11294_v36 = vpop.f32.mrb[95].mxu1  ;;  %v3029_v56 = vadd.f32 %v11004_v13, %v20250_v27  ;;  %v11007_v3 = vadd.f32 %v11006_v38, %v11005_v50  ;;  %11622 = vmatprep.subr.bf16.mxu0 %v13481_v6  ;;  %vm20255_vm13 = vnez %v20254_v58 }
 0x34a   : > { %v16224_v42 = vadd.f32 %v11294_v36, %v11293_v40  ;;  %10021 = vmatmul.mubr.msk.bf16.gmra.mrb[240].mxu0 %vm20245_vm3, %v20251_v22  ;;  %v13484_v36 = vld [vmem:[#allocation6 + $0x3b8] sm:$0xff]  }
 0x34b   : > { %10165 = vmatmul.mubr.msk.bf16.gmra.mrb[200].mxu1 %vm20217_vm8, %v20218_v14  ;;  %v3032_v9 = vadd.f32 %v11007_v3, %v20252_v44  ;;  %10024 = vmatprep.mubr.msk.bf16.mxu0 %vm20255_vm13, %v20253_v2  ;;  %v16240_v40 = vadd.f32 %v16033_v41, %v3029_v56  ;;  %v20258_v41 = vld [vmem:[#allocation140_spill] sm:$0xff] }
 0x34c   : > { %10168 = vmatprep.mubr.msk.bf16.mxu1 %vm20221_vm15, %v20219_v52  ;;  %11623 = vmatpush3.bf16.msra.mxu0 %v13482_v53 }
 0x34d   : > { %20256 = vst [vmem:[#allocation42_spill] sm:$0xff] %v16240_v40  ;;  %v11008_v6 = vpop.f32.mrb[136].mxu0  ;;  %11624 = vmatprep.subr.bf16.mxu0 %v13483_v24  ;;  %v16243_v14 = vadd.f32 %v16036_v19, %v3032_v9  ;;  %v20259_v40 = vld [vmem:[#allocation100_spill] sm:$0xff]  ;;  %v20260_v19 = vld [vmem:[#allocation141_spill] sm:$0xff] }
 0x34e   : > { %v11296_v32 = vpop.f32.mrb[96].mxu1  ;;  %v11009_v3 = vpop.f32.mrb[137].mxu0  ;;  %v20261_v9 = vld [vmem:[#allocation104_spill] sm:$0xff] }
 0x34f   : > { %20257 = vst [vmem:[#allocation47_spill] sm:$0xff] %v16243_v14  ;;  %v11297_v43 = vpop.f32.mrb[97].mxu1  ;;  %v11010_v13 = vadd.f32 %v11009_v3, %v11008_v6  ;;  %v11011_v38 = vpop.f32.mrb[138].mxu0  ;;  %v20262_v6 = vld [vmem:[#allocation105_spill] sm:$0xff] }
 0x350   : > { %v16245_v50 = vadd.f32 %v11297_v43, %v11296_v32  ;;  %v11299_v27 = vpop.f32.mrb[98].mxu1  ;;  %v11012_v44 = vpop.f32.mrb[139].mxu0  ;;  %11625 = vmatpush3.bf16.msra.mxu0 %v13484_v36  ;;  %vm20263_vm8 = vnez %v20262_v6 }
 0x351   : > { %v11300_v52 = vpop.f32.mrb[99].mxu1  ;;  %v3037_v56 = vadd.f32 %v11010_v13, %v20258_v41  ;;  %v11013_v53 = vadd.f32 %v11012_v44, %v11011_v38 }
 0x352   : > { %v16248_v39 = vadd.f32 %v11300_v52, %v11299_v27  ;;  %10027 = vmatmul.mubr.msk.bf16.gmra.mrb[244].mxu0 %vm20255_vm13, %v20259_v40 }
 0x353   : > { %10171 = vmatmul.mubr.msk.bf16.gmra.mrb[204].mxu1 %vm20221_vm15, %v20222_v5  ;;  %v3040_v24 = vadd.f32 %v11013_v53, %v20260_v19  ;;  %10030 = vmatprep.mubr.msk.bf16.mxu0 %vm20263_vm8, %v20261_v9  ;;  %v16264_v36 = vadd.f32 %v16057_v29, %v3037_v56  ;;  %v20266_v19 = vld [vmem:[#allocation142_spill] sm:$0xff]  ;;  %v20267_v29 = vld [vmem:[#allocation117_spill] sm:$0xff] }
 0x354   : > { %10174 = vmatprep.mubr.msk.bf16.mxu1 %vm20225_vm2, %v20223_v23 }
 0x355   : > { %20264 = vst [vmem:[#allocation49_spill] sm:$0xff] %v16264_v36  ;;  %v11014_v32 = vpop.f32.mrb[140].mxu0  ;;  %v16267_v43 = vadd.f32 %v16060_v60, %v3040_v24  ;;  %v20268_v60 = vld [vmem:[#allocation143_spill] sm:$0xff]  ;;  %v20269_v24 = vld [vmem:[#allocation120_spill] sm:$0xff] }
 0x356   : > { %v11302_v3 = vpop.f32.mrb[100].mxu1  ;;  %v11015_v13 = vpop.f32.mrb[141].mxu0  ;;  %v20277_v36 = vld [vmem:[#allocation144_spill] sm:$0xff] }
 0x357   : > { %20265 = vst [vmem:[#allocation55_spill] sm:$0xff] %v16267_v43  ;;  %v11303_v5 = vpop.f32.mrb[101].mxu1  ;;  %v11016_v38 = vadd.f32 %v11015_v13, %v11014_v32  ;;  %v11017_v44 = vpop.f32.mrb[142].mxu0  ;;  %v20270_v32 = vld [vmem:[#allocation118_spill] sm:$0xff] }
 0x358   : > { %v16269_v27 = vadd.f32 %v11303_v5, %v11302_v3  ;;  %v11305_v52 = vpop.f32.mrb[102].mxu1  ;;  %v11018_v41 = vpop.f32.mrb[143].mxu0  ;;  %vm20271_vm15 = vnez %v20270_v32  ;;  %v20272_v3 = vld [vmem:[#allocation84_spill] sm:$0xff]  ;;  %v20273_v13 = vld [vmem:[#allocation82_spill] sm:$0xff] }
 0x359   : > { %v11306_v53 = vpop.f32.mrb[103].mxu1  ;;  %v3045_v0 = vadd.f32 %v11016_v38, %v20266_v19  ;;  %v11019_v23 = vadd.f32 %v11018_v41, %v11017_v44  ;;  %vm20274_vm14 = vnez %v20273_v13 }
 0x35a   : > { %v16272_v14 = vadd.f32 %v11306_v53, %v11305_v52  ;;  %10033 = vmatmul.mubr.msk.bf16.gmra.mrb[248].mxu0 %vm20263_vm8, %v20267_v29 }
 0x35b   : > { %10177 = vmatmul.mubr.msk.bf16.gmra.mrb[208].mxu1 %vm20225_vm2, %v20226_v1  ;;  %v3048_v56 = vadd.f32 %v11019_v23, %v20268_v60  ;;  %10036 = vmatprep.mubr.msk.bf16.mxu0 %vm20271_vm15, %v20269_v24  ;;  %v16288_v5 = vadd.f32 %v16081_v33, %v3045_v0  ;;  %v20278_v33 = vld [vmem:[#allocation91_spill] sm:$0xff]  ;;  %v20280_v0 = vld [vmem:[#allocation145_spill] sm:$0xff] }
 0x35c   : > { %10180 = vmatprep.mubr.msk.bf16.mxu1 %vm20274_vm14, %v20272_v3 }
 0x35d   : > { %20275 = vst [vmem:[#allocation57_spill] sm:$0xff] %v16288_v5  ;;  %v11020_v38 = vpop.f32.mrb[144].mxu0  ;;  %v16291_v52 = vadd.f32 %v16084_v21, %v3048_v56  ;;  %v20279_v21 = vld [vmem:[#allocation81_spill] sm:$0xff] }
 0x35e   : > { %v11308_v44 = vpop.f32.mrb[104].mxu1  ;;  %v11021_v41 = vpop.f32.mrb[145].mxu0 }
 0x35f   : > { %20276 = vst [vmem:[#allocation64_spill] sm:$0xff] %v16291_v52  ;;  %v11309_v1 = vpop.f32.mrb[105].mxu1  ;;  %v11022_v53 = vadd.f32 %v11021_v41, %v11020_v38  ;;  %v11023_v23 = vpop.f32.mrb[146].mxu0  ;;  %v20281_v38 = vld [vmem:[#allocation121_spill] sm:$0xff]  ;;  %v20286_v52 = vld [vmem:[#allocation146_spill] sm:$0xff] }
 0x360   : > { %v16293_v19 = vadd.f32 %v11309_v1, %v11308_v44  ;;  %v11311_v60 = vpop.f32.mrb[106].mxu1  ;;  %v11024_v62 = vpop.f32.mrb[147].mxu0  ;;  %v20282_v44 = vld [vmem:[#allocation14_spill] sm:$0xff] }
 0x361   : > { %v11312_v43 = vpop.f32.mrb[107].mxu1  ;;  %v3053_v16 = vadd.f32 %v11022_v53, %v20277_v36  ;;  %v11025_v3 = vadd.f32 %v11024_v62, %v11023_v23  ;;  %vm20283_vm2 = vnez %v20282_v44 }
 0x362   : > { %v16296_v7 = vadd.f32 %v11312_v43, %v11311_v60  ;;  %10039 = vmatmul.mubr.msk.bf16.gmra.mrb[252].mxu0 %vm20271_vm15, %v20278_v33 }
 0x363   : > { %10183 = vmatmul.mubr.msk.bf16.gmra.mrb[212].mxu1 %vm20274_vm14, %v20279_v21  ;;  %v3056_v56 = vadd.f32 %v11025_v3, %v20280_v0  ;;  %10042 = vmatprep.mubr.msk.bf16.mxu0 %vm20283_vm2, %v20281_v38  ;;  %v16310_v62 = vadd.f32 %v16105_v35, %v3053_v16  ;;  %v20288_v35 = vld [vmem:[#allocation123_spill] sm:$0xff] }
 0x364   : > { %4656 = vmatprep.mubr.bf16.mxu1 %v20133_v28 }
 0x365   : > { %20284 = vst [vmem:[#allocation66_spill] sm:$0xff] %v16310_v62  ;;  %v11026_v36 = vpop.f32.mrb[148].mxu0  ;;  %v16313_v41 = vadd.f32 %v16108_v34, %v3056_v56  ;;  %v20289_v34 = vld [vmem:[#allocation147_spill] sm:$0xff]  ;;  %v20290_v56 = vld [vmem:[#allocation126_spill] sm:$0xff] }
 0x366   : > { %v11314_v43 = vpop.f32.mrb[108].mxu1  ;;  %v11027_v1 = vpop.f32.mrb[149].mxu0 }
 0x367   : > { %20285 = vst [vmem:[#allocation70_spill] sm:$0xff] %v16313_v41  ;;  %v11315_v53 = vpop.f32.mrb[109].mxu1  ;;  %v11028_v23 = vadd.f32 %v11027_v1, %v11026_v36  ;;  %v11029_v3 = vpop.f32.mrb[150].mxu0  ;;  %v20294_v41 = vld [vmem:[#allocation148_spill] sm:$0xff] }
 0x368   : > { %v16315_v60 = vadd.f32 %v11315_v53, %v11314_v43  ;;  %v11317_v21 = vpop.f32.mrb[110].mxu1  ;;  %v11030_v0 = vpop.f32.mrb[151].mxu0 }
 0x369   : > { %v11318_v13 = vpop.f32.mrb[111].mxu1  ;;  %v3061_v5 = vadd.f32 %v11028_v23, %v20286_v52  ;;  %v11031_v26 = vadd.f32 %v11030_v0, %v11029_v3 }
 0x36a   : > { %v16318_v8 = vadd.f32 %v11318_v13, %v11317_v21  ;;  %10045 = vmatmul.mubr.msk.bf16.gmra.mrb[0].mxu0 %vm20283_vm2, %v20288_v35 }
 0x36b   : > { %4657 = vmatmul.mubr.bf16.gmra.mrb[216].mxu1 %v20133_v28  ;;  %v3064_v16 = vadd.f32 %v11031_v26, %v20289_v34  ;;  %10048 = vmatprep.mubr.msk.bf16.mxu0 %vm15467_vm1, %v20290_v56  ;;  %v16332_v52 = vadd.f32 %v16129_v12, %v3061_v5  ;;  %v20295_v12 = vld [vmem:[#allocation39_spill] sm:$0xff] }
 0x36c   : > { %20287 = vst [vmem:[#allocation71_spill] sm:$0xff] %v16318_v8  ;;  %10186 = vmatprep.mubr.msk.bf16.mxu1 %vm20235_vm5, %v20233_v51 }
 0x36d   : > { %20292 = vst [vmem:[#allocation74_spill] sm:$0xff] %v16332_v52  ;;  %v11032_v13 = vpop.f32.mrb[152].mxu0  ;;  %v16335_v1 = vadd.f32 %v16132_v61, %v3064_v16  ;;  %v20296_v61 = vld [vmem:[#allocation149_spill] sm:$0xff] }
 0x36e   : > { %v11320_v43 = vpop.f32.mrb[112].mxu1  ;;  %v11033_v53 = vpop.f32.mrb[153].mxu0  ;;  %v20297_v16 = vld [vmem:[#allocation41_spill] sm:$0xff] }
 0x36f   : > { %20293 = vst [vmem:[#allocation72_spill] sm:$0xff] %v16335_v1  ;;  %v11321_v23 = vpop.f32.mrb[113].mxu1  ;;  %v11034_v3 = vadd.f32 %v11033_v53, %v11032_v13  ;;  %v11035_v21 = vpop.f32.mrb[154].mxu0  ;;  %v20298_v13 = vld [vmem:[#allocation127_spill] sm:$0xff] }
 0x370   : > { %v16337_v26 = vadd.f32 %v11321_v23, %v11320_v43  ;;  %v11323_v0 = vpop.f32.mrb[114].mxu1  ;;  %v11036_v34 = vpop.f32.mrb[155].mxu0  ;;  %vm20299_vm14 = vnez %v20298_v13 }
 0x371   : > { %v11324_v28 = vpop.f32.mrb[115].mxu1  ;;  %v3069_v62 = vadd.f32 %v11034_v3, %v20294_v41  ;;  %v11037_v51 = vadd.f32 %v11036_v34, %v11035_v21 }
 0x372   : > { %v16340_v8 = vadd.f32 %v11324_v28, %v11323_v0  ;;  %10051 = vmatmul.mubr.msk.bf16.gmra.mrb[4].mxu0 %vm15467_vm1, %v20295_v12 }
 0x373   : > { %10189 = vmatmul.mubr.msk.bf16.vlgmr.msra.gmra.mrb[220].mxu1 %vm20235_vm5, %v20241_v10  ;;  %v3072_v5 = vadd.f32 %v11037_v51, %v20296_v61  ;;  %10054 = vmatprep.mubr.msk.bf16.mxu0 %vm20299_vm14, %v20297_v16  ;;  %v16356_v28 = vadd.f32 %v16151_v25, %v3069_v62  ;;  %v20303_v25 = vld [vmem:[#allocation18_spill] sm:$0xff] }
 0x374   : > { %10192 = vmatprep.mubr.msk.bf16.mxu1 %vm20245_vm3, %v20243_v47 }
 0x375   : > { %20300 = vst [vmem:[#allocation78_spill] sm:$0xff] %v16356_v28  ;;  %v11038_v41 = vpop.f32.mrb[156].mxu0  ;;  %v16359_v53 = vadd.f32 %v16154_v15, %v3072_v5  ;;  %v20304_v15 = vld [vmem:[#allocation150_spill] sm:$0xff] }
 0x376   : > { %v11326_v43 = vpop.f32.mrb[116].mxu1  ;;  %v11039_v23 = vpop.f32.mrb[157].mxu0  ;;  %v20305_v5 = vld [vmem:[#allocation46_spill] sm:$0xff] }
 0x377   : > { %20301 = vst [vmem:[#allocation76_spill] sm:$0xff] %v16359_v53  ;;  %v11327_v10 = vpop.f32.mrb[117].mxu1  ;;  %v11040_v3 = vadd.f32 %v11039_v23, %v11038_v41  ;;  %v11041_v0 = vpop.f32.mrb[158].mxu0  ;;  %v20306_v41 = vld [vmem:[#allocation44_spill] sm:$0xff] }
 0x378   : > { %v16361_v21 = vadd.f32 %v11327_v10, %v11326_v43  ;;  %v11329_v34 = vpop.f32.mrb[118].mxu1  ;;  %v11042_v51 = vpop.f32.mrb[159].mxu0  ;;  %vm20307_vm12 = vnez %v20306_v41  ;;  %v20369_v41 = vld [vmem:[#allocation136_spill] sm:$0xff] }
 0x379   : > { %v11330_v61 = vpop.f32.mrb[119].mxu1  ;;  %v3077_v1 = vadd.f32 %v11040_v3, %v20302_v17  ;;  %v11043_v47 = vadd.f32 %v11042_v51, %v11041_v0 }
 0x37a   : > { %v16364_v52 = vadd.f32 %v11330_v61, %v11329_v34  ;;  %10057 = vmatmul.mubr.msk.bf16.gmra.mrb[8].mxu0 %vm20299_vm14, %v20303_v25 }
 0x37b   : > { %10195 = vmatmul.mubr.msk.bf16.gmra.mrb[224].mxu1 %vm20245_vm3, %v20251_v22  ;;  %v3080_v62 = vadd.f32 %v11043_v47, %v20304_v15  ;;  %10060 = vmatprep.mubr.msk.bf16.mxu0 %vm20307_vm12, %v20305_v5  ;;  %v16380_v17 = vadd.f32 %v16173_v20, %v3077_v1  ;;  %v20310_v20 = vld [vmem:[#allocation20_spill] sm:$0xff] }
 0x37c   : > { %10198 = vmatprep.mubr.msk.bf16.mxu1 %vm20255_vm13, %v20253_v2 }
 0x37d   : > { %v11044_v43 = vpop.f32.mrb[160].mxu0  ;;  %v16383_v10 = vadd.f32 %v16176_v63, %v3080_v62  ;;  %v20311_v63 = vld [vmem:[#allocation33_spill] sm:$0xff]  ;;  %v20312_v62 = vld [vmem:[#allocation43_spill] sm:$0xff] }
 0x37e   : > { %v11332_v23 = vpop.f32.mrb[120].mxu1  ;;  %v11045_v3 = vpop.f32.mrb[161].mxu0 }
 0x37f   : > { %20308 = vst [vmem:[#allocation35_spill] sm:$0xff] %v16383_v10  ;;  %v11333_v22 = vpop.f32.mrb[121].mxu1  ;;  %v11046_v0 = vadd.f32 %v11045_v3, %v11044_v43  ;;  %v11047_v51 = vpop.f32.mrb[162].mxu0  ;;  %v20313_v43 = vld [vmem:[#allocation56_spill] sm:$0xff] }
 0x380   : > { %v16385_v34 = vadd.f32 %v11333_v22, %v11332_v23  ;;  %v11335_v61 = vpop.f32.mrb[122].mxu1  ;;  %v11048_v47 = vpop.f32.mrb[163].mxu0  ;;  %vm20314_vm7 = vnez %v20313_v43 }
 0x381   : > { %v11336_v15 = vpop.f32.mrb[123].mxu1  ;;  %v3085_v53 = vadd.f32 %v11046_v0, %v20309_v45  ;;  %v11049_v2 = vadd.f32 %v11048_v47, %v11047_v51 }
 0x382   : > { %v16388_v28 = vadd.f32 %v11336_v15, %v11335_v61  ;;  %10063 = vmatmul.mubr.msk.bf16.gmra.mrb[12].mxu0 %vm20307_vm12, %v20310_v20 }
 0x383   : > { %10201 = vmatmul.mubr.msk.bf16.gmra.mrb[228].mxu1 %vm20255_vm13, %v20259_v40  ;;  %v3088_v1 = vadd.f32 %v11049_v2, %v20311_v63  ;;  %10066 = vmatprep.mubr.msk.bf16.mxu0 %vm20314_vm7, %v20312_v62  ;;  %v16404_v45 = vadd.f32 %v16197_v4, %v3085_v53  ;;  %v20315_v4 = vld [vmem:[#allocation19_spill] sm:$0xff]  ;;  %v20316_v53 = vld [vmem:[#allocation34_spill] sm:$0xff] }
 0x384   : > { %10204 = vmatprep.mubr.msk.bf16.mxu1 %vm20263_vm8, %v20261_v9 }
 0x385   : > { %v11178_v23 = vpop.f32.mrb[164].mxu0  ;;  %v16407_v22 = vadd.f32 %v16200_v37, %v3088_v1 }
 0x386   : > { %v11338_v3 = vpop.f32.mrb[124].mxu1  ;;  %v11179_v0 = vpop.f32.mrb[165].mxu0 }
 0x387   : > { %v11339_v40 = vpop.f32.mrb[125].mxu1  ;;  %v11180_v51 = vadd.f32 %v11179_v0, %v11178_v23  ;;  %v11181_v47 = vpop.f32.mrb[166].mxu0 }
 0x388   : > { %v16409_v61 = vadd.f32 %v11339_v40, %v11338_v3  ;;  %v11341_v15 = vpop.f32.mrb[126].mxu1  ;;  %v11182_v2 = vpop.f32.mrb[167].mxu0 }
 0x389   : > { %v11342_v63 = vpop.f32.mrb[127].mxu1  ;;  %v3575_v58 = vadd.f32 %v11180_v51, %v16052_v31  ;;  %v11183_v9 = vadd.f32 %v11182_v2, %v11181_v47 }
 0x38a   : > { %v16412_v10 = vadd.f32 %v11342_v63, %v11341_v15  ;;  %10069 = vmatmul.mubr.msk.bf16.gmra.mrb[16].mxu0 %vm20314_vm7, %v20315_v4 }
 0x38b   : > { %10207 = vmatmul.mubr.msk.bf16.gmra.mrb[232].mxu1 %vm20263_vm8, %v20267_v29  ;;  %v3578_v37 = vadd.f32 %v11183_v9, %v16055_v48  ;;  %10072 = vmatprep.mubr.msk.bf16.mxu0 %vm15624_vm10, %v20316_v53  ;;  %v16428_v31 = vadd.f32 %v16221_v55, %v3575_v58  ;;  %v20318_v55 = vld [vmem:[#allocation61_spill] sm:$0xff]  ;;  %v20319_v58 = vld [vmem:[#allocation38_spill] sm:$0xff] }
 0x38c   : > { %10210 = vmatprep.mubr.msk.bf16.mxu1 %vm20271_vm15, %v20269_v24 }
 0x38d   : > { %v11184_v23 = vpop.f32.mrb[168].mxu0  ;;  %v16431_v0 = vadd.f32 %v16224_v42, %v3578_v37 }
 0x38e   : > { %v11344_v3 = vpop.f32.mrb[128].mxu1  ;;  %v11185_v40 = vpop.f32.mrb[169].mxu0 }
 0x38f   : > { %v11345_v29 = vpop.f32.mrb[129].mxu1  ;;  %v11186_v51 = vadd.f32 %v11185_v40, %v11184_v23  ;;  %v11187_v47 = vpop.f32.mrb[170].mxu0 }
 0x390   : > { %v16433_v48 = vadd.f32 %v11345_v29, %v11344_v3  ;;  %v11347_v15 = vpop.f32.mrb[130].mxu1  ;;  %v11188_v2 = vpop.f32.mrb[171].mxu0 }
 0x391   : > { %v11348_v63 = vpop.f32.mrb[131].mxu1  ;;  %v3583_v9 = vadd.f32 %v11186_v51, %v16076_v18  ;;  %v11189_v24 = vadd.f32 %v11188_v2, %v11187_v47 }
 0x392   : > { %v16436_v6 = vadd.f32 %v11348_v63, %v11347_v15  ;;  %10075 = vmatmul.mubr.msk.bf16.gmra.mrb[20].mxu0 %vm15624_vm10, %v20318_v55 }
 0x393   : > { %10213 = vmatmul.mubr.msk.bf16.gmra.mrb[236].mxu1 %vm20271_vm15, %v20278_v33  ;;  %v3586_v42 = vadd.f32 %v11189_v24, %v16079_v59  ;;  %10078 = vmatprep.mubr.msk.bf16.mxu0 %vm15663_vm0, %v20319_v58  ;;  %v16452_v18 = vadd.f32 %v16245_v50, %v3583_v9  ;;  %v20321_v50 = vld [vmem:[#allocation58_spill] sm:$0xff]  ;;  %v20322_v9 = vld [vmem:[#allocation75_spill] sm:$0xff] }
 0x394   : > { %10216 = vmatprep.mubr.msk.bf16.mxu1 %vm20283_vm2, %v20281_v38 }
 0x395   : > { %v11190_v23 = vpop.f32.mrb[172].mxu0  ;;  %v16455_v40 = vadd.f32 %v16248_v39, %v3586_v42  ;;  %v20357_v42 = vld [vmem:[#allocation132_spill] sm:$0xff] }
 0x396   : > { %v11350_v3 = vpop.f32.mrb[132].mxu1  ;;  %v11191_v29 = vpop.f32.mrb[173].mxu0 }
 0x397   : > { %v11351_v33 = vpop.f32.mrb[133].mxu1  ;;  %v11192_v51 = vadd.f32 %v11191_v29, %v11190_v23  ;;  %v11193_v47 = vpop.f32.mrb[174].mxu0 }
 0x398   : > { %v16457_v59 = vadd.f32 %v11351_v33, %v11350_v3  ;;  %v11353_v15 = vpop.f32.mrb[134].mxu1  ;;  %v11194_v2 = vpop.f32.mrb[175].mxu0 }
 0x399   : > { %v11354_v63 = vpop.f32.mrb[135].mxu1  ;;  %v3591_v24 = vadd.f32 %v11192_v51, %v16100_v49  ;;  %v11195_v38 = vadd.f32 %v11194_v2, %v11193_v47 }
 0x39a   : > { %v16460_v32 = vadd.f32 %v11354_v63, %v11353_v15  ;;  %10081 = vmatmul.mubr.msk.bf16.gmra.mrb[24].mxu0 %vm15663_vm0, %v20321_v50 }
 0x39b   : > { %10219 = vmatmul.mubr.msk.bf16.gmra.mrb[240].mxu1 %vm20283_vm2, %v20288_v35  ;;  %v3594_v39 = vadd.f32 %v11195_v38, %v16103_v54  ;;  %10084 = vmatprep.mubr.msk.bf16.mxu0 %vm15696_vm6, %v20322_v9  ;;  %v16476_v49 = vadd.f32 %v16269_v27, %v3591_v24  ;;  %v20324_v27 = vld [vmem:[#allocation101_spill] sm:$0xff]  ;;  %v20325_v24 = vld [vmem:[#allocation106_spill] sm:$0xff] }
 0x39c   : > { %10222 = vmatprep.mubr.msk.bf16.mxu1 %vm15467_vm1, %v20290_v56 }
 0x39d   : > { %v11196_v23 = vpop.f32.mrb[176].mxu0  ;;  %v16479_v29 = vadd.f32 %v16272_v14, %v3594_v39 }
 0x39e   : > { %v11356_v3 = vpop.f32.mrb[136].mxu1  ;;  %v11197_v33 = vpop.f32.mrb[177].mxu0 }
 0x39f   : > { %v11357_v35 = vpop.f32.mrb[137].mxu1  ;;  %v11198_v51 = vadd.f32 %v11197_v33, %v11196_v23  ;;  %v11199_v47 = vpop.f32.mrb[178].mxu0 }
 0x3a0   : > { %v16481_v54 = vadd.f32 %v11357_v35, %v11356_v3  ;;  %v11359_v15 = vpop.f32.mrb[138].mxu1  ;;  %v11200_v2 = vpop.f32.mrb[179].mxu0 }
 0x3a1   : > { %v11360_v63 = vpop.f32.mrb[139].mxu1  ;;  %v3599_v38 = vadd.f32 %v11198_v51, %v16124_v57  ;;  %v11201_v56 = vadd.f32 %v11200_v2, %v11199_v47 }
 0x3a2   : > { %v16484_v44 = vadd.f32 %v11360_v63, %v11359_v15  ;;  %10087 = vmatmul.mubr.msk.bf16.gmra.mrb[28].mxu0 %vm15696_vm6, %v20324_v27 }
 0x3a3   : > { %10225 = vmatmul.mubr.msk.bf16.gmra.mrb[244].mxu1 %vm15467_vm1, %v20295_v12  ;;  %v3602_v14 = vadd.f32 %v11201_v56, %v16127_v11  ;;  %10090 = vmatprep.mubr.msk.bf16.mxu0 %vm15718_vm11, %v20325_v24  ;;  %v16500_v57 = vadd.f32 %v16293_v19, %v3599_v38  ;;  %v20327_v19 = vld [vmem:[#allocation107_spill] sm:$0xff]  ;;  %v20328_v38 = vld [vmem:[#allocation48_spill] sm:$0xff] }
 0x3a4   : > { %10228 = vmatprep.mubr.msk.bf16.mxu1 %vm20299_vm14, %v20297_v16 }
 0x3a5   : > { %v11202_v23 = vpop.f32.mrb[180].mxu0  ;;  %v16503_v33 = vadd.f32 %v16296_v7, %v3602_v14 }
 0x3a6   : > { %v11362_v3 = vpop.f32.mrb[140].mxu1  ;;  %v11203_v35 = vpop.f32.mrb[181].mxu0 }
 0x3a7   : > { %v11363_v12 = vpop.f32.mrb[141].mxu1  ;;  %v11204_v51 = vadd.f32 %v11203_v35, %v11202_v23  ;;  %v11205_v47 = vpop.f32.mrb[182].mxu0 }
 0x3a8   : > { %v16505_v11 = vadd.f32 %v11363_v12, %v11362_v3  ;;  %v11365_v15 = vpop.f32.mrb[142].mxu1  ;;  %v11206_v2 = vpop.f32.mrb[183].mxu0  ;;  %v20329_v3 = vld [vmem:[#allocation71_spill] sm:$0xff] }
 0x3a9   : > { %v11366_v63 = vpop.f32.mrb[143].mxu1  ;;  %v3607_v56 = vadd.f32 %v11204_v51, %v16146_v30  ;;  %v11207_v16 = vadd.f32 %v11206_v2, %v11205_v47 }
 0x3aa   : > { %v16508_v36 = vadd.f32 %v11366_v63, %v11365_v15  ;;  %10093 = vmatmul.mubr.msk.bf16.gmra.mrb[32].mxu0 %vm15718_vm11, %v20327_v19 }
 0x3ab   : > { %10231 = vmatmul.mubr.msk.bf16.gmra.mrb[248].mxu1 %vm20299_vm14, %v20303_v25  ;;  %v3610_v7 = vadd.f32 %v11207_v16, %v16149_v46  ;;  %4697 = vmatprep.mubr.bf16.mxu0 %v20328_v38  ;;  %v16522_v30 = vadd.f32 %v16315_v60, %v3607_v56  ;;  %v20330_v16 = vld [vmem:[#allocation31_spill] sm:$0xff] }
 0x3ac   : > { %10234 = vmatprep.mubr.msk.bf16.mxu1 %vm20307_vm12, %v20305_v5  ;;  %v20331_v60 = vld [vmem:[#allocation23_spill] sm:$0xff] }
 0x3ad   : > { %v11208_v14 = vpop.f32.mrb[184].mxu0  ;;  %v16525_v35 = vadd.f32 %v20329_v3, %v3610_v7  ;;  %v20332_v56 = vld [vmem:[#allocation119_spill] sm:$0xff] }
 0x3ae   : > { %v11368_v23 = vpop.f32.mrb[144].mxu1  ;;  %v11209_v12 = vpop.f32.mrb[185].mxu0 }
 0x3af   : > { %v11369_v51 = vpop.f32.mrb[145].mxu1  ;;  %v11210_v47 = vadd.f32 %v11209_v12, %v11208_v14  ;;  %v11211_v46 = vpop.f32.mrb[186].mxu0  ;;  %v20333_v14 = vld [vmem:[#allocation15_spill] sm:$0xff] }
 0x3b0   : > { %v16527_v25 = vadd.f32 %v11369_v51, %v11368_v23  ;;  %v11371_v15 = vpop.f32.mrb[146].mxu1  ;;  %v11212_v2 = vpop.f32.mrb[187].mxu0 }
 0x3b1   : > { %v11372_v63 = vpop.f32.mrb[147].mxu1  ;;  %v3615_v38 = vadd.f32 %v11210_v47, %v20330_v16  ;;  %v11213_v5 = vadd.f32 %v11212_v2, %v11211_v46 }
 0x3b2   : > { %v16530_v13 = vadd.f32 %v11372_v63, %v11371_v15  ;;  %4698 = vmatmul.mubr.bf16.vlgmr.msra.gmra.mrb[36].mxu0 %v20331_v60  ;;  %v20334_v60 = vld [vmem:[#allocation90_spill] sm:$0xff] }
 0x3b3   : > { %10237 = vmatmul.mubr.msk.bf16.gmra.mrb[252].mxu1 %vm20307_vm12, %v20310_v20  ;;  %v3618_v7 = vadd.f32 %v11213_v5, %v20332_v56  ;;  %4705 = vmatprep.mubr.bf16.mxu0 %v20333_v14  ;;  %v16542_v23 = vadd.f32 %v16337_v26, %v3615_v38  ;;  %v20335_v26 = vld [vmem:[#allocation52_spill] sm:$0xff] }
 0x3b4   : > { %10240 = vmatprep.mubr.msk.bf16.mxu1 %vm20314_vm7, %v20312_v62 }
 0x3b5   : > { %v11214_v3 = vpop.f32.mrb[188].mxu0  ;;  %v16545_v51 = vadd.f32 %v16340_v8, %v3618_v7  ;;  %v20336_v8 = vld [vmem:[#allocation29_spill] sm:$0xff]  ;;  %v20337_v7 = vld [vmem:[#allocation30_spill] sm:$0xff] }
 0x3b6   : > { %v11374_v12 = vpop.f32.mrb[148].mxu1  ;;  %v11215_v47 = vpop.f32.mrb[189].mxu0 }
 0x3b7   : > { %v11375_v46 = vpop.f32.mrb[149].mxu1  ;;  %v11216_v15 = vadd.f32 %v11215_v47, %v11214_v3  ;;  %v11217_v2 = vpop.f32.mrb[190].mxu0 }
 0x3b8   : > { %v16547_v20 = vadd.f32 %v11375_v46, %v11374_v12  ;;  %v11377_v63 = vpop.f32.mrb[150].mxu1  ;;  %v11218_v16 = vpop.f32.mrb[191].mxu0 }
 0x3b9   : > { %v11378_v5 = vpop.f32.mrb[151].mxu1  ;;  %v3623_v56 = vadd.f32 %v11216_v15, %v20334_v60  ;;  %v11219_v62 = vadd.f32 %v11218_v16, %v11217_v2 }
 0x3ba   : > { %v16550_v14 = vadd.f32 %v11378_v5, %v11377_v63  ;;  %4706 = vmatmul.mubr.bf16.gmra.mrb[40].mxu0 %v20335_v26  ;;  %v20338_v26 = vld [vmem:[#allocation122_spill] sm:$0xff] }
 0x3bb   : > { %10243 = vmatmul.mubr.msk.bf16.gmra.mrb[0].mxu1 %vm20314_vm7, %v20315_v4  ;;  %v3626_v38 = vadd.f32 %v11219_v62, %v20336_v8  ;;  %4713 = vmatprep.mubr.bf16.mxu0 %v20337_v7  ;;  %v16562_v3 = vadd.f32 %v16361_v21, %v3623_v56  ;;  %v20339_v21 = vld [vmem:[#allocation50_spill] sm:$0xff] }
 0x3bc   : > { %10246 = vmatprep.mubr.msk.bf16.mxu1 %vm15624_vm10, %v20316_v53 }
 0x3bd   : > { %v11220_v12 = vpop.f32.mrb[192].mxu0  ;;  %v16565_v46 = vadd.f32 %v16364_v52, %v3626_v38  ;;  %v20340_v52 = vld [vmem:[#allocation125_spill] sm:$0xff]  ;;  %v20341_v38 = vld [vmem:[#allocation32_spill] sm:$0xff] }
 0x3be   : > { %v11380_v47 = vpop.f32.mrb[152].mxu1  ;;  %v11221_v15 = vpop.f32.mrb[193].mxu0 }
 0x3bf   : > { %v11381_v2 = vpop.f32.mrb[153].mxu1  ;;  %v11222_v63 = vadd.f32 %v11221_v15, %v11220_v12  ;;  %v11223_v16 = vpop.f32.mrb[194].mxu0 }
 0x3c0   : > { %v16567_v4 = vadd.f32 %v11381_v2, %v11380_v47  ;;  %v11383_v5 = vpop.f32.mrb[154].mxu1  ;;  %v11224_v60 = vpop.f32.mrb[195].mxu0 }
 0x3c1   : > { %v11384_v62 = vpop.f32.mrb[155].mxu1  ;;  %v3631_v8 = vadd.f32 %v11222_v63, %v20338_v26  ;;  %v11225_v53 = vadd.f32 %v11224_v60, %v11223_v16 }
 0x3c2   : > { %v16570_v7 = vadd.f32 %v11384_v62, %v11383_v5  ;;  %4714 = vmatmul.mubr.bf16.gmra.mrb[44].mxu0 %v20339_v21  ;;  %v20342_v21 = vld [vmem:[#allocation42_spill] sm:$0xff] }
 0x3c3   : > { %10249 = vmatmul.mubr.msk.bf16.gmra.mrb[4].mxu1 %vm15624_vm10, %v20318_v55  ;;  %v3634_v56 = vadd.f32 %v11225_v53, %v20340_v52  ;;  %4721 = vmatprep.mubr.bf16.mxu0 %v20341_v38  ;;  %v16582_v12 = vadd.f32 %v16385_v34, %v3631_v8  ;;  %v20343_v34 = vld [vmem:[#allocation60_spill] sm:$0xff] }
 0x3c4   : > { %10252 = vmatprep.mubr.msk.bf16.mxu1 %vm15663_vm0, %v20319_v58 }
 0x3c5   : > { %v11226_v47 = vpop.f32.mrb[196].mxu0  ;;  %v16585_v2 = vadd.f32 %v16388_v28, %v3634_v56  ;;  %v20344_v28 = vld [vmem:[#allocation47_spill] sm:$0xff]  ;;  %v20345_v56 = vld [vmem:[#allocation36_spill] sm:$0xff] }
 0x3c6   : > { %v11514_v15 = vpop.f32.mrb[156].mxu1  ;;  %v11227_v63 = vpop.f32.mrb[197].mxu0 }
 0x3c7   : > { %v11515_v16 = vpop.f32.mrb[157].mxu1  ;;  %v11228_v5 = vadd.f32 %v11227_v63, %v11226_v47  ;;  %v11229_v60 = vpop.f32.mrb[198].mxu0 }
 0x3c8   : > { %v16587_v55 = vadd.f32 %v11515_v16, %v11514_v15  ;;  %v11517_v62 = vpop.f32.mrb[158].mxu1  ;;  %v11230_v26 = vpop.f32.mrb[199].mxu0 }
 0x3c9   : > { %v11518_v53 = vpop.f32.mrb[159].mxu1  ;;  %v3639_v52 = vadd.f32 %v11228_v5, %v20342_v21  ;;  %v11231_v58 = vadd.f32 %v11230_v26, %v11229_v60 }
 0x3ca   : > { %v16590_v38 = vadd.f32 %v11518_v53, %v11517_v62  ;;  %4722 = vmatmul.mubr.bf16.gmra.mrb[48].mxu0 %v20343_v34  ;;  %v20346_v34 = vld [vmem:[#allocation49_spill] sm:$0xff] }
 0x3cb   : > { %10255 = vmatmul.mubr.msk.bf16.gmra.mrb[8].mxu1 %vm15663_vm0, %v20321_v50  ;;  %v3642_v8 = vadd.f32 %v11231_v58, %v20344_v28  ;;  %4729 = vmatprep.mubr.bf16.mxu0 %v20345_v56  ;;  %v16602_v47 = vadd.f32 %v16409_v61, %v3639_v52  ;;  %v20347_v61 = vld [vmem:[#allocation51_spill] sm:$0xff] }
 0x3cc   : > { %10258 = vmatprep.mubr.msk.bf16.mxu1 %vm15696_vm6, %v20322_v9 }
 0x3cd   : > { %v11232_v15 = vpop.f32.mrb[200].mxu0  ;;  %v16605_v16 = vadd.f32 %v16412_v10, %v3642_v8  ;;  %v20348_v10 = vld [vmem:[#allocation55_spill] sm:$0xff]  ;;  %v20349_v8 = vld [vmem:[#allocation128_spill] sm:$0xff] }
 0x3ce   : > { %v11520_v63 = vpop.f32.mrb[160].mxu1  ;;  %v11233_v5 = vpop.f32.mrb[201].mxu0 }
 0x3cf   : > { %v11521_v60 = vpop.f32.mrb[161].mxu1  ;;  %v11234_v62 = vadd.f32 %v11233_v5, %v11232_v15  ;;  %v11235_v26 = vpop.f32.mrb[202].mxu0 }
 0x3d0   : > { %v16607_v50 = vadd.f32 %v11521_v60, %v11520_v63  ;;  %v11523_v53 = vpop.f32.mrb[162].mxu1  ;;  %v11236_v21 = vpop.f32.mrb[203].mxu0 }
 0x3d1   : > { %v11524_v58 = vpop.f32.mrb[163].mxu1  ;;  %v3647_v28 = vadd.f32 %v11234_v62, %v20346_v34  ;;  %v11237_v9 = vadd.f32 %v11236_v21, %v11235_v26 }
 0x3d2   : > { %v16610_v56 = vadd.f32 %v11524_v58, %v11523_v53  ;;  %4730 = vmatmul.mubr.bf16.gmra.mrb[52].mxu0 %v20347_v61  ;;  %v20350_v61 = vld [vmem:[#allocation57_spill] sm:$0xff] }
 0x3d3   : > { %10261 = vmatmul.mubr.msk.bf16.gmra.mrb[12].mxu1 %vm15696_vm6, %v20324_v27  ;;  %v3650_v52 = vadd.f32 %v11237_v9, %v20348_v10  ;;  %4737 = vmatprep.mubr.bf16.mxu0 %v20349_v8  ;;  %v16622_v15 = vadd.f32 %v16433_v48, %v3647_v28  ;;  %v20351_v48 = vld [vmem:[#allocation129_spill] sm:$0xff] }
 0x3d4   : > { %10264 = vmatprep.mubr.msk.bf16.mxu1 %vm15718_vm11, %v20325_v24 }
 0x3d5   : > { %v11238_v63 = vpop.f32.mrb[204].mxu0  ;;  %v16625_v60 = vadd.f32 %v16436_v6, %v3650_v52  ;;  %v20352_v6 = vld [vmem:[#allocation64_spill] sm:$0xff]  ;;  %v20353_v52 = vld [vmem:[#allocation131_spill] sm:$0xff] }
 0x3d6   : > { %v11526_v5 = vpop.f32.mrb[164].mxu1  ;;  %v11239_v62 = vpop.f32.mrb[205].mxu0 }
 0x3d7   : > { %v11527_v26 = vpop.f32.mrb[165].mxu1  ;;  %v11240_v53 = vadd.f32 %v11239_v62, %v11238_v63  ;;  %v11241_v21 = vpop.f32.mrb[206].mxu0  ;;  %v20354_v63 = vld [vmem:[#allocation108_spill] sm:$0xff] }
 0x3d8   : > { %v16627_v27 = vadd.f32 %v11527_v26, %v11526_v5  ;;  %v11529_v58 = vpop.f32.mrb[166].mxu1  ;;  %v11242_v34 = vpop.f32.mrb[207].mxu0  ;;  %v13485_v26 = vld [vmem:[#allocation8 + $0x140] sm:$0xff]  }
 0x3d9   : > { %v11530_v9 = vpop.f32.mrb[167].mxu1  ;;  %v3655_v10 = vadd.f32 %v11240_v53, %v20350_v61  ;;  %v11243_v24 = vadd.f32 %v11242_v34, %v11241_v21  ;;  %12650 = vmatprep.subr.bf16.mxu1 %v13485_v26 }
 0x3da   : > { %v16630_v8 = vadd.f32 %v11530_v9, %v11529_v58  ;;  %4738 = vmatmul.mubr.bf16.gmra.mrb[56].mxu0 %v20351_v48  ;;  %12651 = vmatpush3.bf16.msra.mxu1 %v13485_v26 }
 0x3db   : > { %10267 = vmatmul.mubr.msk.bf16.gmra.mrb[16].mxu1 %vm15718_vm11, %v20327_v19  ;;  %v3658_v28 = vadd.f32 %v11243_v24, %v20352_v6  ;;  %4745 = vmatprep.mubr.bf16.mxu0 %v20353_v52  ;;  %v16642_v62 = vadd.f32 %v16457_v59, %v3655_v10 }
 0x3dc   : > { %10270 = vmatprep.mubr.msk.bf16.mxu1 %vm15739_vm4, %v20354_v63  ;;  %v20356_v63 = vld [vmem:[#allocation66_spill] sm:$0xff] }
 0x3dd   : > { %v11244_v53 = vpop.f32.mrb[208].mxu0  ;;  %v16645_v58 = vadd.f32 %v16460_v32, %v3658_v28  ;;  %v20358_v32 = vld [vmem:[#allocation109_spill] sm:$0xff]  ;;  %v20359_v28 = vld [vmem:[#allocation70_spill] sm:$0xff] }
 0x3de   : > { %v11532_v21 = vpop.f32.mrb[168].mxu1  ;;  %v11245_v34 = vpop.f32.mrb[209].mxu0 }
 0x3df   : > { %v11533_v19 = vpop.f32.mrb[169].mxu1  ;;  %v11246_v9 = vadd.f32 %v11245_v34, %v11244_v53  ;;  %v11247_v24 = vpop.f32.mrb[210].mxu0  ;;  %v20360_v53 = vld [vmem:[#allocation133_spill] sm:$0xff] }
 0x3e0   : > { %v16647_v61 = vadd.f32 %v11533_v19, %v11532_v21  ;;  %v11535_v48 = vpop.f32.mrb[170].mxu1  ;;  %v11248_v6 = vpop.f32.mrb[211].mxu0  ;;  %v20361_v21 = vmov 0  }
 0x3e1   : > { %v11536_v52 = vpop.f32.mrb[171].mxu1  ;;  %v3663_v59 = vadd.f32 %v11246_v9, %v20356_v63  ;;  %v11249_v10 = vadd.f32 %v11248_v6, %v11247_v24 }
 0x3e2   : > { %v16650_v39 = vadd.f32 %v11536_v52, %v11535_v48  ;;  %4746 = vmatmul.mubr.bf16.gmra.mrb[60].mxu0 %v20357_v42 }
 0x3e3   : > { %10273 = vmatmul.mubr.msk.bf16.gmra.mrb[20].mxu1 %vm15739_vm4, %v20358_v32  ;;  %v3666_v26 = vadd.f32 %v11249_v10, %v20359_v28  ;;  %4753 = vmatprep.mubr.bf16.mxu0 %v20360_v53  ;;  %v16660_v34 = vadd.f32 %v16481_v54, %v3663_v59  ;;  %v20362_v53 = vld [vmem:[#allocation74_spill] sm:$0xff] }
 0x3e4   : > { %4978 = vmatprep.mubr.bf16.mxu1 %v20361_v21  ;;  %v20364_v54 = vld [vmem:[#allocation134_spill] sm:$0xff] }
 0x3e5   : > { %v11250_v19 = vpop.f32.mrb[212].mxu0  ;;  %v16663_v24 = vadd.f32 %v16484_v44, %v3666_v26  ;;  %v20365_v44 = vld [vmem:[#allocation72_spill] sm:$0xff]  ;;  %v20366_v26 = vld [vmem:[#allocation135_spill] sm:$0xff] }
 0x3e6   : > { %v11538_v9 = vpop.f32.mrb[172].mxu1  ;;  %v11251_v48 = vpop.f32.mrb[213].mxu0 }
 0x3e7   : > { %v11539_v42 = vpop.f32.mrb[173].mxu1  ;;  %v11252_v6 = vadd.f32 %v11251_v48, %v11250_v19  ;;  %v11253_v63 = vpop.f32.mrb[214].mxu0 }
 0x3e8   : > { %v16665_v52 = vadd.f32 %v11539_v42, %v11538_v9  ;;  %v11541_v32 = vpop.f32.mrb[174].mxu1  ;;  %v11254_v10 = vpop.f32.mrb[215].mxu0  ;;  %v13486_v9 = vld [vmem:[#allocation8 + $0x148] sm:$0xff]  }
 0x3e9   : > { %v11542_v28 = vpop.f32.mrb[175].mxu1  ;;  %v3671_v5 = vadd.f32 %v11252_v6, %v20362_v53  ;;  %v11255_v37 = vadd.f32 %v11254_v10, %v11253_v63  ;;  %12652 = vmatprep.subr.bf16.mxu1 %v13486_v9 }
 0x3ea   : > { %v16668_v1 = vadd.f32 %v11542_v28, %v11541_v32  ;;  %4754 = vmatmul.mubr.bf16.gmra.mrb[64].mxu0 %v20364_v54  ;;  %12653 = vmatpush3.bf16.msra.mxu1 %v13486_v9 }
 0x3eb   : > { %4979 = vmatmul.mubr.bf16.gmra.mrb[24].mxu1 %v20361_v21  ;;  %v3674_v59 = vadd.f32 %v11255_v37, %v20365_v44  ;;  %4761 = vmatprep.mubr.bf16.mxu0 %v20366_v26  ;;  %v16675_v19 = vadd.f32 %v16505_v11, %v3671_v5  ;;  %v20368_v44 = vld [vmem:[#allocation78_spill] sm:$0xff] }
 0x3ec   : > { %20363 = vst [vmem:[#allocation28_spill] sm:$0xff] %v16668_v1  ;;  %v20371_v1 = vld [vmem:[#allocation137_spill] sm:$0xff] }
 0x3ed   : > { %v11256_v48 = vpop.f32.mrb[216].mxu0  ;;  %v16678_v43 = vadd.f32 %v16508_v36, %v3674_v59  ;;  %v20370_v36 = vld [vmem:[#allocation76_spill] sm:$0xff] }
 0x3ee   : > { %v11544_v42 = vpop.f32.mrb[176].mxu1  ;;  %v11257_v6 = vpop.f32.mrb[217].mxu0 }
 0x3ef   : > { %v11545_v63 = vpop.f32.mrb[177].mxu1  ;;  %v11258_v32 = vadd.f32 %v11257_v6, %v11256_v48  ;;  %v11259_v28 = vpop.f32.mrb[218].mxu0 }
 0x3f0   : > { %v16680_v10 = vadd.f32 %v11545_v63, %v11544_v42  ;;  %v11547_v37 = vpop.f32.mrb[178].mxu1  ;;  %v11260_v53 = vpop.f32.mrb[219].mxu0 }
 0x3f1   : > { %v11548_v54 = vpop.f32.mrb[179].mxu1  ;;  %v3679_v11 = vadd.f32 %v11258_v32, %v20368_v44  ;;  %v11261_v5 = vadd.f32 %v11260_v53, %v11259_v28 }
 0x3f2   : > { %20367 = vst [vmem:[#allocation86_spill] sm:$0xff] %v16680_v10  ;;  %v16683_v26 = vadd.f32 %v11548_v54, %v11547_v37  ;;  %4762 = vmatmul.mubr.bf16.gmra.mrb[68].mxu0 %v20369_v41 }
 0x3f3   : > { %v3682_v59 = vadd.f32 %v11261_v5, %v20370_v36  ;;  %4769 = vmatprep.mubr.bf16.mxu0 %v20371_v1  ;;  %v16689_v9 = vadd.f32 %v16527_v25, %v3679_v11  ;;  %v20372_v25 = vld [vmem:[#allocation138_spill] sm:$0xff]  ;;  %v20373_v11 = vld [vmem:[#allocation35_spill] sm:$0xff] }
 0x3f5   : > { %v11262_v48 = vpop.f32.mrb[220].mxu0  ;;  %v16692_v6 = vadd.f32 %v16530_v13, %v3682_v59  ;;  %v20374_v13 = vld [vmem:[#allocation139_spill] sm:$0xff] }
 0x3f6   : > { %v11550_v42 = vpop.f32.mrb[180].mxu1  ;;  %v11263_v63 = vpop.f32.mrb[221].mxu0 }
 0x3f7   : > { %v11551_v10 = vpop.f32.mrb[181].mxu1  ;;  %v11264_v32 = vadd.f32 %v11263_v63, %v11262_v48  ;;  %v11265_v37 = vpop.f32.mrb[222].mxu0 }
 0x3f8   : > { %v16694_v28 = vadd.f32 %v11551_v10, %v11550_v42  ;;  %v11553_v53 = vpop.f32.mrb[182].mxu1  ;;  %v11266_v41 = vpop.f32.mrb[223].mxu0  ;;  %v13487_v10 = vld [vmem:[#allocation8 + $0x150] sm:$0xff]  }
 0x3f9   : > { %v11554_v54 = vpop.f32.mrb[183].mxu1  ;;  %v3687_v44 = vadd.f32 %v11264_v32, %v16380_v17  ;;  %v11267_v1 = vadd.f32 %v11266_v41, %v11265_v37  ;;  %12654 = vmatprep.subr.bf16.mxu1 %v13487_v10 }
 0x3fa   : > { %v16697_v5 = vadd.f32 %v11554_v54, %v11553_v53  ;;  %4770 = vmatmul.mubr.bf16.gmra.mrb[72].mxu0 %v20372_v25  ;;  %12655 = vmatpush3.bf16.msra.mxu1 %v13487_v10 }
 0x3fb   : > { %v3690_v36 = vadd.f32 %v11267_v1, %v20373_v11  ;;  %4777 = vmatprep.mubr.bf16.mxu0 %v20374_v13  ;;  %v16703_v59 = vadd.f32 %v16547_v20, %v3687_v44  ;;  %v20377_v13 = vld [vmem:[#allocation54_spill] sm:$0xff] }
 0x3fd   : > { %v11268_v48 = vpop.f32.mrb[224].mxu0  ;;  %v16706_v63 = vadd.f32 %v16550_v14, %v3690_v36  ;;  %v20378_v36 = vld [vmem:[#allocation65_spill] sm:$0xff] }
 0x3fe   : > { %v11556_v42 = vpop.f32.mrb[184].mxu1  ;;  %v11269_v17 = vpop.f32.mrb[225].mxu0 }
 0x3ff   : > { %v11557_v32 = vpop.f32.mrb[185].mxu1  ;;  %v11270_v37 = vadd.f32 %v11269_v17, %v11268_v48  ;;  %v11271_v41 = vpop.f32.mrb[226].mxu0 }
 0x400   : > { %v16708_v53 = vadd.f32 %v11557_v32, %v11556_v42  ;;  %v11559_v54 = vpop.f32.mrb[186].mxu1  ;;  %v11272_v1 = vpop.f32.mrb[227].mxu0 }
 0x401   : > { %v11560_v25 = vpop.f32.mrb[187].mxu1  ;;  %v3695_v20 = vadd.f32 %v11270_v37, %v16404_v45  ;;  %v11273_v44 = vadd.f32 %v11272_v1, %v11271_v41 }
 0x402   : > { %20375 = vst [vmem:[#allocation59_spill] sm:$0xff] %v16708_v53  ;;  %v16711_v11 = vadd.f32 %v11560_v25, %v11559_v54  ;;  %4778 = vmatmul.mubr.bf16.gmra.mrb[76].mxu0 %v20377_v13  ;;  %v20382_v13 = vld [vmem:[#allocation110_spill] sm:$0xff] }
 0x403   : > { %v3698_v14 = vadd.f32 %v11273_v44, %v16407_v22  ;;  %4785 = vmatprep.mubr.bf16.mxu0 %v20378_v36  ;;  %v16717_v10 = vadd.f32 %v16567_v4, %v3695_v20  ;;  %v20381_v20 = vld [vmem:[#allocation63_spill] sm:$0xff] }
 0x404   : > { %20376 = vst [vmem:[#allocation22_spill] sm:$0xff] %v16711_v11 }
 0x405   : > { %v11402_v48 = vpop.f32.mrb[228].mxu0  ;;  %v16720_v17 = vadd.f32 %v16570_v7, %v3698_v14 }
 0x406   : > { %v11562_v42 = vpop.f32.mrb[188].mxu1  ;;  %v11403_v32 = vpop.f32.mrb[229].mxu0 }
 0x407   : > { %v11563_v53 = vpop.f32.mrb[189].mxu1  ;;  %v11404_v45 = vadd.f32 %v11403_v32, %v11402_v48  ;;  %v11405_v41 = vpop.f32.mrb[230].mxu0 }
 0x408   : > { %v16722_v37 = vadd.f32 %v11563_v53, %v11562_v42  ;;  %v11565_v54 = vpop.f32.mrb[190].mxu1  ;;  %v11406_v1 = vpop.f32.mrb[231].mxu0 }
 0x409   : > { %v11566_v25 = vpop.f32.mrb[191].mxu1  ;;  %v16725_v22 = vadd.f32 %v11404_v45, %v16428_v31  ;;  %v11407_v44 = vadd.f32 %v11406_v1, %v11405_v41  ;;  %v13488_v45 = vld [vmem:[#allocation8 + $0x158] sm:$0xff]  }
 0x40a   : > { %20379 = vst [vmem:[#allocation37_spill] sm:$0xff] %v16722_v37  ;;  %v16727_v4 = vadd.f32 %v11566_v25, %v11565_v54  ;;  %4786 = vmatmul.mubr.bf16.gmra.mrb[80].mxu0 %v20381_v20  ;;  %12656 = vmatprep.subr.bf16.mxu1 %v13488_v45 }
 0x40b   : > { %v16731_v7 = vadd.f32 %v11407_v44, %v16431_v0  ;;  %4793 = vmatprep.mubr.bf16.mxu0 %v20382_v13  ;;  %v20385_v44 = vld [vmem:[#allocation111_spill] sm:$0xff]  ;;  %12657 = vmatpush3.bf16.msra.mxu1 %v13488_v45  ;;  %v20386_v13 = vld [vmem:[#allocation113_spill] sm:$0xff] }
 0x40c   : > { %20380 = vst [vmem:[#allocation89_spill] sm:$0xff] %v16727_v4 }
 0x40d   : > { %v11408_v14 = vpop.f32.mrb[232].mxu0 }
 0x40e   : > { %v11568_v53 = vpop.f32.mrb[192].mxu1  ;;  %v11409_v36 = vpop.f32.mrb[233].mxu0 }
 0x40f   : > { %v11569_v48 = vpop.f32.mrb[193].mxu1  ;;  %v11410_v42 = vadd.f32 %v11409_v36, %v11408_v14  ;;  %v11411_v37 = vpop.f32.mrb[234].mxu0 }
 0x410   : > { %v16734_v32 = vadd.f32 %v11569_v48, %v11568_v53  ;;  %v11571_v31 = vpop.f32.mrb[194].mxu1  ;;  %v11412_v41 = vpop.f32.mrb[235].mxu0 }
 0x411   : > { %v11572_v54 = vpop.f32.mrb[195].mxu1  ;;  %v16737_v1 = vadd.f32 %v11410_v42, %v16452_v18  ;;  %v11413_v25 = vadd.f32 %v11412_v41, %v11411_v37 }
 0x412   : > { %20383 = vst [vmem:[#allocation88_spill] sm:$0xff] %v16734_v32  ;;  %v16739_v0 = vadd.f32 %v11572_v54, %v11571_v31  ;;  %4794 = vmatmul.mubr.bf16.gmra.mrb[84].mxu0 %v20385_v44  ;;  %v20390_v44 = vld [vmem:[#allocation115_spill] sm:$0xff] }
 0x413   : > { %v16743_v20 = vadd.f32 %v11413_v25, %v16455_v40  ;;  %4801 = vmatprep.mubr.bf16.mxu0 %v20386_v13  ;;  %v20389_v40 = vld [vmem:[#allocation114_spill] sm:$0xff] }
 0x414   : > { %20384 = vst [vmem:[#allocation92_spill] sm:$0xff] %v16739_v0 }
 0x415   : > { %v11414_v14 = vpop.f32.mrb[236].mxu0 }
 0x416   : > { %v11574_v53 = vpop.f32.mrb[196].mxu1  ;;  %v11415_v36 = vpop.f32.mrb[237].mxu0 }
 0x417   : > { %v11575_v48 = vpop.f32.mrb[197].mxu1  ;;  %v11416_v32 = vadd.f32 %v11415_v36, %v11414_v14  ;;  %v11417_v18 = vpop.f32.mrb[238].mxu0 }
 0x418   : > { %v16746_v4 = vadd.f32 %v11575_v48, %v11574_v53  ;;  %v11577_v37 = vpop.f32.mrb[198].mxu1  ;;  %v11418_v42 = vpop.f32.mrb[239].mxu0 }
 0x419   : > { %v11578_v31 = vpop.f32.mrb[199].mxu1  ;;  %v16749_v41 = vadd.f32 %v11416_v32, %v16476_v49  ;;  %v11419_v45 = vadd.f32 %v11418_v42, %v11417_v18 }
 0x41a   : > { %20387 = vst [vmem:[#allocation95_spill] sm:$0xff] %v16746_v4  ;;  %v16751_v54 = vadd.f32 %v11578_v31, %v11577_v37  ;;  %4802 = vmatmul.mubr.bf16.gmra.mrb[88].mxu0 %v20389_v40 }
 0x41b   : > { %v16755_v25 = vadd.f32 %v11419_v45, %v16479_v29  ;;  %4809 = vmatprep.mubr.bf16.mxu0 %v20390_v44  ;;  %v20393_v29 = vld [vmem:[#allocation116_spill] sm:$0xff] }
 0x41c   : > { %20388 = vst [vmem:[#allocation103_spill] sm:$0xff] %v16751_v54 }
 0x41d   : > { %v11420_v13 = vpop.f32.mrb[240].mxu0 }
 0x41e   : > { %v11580_v14 = vpop.f32.mrb[200].mxu1  ;;  %v11421_v53 = vpop.f32.mrb[241].mxu0 }
 0x41f   : > { %v11581_v36 = vpop.f32.mrb[201].mxu1  ;;  %v11422_v48 = vadd.f32 %v11421_v53, %v11420_v13  ;;  %v11423_v0 = vpop.f32.mrb[242].mxu0  ;;  %v13489_v53 = vld [vmem:[#allocation8 + $0x160] sm:$0xff]  }
 0x420   : > { %v16758_v4 = vadd.f32 %v11581_v36, %v11580_v14  ;;  %v11583_v49 = vpop.f32.mrb[202].mxu1  ;;  %v11424_v32 = vpop.f32.mrb[243].mxu0  ;;  %v13490_v36 = vld [vmem:[#allocation8 + $0x100] sm:$0xff]   ;;  %12658 = vmatprep.subr.bf16.mxu1 %v13489_v53 }
 0x421   : > { %v11584_v18 = vpop.f32.mrb[203].mxu1  ;;  %v16761_v37 = vadd.f32 %v11422_v48, %v16500_v57  ;;  %v11425_v42 = vadd.f32 %v11424_v32, %v11423_v0  ;;  %11834 = vmatprep.subr.bf16.mxu0 %v13490_v36  ;;  %12659 = vmatpush3.bf16.msra.mxu1 %v13489_v53  ;;  %v13493_v53 = vld [vmem:[#allocation8 + $0x170] sm:$0xff]  }
 0x422   : > { %20391 = vst [vmem:[#allocation93_spill] sm:$0xff] %v16758_v4  ;;  %v16763_v31 = vadd.f32 %v11584_v18, %v11583_v49  ;;  %4810 = vmatmul.mubr.bf16.gmra.mrb[92].mxu0 %v20393_v29  ;;  %v13491_v4 = vld [vmem:[#allocation8 + $0xc0] sm:$0xff]   ;;  %v13492_v49 = vld [vmem:[#allocation8 + $0x168] sm:$0xff]  }
 0x423   : > { %v16767_v45 = vadd.f32 %v11425_v42, %v16503_v33  ;;  %4817 = vmatprep.mubr.bf16.mxu0 %v20361_v21  ;;  %11835 = vmatpush3.bf16.msra.mxu0 %v13491_v4  ;;  %v13494_v4 = vld [vmem:[#allocation8 + $0x178] sm:$0xff]  }
 0x424   : > { %20392 = vst [vmem:[#allocation94_spill] sm:$0xff] %v16763_v31  ;;  %12660 = vmatprep.subr.bf16.mxu1 %v13492_v49 }
 0x425   : > { %v11426_v40 = vpop.f32.mrb[244].mxu0  ;;  %12661 = vmatpush3.bf16.msra.mxu1 %v13492_v49 }
 0x426   : > { %v11586_v44 = vpop.f32.mrb[204].mxu1  ;;  %v11427_v13 = vpop.f32.mrb[245].mxu0  ;;  %12662 = vmatprep.subr.bf16.mxu1 %v13493_v53 }
 0x427   : > { %v11587_v14 = vpop.f32.mrb[205].mxu1  ;;  %v11428_v54 = vadd.f32 %v11427_v13, %v11426_v40  ;;  %v11429_v0 = vpop.f32.mrb[246].mxu0 }
 0x428   : > { %v16770_v57 = vadd.f32 %v11587_v14, %v11586_v44  ;;  %v11589_v48 = vpop.f32.mrb[206].mxu1  ;;  %v11430_v32 = vpop.f32.mrb[247].mxu0 }
 0x429   : > { %v11590_v18 = vpop.f32.mrb[207].mxu1  ;;  %v16773_v33 = vadd.f32 %v11428_v54, %v16522_v30  ;;  %v11431_v42 = vadd.f32 %v11430_v32, %v11429_v0  ;;  %12663 = vmatpush3.bf16.msra.mxu1 %v13493_v53 }
 0x42a   : > { %20394 = vst [vmem:[#allocation98_spill] sm:$0xff] %v16770_v57  ;;  %v16775_v29 = vadd.f32 %v11590_v18, %v11589_v48  ;;  %4818 = vmatmul.mubr.bf16.gmra.mrb[96].mxu0 %v20361_v21  ;;  %12664 = vmatprep.subr.bf16.mxu1 %v13494_v4  ;;  %v13496_v21 = vld [vmem:[#allocation8 + $0xc8] sm:$0xff]  }
 0x42b   : > { %v16779_v40 = vadd.f32 %v11431_v42, %v16525_v35 }
 0x42c   : > { %20395 = vst [vmem:[#allocation97_spill] sm:$0xff] %v16775_v29 }
 0x42d   : > { %v11432_v44 = vpop.f32.mrb[248].mxu0  ;;  %12665 = vmatpush3.bf16.msra.mxu1 %v13494_v4 }
 0x42e   : > { %v11592_v13 = vpop.f32.mrb[208].mxu1  ;;  %v11433_v14 = vpop.f32.mrb[249].mxu0 }
 0x42f   : > { %v11593_v57 = vpop.f32.mrb[209].mxu1  ;;  %v11434_v36 = vadd.f32 %v11433_v14, %v11432_v44  ;;  %v11435_v30 = vpop.f32.mrb[250].mxu0  ;;  %v13495_v14 = vld [vmem:[#allocation8 + $0x108] sm:$0xff]  }
 0x430   : > { %v16781_v31 = vadd.f32 %v11593_v57, %v11592_v13  ;;  %v11595_v54 = vpop.f32.mrb[210].mxu1  ;;  %v11436_v0 = vpop.f32.mrb[251].mxu0  ;;  %11836 = vmatprep.subr.bf16.mxu0 %v13495_v14 }
 0x431   : > { %v11596_v48 = vpop.f32.mrb[211].mxu1  ;;  %v16784_v32 = vadd.f32 %v11434_v36, %v16542_v23  ;;  %v11437_v18 = vadd.f32 %v11436_v0, %v11435_v30  ;;  %11837 = vmatpush3.bf16.msra.mxu0 %v13496_v21 }
 0x432   : > { %20396 = vst [vmem:[#allocation140_spill] sm:$0xff] %v16781_v31  ;;  %v16786_v35 = vadd.f32 %v11596_v48, %v11595_v54 }
 0x433   : > { %v16789_v49 = vadd.f32 %v11437_v18, %v16545_v51 }
 0x434   : > { %20397 = vst [vmem:[#allocation100_spill] sm:$0xff] %v16786_v35 }
 0x435   : > { %v11438_v57 = vpop.f32.mrb[252].mxu0 }
 0x436   : > { %v11598_v42 = vpop.f32.mrb[212].mxu1  ;;  %v11439_v44 = vpop.f32.mrb[253].mxu0 }
 0x437   : > { %v11599_v13 = vpop.f32.mrb[213].mxu1  ;;  %v11440_v31 = vadd.f32 %v11439_v44, %v11438_v57  ;;  %v11441_v23 = vpop.f32.mrb[254].mxu0 }
 0x438   : > { %v16791_v29 = vadd.f32 %v11599_v13, %v11598_v42  ;;  %v11601_v36 = vpop.f32.mrb[214].mxu1  ;;  %v11442_v30 = vpop.f32.mrb[255].mxu0 }
 0x439   : > { %v11602_v54 = vpop.f32.mrb[215].mxu1  ;;  %v16794_v51 = vadd.f32 %v11440_v31, %v16562_v3  ;;  %v11443_v0 = vadd.f32 %v11442_v30, %v11441_v23 }
 0x43a   : > { %20398 = vst [vmem:[#allocation141_spill] sm:$0xff] %v16791_v29  ;;  %v16796_v48 = vadd.f32 %v11602_v54, %v11601_v36 }
 0x43b   : > { %v16799_v53 = vadd.f32 %v11443_v0, %v16565_v46  ;;  %v13497_v0 = vld [vmem:[#allocation8 + $0x110] sm:$0xff]  }
 0x43c   : > { %20399 = vst [vmem:[#allocation104_spill] sm:$0xff] %v16796_v48  ;;  %11838 = vmatprep.subr.bf16.mxu0 %v13497_v0 }
 0x43d   : > { %v11444_v18 = vpop.f32.mrb[0].mxu0 }
 0x43e   : > { %v11604_v57 = vpop.f32.mrb[216].mxu1  ;;  %v11445_v42 = vpop.f32.mrb[1].mxu0 }
 0x43f   : > { %v11605_v44 = vpop.f32.mrb[217].mxu1  ;;  %v11446_v13 = vadd.f32 %v11445_v42, %v11444_v18  ;;  %v11447_v29 = vpop.f32.mrb[2].mxu0  ;;  %v13498_v18 = vld [vmem:[#allocation8 + $0xd0] sm:$0xff]  }
 0x440   : > { %v16801_v4 = vadd.f32 %v11605_v44, %v11604_v57  ;;  %v11607_v35 = vpop.f32.mrb[218].mxu1  ;;  %v11448_v14 = vpop.f32.mrb[3].mxu0  ;;  %11839 = vmatpush3.bf16.msra.mxu0 %v13498_v18 }
 0x441   : > { %v11608_v11 = vpop.f32.mrb[219].mxu1  ;;  %v16804_v3 = vadd.f32 %v11446_v13, %v16582_v12  ;;  %v11449_v31 = vadd.f32 %v11448_v14, %v11447_v29 }
 0x442   : > { %20400 = vst [vmem:[#allocation142_spill] sm:$0xff] %v16801_v4  ;;  %v16806_v23 = vadd.f32 %v11608_v11, %v11607_v35 }
 0x443   : > { %v16809_v46 = vadd.f32 %v11449_v31, %v16585_v2 }
 0x444   : > { %20401 = vst [vmem:[#allocation117_spill] sm:$0xff] %v16806_v23 }
 0x445   : > { %20402 = vst [vmem:[#allocation143_spill] sm:$0xff] %v16809_v46  ;;  %v11450_v21 = vpop.f32.mrb[4].mxu0 }
 0x446   : > { %v11738_v36 = vpop.f32.mrb[220].mxu1  ;;  %v11451_v30 = vpop.f32.mrb[5].mxu0 }
 0x447   : > { %v11739_v54 = vpop.f32.mrb[221].mxu1  ;;  %v11452_v57 = vadd.f32 %v11451_v30, %v11450_v21  ;;  %v11453_v44 = vpop.f32.mrb[6].mxu0 }
 0x448   : > { %v16811_v42 = vadd.f32 %v11739_v54, %v11738_v36  ;;  %v11741_v4 = vpop.f32.mrb[222].mxu1  ;;  %v11454_v48 = vpop.f32.mrb[7].mxu0 }
 0x449   : > { %v11742_v12 = vpop.f32.mrb[223].mxu1  ;;  %v16814_v11 = vadd.f32 %v11452_v57, %v16602_v47  ;;  %v11455_v29 = vadd.f32 %v11454_v48, %v11453_v44 }
 0x44a   : > { %v16816_v2 = vadd.f32 %v11742_v12, %v11741_v4 }
 0x44b   : > { %20403 = vst [vmem:[#allocation120_spill] sm:$0xff] %v16814_v11  ;;  %v16819_v35 = vadd.f32 %v11455_v29, %v16605_v16  ;;  %v13499_v29 = vld [vmem:[#allocation8 + $0x118] sm:$0xff]  }
 0x44c   : > { %11840 = vmatprep.subr.bf16.mxu0 %v13499_v29 }
 0x44d   : > { %20404 = vst [vmem:[#allocation84_spill] sm:$0xff] %v16819_v35  ;;  %v11456_v13 = vpop.f32.mrb[8].mxu0 }
 0x44e   : > { %v11744_v14 = vpop.f32.mrb[224].mxu1  ;;  %v11457_v31 = vpop.f32.mrb[9].mxu0 }
 0x44f   : > { %v11745_v21 = vpop.f32.mrb[225].mxu1  ;;  %v11458_v36 = vadd.f32 %v11457_v31, %v11456_v13  ;;  %v11459_v54 = vpop.f32.mrb[10].mxu0  ;;  %v13500_v13 = vld [vmem:[#allocation8 + $0xd8] sm:$0xff]  }
 0x450   : > { %v16821_v30 = vadd.f32 %v11745_v21, %v11744_v14  ;;  %v11747_v23 = vpop.f32.mrb[226].mxu1  ;;  %v11460_v0 = vpop.f32.mrb[11].mxu0  ;;  %11841 = vmatpush3.bf16.msra.mxu0 %v13500_v13 }
 0x451   : > { %v11748_v46 = vpop.f32.mrb[227].mxu1  ;;  %v16824_v47 = vadd.f32 %v11458_v36, %v16622_v15  ;;  %v11461_v48 = vadd.f32 %v11460_v0, %v11459_v54 }
 0x452   : > { %v16826_v4 = vadd.f32 %v11748_v46, %v11747_v23 }
 0x453   : > { %20405 = vst [vmem:[#allocation144_spill] sm:$0xff] %v16824_v47  ;;  %v16829_v16 = vadd.f32 %v11461_v48, %v16625_v60 }
 0x455   : > { %20406 = vst [vmem:[#allocation91_spill] sm:$0xff] %v16829_v16  ;;  %v11462_v18 = vpop.f32.mrb[12].mxu0 }
 0x456   : > { %v11750_v57 = vpop.f32.mrb[228].mxu1  ;;  %v11463_v44 = vpop.f32.mrb[13].mxu0 }
 0x457   : > { %v11751_v12 = vpop.f32.mrb[229].mxu1  ;;  %v11464_v14 = vadd.f32 %v11463_v44, %v11462_v18  ;;  %v11465_v21 = vpop.f32.mrb[14].mxu0 }
 0x458   : > { %v16831_v31 = vadd.f32 %v11751_v12, %v11750_v57  ;;  %v11753_v35 = vpop.f32.mrb[230].mxu1  ;;  %v11466_v11 = vpop.f32.mrb[15].mxu0 }
 0x459   : > { %v11754_v15 = vpop.f32.mrb[231].mxu1  ;;  %v16834_v23 = vadd.f32 %v11464_v14, %v16642_v62  ;;  %v11467_v46 = vadd.f32 %v11466_v11, %v11465_v21 }
 0x45a   : > { %v16836_v60 = vadd.f32 %v11754_v15, %v11753_v35 }
 0x45b   : > { %20407 = vst [vmem:[#allocation81_spill] sm:$0xff] %v16834_v23  ;;  %v16839_v36 = vadd.f32 %v11467_v46, %v16645_v58  ;;  %v13501_v46 = vld [vmem:[#allocation8 + $0x40] sm:$0xff]  }
 0x45c   : > { %v13504_v23 = vld [vmem:[#allocation8 + $0xe0] sm:$0xff]   ;;  %11970 = vmatprep.subr.bf16.mxu1 %v13501_v46 }
 0x45d   : > { %20408 = vst [vmem:[#allocation145_spill] sm:$0xff] %v16839_v36  ;;  %v11468_v54 = vpop.f32.mrb[16].mxu0 }
 0x45e   : > { %v11756_v0 = vpop.f32.mrb[232].mxu1  ;;  %v11469_v48 = vpop.f32.mrb[17].mxu0 }
 0x45f   : > { %v11757_v18 = vpop.f32.mrb[233].mxu1  ;;  %v11470_v57 = vadd.f32 %v11469_v48, %v11468_v54  ;;  %v11471_v12 = vpop.f32.mrb[18].mxu0  ;;  %v13503_v54 = vld [vmem:[#allocation8 + $0x120] sm:$0xff]  }
 0x460   : > { %v16841_v44 = vadd.f32 %v11757_v18, %v11756_v0  ;;  %v11759_v16 = vpop.f32.mrb[234].mxu1  ;;  %v11472_v29 = vpop.f32.mrb[19].mxu0  ;;  %11842 = vmatprep.subr.bf16.mxu0 %v13503_v54 }
 0x461   : > { %v11760_v47 = vpop.f32.mrb[235].mxu1  ;;  %v16844_v62 = vadd.f32 %v11470_v57, %v16660_v34  ;;  %v11473_v11 = vadd.f32 %v11472_v29, %v11471_v12  ;;  %11843 = vmatpush3.bf16.msra.mxu0 %v13504_v23 }
 0x462   : > { %v16846_v35 = vadd.f32 %v11760_v47, %v11759_v16 }
 0x463   : > { %20409 = vst [vmem:[#allocation121_spill] sm:$0xff] %v16844_v62  ;;  %v16849_v58 = vadd.f32 %v11473_v11, %v16663_v24 }
 0x465   : > { %20410 = vst [vmem:[#allocation146_spill] sm:$0xff] %v16849_v58  ;;  %v11474_v13 = vpop.f32.mrb[20].mxu0 }
 0x466   : > { %v11762_v14 = vpop.f32.mrb[236].mxu1  ;;  %v11475_v21 = vpop.f32.mrb[21].mxu0 }
 0x467   : > { %v11763_v15 = vpop.f32.mrb[237].mxu1  ;;  %v11476_v0 = vadd.f32 %v11475_v21, %v11474_v13  ;;  %v11477_v18 = vpop.f32.mrb[22].mxu0 }
 0x468   : > { %v16851_v48 = vadd.f32 %v11763_v15, %v11762_v14  ;;  %v11765_v36 = vpop.f32.mrb[238].mxu1  ;;  %v11478_v34 = vpop.f32.mrb[23].mxu0 }
 0x469   : > { %v11766_v57 = vpop.f32.mrb[239].mxu1  ;;  %v16854_v47 = vadd.f32 %v11476_v0, %v16675_v19  ;;  %v11479_v24 = vadd.f32 %v11478_v34, %v11477_v18 }
 0x46a   : > { %v16856_v16 = vadd.f32 %v11766_v57, %v11765_v36 }
 0x46b   : > { %20411 = vst [vmem:[#allocation123_spill] sm:$0xff] %v16854_v47  ;;  %v16859_v12 = vadd.f32 %v11479_v24, %v16678_v43  ;;  %v13509_v24 = vld [vmem:[#allocation8 + $0x128] sm:$0xff]  }
 0x46c   : > { %11844 = vmatprep.subr.bf16.mxu0 %v13509_v24 }
 0x46d   : > { %20412 = vst [vmem:[#allocation147_spill] sm:$0xff] %v16859_v12  ;;  %v11480_v29 = vpop.f32.mrb[24].mxu0  ;;  %v13510_v12 = vld [vmem:[#allocation8 + $0xe8] sm:$0xff]  }
 0x46e   : > { %v11768_v11 = vpop.f32.mrb[240].mxu1  ;;  %v11481_v13 = vpop.f32.mrb[25].mxu0  ;;  %11845 = vmatpush3.bf16.msra.mxu0 %v13510_v12 }
 0x46f   : > { %v11769_v14 = vpop.f32.mrb[241].mxu1  ;;  %v11482_v21 = vadd.f32 %v11481_v13, %v11480_v29  ;;  %v11483_v58 = vpop.f32.mrb[26].mxu0 }
 0x470   : > { %v16861_v15 = vadd.f32 %v11769_v14, %v11768_v11  ;;  %v11771_v46 = vpop.f32.mrb[242].mxu1  ;;  %v11484_v54 = vpop.f32.mrb[27].mxu0 }
 0x471   : > { %v11772_v62 = vpop.f32.mrb[243].mxu1  ;;  %v16864_v19 = vadd.f32 %v11482_v21, %v16689_v9  ;;  %v11485_v36 = vadd.f32 %v11484_v54, %v11483_v58 }
 0x472   : > { %v16866_v0 = vadd.f32 %v11772_v62, %v11771_v46 }
 0x473   : > { %20413 = vst [vmem:[#allocation126_spill] sm:$0xff] %v16864_v19  ;;  %v16869_v43 = vadd.f32 %v11485_v36, %v16692_v6 }
 0x475   : > { %20414 = vst [vmem:[#allocation148_spill] sm:$0xff] %v16869_v43  ;;  %v11486_v23 = vpop.f32.mrb[28].mxu0 }
 0x476   : > { %v11774_v18 = vpop.f32.mrb[244].mxu1  ;;  %v11487_v34 = vpop.f32.mrb[29].mxu0 }
 0x477   : > { %v11775_v57 = vpop.f32.mrb[245].mxu1  ;;  %v11488_v29 = vadd.f32 %v11487_v34, %v11486_v23  ;;  %v11489_v13 = vpop.f32.mrb[30].mxu0 }
 0x478   : > { %v16871_v11 = vadd.f32 %v11775_v57, %v11774_v18  ;;  %v11777_v14 = vpop.f32.mrb[246].mxu1  ;;  %v11490_v47 = vpop.f32.mrb[31].mxu0 }
 0x479   : > { %v11778_v9 = vpop.f32.mrb[247].mxu1  ;;  %v16874_v62 = vadd.f32 %v11488_v29, %v16703_v59  ;;  %v11491_v58 = vadd.f32 %v11490_v47, %v11489_v13 }
 0x47a   : > { %v16876_v6 = vadd.f32 %v11778_v9, %v11777_v14 }
 0x47b   : > { %20415 = vst [vmem:[#allocation39_spill] sm:$0xff] %v16874_v62  ;;  %v16879_v21 = vadd.f32 %v11491_v58, %v16706_v63  ;;  %v13515_v58 = vld [vmem:[#allocation8 + $0x130] sm:$0xff]  }
 0x47c   : > { %11846 = vmatprep.subr.bf16.mxu0 %v13515_v58 }
 0x47d   : > { %20416 = vst [vmem:[#allocation149_spill] sm:$0xff] %v16879_v21  ;;  %v11492_v46 = vpop.f32.mrb[32].mxu0  ;;  %v13516_v21 = vld [vmem:[#allocation8 + $0xf0] sm:$0xff]  }
 0x47e   : > { %v11780_v54 = vpop.f32.mrb[248].mxu1  ;;  %v11493_v36 = vpop.f32.mrb[33].mxu0  ;;  %11847 = vmatpush3.bf16.msra.mxu0 %v13516_v21 }
 0x47f   : > { %v11781_v23 = vpop.f32.mrb[249].mxu1  ;;  %v11494_v18 = vadd.f32 %v11493_v36, %v11492_v46  ;;  %v11495_v57 = vpop.f32.mrb[34].mxu0 }
 0x480   : > { %v16881_v34 = vadd.f32 %v11781_v23, %v11780_v54  ;;  %v11783_v43 = vpop.f32.mrb[250].mxu1  ;;  %v11496_v24 = vpop.f32.mrb[35].mxu0 }
 0x481   : > { %v11784_v19 = vpop.f32.mrb[251].mxu1  ;;  %v16884_v59 = vadd.f32 %v11494_v18, %v16717_v10  ;;  %v11497_v47 = vadd.f32 %v11496_v24, %v11495_v57  ;;  %v16901_v24 = vld [vmem:[%s19062_s4] ss:$0 sm:$0xff] }
 0x482   : > { %v16886_v29 = vadd.f32 %v11784_v19, %v11783_v43 }
 0x483   : > { %v16889_v63 = vadd.f32 %v11497_v47, %v16720_v17 }
 0x485   : > { %20417 = vst [vmem:[#allocation41_spill] sm:$0xff] %v16889_v63  ;;  %v11626_v12 = vpop.f32.mrb[36].mxu0 }
 0x486   : > { %v11786_v13 = vpop.f32.mrb[252].mxu1  ;;  %v11627_v14 = vpop.f32.mrb[37].mxu0 }
 0x487   : > { %v11787_v9 = vpop.f32.mrb[253].mxu1  ;;  %v11628_v46 = vadd.f32 %v11627_v14, %v11626_v12  ;;  %v11629_v36 = vpop.f32.mrb[38].mxu0 }
 0x488   : > { %v16891_v54 = vadd.f32 %v11787_v9, %v11786_v13  ;;  %v11789_v23 = vpop.f32.mrb[254].mxu1  ;;  %v11630_v62 = vpop.f32.mrb[39].mxu0 }
 0x489   : > { %v11790_v10 = vpop.f32.mrb[255].mxu1  ;;  %v4700_v19 = vadd.f32 %v11628_v46, %v16587_v55  ;;  %v11631_v43 = vadd.f32 %v11630_v62, %v11629_v36 }
 0x48a   : > { %v16894_v18 = vadd.f32 %v11790_v10, %v11789_v23 }
 0x48b   : > { %v4861_v17 = vadd.f32 %v16811_v42, %v4700_v19  ;;  %v4703_v57 = vadd.f32 %v11631_v43, %v16590_v38 }
 0x48d   : > { %v4987_v47 = vadd.f32 %v4861_v17, %v16725_v22  ;;  %v4864_v12 = vadd.f32 %v16816_v2, %v4703_v57  ;;  %v11632_v13 = vpop.f32.mrb[40].mxu0  ;;  %v13521_v17 = vld [vmem:[#allocation8 + $0x138] sm:$0xff]  }
 0x48e   : > { %v11792_v14 = vpop.f32.mrb[0].mxu1  ;;  %v11633_v55 = vpop.f32.mrb[41].mxu0  ;;  %11848 = vmatprep.subr.bf16.mxu0 %v13521_v17 }
 0x48f   : > { %v11793_v62 = vpop.f32.mrb[1].mxu1  ;;  %v4988_v9 = vadd.f32 %v4864_v12, %v16731_v7  ;;  %v11634_v21 = vadd.f32 %v11633_v55, %v11632_v13  ;;  %v11635_v42 = vpop.f32.mrb[42].mxu0  ;;  %v5026_v46 = vadd.f32 %v16901_v24, %v4987_v47  ;;  %v13522_v7 = vld [vmem:[#allocation8 + $0xf8] sm:$0xff]  }
 0x490   : > { %v16906_v58 = vadd.f32 %v11793_v62, %v11792_v14  ;;  %v11795_v38 = vpop.f32.mrb[2].mxu1  ;;  %v11636_v36 = vpop.f32.mrb[43].mxu0  ;;  %11849 = vmatpush3.bf16.msra.mxu0 %v13522_v7 }
 0x491   : > { %v11796_v23 = vpop.f32.mrb[3].mxu1  ;;  %v4708_v10 = vadd.f32 %v11634_v21, %v16607_v50  ;;  %v11637_v22 = vadd.f32 %v11636_v36, %v11635_v42  ;;  %v5027_v2 = vadd.f32 %v16901_v24, %v4988_v9  ;;  %vm5058_vm4 = vcmp.ge.f32.partialorder %v5026_v46, 0.0 }
 0x492   : > { %v16910_v19 = vadd.f32 %v11796_v23, %v11795_v38  ;;  %v5090_v43 = vmul.f32 0.2, %v5026_v46 }
 0x493   : > { %v4869_v57 = vadd.f32 %v16821_v30, %v4708_v10  ;;  %v4711_v12 = vadd.f32 %v11637_v22, %v16610_v56  ;;  %vm5059_vm11 = vcmp.ge.f32.partialorder %v5027_v2, 0.0  ;;  %v5091_v13 = vmul.f32 0.2, %v5027_v2 }
 0x494   : > { %v16915_v47 = vsel %vm5058_vm4, %v5026_v46, %v5090_v43  ;;  %v20419_v43 = vld [vmem:[#allocation13_spill] sm:$0xff] }
 0x495   : > { %v4989_v50 = vadd.f32 %v4869_v57, %v16737_v1  ;;  %v4872_v14 = vadd.f32 %v16826_v4, %v4711_v12  ;;  %v11638_v55 = vpop.f32.mrb[44].mxu0  ;;  %v5123_v9 = vsel %vm5059_vm11, %v5027_v2, %v5091_v13  ;;  %v19464_v38 = vrot.slane %v16915_v47, 7 }
 0x496   : > { %v11798_v62 = vpop.f32.mrb[4].mxu1  ;;  %v11639_v21 = vpop.f32.mrb[45].mxu0  ;;  %v5155_v30 = vrot.slane %v5123_v9, 7  ;;  %v16921_v56 = vpack.c.bf16 %v5123_v9, %v16915_v47  ;;  %vm20420_vm11 = vcmp.lt.s32.totalorder %v20419_v43, 1  ;;  %v5251_v7 = vrot.slane %v5123_v9, 1 }
 0x497   : > { %v11799_v42 = vpop.f32.mrb[5].mxu1  ;;  %v5028_v46 = vadd.f32 %v16901_v24, %v4989_v50  ;;  %v4990_v36 = vadd.f32 %v4872_v14, %v16743_v20  ;;  %v11640_v23 = vadd.f32 %v11639_v21, %v11638_v55  ;;  %v11641_v4 = vpop.f32.mrb[46].mxu0  ;;  %v19468_v14 = vrot.slane %v16915_v47, 1 }
 0x498   : > { %20418 = vst [vmem:[#allocation83_spill] sm:$0xff] %v16921_v56  ;;  %v16925_v1 = vadd.f32 %v11799_v42, %v11798_v62  ;;  %v11801_v10 = vpop.f32.mrb[6].mxu1  ;;  %v11642_v22 = vpop.f32.mrb[47].mxu0  ;;  %v16931_v17 = vsel %vm20420_vm11, %v19464_v38, %v5155_v30  ;;  %5766 = vmatprep.mubr.bf16.mxu0 %v16921_v56  ;;  %vm20422_vm11 = vcmp.lt.s32.totalorder %v20419_v43, 7 }
 0x499   : > { %v11802_v2 = vpop.f32.mrb[7].mxu1  ;;  %20421 = vst [vmem:[#allocation18_spill] sm:$0xff] %v16931_v17  ;;  %vm5060_vm4 = vcmp.ge.f32.partialorder %v5028_v46, 0.0  ;;  %v5092_v57 = vmul.f32 0.2, %v5028_v46  ;;  %v5029_v20 = vadd.f32 %v16901_v24, %v4990_v36  ;;  %v4716_v12 = vadd.f32 %v11640_v23, %v16627_v27  ;;  %v13526_v23 = vld [vmem:[#allocation8 + $0x1c0] sm:$0xff]  }
 0x49a   : > { %v11643_v13 = vadd.f32 %v11642_v22, %v11641_v4  ;;  %v16936_v50 = vadd.f32 %v11802_v2, %v11801_v10  ;;  %v5312_v27 = vsel %vm20422_vm11, %v19468_v14, %v5251_v7  ;;  %12106 = vmatprep.subr.bf16.mxu0 %v13526_v23 }
 0x49b   : > { %v5124_v55 = vsel %vm5060_vm4, %v5028_v46, %v5092_v57  ;;  %vm5061_vm6 = vcmp.ge.f32.partialorder %v5029_v20, 0.0  ;;  %v5093_v62 = vmul.f32 0.2, %v5029_v20  ;;  %v4877_v21 = vadd.f32 %v16831_v31, %v4716_v12 }
 0x49c   : > { %v4719_v9 = vadd.f32 %v11643_v13, %v16630_v8  ;;  %v5156_v42 = vrot.slane %v5124_v55, 7  ;;  %v5252_v38 = vrot.slane %v5124_v55, 1  ;;  %vm20423_vm4 = vcmp.lt.s32.totalorder %v20419_v43, 1 }
 0x49d   : > { %v5125_v56 = vsel %vm5061_vm6, %v5029_v20, %v5093_v62  ;;  %v4991_v17 = vadd.f32 %v4877_v21, %v16749_v41  ;;  %v11644_v36 = vpop.f32.mrb[48].mxu0  ;;  %vm20424_vm6 = vmmov %vm20422_vm11 }
 0x49e   : > { %v11804_v63 = vpop.f32.mrb[8].mxu1  ;;  %v5157_v46 = vrot.slane %v5125_v56, 7  ;;  %v5253_v4 = vrot.slane %v5125_v56, 1  ;;  %v4880_v10 = vadd.f32 %v16836_v60, %v4719_v9  ;;  %v5215_v8 = vsel %vm20423_vm4, %v5155_v30, %v5156_v42  ;;  %v11645_v31 = vpop.f32.mrb[49].mxu0  ;;  %vm20425_vm11 = vmmov %vm20423_vm4 }
 0x49f   : > { %v11805_v22 = vpop.f32.mrb[9].mxu1  ;;  %v5030_v2 = vadd.f32 %v16901_v24, %v4991_v17  ;;  %v11646_v41 = vadd.f32 %v11645_v31, %v11644_v36  ;;  %v11647_v20 = vpop.f32.mrb[50].mxu0  ;;  %v5311_v13 = vsel %vm20424_vm6, %v5251_v7, %v5252_v38  ;;  %vm20426_vm4 = vmmov %vm20424_vm6 }
 0x4a0   : > { %v16950_v57 = vadd.f32 %v11805_v22, %v11804_v63  ;;  %v11807_v12 = vpop.f32.mrb[10].mxu1  ;;  %v4992_v62 = vadd.f32 %v4880_v10, %v16755_v25  ;;  %v5214_v60 = vsel %vm20425_vm11, %v5156_v42, %v5157_v46  ;;  %v11648_v21 = vpop.f32.mrb[51].mxu0  ;;  %v5310_v9 = vsel %vm20426_vm4, %v5252_v38, %v5253_v4 }
 0x4a1   : > { %v11808_v30 = vpop.f32.mrb[11].mxu1  ;;  %v16959_v17 = vpack.c.bf16 %v5311_v13, %v5312_v27  ;;  %vm5062_vm0 = vcmp.ge.f32.partialorder %v5030_v2, 0.0  ;;  %v5094_v63 = vmul.f32 0.2, %v5030_v2  ;;  %v16961_v36 = vpack.c.bf16 %v5214_v60, %v5215_v8 }
 0x4a2   : > { %v4724_v31 = vadd.f32 %v11646_v41, %v16647_v61  ;;  %v5031_v7 = vadd.f32 %v16901_v24, %v4992_v62  ;;  %v11649_v23 = vadd.f32 %v11648_v21, %v11647_v20  ;;  %v16965_v25 = vadd.f32 %v11808_v30, %v11807_v12 }
 0x4a3   : > { %20427 = vst [vmem:[#allocation150_spill] sm:$0xff] %v16959_v17  ;;  %12666 = vmatprep.mubr.msk.bf16.mxu1 %vm20229_vm9, %v16959_v17  ;;  %v16970_v10 = vpack.c.bf16 %v5125_v56, %v5124_v55  ;;  %v5126_v38 = vsel %vm5062_vm0, %v5030_v2, %v5094_v63 }
 0x4a4   : > { %v4885_v27 = vadd.f32 %v16841_v44, %v4724_v31  ;;  %v5158_v22 = vrot.slane %v5126_v38, 7  ;;  %v5254_v13 = vrot.slane %v5126_v38, 1  ;;  %vm5063_vm6 = vcmp.ge.f32.partialorder %v5031_v7, 0.0  ;;  %v13502_v44 = vld [vmem:[#allocation8] sm:$0xff]  }
 0x4a5   : > { %v5095_v8 = vmul.f32 0.2, %v5031_v7  ;;  %v4727_v41 = vadd.f32 %v11649_v23, %v16650_v39  ;;  %v11650_v20 = vpop.f32.mrb[52].mxu0  ;;  %v13505_v23 = vld [vmem:[#allocation8 + $0x48] sm:$0xff]  }
 0x4a6   : > { %v4993_v61 = vadd.f32 %v4885_v27, %v16761_v37  ;;  %v11810_v12 = vpop.f32.mrb[12].mxu1  ;;  %v5213_v62 = vsel %vm20425_vm11, %v5157_v46, %v5158_v22  ;;  %v5309_v56 = vsel %vm20426_vm4, %v5253_v4, %v5254_v13  ;;  %v11651_v55 = vpop.f32.mrb[53].mxu0 }
 0x4a7   : > { %v11811_v2 = vpop.f32.mrb[13].mxu1  ;;  %v5127_v60 = vsel %vm5063_vm6, %v5031_v7, %v5095_v8  ;;  %v4888_v30 = vadd.f32 %v16846_v35, %v4727_v41  ;;  %v16981_v63 = vpack.c.bf16 %v5309_v56, %v5310_v9  ;;  %v11652_v37 = vadd.f32 %v11651_v55, %v11650_v20  ;;  %v11653_v39 = vpop.f32.mrb[54].mxu0  ;;  %vm20430_vm6 = vmmov %vm20425_vm11 }
 0x4a8   : > { %v5032_v21 = vadd.f32 %v16901_v24, %v4993_v61  ;;  %v11813_v31 = vpop.f32.mrb[14].mxu1  ;;  %v16983_v27 = vadd.f32 %v11811_v2, %v11810_v12  ;;  %v11654_v46 = vpop.f32.mrb[55].mxu0  ;;  %v5159_v42 = vrot.slane %v5127_v60, 7  ;;  %v5255_v4 = vrot.slane %v5127_v60, 1  ;;  %vm20431_vm11 = vmmov %vm20426_vm4  ;;  %v13506_v12 = vld [vmem:[#allocation8 + $0x8] sm:$0xff]   ;;  %v13507_v2 = vld [vmem:[#allocation8 + $0x50] sm:$0xff]  }
 0x4a9   : > { %v11814_v14 = vpop.f32.mrb[15].mxu1  ;;  %v16985_v17 = vpack.c.bf16 %v5127_v60, %v5126_v38  ;;  %v4994_v8 = vadd.f32 %v4888_v30, %v16767_v45  ;;  %v4732_v35 = vadd.f32 %v11652_v37, %v16665_v52  ;;  %12667 = vmatmul.mubr.msk.bf16.vlgmr.msra.gmra.mrb[28].mxu1 %vm20235_vm5, %v16981_v63  ;;  %v11655_v61 = vadd.f32 %v11654_v46, %v11653_v39  ;;  %v20432_v60 = vld [vmem:[#allocation28_spill] sm:$0xff] }
 0x4aa   : > { %vm5064_vm0 = vcmp.ge.f32.partialorder %v5032_v21, 0.0  ;;  %v5096_v7 = vmul.f32 0.2, %v5032_v21  ;;  %v16992_v41 = vadd.f32 %v11814_v14, %v11813_v31  ;;  %v5212_v20 = vsel %vm20430_vm6, %v5158_v22, %v5159_v42  ;;  %11971 = vmatpush3.bf16.msra.mxu1 %v13502_v44 }
 0x4ab   : > { %v5308_v38 = vsel %vm20431_vm11, %v5254_v13, %v5255_v4  ;;  %v5033_v56 = vadd.f32 %v16901_v24, %v4994_v8  ;;  %v4893_v45 = vadd.f32 %v16851_v48, %v4732_v35  ;;  %v17000_v55 = vpack.c.bf16 %v5212_v20, %v5213_v62  ;;  %11972 = vmatprep.subr.bf16.mxu1 %v13505_v23  ;;  %v13508_v20 = vld [vmem:[#allocation8 + $0x10] sm:$0xff]  }
 0x4ac   : > { %v5128_v52 = vsel %vm5064_vm0, %v5032_v21, %v5096_v7  ;;  %v4735_v14 = vadd.f32 %v11655_v61, %v20432_v60  ;;  %vm20433_vm0 = vmmov %vm20430_vm6 }
 0x4ad   : > { %v5160_v30 = vrot.slane %v5128_v52, 7  ;;  %v5256_v37 = vrot.slane %v5128_v52, 1  ;;  %vm5065_vm4 = vcmp.ge.f32.partialorder %v5033_v56, 0.0  ;;  %v5097_v22 = vmul.f32 0.2, %v5033_v56  ;;  %v11656_v13 = vpop.f32.mrb[56].mxu0  ;;  %vm20434_vm6 = vmmov %vm20431_vm11 }
 0x4ae   : > { %v4995_v39 = vadd.f32 %v4893_v45, %v16773_v33  ;;  %v11816_v44 = vpop.f32.mrb[16].mxu1  ;;  %v4896_v31 = vadd.f32 %v16856_v16, %v4735_v14  ;;  %v11657_v46 = vpop.f32.mrb[57].mxu0  ;;  %11973 = vmatpush3.bf16.msra.mxu1 %v13506_v12 }
 0x4af   : > { %v11817_v8 = vpop.f32.mrb[17].mxu1  ;;  %v5211_v48 = vsel %vm20433_vm0, %v5159_v42, %v5160_v30  ;;  %v5307_v62 = vsel %vm20434_vm6, %v5255_v4, %v5256_v37  ;;  %v5129_v21 = vsel %vm5065_vm4, %v5033_v56, %v5097_v22  ;;  %v11658_v7 = vadd.f32 %v11657_v46, %v11656_v13  ;;  %v11659_v33 = vpop.f32.mrb[58].mxu0  ;;  %11974 = vmatprep.subr.bf16.mxu1 %v13507_v2  ;;  %v13511_v4 = vld [vmem:[#allocation8 + $0x58] sm:$0xff]   ;;  %v20435_v56 = vld [vmem:[#allocation86_spill] sm:$0xff]  ;;  %vm20436_vm4 = vmmov %vm20433_vm0 }
 0x4b0   : > { %v5034_v23 = vadd.f32 %v16901_v24, %v4995_v39  ;;  %v17010_v35 = vadd.f32 %v11817_v8, %v11816_v44  ;;  %v11819_v61 = vpop.f32.mrb[18].mxu1  ;;  %v5161_v16 = vrot.slane %v5129_v21, 7  ;;  %v5257_v45 = vrot.slane %v5129_v21, 1  ;;  %v11660_v14 = vpop.f32.mrb[59].mxu0  ;;  %vm20437_vm0 = vmmov %vm20434_vm6 }
 0x4b1   : > { %v4996_v60 = vadd.f32 %v4896_v31, %v16779_v40  ;;  %v11820_v42 = vpop.f32.mrb[19].mxu1  ;;  %v17013_v9 = vpack.c.bf16 %v5307_v62, %v5308_v38  ;;  %v4740_v22 = vadd.f32 %v11658_v7, %v20435_v56  ;;  %v11661_v39 = vadd.f32 %v11660_v14, %v11659_v33  ;;  %v13512_v7 = vld [vmem:[#allocation8 + $0x18] sm:$0xff]   ;;  %v13517_v31 = vld [vmem:[#allocation8 + $0x68] sm:$0xff]  }
 0x4b2   : > { %vm5066_vm11 = vcmp.ge.f32.partialorder %v5034_v23, 0.0  ;;  %v5098_v12 = vmul.f32 0.2, %v5034_v23  ;;  %v17017_v44 = vadd.f32 %v11820_v42, %v11819_v61  ;;  %v5210_v2 = vsel %vm20436_vm4, %v5160_v30, %v5161_v16  ;;  %11975 = vmatpush3.bf16.msra.mxu1 %v13508_v20 }
 0x4b3   : > { %v5035_v13 = vadd.f32 %v16901_v24, %v4996_v60  ;;  %v5306_v40 = vsel %vm20437_vm0, %v5256_v37, %v5257_v45  ;;  %12670 = vmatprep.mubr.msk.bf16.mxu1 %vm20245_vm3, %v17013_v9  ;;  %v4901_v46 = vadd.f32 %v16861_v15, %v4740_v22  ;;  %v4743_v8 = vadd.f32 %v11661_v39, %v16683_v26  ;;  %v13513_v60 = vld [vmem:[#allocation8 + $0x60] sm:$0xff]  }
 0x4b4   : > { %v5130_v38 = vsel %vm5066_vm11, %v5034_v23, %v5098_v12  ;;  %v17028_v62 = vpack.c.bf16 %v5210_v2, %v5211_v48  ;;  %11976 = vmatprep.subr.bf16.mxu1 %v13511_v4  ;;  %v17032_v12 = vpack.c.bf16 %v5129_v21, %v5128_v52  ;;  %vm20439_vm11 = vmmov %vm20436_vm4  ;;  %v13514_v52 = vld [vmem:[#allocation8 + $0x20] sm:$0xff]  }
 0x4b5   : > { %v5162_v33 = vrot.slane %v5130_v38, 7  ;;  %v5258_v61 = vrot.slane %v5130_v38, 1  ;;  %vm5067_vm6 = vcmp.ge.f32.partialorder %v5035_v13, 0.0  ;;  %v5099_v30 = vmul.f32 0.2, %v5035_v13  ;;  %v11662_v42 = vpop.f32.mrb[60].mxu0  ;;  %vm20440_vm4 = vmmov %vm20437_vm0 }
 0x4b6   : > { %v4997_v37 = vadd.f32 %v4901_v46, %v16784_v32  ;;  %v4904_v14 = vadd.f32 %v16866_v0, %v4743_v8  ;;  %v11822_v23 = vpop.f32.mrb[20].mxu1  ;;  %v11663_v48 = vpop.f32.mrb[61].mxu0  ;;  %11977 = vmatpush3.bf16.msra.mxu1 %v13512_v7 }
 0x4b7   : > { %v5209_v26 = vsel %vm20439_vm11, %v5161_v16, %v5162_v33  ;;  %v5305_v15 = vsel %vm20440_vm4, %v5257_v45, %v5258_v61  ;;  %v11823_v20 = vpop.f32.mrb[21].mxu1  ;;  %v5131_v56 = vsel %vm5067_vm6, %v5035_v13, %v5099_v30  ;;  %v11664_v0 = vadd.f32 %v11663_v48, %v11662_v42  ;;  %v11665_v39 = vpop.f32.mrb[62].mxu0  ;;  %11978 = vmatprep.subr.bf16.mxu1 %v13513_v60  ;;  %vm20442_vm6 = vmmov %vm20439_vm11 }
 0x4b8   : > { %v5036_v4 = vadd.f32 %v16901_v24, %v4997_v37  ;;  %v4998_v22 = vadd.f32 %v4904_v14, %v16789_v49  ;;  %v17040_v32 = vpack.c.bf16 %v5305_v15, %v5306_v40  ;;  %v11825_v2 = vpop.f32.mrb[22].mxu1  ;;  %v17042_v21 = vadd.f32 %v11823_v20, %v11822_v23  ;;  %v11666_v16 = vpop.f32.mrb[63].mxu0  ;;  %vm20443_vm11 = vmmov %vm20440_vm4 }
 0x4b9   : > { %v11826_v46 = vpop.f32.mrb[23].mxu1  ;;  %v5163_v8 = vrot.slane %v5131_v56, 7  ;;  %v5259_v45 = vrot.slane %v5131_v56, 1  ;;  %v17044_v13 = vpack.c.bf16 %v5131_v56, %v5130_v38  ;;  %v4748_v40 = vadd.f32 %v11664_v0, %v16694_v28  ;;  %v13518_v28 = vld [vmem:[#allocation8 + $0x28] sm:$0xff]   ;;  %v13519_v0 = vld [vmem:[#allocation8 + $0x70] sm:$0xff]  }
 0x4ba   : > { %vm5068_vm0 = vcmp.ge.f32.partialorder %v5036_v4, 0.0  ;;  %v5100_v30 = vmul.f32 0.2, %v5036_v4  ;;  %v5037_v49 = vadd.f32 %v16901_v24, %v4998_v22  ;;  %12671 = vmatmul.mubr.msk.bf16.gmra.mrb[32].mxu1 %vm20255_vm13, %v17040_v32  ;;  %v11667_v7 = vadd.f32 %v11666_v16, %v11665_v39 }
 0x4bb   : > { %v17051_v14 = vadd.f32 %v11826_v46, %v11825_v2  ;;  %v5208_v42 = vsel %vm20442_vm6, %v5162_v33, %v5163_v8  ;;  %v5304_v38 = vsel %vm20443_vm11, %v5258_v61, %v5259_v45  ;;  %v4909_v23 = vadd.f32 %v16871_v11, %v4748_v40  ;;  %11979 = vmatpush3.bf16.msra.mxu1 %v13514_v52 }
 0x4bc   : > { %vm5069_vm4 = vcmp.ge.f32.partialorder %v5037_v49, 0.0  ;;  %v5101_v60 = vmul.f32 0.2, %v5037_v49  ;;  %v5132_v15 = vsel %vm5068_vm0, %v5036_v4, %v5100_v30  ;;  %v4751_v48 = vadd.f32 %v11667_v7, %v16697_v5  ;;  %11980 = vmatprep.subr.bf16.mxu1 %v13517_v31  ;;  %vm20444_vm0 = vmmov %vm20442_vm6  ;;  %v13520_v7 = vld [vmem:[#allocation8 + $0x30] sm:$0xff]  }
 0x4bd   : > { %v5164_v20 = vrot.slane %v5132_v15, 7  ;;  %v5260_v56 = vrot.slane %v5132_v15, 1  ;;  %v17059_v22 = vpack.c.bf16 %v5208_v42, %v5209_v26  ;;  %v4999_v33 = vadd.f32 %v4909_v23, %v16794_v51  ;;  %v11668_v2 = vpop.f32.mrb[64].mxu0  ;;  %vm20445_vm6 = vmmov %vm20443_vm11 }
 0x4be   : > { %v5133_v39 = vsel %vm5069_vm4, %v5037_v49, %v5101_v60  ;;  %v11828_v61 = vpop.f32.mrb[24].mxu1  ;;  %v4912_v11 = vadd.f32 %v16876_v6, %v4751_v48  ;;  %v11669_v4 = vpop.f32.mrb[65].mxu0  ;;  %vm20446_vm11 = vmmov %vm20444_vm0 }
 0x4bf   : > { %v5165_v16 = vrot.slane %v5133_v39, 7  ;;  %v5261_v46 = vrot.slane %v5133_v39, 1  ;;  %v5207_v52 = vsel %vm20444_vm0, %v5163_v8, %v5164_v20  ;;  %v11829_v5 = vpop.f32.mrb[25].mxu1  ;;  %v5038_v30 = vadd.f32 %v16901_v24, %v4999_v33  ;;  %v11671_v40 = vpop.f32.mrb[66].mxu0  ;;  %11981 = vmatpush3.bf16.msra.mxu1 %v13518_v28  ;;  %vm20447_vm4 = vmmov %vm20445_vm6  ;;  %v13523_v33 = vld [vmem:[#allocation8 + $0x78] sm:$0xff]  }
 0x4c0   : > { %v11670_v26 = vadd.f32 %v11669_v4, %v11668_v2  ;;  %v5303_v31 = vsel %vm20445_vm6, %v5259_v45, %v5260_v56  ;;  %v17068_v49 = vadd.f32 %v11829_v5, %v11828_v61  ;;  %v11831_v51 = vpop.f32.mrb[26].mxu1  ;;  %v5000_v42 = vadd.f32 %v4912_v11, %v16799_v53  ;;  %v11672_v6 = vpop.f32.mrb[67].mxu0  ;;  %11982 = vmatprep.subr.bf16.mxu1 %v13519_v0  ;;  %v20448_v2 = vld [vmem:[#allocation59_spill] sm:$0xff]  ;;  %v20450_v5 = vld [vmem:[#allocation22_spill] sm:$0xff] }
 0x4c1   : > { %v5206_v60 = vsel %vm20446_vm11, %v5164_v20, %v5165_v16  ;;  %v5302_v8 = vsel %vm20447_vm4, %v5260_v56, %v5261_v46  ;;  %v17075_v23 = vpack.c.bf16 %v5303_v31, %v5304_v38  ;;  %v11832_v48 = vpop.f32.mrb[27].mxu1  ;;  %vm5070_vm0 = vcmp.ge.f32.partialorder %v5038_v30, 0.0 }
 0x4c2   : > { %v5102_v45 = vmul.f32 0.2, %v5038_v30  ;;  %v4756_v61 = vadd.f32 %v11670_v26, %v20448_v2  ;;  %v11673_v28 = vadd.f32 %v11672_v6, %v11671_v40  ;;  %v5039_v4 = vadd.f32 %v16901_v24, %v5000_v42  ;;  %v13524_v26 = vld [vmem:[#allocation8 + $0x38] sm:$0xff]   ;;  %v17090_v42 = vld [vmem:[#allocation8 + $0x80] sm:$0xff]  }
 0x4c3   : > { %v17079_v53 = vpack.c.bf16 %v5206_v60, %v5207_v52  ;;  %12674 = vmatprep.mubr.msk.bf16.mxu1 %vm20263_vm8, %v17075_v23  ;;  %v17084_v20 = vadd.f32 %v11832_v48, %v11831_v51  ;;  %v17086_v38 = vpack.c.bf16 %v5133_v39, %v5132_v15  ;;  %11983 = vmatpush3.bf16.msra.mxu1 %v13520_v7 }
 0x4c4   : > { %v5134_v56 = vsel %vm5070_vm0, %v5038_v30, %v5102_v45  ;;  %v4917_v0 = vadd.f32 %v16881_v34, %v4756_v61  ;;  %v4759_v31 = vadd.f32 %v11673_v28, %v20450_v5  ;;  %vm5071_vm6 = vcmp.ge.f32.partialorder %v5039_v4, 0.0  ;;  %11984 = vmatprep.subr.bf16.mxu1 %v13523_v33  ;;  %v20451_v45 = vld [vmem:[#allocation143_spill] sm:$0xff]  ;;  %v20453_v5 = vld [vmem:[#allocation37_spill] sm:$0xff] }
 0x4c5   : > { %v5166_v40 = vrot.slane %v5134_v56, 7  ;;  %v5262_v6 = vrot.slane %v5134_v56, 1  ;;  %v5103_v52 = vmul.f32 0.2, %v5039_v4  ;;  %v11674_v15 = vpop.f32.mrb[68].mxu0 }
 0x4c6   : > { %v5001_v60 = vadd.f32 %v4917_v0, %v16804_v3  ;;  %v4920_v51 = vadd.f32 %v16886_v29, %v4759_v31  ;;  %v11675_v30 = vpop.f32.mrb[69].mxu0 }
 0x4c7   : > { %v5205_v39 = vsel %vm20446_vm11, %v5165_v16, %v5166_v40  ;;  %v5301_v34 = vsel %vm20447_vm4, %v5261_v46, %v5262_v6  ;;  %v5135_v7 = vsel %vm5071_vm6, %v5039_v4, %v5103_v52  ;;  %v11676_v61 = vadd.f32 %v11675_v30, %v11674_v15  ;;  %v11677_v28 = vpop.f32.mrb[70].mxu0  ;;  %11985 = vmatpush3.bf16.msra.mxu1 %v13524_v26  ;;  %vm20455_vm6 = vmmov %vm20446_vm11 }
 0x4c8   : > { %v5040_v48 = vadd.f32 %v16901_v24, %v5001_v60  ;;  %v5002_v2 = vadd.f32 %v4920_v51, %v20451_v45  ;;  %v17100_v33 = vpack.c.bf16 %v5301_v34, %v5302_v8  ;;  %v11678_v3 = vpop.f32.mrb[71].mxu0  ;;  %v5167_v29 = vrot.slane %v5135_v7, 7  ;;  %12698 = vmatprep.subr.bf16.mxu1 %v17090_v42  ;;  %vm20456_vm11 = vmmov %vm20447_vm4  ;;  %v20457_v34 = vld [vmem:[#allocation89_spill] sm:$0xff] }
 0x4c9   : > { %v5263_v0 = vrot.slane %v5135_v7, 1  ;;  %v17103_v16 = vpack.c.bf16 %v5135_v7, %v5134_v56  ;;  %v4764_v31 = vadd.f32 %v11676_v61, %v20453_v5  ;;  %v11679_v8 = vadd.f32 %v11678_v3, %v11677_v28  ;;  %v20458_v5 = vld [vmem:[#allocation120_spill] sm:$0xff] }
 0x4ca   : > { %20452 = vst [vmem:[#allocation46_spill] sm:$0xff] %v17100_v33  ;;  %vm5072_vm0 = vcmp.ge.f32.partialorder %v5040_v48, 0.0  ;;  %v5104_v46 = vmul.f32 0.2, %v5040_v48  ;;  %v5041_v4 = vadd.f32 %v16901_v24, %v5002_v2  ;;  %12675 = vmatmul.mubr.msk.bf16.gmra.mrb[36].mxu1 %vm20271_vm15, %v17100_v33  ;;  %v5204_v26 = vsel %vm20455_vm6, %v5166_v40, %v5167_v29 }
 0x4cb   : > { %v5300_v60 = vsel %vm20456_vm11, %v5262_v6, %v5263_v0  ;;  %v4925_v51 = vadd.f32 %v16891_v54, %v4764_v31  ;;  %v4767_v30 = vadd.f32 %v11679_v8, %v20457_v34  ;;  %v17116_v2 = vpack.c.bf16 %v5204_v26, %v5205_v39  ;;  %v20464_v34 = vld [vmem:[#allocation88_spill] sm:$0xff] }
 0x4cc   : > { %vm5073_vm4 = vcmp.ge.f32.partialorder %v5041_v4, 0.0  ;;  %v5105_v56 = vmul.f32 0.2, %v5041_v4  ;;  %v5136_v15 = vsel %vm5072_vm0, %v5040_v48, %v5104_v46  ;;  %vm20459_vm0 = vmmov %vm20456_vm11 }
 0x4cd   : > { %v5168_v7 = vrot.slane %v5136_v15, 7  ;;  %v5264_v45 = vrot.slane %v5136_v15, 1  ;;  %v5003_v28 = vadd.f32 %v4925_v51, %v20458_v5  ;;  %v11680_v3 = vpop.f32.mrb[72].mxu0  ;;  %v4928_v33 = vadd.f32 %v16894_v18, %v4767_v30  ;;  %vm20461_vm11 = vmmov %vm20455_vm6 }
 0x4ce   : > { %v5137_v61 = vsel %vm5073_vm4, %v5041_v4, %v5105_v56  ;;  %v11681_v6 = vpop.f32.mrb[73].mxu0  ;;  %v20460_v4 = vld [vmem:[#allocation84_spill] sm:$0xff]  ;;  %vm20462_vm4 = vmmov %vm20459_vm0 }
 0x4cf   : > { %v5169_v52 = vrot.slane %v5137_v61, 7  ;;  %v5265_v40 = vrot.slane %v5137_v61, 1  ;;  %v5203_v11 = vsel %vm20455_vm6, %v5167_v29, %v5168_v7  ;;  %v5042_v54 = vadd.f32 %v16901_v24, %v5003_v28  ;;  %v11683_v46 = vpop.f32.mrb[74].mxu0  ;;  %v20466_v28 = vld [vmem:[#allocation92_spill] sm:$0xff] }
 0x4d0   : > { %v11682_v48 = vadd.f32 %v11681_v6, %v11680_v3  ;;  %v5299_v39 = vsel %vm20459_vm0, %v5263_v0, %v5264_v45  ;;  %v17125_v31 = vpack.c.bf16 %v5137_v61, %v5136_v15  ;;  %v5004_v8 = vadd.f32 %v4928_v33, %v20460_v4  ;;  %v11684_v26 = vpop.f32.mrb[75].mxu0 }
 0x4d1   : > { %v5202_v56 = vsel %vm20461_vm11, %v5168_v7, %v5169_v52  ;;  %v5298_v18 = vsel %vm20462_vm4, %v5264_v45, %v5265_v40  ;;  %v17132_v51 = vpack.c.bf16 %v5299_v39, %v5300_v60  ;;  %vm5074_vm6 = vcmp.ge.f32.partialorder %v5042_v54, 0.0  ;;  %v20467_v39 = vld [vmem:[#allocation144_spill] sm:$0xff] }
 0x4d2   : > { %v5106_v29 = vmul.f32 0.2, %v5042_v54  ;;  %v4772_v30 = vadd.f32 %v11682_v48, %v20464_v34  ;;  %v11685_v5 = vadd.f32 %v11684_v26, %v11683_v46  ;;  %v5043_v0 = vadd.f32 %v16901_v24, %v5004_v8 }
 0x4d3   : > { %20463 = vst [vmem:[#allocation79_spill] sm:$0xff] %v17132_v51  ;;  %v17136_v15 = vpack.c.bf16 %v5202_v56, %v5203_v11  ;;  %12678 = vmatprep.mubr.msk.bf16.mxu1 %vm20283_vm2, %v17132_v51  ;;  %v20468_v56 = vld [vmem:[#allocation91_spill] sm:$0xff] }
 0x4d4   : > { %v5138_v61 = vsel %vm5074_vm6, %v5042_v54, %v5106_v29  ;;  %v4933_v7 = vadd.f32 %v16906_v58, %v4772_v30  ;;  %v4775_v45 = vadd.f32 %v11685_v5, %v20466_v28  ;;  %vm5075_vm0 = vcmp.ge.f32.partialorder %v5043_v0, 0.0 }
 0x4d5   : > { %v5170_v60 = vrot.slane %v5138_v61, 7  ;;  %v5266_v3 = vrot.slane %v5138_v61, 1  ;;  %v5107_v6 = vmul.f32 0.2, %v5043_v0  ;;  %v11686_v4 = vpop.f32.mrb[76].mxu0 }
 0x4d6   : > { %v5005_v48 = vadd.f32 %v4933_v7, %v20467_v39  ;;  %v4936_v46 = vadd.f32 %v16910_v19, %v4775_v45  ;;  %v11687_v54 = vpop.f32.mrb[77].mxu0 }
 0x4d7   : > { %v5201_v11 = vsel %vm20461_vm11, %v5169_v52, %v5170_v60  ;;  %v5297_v8 = vsel %vm20462_vm4, %v5265_v40, %v5266_v3  ;;  %v5139_v26 = vsel %vm5075_vm0, %v5043_v0, %v5107_v6  ;;  %v11688_v30 = vadd.f32 %v11687_v54, %v11686_v4  ;;  %v11689_v5 = vpop.f32.mrb[78].mxu0  ;;  %v20470_v40 = vld [vmem:[#allocation95_spill] sm:$0xff]  ;;  %vm20472_vm0 = vmmov %vm20461_vm11 }
 0x4d8   : > { %v5044_v58 = vadd.f32 %v16901_v24, %v5005_v48  ;;  %v5006_v29 = vadd.f32 %v4936_v46, %v20468_v56  ;;  %v17151_v34 = vpack.c.bf16 %v5297_v8, %v5298_v18  ;;  %v11690_v7 = vpop.f32.mrb[79].mxu0  ;;  %v5171_v28 = vrot.slane %v5139_v26, 7  ;;  %vm20473_vm11 = vmmov %vm20462_vm4  ;;  %v20474_v8 = vld [vmem:[#allocation103_spill] sm:$0xff] }
 0x4d9   : > { %v5267_v19 = vrot.slane %v5139_v26, 1  ;;  %v17153_v45 = vpack.c.bf16 %v5139_v26, %v5138_v61  ;;  %v4780_v33 = vadd.f32 %v11688_v30, %v20470_v40  ;;  %v11691_v6 = vadd.f32 %v11690_v7, %v11689_v5  ;;  %v20475_v40 = vld [vmem:[#allocation81_spill] sm:$0xff] }
 0x4da   : > { %20469 = vst [vmem:[#allocation20_spill] sm:$0xff] %v17151_v34  ;;  %vm5076_vm6 = vcmp.ge.f32.partialorder %v5044_v58, 0.0  ;;  %v5108_v52 = vmul.f32 0.2, %v5044_v58  ;;  %v5045_v39 = vadd.f32 %v16901_v24, %v5006_v29  ;;  %12679 = vmatmul.mubr.msk.bf16.gmra.mrb[40].mxu1 %vm15467_vm1, %v17151_v34  ;;  %v5200_v18 = vsel %vm20472_vm0, %v5170_v60, %v5171_v28 }
 0x4db   : > { %v5296_v48 = vsel %vm20473_vm11, %v5266_v3, %v5267_v19  ;;  %v4941_v46 = vadd.f32 %v16925_v1, %v4780_v33  ;;  %v4783_v54 = vadd.f32 %v11691_v6, %v20474_v8  ;;  %v17166_v29 = vpack.c.bf16 %v5200_v18, %v5201_v11  ;;  %v20481_v8 = vld [vmem:[#allocation93_spill] sm:$0xff] }
 0x4dc   : > { %vm5077_vm4 = vcmp.ge.f32.partialorder %v5045_v39, 0.0  ;;  %v5109_v61 = vmul.f32 0.2, %v5045_v39  ;;  %v5140_v4 = vsel %vm5076_vm6, %v5044_v58, %v5108_v52  ;;  %vm20476_vm6 = vmmov %vm20473_vm11 }
 0x4dd   : > { %v5172_v26 = vrot.slane %v5140_v4, 7  ;;  %v5268_v56 = vrot.slane %v5140_v4, 1  ;;  %v5007_v5 = vadd.f32 %v4941_v46, %v20475_v40  ;;  %v11692_v7 = vpop.f32.mrb[80].mxu0  ;;  %v4944_v34 = vadd.f32 %v16936_v50, %v4783_v54  ;;  %vm20478_vm11 = vmmov %vm20472_vm0 }
 0x4de   : > { %v5141_v30 = vsel %vm5077_vm4, %v5045_v39, %v5109_v61  ;;  %v11693_v3 = vpop.f32.mrb[81].mxu0  ;;  %v20477_v39 = vld [vmem:[#allocation145_spill] sm:$0xff]  ;;  %vm20479_vm4 = vmmov %vm20476_vm6 }
 0x4df   : > { %v5173_v0 = vrot.slane %v5141_v30, 7  ;;  %v5269_v60 = vrot.slane %v5141_v30, 1  ;;  %v5199_v51 = vsel %vm20472_vm0, %v5171_v28, %v5172_v26  ;;  %v5046_v1 = vadd.f32 %v16901_v24, %v5007_v5  ;;  %v11695_v58 = vpop.f32.mrb[82].mxu0  ;;  %v20483_v5 = vld [vmem:[#allocation94_spill] sm:$0xff] }
 0x4e0   : > { %v11694_v33 = vadd.f32 %v11693_v3, %v11692_v7  ;;  %v5295_v11 = vsel %vm20476_vm6, %v5267_v19, %v5268_v56  ;;  %v17175_v52 = vpack.c.bf16 %v5141_v30, %v5140_v4  ;;  %v5008_v6 = vadd.f32 %v4944_v34, %v20477_v39  ;;  %v11696_v18 = vpop.f32.mrb[83].mxu0 }
 0x4e1   : > { %v5198_v61 = vsel %vm20478_vm11, %v5172_v26, %v5173_v0  ;;  %v5294_v50 = vsel %vm20479_vm4, %v5268_v56, %v5269_v60  ;;  %v17182_v46 = vpack.c.bf16 %v5295_v11, %v5296_v48  ;;  %vm5078_vm0 = vcmp.ge.f32.partialorder %v5046_v1, 0.0  ;;  %v20484_v11 = vld [vmem:[#allocation121_spill] sm:$0xff] }
 0x4e2   : > { %v5110_v28 = vmul.f32 0.2, %v5046_v1  ;;  %v4788_v54 = vadd.f32 %v11694_v33, %v20481_v8  ;;  %v11697_v40 = vadd.f32 %v11696_v18, %v11695_v58  ;;  %v5047_v19 = vadd.f32 %v16901_v24, %v5008_v6 }
 0x4e3   : > { %20480 = vst [vmem:[#allocation33_spill] sm:$0xff] %v17182_v46  ;;  %v17186_v4 = vpack.c.bf16 %v5198_v61, %v5199_v51  ;;  %12682 = vmatprep.mubr.msk.bf16.mxu1 %vm20299_vm14, %v17182_v46  ;;  %v20485_v61 = vld [vmem:[#allocation146_spill] sm:$0xff] }
 0x4e4   : > { %v5142_v30 = vsel %vm5078_vm0, %v5046_v1, %v5110_v28  ;;  %v4949_v26 = vadd.f32 %v16950_v57, %v4788_v54  ;;  %v4791_v56 = vadd.f32 %v11697_v40, %v20483_v5  ;;  %vm5079_vm6 = vcmp.ge.f32.partialorder %v5047_v19, 0.0 }
 0x4e5   : > { %v5174_v48 = vrot.slane %v5142_v30, 7  ;;  %v5270_v7 = vrot.slane %v5142_v30, 1  ;;  %v5111_v3 = vmul.f32 0.2, %v5047_v19  ;;  %v11698_v39 = vpop.f32.mrb[84].mxu0 }
 0x4e6   : > { %v5009_v33 = vadd.f32 %v4949_v26, %v20484_v11  ;;  %v4952_v58 = vadd.f32 %v16965_v25, %v4791_v56  ;;  %v11699_v1 = vpop.f32.mrb[85].mxu0 }
 0x4e7   : > { %v5197_v51 = vsel %vm20478_vm11, %v5173_v0, %v5174_v48  ;;  %v5293_v6 = vsel %vm20479_vm4, %v5269_v60, %v5270_v7  ;;  %v5143_v18 = vsel %vm5079_vm6, %v5047_v19, %v5111_v3  ;;  %v11700_v54 = vadd.f32 %v11699_v1, %v11698_v39  ;;  %v11701_v40 = vpop.f32.mrb[86].mxu0  ;;  %v20487_v60 = vld [vmem:[#allocation98_spill] sm:$0xff]  ;;  %vm20489_vm6 = vmmov %vm20478_vm11 }
 0x4e8   : > { %v5048_v57 = vadd.f32 %v16901_v24, %v5009_v33  ;;  %v5010_v28 = vadd.f32 %v4952_v58, %v20485_v61  ;;  %v17201_v8 = vpack.c.bf16 %v5293_v6, %v5294_v50  ;;  %v11702_v26 = vpop.f32.mrb[87].mxu0  ;;  %v5175_v5 = vrot.slane %v5143_v18, 7  ;;  %vm20490_vm11 = vmmov %vm20479_vm4  ;;  %v20491_v6 = vld [vmem:[#allocation97_spill] sm:$0xff] }
 0x4e9   : > { %v5271_v25 = vrot.slane %v5143_v18, 1  ;;  %v17203_v56 = vpack.c.bf16 %v5143_v18, %v5142_v30  ;;  %v4796_v34 = vadd.f32 %v11700_v54, %v20487_v60  ;;  %v11703_v3 = vadd.f32 %v11702_v26, %v11701_v40  ;;  %v20492_v60 = vld [vmem:[#allocation123_spill] sm:$0xff] }
 0x4ea   : > { %20486 = vst [vmem:[#allocation43_spill] sm:$0xff] %v17201_v8  ;;  %vm5080_vm0 = vcmp.ge.f32.partialorder %v5048_v57, 0.0  ;;  %v5112_v0 = vmul.f32 0.2, %v5048_v57  ;;  %v5049_v11 = vadd.f32 %v16901_v24, %v5010_v28  ;;  %12683 = vmatmul.mubr.msk.bf16.gmra.mrb[44].mxu1 %vm20307_vm12, %v17201_v8  ;;  %v5196_v50 = vsel %vm20489_vm6, %v5174_v48, %v5175_v5 }
 0x4eb   : > { %v5292_v33 = vsel %vm20490_vm11, %v5270_v7, %v5271_v25  ;;  %v4957_v58 = vadd.f32 %v16983_v27, %v4796_v34  ;;  %v4799_v1 = vadd.f32 %v11703_v3, %v20491_v6  ;;  %v17216_v28 = vpack.c.bf16 %v5196_v50, %v5197_v51  ;;  %v20497_v6 = vld [vmem:[#allocation140_spill] sm:$0xff] }
 0x4ec   : > { %vm5081_vm4 = vcmp.ge.f32.partialorder %v5049_v11, 0.0  ;;  %v5113_v30 = vmul.f32 0.2, %v5049_v11  ;;  %v5144_v39 = vsel %vm5080_vm0, %v5048_v57, %v5112_v0  ;;  %vm20493_vm0 = vmmov %vm20490_vm11 }
 0x4ed   : > { %v5176_v18 = vrot.slane %v5144_v39, 7  ;;  %v5272_v61 = vrot.slane %v5144_v39, 1  ;;  %v5011_v40 = vadd.f32 %v4957_v58, %v20492_v60  ;;  %v11704_v26 = vpop.f32.mrb[88].mxu0  ;;  %v4960_v8 = vadd.f32 %v16992_v41, %v4799_v1  ;;  %vm20495_vm11 = vmmov %vm20489_vm6 }
 0x4ee   : > { %v5145_v54 = vsel %vm5081_vm4, %v5049_v11, %v5113_v30  ;;  %v11705_v7 = vpop.f32.mrb[89].mxu0  ;;  %v20494_v11 = vld [vmem:[#allocation147_spill] sm:$0xff]  ;;  %vm20496_vm4 = vmmov %vm20493_vm0 }
 0x4ef   : > { %v5177_v19 = vrot.slane %v5145_v54, 7  ;;  %v5273_v48 = vrot.slane %v5145_v54, 1  ;;  %v5195_v46 = vsel %vm20489_vm6, %v5175_v5, %v5176_v18  ;;  %v5050_v27 = vadd.f32 %v16901_v24, %v5011_v40  ;;  %v11707_v57 = vpop.f32.mrb[90].mxu0  ;;  %v20499_v40 = vld [vmem:[#allocation100_spill] sm:$0xff] }
 0x4f0   : > { %v11706_v34 = vadd.f32 %v11705_v7, %v11704_v26  ;;  %v5291_v51 = vsel %vm20493_vm0, %v5271_v25, %v5272_v61  ;;  %v17225_v0 = vpack.c.bf16 %v5145_v54, %v5144_v39  ;;  %v5012_v3 = vadd.f32 %v4960_v8, %v20494_v11  ;;  %v11708_v50 = vpop.f32.mrb[91].mxu0 }
 0x4f1   : > { %v5194_v30 = vsel %vm20495_vm11, %v5176_v18, %v5177_v19  ;;  %v5290_v41 = vsel %vm20496_vm4, %v5272_v61, %v5273_v48  ;;  %v17232_v58 = vpack.c.bf16 %v5291_v51, %v5292_v33  ;;  %vm5082_vm6 = vcmp.ge.f32.partialorder %v5050_v27, 0.0  ;;  %v20500_v51 = vld [vmem:[#allocation126_spill] sm:$0xff] }
 0x4f2   : > { %v5114_v5 = vmul.f32 0.2, %v5050_v27  ;;  %v4804_v1 = vadd.f32 %v11706_v34, %v20497_v6  ;;  %v11709_v60 = vadd.f32 %v11708_v50, %v11707_v57  ;;  %v5051_v25 = vadd.f32 %v16901_v24, %v5012_v3 }
 0x4f3   : > { %v17236_v39 = vpack.c.bf16 %v5194_v30, %v5195_v46  ;;  %12686 = vmatprep.mubr.msk.bf16.mxu1 %vm20314_vm7, %v17232_v58  ;;  %v20501_v30 = vld [vmem:[#allocation148_spill] sm:$0xff] }
 0x4f4   : > { %v5146_v54 = vsel %vm5082_vm6, %v5050_v27, %v5114_v5  ;;  %v4965_v18 = vadd.f32 %v17010_v35, %v4804_v1  ;;  %v4807_v61 = vadd.f32 %v11709_v60, %v20499_v40  ;;  %vm5083_vm0 = vcmp.ge.f32.partialorder %v5051_v25, 0.0 }
 0x4f5   : > { %v5178_v33 = vrot.slane %v5146_v54, 7  ;;  %v5274_v26 = vrot.slane %v5146_v54, 1  ;;  %v5115_v7 = vmul.f32 0.2, %v5051_v25  ;;  %v11710_v11 = vpop.f32.mrb[92].mxu0 }
 0x4f6   : > { %v5013_v34 = vadd.f32 %v4965_v18, %v20500_v51  ;;  %v4968_v57 = vadd.f32 %v17017_v44, %v4807_v61  ;;  %v11711_v27 = vpop.f32.mrb[93].mxu0 }
 0x4f7   : > { %v5193_v46 = vsel %vm20495_vm11, %v5177_v19, %v5178_v33  ;;  %v5289_v3 = vsel %vm20496_vm4, %v5273_v48, %v5274_v26  ;;  %v5147_v50 = vsel %vm5083_vm0, %v5051_v25, %v5115_v7  ;;  %v11712_v1 = vadd.f32 %v11711_v27, %v11710_v11  ;;  %v11713_v60 = vpop.f32.mrb[94].mxu0  ;;  %v20503_v48 = vld [vmem:[#allocation141_spill] sm:$0xff]  ;;  %vm20505_vm0 = vmmov %vm20495_vm11 }
 0x4f8   : > { %v5052_v35 = vadd.f32 %v16901_v24, %v5013_v34  ;;  %v5014_v5 = vadd.f32 %v4968_v57, %v20501_v30  ;;  %v17251_v6 = vpack.c.bf16 %v5289_v3, %v5290_v41  ;;  %v11714_v18 = vpop.f32.mrb[95].mxu0  ;;  %v5179_v40 = vrot.slane %v5147_v50, 7  ;;  %vm20506_vm11 = vmmov %vm20496_vm4  ;;  %v20507_v3 = vld [vmem:[#allocation104_spill] sm:$0xff] }
 0x4f9   : > { %v5275_v44 = vrot.slane %v5147_v50, 1  ;;  %v17253_v61 = vpack.c.bf16 %v5147_v50, %v5146_v54  ;;  %v4812_v8 = vadd.f32 %v11712_v1, %v20503_v48  ;;  %v11715_v7 = vadd.f32 %v11714_v18, %v11713_v60  ;;  %v20508_v1 = vld [vmem:[#allocation39_spill] sm:$0xff] }
 0x4fa   : > { %20502 = vst [vmem:[#allocation19_spill] sm:$0xff] %v17251_v6  ;;  %vm5084_vm6 = vcmp.ge.f32.partialorder %v5052_v35, 0.0  ;;  %v5116_v19 = vmul.f32 0.2, %v5052_v35  ;;  %v5053_v51 = vadd.f32 %v16901_v24, %v5014_v5  ;;  %12687 = vmatmul.mubr.msk.bf16.gmra.mrb[48].mxu1 %vm15624_vm10, %v17251_v6  ;;  %v5192_v41 = vsel %vm20505_vm0, %v5178_v33, %v5179_v40 }
 0x4fb   : > { %v5288_v34 = vsel %vm20506_vm11, %v5274_v26, %v5275_v44  ;;  %v4973_v57 = vadd.f32 %v17042_v21, %v4812_v8  ;;  %v4815_v24 = vadd.f32 %v11715_v7, %v20507_v3  ;;  %v17266_v30 = vpack.c.bf16 %v5192_v41, %v5193_v46  ;;  %v13629_v21 = vld [vmem:[%s19062_s4] ss:$0 sm:$0xff]  ;;  %v20510_v7 = vld [vmem:[#allocation149_spill] sm:$0xff] }
 0x4fc   : > { %vm5085_vm4 = vcmp.ge.f32.partialorder %v5053_v51, 0.0  ;;  %v5117_v54 = vmul.f32 0.2, %v5053_v51  ;;  %v5148_v11 = vsel %vm5084_vm6, %v5052_v35, %v5116_v19  ;;  %vm20509_vm6 = vmmov %vm20506_vm11  ;;  %vm20518_vm10 = vcmp.lt.s32.totalorder %v20419_v43, 7 }
 0x4fd   : > { %v5180_v27 = vrot.slane %v5148_v11, 7  ;;  %v5276_v50 = vrot.slane %v5148_v11, 1  ;;  %v5015_v60 = vadd.f32 %v4973_v57, %v20508_v1  ;;  %v11716_v18 = vpop.f32.mrb[96].mxu0  ;;  %v4976_v25 = vadd.f32 %v17051_v14, %v4815_v24  ;;  %vm20511_vm11 = vmmov %vm20505_vm0  ;;  %v20513_v24 = vld [vmem:[#allocation142_spill] sm:$0xff] }
 0x4fe   : > { %v5149_v5 = vsel %vm5085_vm4, %v5053_v51, %v5117_v54  ;;  %v11717_v26 = vpop.f32.mrb[97].mxu0  ;;  %vm20512_vm4 = vmmov %vm20509_vm6 }
 0x4ff   : > { %v5181_v48 = vrot.slane %v5149_v5, 7  ;;  %v5277_v33 = vrot.slane %v5149_v5, 1  ;;  %v5191_v6 = vsel %vm20505_vm0, %v5179_v40, %v5180_v27  ;;  %v5054_v8 = vadd.f32 %v13629_v21, %v5015_v60  ;;  %v11719_v46 = vpop.f32.mrb[98].mxu0 }
 0x500   : > { %v11718_v35 = vadd.f32 %v11717_v26, %v11716_v18  ;;  %v5287_v19 = vsel %vm20509_vm6, %v5275_v44, %v5276_v50  ;;  %v17277_v51 = vpack.c.bf16 %v5149_v5, %v5148_v11  ;;  %v5016_v41 = vadd.f32 %v4976_v25, %v20510_v7  ;;  %v11720_v54 = vpop.f32.mrb[99].mxu0  ;;  %v20514_v11 = vld [vmem:[#allocation27_spill] sm:$0xff]  ;;  %v20516_v5 = vld [vmem:[#allocation117_spill] sm:$0xff] }
 0x501   : > { %v5190_v14 = vsel %vm20511_vm11, %v5180_v27, %v5181_v48  ;;  %v5286_v40 = vsel %vm20512_vm4, %v5276_v50, %v5277_v33  ;;  %v17284_v57 = vpack.c.bf16 %v5287_v19, %v5288_v34  ;;  %vm5086_vm0 = vcmp.ge.f32.partialorder %v5054_v8, 0.0 }
 0x502   : > { %v5118_v3 = vmul.f32 0.2, %v5054_v8  ;;  %v4820_v1 = vadd.f32 %v11718_v35, %v20513_v24  ;;  %v11721_v60 = vadd.f32 %v11720_v54, %v11719_v46  ;;  %v5055_v18 = vadd.f32 %v13629_v21, %v5016_v41  ;;  %v20519_v54 = vld [vmem:[#allocation41_spill] sm:$0xff] }
 0x503   : > { %v17287_v44 = vpack.c.bf16 %v5190_v14, %v5191_v6  ;;  %vm20515_vm6 = vnez %v20514_v11  ;;  %vm20517_vm4 = vcmp.lt.s32.totalorder %v20419_v43, 1  ;;  %v20569_v43 = vld [vmem:[#allocation87_spill] sm:$0xff] }
 0x504   : > { %12690 = vmatprep.mubr.msk.bf16.mxu1 %vm20515_vm6, %v17284_v57  ;;  %v5150_v25 = vsel %vm5086_vm0, %v5054_v8, %v5118_v3  ;;  %v4981_v27 = vadd.f32 %v17068_v49, %v4820_v1  ;;  %v4823_v26 = vadd.f32 %v11721_v60, %v20516_v5  ;;  %vm5087_vm11 = vcmp.ge.f32.partialorder %v5055_v18, 0.0  ;;  %vm20522_vm7 = vmmov %vm20517_vm4 }
 0x505   : > { %v5182_v50 = vrot.slane %v5150_v25, 7  ;;  %v5278_v34 = vrot.slane %v5150_v25, 1  ;;  %v5119_v19 = vmul.f32 0.2, %v5055_v18 }
 0x506   : > { %v5017_v7 = vadd.f32 %v4981_v27, %v16884_v59  ;;  %v4984_v35 = vadd.f32 %v17084_v20, %v4823_v26  ;;  %v20520_v20 = vld [vmem:[#allocation68_spill] sm:$0xff] }
 0x507   : > { %v5189_v6 = vsel %vm20517_vm4, %v5181_v48, %v5182_v50  ;;  %v5285_v46 = vsel %vm20518_vm10, %v5277_v33, %v5278_v34  ;;  %v5151_v41 = vsel %vm5087_vm11, %v5055_v18, %v5119_v19  ;;  %vm20521_vm6 = vnez %v20520_v20 }
 0x508   : > { %v5056_v8 = vadd.f32 %v13629_v21, %v5017_v7  ;;  %v5018_v49 = vadd.f32 %v4984_v35, %v20519_v54  ;;  %v17301_v14 = vpack.c.bf16 %v5285_v46, %v5286_v40  ;;  %v5183_v3 = vrot.slane %v5151_v41, 7 }
 0x509   : > { %v5279_v24 = vrot.slane %v5151_v41, 1  ;;  %v17303_v1 = vpack.c.bf16 %v5151_v41, %v5150_v25  ;;  %v20527_v54 = vrot.slane %v16915_v47, 1 }
 0x50a   : > { %vm5088_vm0 = vcmp.ge.f32.partialorder %v5056_v8, 0.0  ;;  %v5120_v59 = vmul.f32 0.2, %v5056_v8  ;;  %v5057_v60 = vadd.f32 %v13629_v21, %v5018_v49  ;;  %12691 = vmatmul.mubr.msk.bf16.gmra.mrb[52].mxu1 %vm20521_vm6, %v17301_v14  ;;  %v5188_v48 = vsel %vm20517_vm4, %v5182_v50, %v5183_v3  ;;  %vm20523_vm6 = vmmov %vm20518_vm10 }
 0x50b   : > { %v5284_v33 = vsel %vm20518_vm10, %v5278_v34, %v5279_v24  ;;  %v17312_v18 = vpack.c.bf16 %v5188_v48, %v5189_v6  ;;  %v20524_v34 = vrot.slane %v16915_v47, 7  ;;  %vm20526_vm10 = vmmov %vm20523_vm6  ;;  %v20534_v47 = vld [vmem:[#allocation130_spill] sm:$0xff] }
 0x50c   : > { %vm5089_vm11 = vcmp.ge.f32.partialorder %v5057_v60, 0.0  ;;  %v5121_v40 = vmul.f32 0.2, %v5057_v60  ;;  %v5152_v27 = vsel %vm5088_vm0, %v5056_v8, %v5120_v59  ;;  %vm20525_vm0 = vmmov %vm20517_vm4 }
 0x50d   : > { %v5184_v25 = vrot.slane %v5152_v27, 7  ;;  %v5280_v5 = vrot.slane %v5152_v27, 1 }
 0x50e   : > { %v5153_v26 = vsel %vm5089_vm11, %v5057_v60, %v5121_v40  ;;  %v20530_v60 = vld [vmem:[#allocation67_spill] sm:$0xff]  ;;  %v13529_v40 = vld [vmem:[#allocation8 + $0x1c8] sm:$0xff]  }
 0x50f   : > { %v5185_v19 = vrot.slane %v5153_v26, 7  ;;  %v5281_v21 = vrot.slane %v5153_v26, 1  ;;  %v5187_v7 = vsel %vm20522_vm7, %v5183_v3, %v5184_v25  ;;  %v5283_v35 = vsel %vm20523_vm6, %v5279_v24, %v5280_v5  ;;  %vm20528_vm7 = vmmov %vm20523_vm6  ;;  %v20529_v3 = vld [vmem:[#allocation18_spill] sm:$0xff] }
 0x510   : > { %v17318_v50 = vpack.c.bf16 %v5283_v35, %v5284_v33  ;;  %v17320_v46 = vpack.c.bf16 %v5153_v26, %v5152_v27  ;;  %vm20531_vm6 = vnez %v20530_v60  ;;  %v13527_v33 = vld [vmem:[#allocation8 + $0x180] sm:$0xff]   ;;  %v20532_v27 = vld [vmem:[#allocation80_spill] sm:$0xff]  ;;  %v13532_v26 = vld [vmem:[#allocation8 + $0x1d0] sm:$0xff]  }
 0x511   : > { %v5217_v6 = vsel %vm20517_vm4, %v5185_v19, %v20524_v34  ;;  %v5186_v41 = vsel %vm20525_vm0, %v5184_v25, %v5185_v19  ;;  %v5282_v8 = vsel %vm20526_vm10, %v5280_v5, %v5281_v21  ;;  %v5313_v49 = vsel %vm20528_vm7, %v5281_v21, %v20527_v54  ;;  %v13530_v5 = vld [vmem:[#allocation8 + $0x188] sm:$0xff]   ;;  %v13533_v21 = vld [vmem:[#allocation8 + $0x190] sm:$0xff]   ;;  %v13535_v35 = vld [vmem:[#allocation8 + $0x1d8] sm:$0xff]  }
 0x512   : > { %v10275_v24 = vpack.c.bf16 %v20529_v3, %v5217_v6  ;;  %v17335_v59 = vpack.c.bf16 %v5186_v41, %v5187_v7  ;;  %12694 = vmatprep.mubr.msk.bf16.mxu1 %vm20531_vm6, %v17318_v50  ;;  %v17340_v48 = vpack.c.bf16 %v5313_v49, %v5282_v8  ;;  %vm20533_vm11 = vnez %v20532_v27  ;;  %v13528_v19 = vld [vmem:[#allocation8 + $0x88] sm:$0xff]   ;;  %v20537_v7 = vld [vmem:[#allocation85_spill] sm:$0xff]  ;;  %v20539_v34 = vld [vmem:[#allocation83_spill] sm:$0xff] }
 0x513   : > { %vm20535_vm4 = vnez %v20534_v47  ;;  %v20536_v25 = vmov 0   ;;  %vm20538_vm0 = vnez %v20537_v7  ;;  %v13531_v6 = vld [vmem:[#allocation8 + $0x90] sm:$0xff]   ;;  %v13536_v41 = vld [vmem:[#allocation8 + $0x198] sm:$0xff]   ;;  %v13538_v8 = vld [vmem:[#allocation8 + $0x1e0] sm:$0xff]  }
 0x514   : > { %10276 = vmatmul.mubr.msk.bf16.vlgmr.msra.gmra.mrb[100].mxu0 %vm20533_vm11, %v10275_v24  ;;  %12695 = vmatmul.mubr.msk.bf16.gmra.mrb[56].mxu1 %vm20535_vm4, %v17340_v48  ;;  %v13534_v54 = vld [vmem:[#allocation8 + $0x98] sm:$0xff]   ;;  %v13539_v49 = vld [vmem:[#allocation8 + $0x1a0] sm:$0xff]   ;;  %v20568_v27 = vld [vmem:[#allocation150_spill] sm:$0xff] }
 0x515   : > { %5774 = vmatprep.mubr.bf16.mxu0 %v16970_v10  ;;  %6232 = vmatprep.mubr.bf16.mxu1 %v20536_v25  ;;  %v20540_v3 = vld [vmem:[#allocation16_spill] sm:$0xff] }
 0x516   : > { %12107 = vmatpush3.bf16.msra.mxu0 %v13527_v33  ;;  %vm20541_vm10 = vnez %v20540_v3  ;;  %v13537_v33 = vld [vmem:[#allocation8 + $0xa0] sm:$0xff]  }
 0x517   : > { %12108 = vmatprep.subr.bf16.mxu0 %v13529_v40  ;;  %v13542_v40 = vld [vmem:[#allocation8 + $0x1a8] sm:$0xff]  }
 0x51a   : > { %12109 = vmatpush3.bf16.msra.mxu0 %v13530_v5  ;;  %v13544_v5 = vld [vmem:[#allocation8 + $0x1f0] sm:$0xff]  }
 0x51b   : > { %12110 = vmatprep.subr.bf16.mxu0 %v13532_v26  ;;  %v13540_v26 = vld [vmem:[#allocation8 + $0xa8] sm:$0xff]  }
 0x51c   : > { %10279 = vmatmul.mubr.msk.bf16.gmra.mrb[104].mxu0 %vm20538_vm0, %v16961_v36  ;;  %6233 = vmatmul.mubr.bf16.vlgmr.msra.gmra.mrb[60].mxu1 %v20536_v25 }
 0x51d   : > { %12699 = vmatpush3.bf16.msra.mxu1 %v17090_v42  ;;  %5782 = vmatprep.mubr.bf16.mxu0 %v16985_v17  ;;  %v13541_v42 = vld [vmem:[#allocation8 + $0x1e8] sm:$0xff]  }
 0x51e   : > { %6240 = vmatprep.mubr.bf16.mxu1 %v20539_v34  ;;  %12700 = vmatprep.subr.bf16.mxu1 %v13528_v19  ;;  %v13548_v34 = vld [vmem:[#allocation8 + $0x1b8] sm:$0xff]  }
 0x51f   : > { %12111 = vmatpush3.bf16.msra.mxu0 %v13533_v21  ;;  %v13547_v21 = vld [vmem:[#allocation8 + $0x1f8] sm:$0xff]  }
 0x520   : > { %12112 = vmatprep.subr.bf16.mxu0 %v13535_v35  ;;  %v13543_v35 = vld [vmem:[#allocation8 + $0xb0] sm:$0xff]  }
 0x521   : > { %12701 = vmatpush3.bf16.msra.mxu1 %v13528_v19  ;;  %v13545_v19 = vld [vmem:[#allocation8 + $0x1b0] sm:$0xff]  }
 0x522   : > { %12702 = vmatprep.subr.bf16.mxu1 %v13531_v6 }
 0x523   : > { %12113 = vmatpush3.bf16.msra.mxu0 %v13536_v41  ;;  %v20544_v41 = vld [vmem:[#allocation96_spill] sm:$0xff] }
 0x524   : > { %10282 = vmatmul.mubr.msk.bf16.gmra.mrb[108].mxu0 %vm20541_vm10, %v17000_v55  ;;  %10372 = vmatmul.mubr.msk.bf16.gmra.mrb[64].mxu1 %vm20533_vm11, %v10275_v24  ;;  %v20542_v24 = vld [vmem:[#allocation21_spill] sm:$0xff]  ;;  %vm20545_vm11 = vnez %v20544_v41  ;;  %v20579_v41 = vld [vmem:[#allocation124_spill] sm:$0xff] }
 0x525   : > { %5790 = vmatprep.mubr.bf16.mxu0 %v17032_v12  ;;  %6248 = vmatprep.mubr.bf16.mxu1 %v16970_v10  ;;  %vm20543_vm7 = vnez %v20542_v24 }
 0x526   : > { %12703 = vmatpush3.bf16.msra.mxu1 %v13531_v6  ;;  %12114 = vmatprep.subr.bf16.mxu0 %v13538_v8  ;;  %v13546_v6 = vld [vmem:[#allocation8 + $0xb8] sm:$0xff]   ;;  %v13549_v8 = vld [vmem:[#allocation8 + $0x200] sm:$0xff]  }
 0x527   : > { %12704 = vmatprep.subr.bf16.mxu1 %v13534_v54  ;;  %12115 = vmatpush3.bf16.msra.mxu0 %v13539_v49  ;;  %v20548_v49 = vld [vmem:[#allocation112_spill] sm:$0xff] }
 0x528   : > { %12116 = vmatprep.subr.bf16.mxu0 %v13541_v42  ;;  %vm20549_vm6 = vnez %v20548_v49  ;;  %v20550_v42 = vld [vmem:[#allocation24_spill] sm:$0xff] }
 0x529   : > { %vm20551_vm12 = vnez %v20550_v42 }
 0x52a   : > { %12705 = vmatpush3.bf16.msra.mxu1 %v13534_v54  ;;  %v20546_v54 = vld [vmem:[#allocation102_spill] sm:$0xff] }
 0x52b   : > { %12706 = vmatprep.subr.bf16.mxu1 %v13537_v33  ;;  %12117 = vmatpush3.bf16.msra.mxu0 %v13542_v40  ;;  %vm20547_vm4 = vnez %v20546_v54  ;;  %v20554_v40 = vld [vmem:[#allocation45_spill] sm:$0xff] }
 0x52c   : > { %10285 = vmatmul.mubr.msk.bf16.gmra.mrb[112].mxu0 %vm20543_vm7, %v17028_v62  ;;  %10375 = vmatmul.mubr.msk.bf16.gmra.mrb[68].mxu1 %vm20538_vm0, %v16961_v36  ;;  %vm20555_vm1 = vnez %v20554_v40 }
 0x52d   : > { %5798 = vmatprep.mubr.bf16.mxu0 %v17044_v13  ;;  %6256 = vmatprep.mubr.bf16.mxu1 %v16985_v17 }
 0x52e   : > { %12707 = vmatpush3.bf16.msra.mxu1 %v13537_v33  ;;  %12118 = vmatprep.subr.bf16.mxu0 %v13544_v5  ;;  %v20552_v33 = vld [vmem:[#allocation40_spill] sm:$0xff]  ;;  %v20556_v5 = vld [vmem:[#allocation53_spill] sm:$0xff] }
 0x52f   : > { %12708 = vmatprep.subr.bf16.mxu1 %v13540_v26  ;;  %12119 = vmatpush3.bf16.msra.mxu0 %v13545_v19  ;;  %vm20553_vm14 = vnez %v20552_v33  ;;  %v20560_v19 = vld [vmem:[#allocation69_spill] sm:$0xff] }
 0x530   : > { %12120 = vmatprep.subr.bf16.mxu0 %v13547_v21  ;;  %v20562_v21 = vld [vmem:[#allocation73_spill] sm:$0xff] }
 0x532   : > { %12709 = vmatpush3.bf16.msra.mxu1 %v13540_v26  ;;  %v20558_v26 = vld [vmem:[#allocation62_spill] sm:$0xff] }
 0x533   : > { %12710 = vmatprep.subr.bf16.mxu1 %v13543_v35  ;;  %12121 = vmatpush3.bf16.msra.mxu0 %v13548_v34  ;;  %v20566_v34 = vld [vmem:[#allocation82_spill] sm:$0xff] }
 0x534   : > { %10288 = vmatmul.mubr.msk.bf16.gmra.mrb[116].mxu0 %vm20545_vm11, %v17059_v22  ;;  %10378 = vmatmul.mubr.msk.bf16.gmra.mrb[72].mxu1 %vm20541_vm10, %v17000_v55 }
 0x535   : > { %5806 = vmatprep.mubr.bf16.mxu0 %v17086_v38  ;;  %6264 = vmatprep.mubr.bf16.mxu1 %v17032_v12 }
 0x536   : > { %12711 = vmatpush3.bf16.msra.mxu1 %v13543_v35  ;;  %v20564_v35 = vld [vmem:[#allocation77_spill] sm:$0xff] }
 0x537   : > { %12712 = vmatprep.subr.bf16.mxu1 %v13546_v6 }
 0x53a   : > { %12713 = vmatpush3.bf16.msra.mxu1 %v13546_v6  ;;  %v13550_v6 = vld [vmem:[#allocation8 + $0x208] sm:$0xff]  }
 0x53b   : > { %12746 = vmatprep.subr.bf16.mxu1 %v13549_v8 }
 0x53c   : > { %10291 = vmatmul.mubr.msk.bf16.gmra.mrb[120].mxu0 %vm20547_vm4, %v17079_v53  ;;  %10381 = vmatmul.mubr.msk.bf16.gmra.mrb[76].mxu1 %vm20543_vm7, %v17028_v62 }
 0x53d   : > { %5814 = vmatprep.mubr.bf16.mxu0 %v17103_v16  ;;  %6272 = vmatprep.mubr.bf16.mxu1 %v17044_v13 }
 0x544   : > { %10294 = vmatmul.mubr.msk.bf16.gmra.mrb[124].mxu0 %vm20549_vm6, %v17116_v2  ;;  %10384 = vmatmul.mubr.msk.bf16.gmra.mrb[80].mxu1 %vm20545_vm11, %v17059_v22 }
 0x545   : > { %5822 = vmatprep.mubr.bf16.mxu0 %v17125_v31  ;;  %6280 = vmatprep.mubr.bf16.mxu1 %v17086_v38 }
 0x54c   : > { %10297 = vmatmul.mubr.msk.bf16.gmra.mrb[128].mxu0 %vm20551_vm12, %v17136_v15  ;;  %10387 = vmatmul.mubr.msk.bf16.gmra.mrb[84].mxu1 %vm20547_vm4, %v17079_v53  ;;  %vm20557_vm4 = vnez %v20556_v5 }
 0x54d   : > { %5830 = vmatprep.mubr.bf16.mxu0 %v17153_v45  ;;  %6288 = vmatprep.mubr.bf16.mxu1 %v17103_v16 }
 0x554   : > { %10300 = vmatmul.mubr.msk.bf16.gmra.mrb[132].mxu0 %vm20553_vm14, %v17166_v29  ;;  %10390 = vmatmul.mubr.msk.bf16.gmra.mrb[88].mxu1 %vm20549_vm6, %v17116_v2  ;;  %vm20559_vm6 = vnez %v20558_v26 }
 0x555   : > { %5838 = vmatprep.mubr.bf16.mxu0 %v17175_v52  ;;  %6296 = vmatprep.mubr.bf16.mxu1 %v17125_v31 }
 0x55c   : > { %10303 = vmatmul.mubr.msk.bf16.gmra.mrb[136].mxu0 %vm20555_vm1, %v17186_v4  ;;  %10393 = vmatmul.mubr.msk.bf16.gmra.mrb[92].mxu1 %vm20551_vm12, %v17136_v15  ;;  %vm20561_vm12 = vnez %v20560_v19 }
 0x55d   : > { %5846 = vmatprep.mubr.bf16.mxu0 %v17203_v56  ;;  %6304 = vmatprep.mubr.bf16.mxu1 %v17153_v45 }
 0x564   : > { %10306 = vmatmul.mubr.msk.bf16.gmra.mrb[140].mxu0 %vm20557_vm4, %v17216_v28  ;;  %10396 = vmatmul.mubr.msk.bf16.gmra.mrb[96].mxu1 %vm20553_vm14, %v17166_v29  ;;  %vm20563_vm14 = vnez %v20562_v21 }
 0x565   : > { %5854 = vmatprep.mubr.bf16.mxu0 %v17225_v0  ;;  %6312 = vmatprep.mubr.bf16.mxu1 %v17175_v52 }
 0x56c   : > { %10309 = vmatmul.mubr.msk.bf16.gmra.mrb[144].mxu0 %vm20559_vm6, %v17236_v39  ;;  %10399 = vmatmul.mubr.msk.bf16.gmra.mrb[100].mxu1 %vm20555_vm1, %v17186_v4  ;;  %vm20565_vm1 = vnez %v20564_v35 }
 0x56d   : > { %5862 = vmatprep.mubr.bf16.mxu0 %v17253_v61  ;;  %6320 = vmatprep.mubr.bf16.mxu1 %v17203_v56 }
 0x574   : > { %10312 = vmatmul.mubr.msk.bf16.gmra.mrb[148].mxu0 %vm20561_vm12, %v17266_v30  ;;  %10402 = vmatmul.mubr.msk.bf16.gmra.mrb[104].mxu1 %vm20557_vm4, %v17216_v28  ;;  %vm20567_vm4 = vnez %v20566_v34 }
 0x575   : > { %5870 = vmatprep.mubr.bf16.mxu0 %v17277_v51  ;;  %6328 = vmatprep.mubr.bf16.mxu1 %v17225_v0 }
 0x57c   : > { %10315 = vmatmul.mubr.msk.bf16.gmra.mrb[152].mxu0 %vm20563_vm14, %v17287_v44  ;;  %10405 = vmatmul.mubr.msk.bf16.gmra.mrb[108].mxu1 %vm20559_vm6, %v17236_v39 }
 0x57d   : > { %5878 = vmatprep.mubr.bf16.mxu0 %v17303_v1  ;;  %6336 = vmatprep.mubr.bf16.mxu1 %v17253_v61 }
 0x584   : > { %10318 = vmatmul.mubr.msk.bf16.gmra.mrb[156].mxu0 %vm20565_vm1, %v17312_v18  ;;  %10408 = vmatmul.mubr.msk.bf16.gmra.mrb[112].mxu1 %vm20561_vm12, %v17266_v30 }
 0x585   : > { %5886 = vmatprep.mubr.bf16.mxu0 %v17320_v46  ;;  %6344 = vmatprep.mubr.bf16.mxu1 %v17277_v51 }
 0x58c   : > { %10321 = vmatmul.mubr.msk.bf16.gmra.mrb[160].mxu0 %vm20567_vm4, %v17335_v59  ;;  %10411 = vmatmul.mubr.msk.bf16.gmra.mrb[116].mxu1 %vm20563_vm14, %v17287_v44  ;;  %vm20590_vm4 = vnez %v20550_v42 }
 0x58d   : > { %6352 = vmatprep.mubr.bf16.mxu1 %v17303_v1  ;;  %6795 = vmatprep.mubr.bf16.mxu0 %v16970_v10 }
 0x594   : > { %10414 = vmatmul.mubr.msk.bf16.gmra.mrb[120].mxu1 %vm20565_vm1, %v17312_v18  ;;  %10462 = vmatmul.mubr.msk.bf16.vlgmr.msra.gmra.mrb[164].mxu0 %vm20538_vm0, %v16961_v36  ;;  %v13552_v36 = vld [vmem:[#allocation8 + $0x218] sm:$0xff]   ;;  %vm20584_vm0 = vnez %v20548_v49 }
 0x595   : > { %6803 = vmatprep.mubr.bf16.mxu0 %v16985_v17  ;;  %12714 = vmatprep.mubr.bf16.mxu1 %v20536_v25  ;;  %v13551_v17 = vld [vmem:[#allocation8 + $0x210] sm:$0xff]  }
 0x59c   : > { %12715 = vmatmul.mubr.msk.bf16.vlgmr.msra.gmra.mrb[28].mxu1 %vm20229_vm9, %v20568_v27  ;;  %10465 = vmatmul.mubr.msk.bf16.gmra.mrb[168].mxu0 %vm20541_vm10, %v17000_v55  ;;  %v13553_v55 = vld [vmem:[#allocation8 + $0x220] sm:$0xff]  }
 0x59d   : > { %12747 = vmatpush3.bf16.msra.mxu1 %v13549_v8  ;;  %12718 = vmatprep.mubr.msk.bf16.mxu1 %vm20235_vm5, %v16981_v63 }
 0x59e   : > { %6811 = vmatprep.mubr.bf16.mxu0 %v17032_v12  ;;  %12748 = vmatprep.subr.bf16.mxu1 %v13550_v6  ;;  %v13554_v12 = vld [vmem:[#allocation8 + $0x228] sm:$0xff]  }
 0x5a1   : > { %12749 = vmatpush3.bf16.msra.mxu1 %v13550_v6  ;;  %v13556_v6 = vld [vmem:[#allocation8 + $0x238] sm:$0xff]  }
 0x5a2   : > { %12750 = vmatprep.subr.bf16.mxu1 %v13551_v17 }
 0x5a4   : > { %12719 = vmatmul.mubr.msk.bf16.gmra.mrb[32].mxu1 %vm20245_vm3, %v17013_v9  ;;  %10468 = vmatmul.mubr.msk.bf16.gmra.mrb[172].mxu0 %vm20543_vm7, %v17028_v62  ;;  %v20573_v62 = vld [vmem:[#allocation46_spill] sm:$0xff]  ;;  %vm20577_vm7 = vnez %v20546_v54  ;;  %v20586_v54 = vld [vmem:[#allocation44_spill] sm:$0xff] }
 0x5a5   : > { %12722 = vmatprep.mubr.msk.bf16.mxu1 %vm20255_vm13, %v17040_v32  ;;  %6819 = vmatprep.mubr.bf16.mxu0 %v17044_v13  ;;  %v13555_v13 = vld [vmem:[#allocation8 + $0x230] sm:$0xff]  }
 0x5a6   : > { %12751 = vmatpush3.bf16.msra.mxu1 %v13551_v17  ;;  %v20575_v17 = vld [vmem:[#allocation79_spill] sm:$0xff] }
 0x5a7   : > { %12752 = vmatprep.subr.bf16.mxu1 %v13552_v36 }
 0x5aa   : > { %12753 = vmatpush3.bf16.msra.mxu1 %v13552_v36 }
 0x5ab   : > { %12754 = vmatprep.subr.bf16.mxu1 %v13553_v55 }
 0x5ac   : > { %12723 = vmatmul.mubr.msk.bf16.gmra.mrb[36].mxu1 %vm20263_vm8, %v17075_v23  ;;  %10471 = vmatmul.mubr.msk.bf16.gmra.mrb[176].mxu0 %vm20545_vm11, %v17059_v22  ;;  %v20578_v22 = vld [vmem:[#allocation20_spill] sm:$0xff]  ;;  %vm20580_vm11 = vnez %v20579_v41 }
 0x5ad   : > { %12726 = vmatprep.mubr.msk.bf16.mxu1 %vm20271_vm15, %v20573_v62  ;;  %6827 = vmatprep.mubr.bf16.mxu0 %v17086_v38  ;;  %v20581_v38 = vld [vmem:[#allocation33_spill] sm:$0xff]  ;;  %v20787_v41 = vld [vmem:[#allocation24_spill] sm:$0xff] }
 0x5ae   : > { %12755 = vmatpush3.bf16.msra.mxu1 %v13553_v55  ;;  %v20582_v55 = vld [vmem:[#allocation127_spill] sm:$0xff] }
 0x5af   : > { %12756 = vmatprep.subr.bf16.mxu1 %v13554_v12  ;;  %vm20583_vm10 = vnez %v20582_v55 }
 0x5b2   : > { %12757 = vmatpush3.bf16.msra.mxu1 %v13554_v12  ;;  %v20585_v12 = vld [vmem:[#allocation43_spill] sm:$0xff] }
 0x5b3   : > { %12758 = vmatprep.subr.bf16.mxu1 %v13555_v13 }
 0x5b4   : > { %12727 = vmatmul.mubr.msk.bf16.gmra.mrb[40].mxu1 %vm20283_vm2, %v20575_v17  ;;  %10474 = vmatmul.mubr.msk.bf16.gmra.mrb[180].mxu0 %vm20577_vm7, %v17079_v53  ;;  %vm20587_vm7 = vnez %v20586_v54  ;;  %v20588_v53 = vld [vmem:[#allocation56_spill] sm:$0xff] }
 0x5b5   : > { %12730 = vmatprep.mubr.msk.bf16.mxu1 %vm20580_vm11, %v20578_v22  ;;  %6835 = vmatprep.mubr.bf16.mxu0 %v17103_v16  ;;  %vm20589_vm9 = vnez %v20588_v53  ;;  %v20591_v16 = vld [vmem:[#allocation19_spill] sm:$0xff] }
 0x5b6   : > { %12759 = vmatpush3.bf16.msra.mxu1 %v13555_v13  ;;  %v20592_v13 = vld [vmem:[#allocation26_spill] sm:$0xff] }
 0x5b7   : > { %12760 = vmatprep.subr.bf16.mxu1 %v13556_v6  ;;  %vm20593_vm1 = vnez %v20592_v13 }
 0x5ba   : > { %12761 = vmatpush3.bf16.msra.mxu1 %v13556_v6 }
 0x5bc   : > { %12731 = vmatmul.mubr.msk.bf16.gmra.mrb[44].mxu1 %vm20583_vm10, %v20581_v38  ;;  %10477 = vmatmul.mubr.msk.bf16.gmra.mrb[184].mxu0 %vm20584_vm0, %v17116_v2  ;;  %vm20594_vm0 = vnez %v20514_v11 }
 0x5bd   : > { %12734 = vmatprep.mubr.msk.bf16.mxu1 %vm20587_vm7, %v20585_v12  ;;  %6843 = vmatprep.mubr.bf16.mxu0 %v17125_v31  ;;  %vm20595_vm7 = vnez %v20552_v33 }
 0x5c4   : > { %12735 = vmatmul.mubr.msk.bf16.gmra.mrb[48].mxu1 %vm20589_vm9, %v17232_v58  ;;  %10480 = vmatmul.mubr.msk.bf16.gmra.mrb[188].mxu0 %vm20590_vm4, %v17136_v15  ;;  %vm20596_vm9 = vnez %v20520_v20  ;;  %vm20597_vm4 = vnez %v20530_v60 }
 0x5c5   : > { %12738 = vmatprep.mubr.msk.bf16.mxu1 %vm20593_vm1, %v20591_v16  ;;  %6851 = vmatprep.mubr.bf16.mxu0 %v17153_v45  ;;  %vm20598_vm1 = vnez %v20554_v40 }
 0x5cc   : > { %12739 = vmatmul.mubr.msk.bf16.gmra.mrb[52].mxu1 %vm20594_vm0, %v17284_v57  ;;  %10483 = vmatmul.mubr.msk.bf16.gmra.mrb[192].mxu0 %vm20595_vm7, %v17166_v29  ;;  %vm20599_vm7 = vnez %v20556_v5 }
 0x5cd   : > { %12742 = vmatprep.mubr.msk.bf16.mxu1 %vm20596_vm9, %v17301_v14  ;;  %6859 = vmatprep.mubr.bf16.mxu0 %v17175_v52 }
 0x5d4   : > { %12743 = vmatmul.mubr.msk.bf16.gmra.mrb[56].mxu1 %vm20597_vm4, %v17318_v50  ;;  %10486 = vmatmul.mubr.msk.bf16.gmra.mrb[196].mxu0 %vm20598_vm1, %v17186_v4 }
 0x5d5   : > { %6867 = vmatprep.mubr.bf16.mxu0 %v17203_v56  ;;  %12762 = vmatprep.mubr.msk.bf16.mxu1 %vm20235_vm5, %v16981_v63 }
 0x5dc   : > { %10489 = vmatmul.mubr.msk.bf16.gmra.mrb[200].mxu0 %vm20599_vm7, %v17216_v28  ;;  %12763 = vmatmul.mubr.msk.bf16.vlgmr.msra.gmra.mrb[28].mxu1 %vm20245_vm3, %v17013_v9  ;;  %vm20603_vm7 = vnez %v20592_v13 }
 0x5dd   : > { %6875 = vmatprep.mubr.bf16.mxu0 %v17225_v0  ;;  %12766 = vmatprep.mubr.msk.bf16.mxu1 %vm20255_vm13, %v17040_v32 }
 0x5e4   : > { %10492 = vmatmul.mubr.msk.bf16.gmra.mrb[204].mxu0 %vm20559_vm6, %v17236_v39  ;;  %12767 = vmatmul.mubr.msk.bf16.gmra.mrb[32].mxu1 %vm20263_vm8, %v17075_v23  ;;  %vm20602_vm6 = vnez %v20588_v53 }
 0x5e5   : > { %6883 = vmatprep.mubr.bf16.mxu0 %v17253_v61  ;;  %12770 = vmatprep.mubr.msk.bf16.mxu1 %vm20271_vm15, %v20573_v62 }
 0x5e7   : > { %v11850_v63 = vpop.f32.mrb[100].mxu0 }
 0x5e8   : > { %v11851_v9 = vpop.f32.mrb[101].mxu0 }
 0x5e9   : > { %v11852_v2 = vadd.f32 %v11851_v9, %v11850_v63  ;;  %v11853_v31 = vpop.f32.mrb[102].mxu0 }
 0x5ea   : > { %v11854_v15 = vpop.f32.mrb[103].mxu0 }
 0x5eb   : > { %v11855_v32 = vadd.f32 %v11854_v15, %v11853_v31 }
 0x5ec   : > { %10495 = vmatmul.mubr.msk.bf16.gmra.mrb[208].mxu0 %vm20561_vm12, %v17266_v30  ;;  %12771 = vmatmul.mubr.msk.bf16.gmra.mrb[36].mxu1 %vm20283_vm2, %v20575_v17  ;;  %vm20600_vm12 = vnez %v20586_v54  ;;  %v20805_v54 = vld [vmem:[#allocation73_spill] sm:$0xff] }
 0x5ed   : > { %6891 = vmatprep.mubr.bf16.mxu0 %v17277_v51  ;;  %12774 = vmatprep.mubr.msk.bf16.mxu1 %vm20580_vm11, %v20578_v22 }
 0x5ef   : > { %v11856_v23 = vpop.f32.mrb[104].mxu0  ;;  %v11986_v45 = vpop.f32.mrb[60].mxu1 }
 0x5f0   : > { %v11857_v29 = vpop.f32.mrb[105].mxu0  ;;  %v11987_v52 = vpop.f32.mrb[61].mxu1 }
 0x5f1   : > { %v11858_v4 = vadd.f32 %v11857_v29, %v11856_v23  ;;  %v11988_v56 = vadd.f32 %v11987_v52, %v11986_v45  ;;  %v11859_v28 = vpop.f32.mrb[106].mxu0  ;;  %v11989_v0 = vpop.f32.mrb[62].mxu1  ;;  %v13557_v52 = vld [vmem:[#allocation10 + $0x100] sm:$0xff]  }
 0x5f2   : > { %v11860_v39 = vpop.f32.mrb[107].mxu0  ;;  %v11990_v61 = vpop.f32.mrb[63].mxu1  ;;  %12242 = vmatprep.subr.bf16.mxu0 %v13557_v52 }
 0x5f3   : > { %v17585_v30 = vadd.f32 %v11988_v56, %v11852_v2  ;;  %v11861_v62 = vadd.f32 %v11860_v39, %v11859_v28  ;;  %v11991_v6 = vadd.f32 %v11990_v61, %v11989_v0  ;;  %v13558_v56 = vld [vmem:[#allocation10 + $0xc0] sm:$0xff]  }
 0x5f4   : > { %10498 = vmatmul.mubr.msk.bf16.gmra.mrb[212].mxu0 %vm20563_vm14, %v17287_v44  ;;  %12775 = vmatmul.mubr.msk.bf16.gmra.mrb[40].mxu1 %vm20583_vm10, %v20581_v38  ;;  %vm20601_vm14 = vnez %v20564_v35 }
 0x5f5   : > { %v17593_v51 = vadd.f32 %v11991_v6, %v11855_v32  ;;  %6899 = vmatprep.mubr.bf16.mxu0 %v17303_v1  ;;  %12778 = vmatprep.mubr.msk.bf16.mxu1 %vm20600_vm12, %v20585_v12 }
 0x5f6   : > { %12243 = vmatpush3.bf16.msra.mxu0 %v13558_v56 }
 0x5f7   : > { %v11862_v17 = vpop.f32.mrb[108].mxu0  ;;  %v11992_v22 = vpop.f32.mrb[64].mxu1 }
 0x5f8   : > { %v11863_v63 = vpop.f32.mrb[109].mxu0  ;;  %v11993_v9 = vpop.f32.mrb[65].mxu1 }
 0x5f9   : > { %v11864_v2 = vadd.f32 %v11863_v63, %v11862_v17  ;;  %v11994_v31 = vadd.f32 %v11993_v9, %v11992_v22  ;;  %v11865_v15 = vpop.f32.mrb[110].mxu0  ;;  %v11995_v44 = vpop.f32.mrb[66].mxu1  ;;  %v13559_v63 = vld [vmem:[#allocation10 + $0x140] sm:$0xff]  }
 0x5fa   : > { %v11866_v23 = vpop.f32.mrb[111].mxu0  ;;  %v11996_v45 = vpop.f32.mrb[67].mxu1  ;;  %12794 = vmatprep.subr.bf16.mxu1 %v13559_v63 }
 0x5fb   : > { %v17599_v29 = vadd.f32 %v11994_v31, %v11858_v4  ;;  %v11867_v38 = vadd.f32 %v11866_v23, %v11865_v15  ;;  %v11997_v32 = vadd.f32 %v11996_v45, %v11995_v44  ;;  %12795 = vmatpush3.bf16.msra.mxu1 %v13559_v63 }
 0x5fc   : > { %10501 = vmatmul.mubr.msk.bf16.gmra.mrb[216].mxu0 %vm20601_vm14, %v17312_v18  ;;  %12779 = vmatmul.mubr.msk.bf16.gmra.mrb[44].mxu1 %vm20602_vm6, %v17232_v58  ;;  %vm20604_vm14 = vnez %v20566_v34 }
 0x5fd   : > { %v17607_v1 = vadd.f32 %v11997_v32, %v11861_v62  ;;  %6907 = vmatprep.mubr.bf16.mxu0 %v17320_v46  ;;  %12782 = vmatprep.mubr.msk.bf16.mxu1 %vm20603_vm7, %v20591_v16 }
 0x5ff   : > { %v11868_v12 = vpop.f32.mrb[112].mxu0  ;;  %v11998_v4 = vpop.f32.mrb[68].mxu1 }
 0x600   : > { %v11869_v28 = vpop.f32.mrb[113].mxu0  ;;  %v11999_v0 = vpop.f32.mrb[69].mxu1 }
 0x601   : > { %v11870_v39 = vadd.f32 %v11869_v28, %v11868_v12  ;;  %v12000_v18 = vadd.f32 %v11999_v0, %v11998_v4  ;;  %v11871_v61 = vpop.f32.mrb[114].mxu0  ;;  %v12001_v6 = vpop.f32.mrb[70].mxu1  ;;  %v13560_v4 = vld [vmem:[#allocation10 + $0x148] sm:$0xff]  }
 0x602   : > { %v11872_v58 = vpop.f32.mrb[115].mxu0  ;;  %v12002_v62 = vpop.f32.mrb[71].mxu1  ;;  %12796 = vmatprep.subr.bf16.mxu1 %v13560_v4 }
 0x603   : > { %v17613_v17 = vadd.f32 %v12000_v18, %v11864_v2  ;;  %v11873_v46 = vadd.f32 %v11872_v58, %v11871_v61  ;;  %v12003_v22 = vadd.f32 %v12002_v62, %v12001_v6  ;;  %12797 = vmatpush3.bf16.msra.mxu1 %v13560_v4 }
 0x604   : > { %10504 = vmatmul.mubr.msk.bf16.gmra.mrb[220].mxu0 %vm20604_vm14, %v17335_v59  ;;  %12783 = vmatmul.mubr.msk.bf16.gmra.mrb[48].mxu1 %vm20594_vm0, %v17284_v57  ;;  %vm20605_vm14 = vnez %v20534_v47  ;;  %v13578_v47 = vld [vmem:[#allocation10 + $0xe8] sm:$0xff]  }
 0x605   : > { %v17621_v16 = vadd.f32 %v12003_v22, %v11867_v38  ;;  %12786 = vmatprep.mubr.msk.bf16.mxu1 %vm20596_vm9, %v17301_v14  ;;  %6915 = vmatprep.mubr.bf16.mxu0 %v20536_v25  ;;  %v13561_v14 = vld [vmem:[#allocation10 + $0x108] sm:$0xff]  }
 0x606   : > { %12244 = vmatprep.subr.bf16.mxu0 %v13561_v14 }
 0x607   : > { %v11874_v9 = vpop.f32.mrb[116].mxu0  ;;  %v12004_v2 = vpop.f32.mrb[72].mxu1 }
 0x608   : > { %v11875_v31 = vpop.f32.mrb[117].mxu0  ;;  %v12005_v15 = vpop.f32.mrb[73].mxu1 }
 0x609   : > { %v11876_v44 = vadd.f32 %v11875_v31, %v11874_v9  ;;  %v12006_v59 = vadd.f32 %v12005_v15, %v12004_v2  ;;  %v11877_v23 = vpop.f32.mrb[118].mxu0  ;;  %v12007_v45 = vpop.f32.mrb[74].mxu1 }
 0x60a   : > { %v11878_v32 = vpop.f32.mrb[119].mxu0  ;;  %v12008_v57 = vpop.f32.mrb[75].mxu1 }
 0x60b   : > { %v17627_v38 = vadd.f32 %v12006_v59, %v11870_v39  ;;  %v11879_v52 = vadd.f32 %v11878_v32, %v11877_v23  ;;  %v12009_v12 = vadd.f32 %v12008_v57, %v12007_v45  ;;  %v13562_v39 = vld [vmem:[#allocation10 + $0xc8] sm:$0xff]  }
 0x60c   : > { %6916 = vmatmul.mubr.bf16.gmra.mrb[224].mxu0 %v20536_v25  ;;  %12787 = vmatmul.mubr.msk.bf16.gmra.mrb[52].mxu1 %vm20597_vm4, %v17318_v50 }
 0x60d   : > { %v17633_v56 = vadd.f32 %v12009_v12, %v11873_v46  ;;  %12790 = vmatprep.mubr.msk.bf16.mxu1 %vm20605_vm14, %v17340_v48  ;;  %12245 = vmatpush3.bf16.msra.mxu0 %v13562_v39  ;;  %v13563_v48 = vld [vmem:[#allocation10 + $0x150] sm:$0xff]  }
 0x60e   : > { %12798 = vmatprep.subr.bf16.mxu1 %v13563_v48 }
 0x60f   : > { %v11880_v28 = vpop.f32.mrb[120].mxu0  ;;  %v12010_v0 = vpop.f32.mrb[76].mxu1  ;;  %12799 = vmatpush3.bf16.msra.mxu1 %v13563_v48 }
 0x610   : > { %v11881_v18 = vpop.f32.mrb[121].mxu0  ;;  %v12011_v61 = vpop.f32.mrb[77].mxu1 }
 0x611   : > { %v11882_v6 = vadd.f32 %v11881_v18, %v11880_v28  ;;  %v12012_v58 = vadd.f32 %v12011_v61, %v12010_v0  ;;  %v11883_v62 = vpop.f32.mrb[122].mxu0  ;;  %v12013_v22 = vpop.f32.mrb[78].mxu1  ;;  %v13564_v18 = vld [vmem:[#allocation10 + $0x158] sm:$0xff]   ;;  %v13565_v61 = vld [vmem:[#allocation10 + $0x110] sm:$0xff]  }
 0x612   : > { %v11884_v50 = vpop.f32.mrb[123].mxu0  ;;  %v12014_v46 = vpop.f32.mrb[79].mxu1  ;;  %12800 = vmatprep.subr.bf16.mxu1 %v13564_v18  ;;  %12246 = vmatprep.subr.bf16.mxu0 %v13565_v61 }
 0x613   : > { %v17638_v63 = vadd.f32 %v12012_v58, %v11876_v44  ;;  %v11885_v9 = vadd.f32 %v11884_v50, %v11883_v62  ;;  %v12015_v2 = vadd.f32 %v12014_v46, %v12013_v22  ;;  %12801 = vmatpush3.bf16.msra.mxu1 %v13564_v18  ;;  %v13566_v22 = vld [vmem:[#allocation10 + $0xd0] sm:$0xff]  }
 0x614   : > { %12791 = vmatmul.mubr.bf16.gmra.mrb[56].mxu1 %v20536_v25  ;;  %12247 = vmatpush3.bf16.msra.mxu0 %v13566_v22  ;;  %v13577_v25 = vld [vmem:[#allocation10 + $0x128] sm:$0xff]  }
 0x615   : > { %v17641_v31 = vadd.f32 %v12015_v2, %v11879_v52 }
 0x617   : > { %v11886_v15 = vpop.f32.mrb[124].mxu0  ;;  %v12016_v59 = vpop.f32.mrb[80].mxu1 }
 0x618   : > { %v11887_v23 = vpop.f32.mrb[125].mxu0  ;;  %v12017_v45 = vpop.f32.mrb[81].mxu1 }
 0x619   : > { %v11888_v32 = vadd.f32 %v11887_v23, %v11886_v15  ;;  %v12018_v57 = vadd.f32 %v12017_v45, %v12016_v59  ;;  %v11889_v12 = vpop.f32.mrb[126].mxu0  ;;  %v12019_v4 = vpop.f32.mrb[82].mxu1 }
 0x61a   : > { %v11890_v14 = vpop.f32.mrb[127].mxu0  ;;  %v12020_v44 = vpop.f32.mrb[83].mxu1 }
 0x61b   : > { %v17643_v28 = vadd.f32 %v12018_v57, %v11882_v6  ;;  %v11891_v0 = vadd.f32 %v11890_v14, %v11889_v12  ;;  %v12021_v39 = vadd.f32 %v12020_v44, %v12019_v4  ;;  %v13567_v12 = vld [vmem:[#allocation10 + $0x160] sm:$0xff]  }
 0x61c   : > { %12802 = vmatprep.subr.bf16.mxu1 %v13567_v12 }
 0x61d   : > { %v17645_v52 = vadd.f32 %v12021_v39, %v11885_v9  ;;  %12803 = vmatpush3.bf16.msra.mxu1 %v13567_v12 }
 0x61f   : > { %v11892_v58 = vpop.f32.mrb[128].mxu0  ;;  %v12022_v62 = vpop.f32.mrb[84].mxu1 }
 0x620   : > { %v11893_v50 = vpop.f32.mrb[129].mxu0  ;;  %v12023_v46 = vpop.f32.mrb[85].mxu1 }
 0x621   : > { %v11894_v2 = vadd.f32 %v11893_v50, %v11892_v58  ;;  %v12024_v48 = vadd.f32 %v12023_v46, %v12022_v62  ;;  %v11895_v15 = vpop.f32.mrb[130].mxu0  ;;  %v12025_v59 = vpop.f32.mrb[86].mxu1 }
 0x622   : > { %v11896_v6 = vpop.f32.mrb[131].mxu0  ;;  %v12026_v23 = vpop.f32.mrb[87].mxu1 }
 0x623   : > { %v17647_v45 = vadd.f32 %v12024_v48, %v11888_v32  ;;  %v11897_v57 = vadd.f32 %v11896_v6, %v11895_v15  ;;  %v12027_v9 = vadd.f32 %v12026_v23, %v12025_v59  ;;  %v13568_v15 = vld [vmem:[#allocation10 + $0x168] sm:$0xff]   ;;  %v13569_v59 = vld [vmem:[#allocation10 + $0x118] sm:$0xff]  }
 0x624   : > { %12804 = vmatprep.subr.bf16.mxu1 %v13568_v15  ;;  %12248 = vmatprep.subr.bf16.mxu0 %v13569_v59 }
 0x625   : > { %v17649_v4 = vadd.f32 %v12027_v9, %v11891_v0  ;;  %12805 = vmatpush3.bf16.msra.mxu1 %v13568_v15 }
 0x627   : > { %v11898_v14 = vpop.f32.mrb[132].mxu0  ;;  %v12028_v44 = vpop.f32.mrb[88].mxu1 }
 0x628   : > { %v11899_v39 = vpop.f32.mrb[133].mxu0  ;;  %v12029_v18 = vpop.f32.mrb[89].mxu1 }
 0x629   : > { %v11900_v61 = vadd.f32 %v11899_v39, %v11898_v14  ;;  %v12030_v58 = vadd.f32 %v12029_v18, %v12028_v44  ;;  %v11901_v62 = vpop.f32.mrb[134].mxu0  ;;  %v12031_v50 = vpop.f32.mrb[90].mxu1 }
 0x62a   : > { %v11902_v22 = vpop.f32.mrb[135].mxu0  ;;  %v12032_v46 = vpop.f32.mrb[91].mxu1 }
 0x62b   : > { %v17651_v34 = vadd.f32 %v12030_v58, %v11894_v2  ;;  %v11903_v32 = vadd.f32 %v11902_v22, %v11901_v62  ;;  %v12033_v48 = vadd.f32 %v12032_v46, %v12031_v50 }
 0x62d   : > { %v17653_v0 = vadd.f32 %v12033_v48, %v11897_v57  ;;  %v13570_v48 = vld [vmem:[#allocation10 + $0xd8] sm:$0xff]  }
 0x62e   : > { %12249 = vmatpush3.bf16.msra.mxu0 %v13570_v48 }
 0x62f   : > { %v11904_v6 = vpop.f32.mrb[136].mxu0  ;;  %v12034_v23 = vpop.f32.mrb[92].mxu1 }
 0x630   : > { %v11905_v9 = vpop.f32.mrb[137].mxu0  ;;  %v12035_v12 = vpop.f32.mrb[93].mxu1 }
 0x631   : > { %v11906_v14 = vadd.f32 %v11905_v9, %v11904_v6  ;;  %v12036_v44 = vadd.f32 %v12035_v12, %v12034_v23  ;;  %v11907_v39 = vpop.f32.mrb[138].mxu0  ;;  %v12037_v18 = vpop.f32.mrb[94].mxu1 }
 0x632   : > { %v11908_v35 = vpop.f32.mrb[139].mxu0  ;;  %v12038_v2 = vpop.f32.mrb[95].mxu1 }
 0x633   : > { %v17655_v58 = vadd.f32 %v12036_v44, %v11900_v61  ;;  %v11909_v62 = vadd.f32 %v11908_v35, %v11907_v39  ;;  %v12039_v50 = vadd.f32 %v12038_v2, %v12037_v18  ;;  %v13571_v35 = vld [vmem:[#allocation10 + $0x170] sm:$0xff]  }
 0x634   : > { %12806 = vmatprep.subr.bf16.mxu1 %v13571_v35 }
 0x635   : > { %v17657_v22 = vadd.f32 %v12039_v50, %v11903_v32  ;;  %12807 = vmatpush3.bf16.msra.mxu1 %v13571_v35 }
 0x637   : > { %v11910_v57 = vpop.f32.mrb[140].mxu0  ;;  %v12040_v46 = vpop.f32.mrb[96].mxu1 }
 0x638   : > { %v11911_v15 = vpop.f32.mrb[141].mxu0  ;;  %v12041_v59 = vpop.f32.mrb[97].mxu1 }
 0x639   : > { %v11912_v21 = vadd.f32 %v11911_v15, %v11910_v57  ;;  %v12042_v19 = vadd.f32 %v12041_v59, %v12040_v46  ;;  %v11913_v26 = vpop.f32.mrb[142].mxu0  ;;  %v12043_v6 = vpop.f32.mrb[98].mxu1 }
 0x63a   : > { %v11914_v23 = vpop.f32.mrb[143].mxu0  ;;  %v12044_v9 = vpop.f32.mrb[99].mxu1 }
 0x63b   : > { %v17659_v12 = vadd.f32 %v12042_v19, %v11906_v14  ;;  %v11915_v61 = vadd.f32 %v11914_v23, %v11913_v26  ;;  %v12045_v44 = vadd.f32 %v12044_v9, %v12043_v6  ;;  %v13572_v23 = vld [vmem:[#allocation10 + $0x178] sm:$0xff]   ;;  %v13573_v9 = vld [vmem:[#allocation10 + $0x120] sm:$0xff]  }
 0x63c   : > { %12808 = vmatprep.subr.bf16.mxu1 %v13572_v23  ;;  %12250 = vmatprep.subr.bf16.mxu0 %v13573_v9 }
 0x63d   : > { %v17661_v39 = vadd.f32 %v12045_v44, %v11909_v62  ;;  %12809 = vmatpush3.bf16.msra.mxu1 %v13572_v23 }
 0x63f   : > { %v11916_v32 = vpop.f32.mrb[144].mxu0  ;;  %v12046_v18 = vpop.f32.mrb[100].mxu1 }
 0x640   : > { %v11917_v2 = vpop.f32.mrb[145].mxu0  ;;  %v12047_v50 = vpop.f32.mrb[101].mxu1 }
 0x641   : > { %v11918_v57 = vadd.f32 %v11917_v2, %v11916_v32  ;;  %v12048_v46 = vadd.f32 %v12047_v50, %v12046_v18  ;;  %v11919_v15 = vpop.f32.mrb[146].mxu0  ;;  %v12049_v59 = vpop.f32.mrb[102].mxu1 }
 0x642   : > { %v11920_v48 = vpop.f32.mrb[147].mxu0  ;;  %v12050_v5 = vpop.f32.mrb[103].mxu1 }
 0x643   : > { %v17663_v40 = vadd.f32 %v12048_v46, %v11912_v21  ;;  %v11921_v19 = vadd.f32 %v11920_v48, %v11919_v15  ;;  %v12051_v26 = vadd.f32 %v12050_v5, %v12049_v59  ;;  %v13574_v21 = vld [vmem:[#allocation10 + $0xe0] sm:$0xff]  }
 0x644   : > { %12251 = vmatpush3.bf16.msra.mxu0 %v13574_v21 }
 0x645   : > { %v17665_v14 = vadd.f32 %v12051_v26, %v11915_v61  ;;  %12252 = vmatprep.subr.bf16.mxu0 %v13577_v25 }
 0x647   : > { %v11922_v62 = vpop.f32.mrb[148].mxu0  ;;  %v12052_v6 = vpop.f32.mrb[104].mxu1 }
 0x648   : > { %v11923_v44 = vpop.f32.mrb[149].mxu0  ;;  %v12053_v35 = vpop.f32.mrb[105].mxu1  ;;  %12253 = vmatpush3.bf16.msra.mxu0 %v13578_v47 }
 0x649   : > { %v11924_v33 = vadd.f32 %v11923_v44, %v11922_v62  ;;  %v12054_v42 = vadd.f32 %v12053_v35, %v12052_v6  ;;  %v11925_v32 = vpop.f32.mrb[150].mxu0  ;;  %v12055_v18 = vpop.f32.mrb[106].mxu1 }
 0x64a   : > { %v11926_v2 = vpop.f32.mrb[151].mxu0  ;;  %v12056_v50 = vpop.f32.mrb[107].mxu1 }
 0x64b   : > { %v17667_v46 = vadd.f32 %v12054_v42, %v11918_v57  ;;  %v11927_v5 = vadd.f32 %v11926_v2, %v11925_v32  ;;  %v12057_v61 = vadd.f32 %v12056_v50, %v12055_v18  ;;  %v17675_v32 = vld [vmem:[#allocation10 + $0x80] sm:$0xff]  }
 0x64c   : > { %12842 = vmatprep.subr.bf16.mxu1 %v17675_v32 }
 0x64d   : > { %v17669_v15 = vadd.f32 %v12057_v61, %v11921_v19 }
 0x64f   : > { %v11928_v59 = vpop.f32.mrb[152].mxu0  ;;  %v12058_v48 = vpop.f32.mrb[108].mxu1 }
 0x650   : > { %v11929_v26 = vpop.f32.mrb[153].mxu0  ;;  %v12059_v62 = vpop.f32.mrb[109].mxu1 }
 0x651   : > { %v11930_v6 = vadd.f32 %v11929_v26, %v11928_v59  ;;  %v12060_v44 = vadd.f32 %v12059_v62, %v12058_v48  ;;  %v11931_v35 = vpop.f32.mrb[154].mxu0  ;;  %v12061_v49 = vpop.f32.mrb[110].mxu1 }
 0x652   : > { %v11932_v9 = vpop.f32.mrb[155].mxu0  ;;  %v12062_v24 = vpop.f32.mrb[111].mxu1 }
 0x653   : > { %v17671_v3 = vadd.f32 %v12060_v44, %v11924_v33  ;;  %v11933_v23 = vadd.f32 %v11932_v9, %v11931_v35  ;;  %v12063_v42 = vadd.f32 %v12062_v24, %v12061_v49 }
 0x655   : > { %v17673_v57 = vadd.f32 %v12063_v42, %v11927_v5 }
 0x657   : > { %v11934_v19 = vpop.f32.mrb[156].mxu0  ;;  %v12064_v18 = vpop.f32.mrb[112].mxu1 }
 0x658   : > { %v11935_v2 = vpop.f32.mrb[157].mxu0  ;;  %v12065_v50 = vpop.f32.mrb[113].mxu1 }
 0x659   : > { %v11936_v21 = vadd.f32 %v11935_v2, %v11934_v19  ;;  %v12066_v61 = vadd.f32 %v12065_v50, %v12064_v18  ;;  %v11937_v59 = vpop.f32.mrb[158].mxu0  ;;  %v12067_v48 = vpop.f32.mrb[114].mxu1 }
 0x65a   : > { %v11938_v26 = vpop.f32.mrb[159].mxu0  ;;  %v12068_v62 = vpop.f32.mrb[115].mxu1 }
 0x65b   : > { %v17678_v33 = vadd.f32 %v12066_v61, %v11930_v6  ;;  %v11939_v44 = vadd.f32 %v11938_v26, %v11937_v59  ;;  %v12069_v24 = vadd.f32 %v12068_v62, %v12067_v48 }
 0x65d   : > { %v17680_v49 = vadd.f32 %v12069_v24, %v11933_v23 }
 0x65f   : > { %v11940_v5 = vpop.f32.mrb[160].mxu0  ;;  %v12070_v35 = vpop.f32.mrb[116].mxu1 }
 0x660   : > { %v11941_v9 = vpop.f32.mrb[161].mxu0  ;;  %v12071_v42 = vpop.f32.mrb[117].mxu1 }
 0x661   : > { %v11942_v60 = vadd.f32 %v11941_v9, %v11940_v5  ;;  %v12072_v20 = vadd.f32 %v12071_v42, %v12070_v35  ;;  %v11943_v19 = vpop.f32.mrb[162].mxu0  ;;  %v12073_v18 = vpop.f32.mrb[118].mxu1 }
 0x662   : > { %v11944_v2 = vpop.f32.mrb[163].mxu0  ;;  %v12074_v50 = vpop.f32.mrb[119].mxu1 }
 0x663   : > { %v17682_v11 = vadd.f32 %v12072_v20, %v11936_v21  ;;  %v11945_v6 = vadd.f32 %v11944_v2, %v11943_v19  ;;  %v12075_v61 = vadd.f32 %v12074_v50, %v12073_v18 }
 0x665   : > { %20606 = vst [vmem:[#allocation34_spill] sm:$0xff] %v17682_v11  ;;  %v17684_v23 = vadd.f32 %v12075_v61, %v11939_v44 }
 0x667   : > { %20607 = vst [vmem:[#allocation61_spill] sm:$0xff] %v17684_v23  ;;  %v12076_v59 = vpop.f32.mrb[120].mxu1  ;;  %v12122_v48 = vpop.f32.mrb[164].mxu0 }
 0x668   : > { %v12077_v26 = vpop.f32.mrb[121].mxu1  ;;  %v12123_v62 = vpop.f32.mrb[165].mxu0 }
 0x669   : > { %v12078_v24 = vadd.f32 %v12077_v26, %v12076_v59  ;;  %v12124_v13 = vadd.f32 %v12123_v62, %v12122_v48  ;;  %v12079_v5 = vpop.f32.mrb[122].mxu1  ;;  %v12125_v35 = vpop.f32.mrb[166].mxu0  ;;  %v13581_v26 = vld [vmem:[#allocation10 + $0x130] sm:$0xff]  }
 0x66a   : > { %v12080_v9 = vpop.f32.mrb[123].mxu1  ;;  %v12126_v42 = vpop.f32.mrb[167].mxu0  ;;  %12254 = vmatprep.subr.bf16.mxu0 %v13581_v26 }
 0x66b   : > { %v17686_v53 = vadd.f32 %v12078_v24, %v11942_v60  ;;  %v12081_v25 = vadd.f32 %v12080_v9, %v12079_v5  ;;  %v12127_v20 = vadd.f32 %v12126_v42, %v12125_v35  ;;  %v17689_v21 = vadd.f32 %v17585_v30, %v12124_v13  ;;  %v13582_v13 = vld [vmem:[#allocation10 + $0xf0] sm:$0xff]  }
 0x66c   : > { %12255 = vmatpush3.bf16.msra.mxu0 %v13582_v13 }
 0x66d   : > { %20608 = vst [vmem:[#allocation38_spill] sm:$0xff] %v17686_v53  ;;  %v17691_v47 = vadd.f32 %v12081_v25, %v11945_v6  ;;  %v17694_v44 = vadd.f32 %v17593_v51, %v12127_v20 }
 0x66f   : > { %20609 = vst [vmem:[#allocation58_spill] sm:$0xff] %v17691_v47  ;;  %v12128_v19 = vpop.f32.mrb[168].mxu0 }
 0x670   : > { %v12129_v18 = vpop.f32.mrb[169].mxu0 }
 0x671   : > { %v12130_v2 = vadd.f32 %v12129_v18, %v12128_v19  ;;  %v12131_v50 = vpop.f32.mrb[170].mxu0 }
 0x672   : > { %v12132_v61 = vpop.f32.mrb[171].mxu0 }
 0x673   : > { %v12133_v59 = vadd.f32 %v12132_v61, %v12131_v50  ;;  %v17697_v48 = vadd.f32 %v17599_v29, %v12130_v2 }
 0x675   : > { %v17700_v60 = vadd.f32 %v17607_v1, %v12133_v59 }
 0x677   : > { %v12134_v30 = vpop.f32.mrb[172].mxu0 }
 0x678   : > { %v12135_v6 = vpop.f32.mrb[173].mxu0 }
 0x679   : > { %v12136_v51 = vadd.f32 %v12135_v6, %v12134_v30  ;;  %v12137_v62 = vpop.f32.mrb[174].mxu0  ;;  %v13585_v30 = vld [vmem:[#allocation10 + $0x138] sm:$0xff]  }
 0x67a   : > { %v12138_v24 = vpop.f32.mrb[175].mxu0  ;;  %v13586_v6 = vld [vmem:[#allocation10 + $0xf8] sm:$0xff]   ;;  %12256 = vmatprep.subr.bf16.mxu0 %v13585_v30 }
 0x67b   : > { %v12139_v5 = vadd.f32 %v12138_v24, %v12137_v62  ;;  %v17703_v35 = vadd.f32 %v17613_v17, %v12136_v51  ;;  %12257 = vmatpush3.bf16.msra.mxu0 %v13586_v6 }
 0x67d   : > { %v17706_v9 = vadd.f32 %v17621_v16, %v12139_v5 }
 0x67f   : > { %v12140_v29 = vpop.f32.mrb[176].mxu0 }
 0x680   : > { %v12141_v42 = vpop.f32.mrb[177].mxu0 }
 0x681   : > { %v12142_v1 = vadd.f32 %v12141_v42, %v12140_v29  ;;  %v12143_v25 = vpop.f32.mrb[178].mxu0  ;;  %v13589_v29 = vld [vmem:[#allocation10 + $0x40] sm:$0xff]  }
 0x682   : > { %v12144_v20 = vpop.f32.mrb[179].mxu0  ;;  %12378 = vmatprep.subr.bf16.mxu0 %v13589_v29 }
 0x683   : > { %v12145_v19 = vadd.f32 %v12144_v20, %v12143_v25  ;;  %v17709_v18 = vadd.f32 %v17627_v38, %v12142_v1 }
 0x685   : > { %v17712_v2 = vadd.f32 %v17633_v56, %v12145_v19 }
 0x687   : > { %v12146_v50 = vpop.f32.mrb[180].mxu0 }
 0x688   : > { %v12147_v61 = vpop.f32.mrb[181].mxu0 }
 0x689   : > { %v12148_v59 = vadd.f32 %v12147_v61, %v12146_v50  ;;  %v12149_v17 = vpop.f32.mrb[182].mxu0 }
 0x68a   : > { %v12150_v26 = vpop.f32.mrb[183].mxu0 }
 0x68b   : > { %v12151_v13 = vadd.f32 %v12150_v26, %v12149_v17  ;;  %v17715_v16 = vadd.f32 %v17638_v63, %v12148_v59 }
 0x68d   : > { %v17718_v51 = vadd.f32 %v17641_v31, %v12151_v13 }
 0x68f   : > { %v12152_v38 = vpop.f32.mrb[184].mxu0 }
 0x690   : > { %v12153_v62 = vpop.f32.mrb[185].mxu0 }
 0x691   : > { %v12154_v56 = vadd.f32 %v12153_v62, %v12152_v38  ;;  %v12155_v24 = vpop.f32.mrb[186].mxu0 }
 0x692   : > { %v12156_v5 = vpop.f32.mrb[187].mxu0 }
 0x693   : > { %v12157_v42 = vadd.f32 %v12156_v5, %v12155_v24  ;;  %v17721_v1 = vadd.f32 %v17643_v28, %v12154_v56 }
 0x695   : > { %v17724_v63 = vadd.f32 %v17645_v52, %v12157_v42 }
 0x697   : > { %v12158_v25 = vpop.f32.mrb[188].mxu0 }
 0x698   : > { %v12159_v20 = vpop.f32.mrb[189].mxu0 }
 0x699   : > { %v12160_v31 = vadd.f32 %v12159_v20, %v12158_v25  ;;  %v12161_v19 = vpop.f32.mrb[190].mxu0 }
 0x69a   : > { %v12162_v50 = vpop.f32.mrb[191].mxu0 }
 0x69b   : > { %v12163_v61 = vadd.f32 %v12162_v50, %v12161_v19  ;;  %v17727_v59 = vadd.f32 %v17647_v45, %v12160_v31 }
 0x69d   : > { %v17730_v17 = vadd.f32 %v17649_v4, %v12163_v61 }
 0x69f   : > { %v12164_v26 = vpop.f32.mrb[192].mxu0 }
 0x6a0   : > { %v12165_v13 = vpop.f32.mrb[193].mxu0 }
 0x6a1   : > { %v12166_v28 = vadd.f32 %v12165_v13, %v12164_v26  ;;  %v12167_v30 = vpop.f32.mrb[194].mxu0 }
 0x6a2   : > { %v12168_v6 = vpop.f32.mrb[195].mxu0 }
 0x6a3   : > { %v12169_v38 = vadd.f32 %v12168_v6, %v12167_v30  ;;  %v17733_v52 = vadd.f32 %v17651_v34, %v12166_v28  ;;  %v17747_v34 = vld [vmem:[%s19064_s6] ss:$0 sm:$0xff] }
 0x6a5   : > { %v17736_v62 = vadd.f32 %v17653_v0, %v12169_v38 }
 0x6a7   : > { %v12170_v56 = vpop.f32.mrb[196].mxu0 }
 0x6a8   : > { %v12171_v24 = vpop.f32.mrb[197].mxu0 }
 0x6a9   : > { %v12172_v5 = vadd.f32 %v12171_v24, %v12170_v56  ;;  %v12173_v45 = vpop.f32.mrb[198].mxu0 }
 0x6aa   : > { %v12174_v29 = vpop.f32.mrb[199].mxu0 }
 0x6ab   : > { %v12175_v42 = vadd.f32 %v12174_v29, %v12173_v45  ;;  %v17739_v4 = vadd.f32 %v17655_v58, %v12172_v5 }
 0x6ad   : > { %v17742_v25 = vadd.f32 %v17657_v22, %v12175_v42 }
 0x6af   : > { %v12176_v20 = vpop.f32.mrb[200].mxu0  ;;  %v12764_v31 = vpop.f32.mrb[28].mxu1 }
 0x6b0   : > { %v12956_v0 = vadd.f32 %v17697_v48, %v12764_v31  ;;  %v12177_v19 = vpop.f32.mrb[201].mxu0  ;;  %v6958_v50 = vpop.f32.mrb[29].mxu1 }
 0x6b1   : > { %v12178_v61 = vadd.f32 %v12177_v19, %v12176_v20  ;;  %v12959_v26 = vadd.f32 %v17689_v21, %v6958_v50  ;;  %v12179_v13 = vpop.f32.mrb[202].mxu0  ;;  %v12765_v58 = vpop.f32.mrb[30].mxu1 }
 0x6b2   : > { %v7126_v28 = vadd.f32 %v12956_v0, %v17747_v34  ;;  %v12962_v22 = vadd.f32 %v17700_v60, %v12765_v58  ;;  %v12180_v30 = vpop.f32.mrb[203].mxu0  ;;  %v6961_v6 = vpop.f32.mrb[31].mxu1 }
 0x6b3   : > { %v7124_v38 = vadd.f32 %v12959_v26, %v17747_v34  ;;  %v12181_v56 = vadd.f32 %v12180_v30, %v12179_v13  ;;  %v12965_v24 = vadd.f32 %v17694_v44, %v6961_v6  ;;  %v17756_v48 = vadd.f32 %v17659_v12, %v12178_v61 }
 0x6b4   : > { %v7127_v5 = vadd.f32 %v12962_v22, %v17747_v34  ;;  %v7190_v29 = vmul.f32 0.2, %v7126_v28  ;;  %vm7158_vm9 = vcmp.ge.f32.partialorder %v7126_v28, 0.0 }
 0x6b5   : > { %v7125_v21 = vadd.f32 %v12965_v24, %v17747_v34  ;;  %v17761_v45 = vadd.f32 %v17661_v39, %v12181_v56  ;;  %v7188_v42 = vmul.f32 0.2, %v7124_v38  ;;  %vm7156_vm1 = vcmp.ge.f32.partialorder %v7124_v38, 0.0 }
 0x6b6   : > { %v7191_v60 = vmul.f32 0.2, %v7127_v5  ;;  %vm7159_vm14 = vcmp.ge.f32.partialorder %v7127_v5, 0.0  ;;  %v17774_v6 = vsel %vm7158_vm9, %v7126_v28, %v7190_v29 }
 0x6b7   : > { %vm7157_vm4 = vcmp.ge.f32.partialorder %v7125_v21, 0.0  ;;  %v7189_v20 = vmul.f32 0.2, %v7125_v21  ;;  %v12182_v31 = vpop.f32.mrb[204].mxu0  ;;  %v12768_v44 = vpop.f32.mrb[32].mxu1  ;;  %v17770_v22 = vsel %vm7156_vm1, %v7124_v38, %v7188_v42  ;;  %20613 = vst [vmem:[#allocation107_spill] sm:$0xff] %v17774_v6 }
 0x6b8   : > { %v12183_v0 = vpop.f32.mrb[205].mxu0  ;;  %v12968_v12 = vadd.f32 %v17709_v18, %v12768_v44  ;;  %v6974_v50 = vpop.f32.mrb[33].mxu1  ;;  %v17766_v26 = vsel %vm7159_vm14, %v7127_v5, %v7191_v60  ;;  %20611 = vst [vmem:[#allocation101_spill] sm:$0xff] %v17770_v22  ;;  %v19533_v28 = vrot.slane %v17770_v22, 7 }
 0x6b9   : > { %v17764_v19 = vadd.f32 %v12183_v0, %v12182_v31  ;;  %v12185_v61 = vpop.f32.mrb[206].mxu0  ;;  %20610 = vst [vmem:[#allocation75_spill] sm:$0xff] %v17766_v26  ;;  %v12971_v39 = vadd.f32 %v17703_v35, %v6974_v50  ;;  %v12769_v13 = vpop.f32.mrb[34].mxu1  ;;  %v17772_v30 = vsel %vm7157_vm4, %v7125_v21, %v7189_v20  ;;  %v7351_v38 = vrot.slane %v17766_v26, 1 }
 0x6ba   : > { %v12186_v58 = vpop.f32.mrb[207].mxu0  ;;  %20612 = vst [vmem:[#allocation106_spill] sm:$0xff] %v17772_v30  ;;  %v7130_v56 = vadd.f32 %v12968_v12, %v17747_v34  ;;  %v12974_v18 = vadd.f32 %v17712_v2, %v12769_v13  ;;  %v6977_v24 = vpop.f32.mrb[35].mxu1  ;;  %v19532_v60 = vrot.slane %v17772_v30, 7  ;;  %v7350_v50 = vrot.slane %v17774_v6, 1 }
 0x6bb   : > { %v7128_v31 = vadd.f32 %v12971_v39, %v17747_v34  ;;  %v17779_v5 = vadd.f32 %v12186_v58, %v12185_v61  ;;  %v12977_v35 = vadd.f32 %v17706_v9, %v6977_v24  ;;  %v20614_v9 = vld [vmem:[#allocation13_spill] sm:$0xff]  ;;  %v7349_v39 = vrot.slane %v17772_v30, 1 }
 0x6bc   : > { %v7194_v42 = vmul.f32 0.2, %v7130_v56  ;;  %v7131_v21 = vadd.f32 %v12974_v18, %v17747_v34  ;;  %vm7162_vm14 = vcmp.ge.f32.partialorder %v7130_v56, 0.0  ;;  %vm20615_vm4 = vcmp.lt.s32.totalorder %v20614_v9, 1 }
 0x6bd   : > { %vm7160_vm9 = vcmp.ge.f32.partialorder %v7128_v31, 0.0  ;;  %v7192_v29 = vmul.f32 0.2, %v7128_v31  ;;  %v7129_v2 = vadd.f32 %v12977_v35, %v17747_v34  ;;  %v17793_v44 = vsel %vm20615_vm4, %v19533_v28, %v19532_v60 }
 0x6be   : > { %vm7163_vm1 = vcmp.ge.f32.partialorder %v7131_v21, 0.0  ;;  %v7195_v20 = vmul.f32 0.2, %v7131_v21  ;;  %20616 = vst [vmem:[#allocation48_spill] sm:$0xff] %v17793_v44  ;;  %v17799_v18 = vsel %vm7162_vm14, %v7130_v56, %v7194_v42  ;;  %vm20620_vm4 = vcmp.lt.s32.totalorder %v20614_v9, 7 }
 0x6bf   : > { %v12188_v0 = vpop.f32.mrb[208].mxu0  ;;  %v12772_v12 = vpop.f32.mrb[36].mxu1  ;;  %v17796_v61 = vsel %vm7160_vm9, %v7128_v31, %v7192_v29  ;;  %vm7161_vm0 = vcmp.ge.f32.partialorder %v7129_v2, 0.0  ;;  %20618 = vst [vmem:[#allocation31_spill] sm:$0xff] %v17799_v18  ;;  %v7193_v23 = vmul.f32 0.2, %v7129_v2  ;;  %v7408_v44 = vsel %vm20620_vm4, %v7350_v50, %v7351_v38  ;;  %vm20622_vm14 = vmmov %vm20620_vm4 }
 0x6c0   : > { %20617 = vst [vmem:[#allocation71_spill] sm:$0xff] %v17796_v61  ;;  %v12189_v13 = vpop.f32.mrb[209].mxu0  ;;  %v6990_v58 = vpop.f32.mrb[37].mxu1  ;;  %v7352_v24 = vrot.slane %v17796_v61, 1  ;;  %v17802_v35 = vsel %vm7163_vm1, %v7131_v21, %v7195_v20  ;;  %v17809_v29 = vpack.c.bf16 %v17772_v30, %v17770_v22  ;;  %v12980_v20 = vadd.f32 %v17721_v1, %v12772_v12  ;;  %vm20625_vm9 = vmmov %vm20620_vm4 }
 0x6c1   : > { %20619 = vst [vmem:[#allocation23_spill] sm:$0xff] %v17802_v35  ;;  %v12191_v60 = vpop.f32.mrb[210].mxu0  ;;  %v12773_v28 = vpop.f32.mrb[38].mxu1  ;;  %v17815_v21 = vsel %vm7161_vm0, %v7129_v2, %v7193_v23  ;;  %v7354_v61 = vrot.slane %v17799_v18, 1  ;;  %v20626_v42 = vrot.slane %v17770_v22, 1  ;;  %vm20627_vm0 = vmmov %vm20620_vm4  ;;  %v17834_v12 = vadd.f32 %v12189_v13, %v12188_v0 }
 0x6c2   : > { %20621 = vst [vmem:[#allocation119_spill] sm:$0xff] %v17809_v29  ;;  %v12192_v47 = vpop.f32.mrb[211].mxu0  ;;  %v6993_v11 = vpop.f32.mrb[39].mxu1  ;;  %v7407_v56 = vsel %vm20622_vm14, %v7351_v38, %v7352_v24  ;;  %20623 = vst [vmem:[#allocation15_spill] sm:$0xff] %v17815_v21  ;;  %7864 = vmatprep.mubr.bf16.mxu0 %v17809_v29  ;;  %v7353_v31 = vrot.slane %v17815_v21, 1  ;;  %v7134_v30 = vadd.f32 %v12980_v20, %v17747_v34  ;;  %v20629_v20 = vrot.slane %v17802_v35, 1 }
 0x6c3   : > { %v17819_v53 = vpack.c.bf16 %v7407_v56, %v7408_v44  ;;  %v7409_v38 = vsel %vm20625_vm9, %v7349_v39, %v7350_v50  ;;  %v7410_v23 = vsel %vm20627_vm0, %v20626_v42, %v7349_v39  ;;  %v13576_v56 = vld [vmem:[#allocation10 + $0x88] sm:$0xff]   ;;  %vm20630_vm1 = vmmov %vm20627_vm0  ;;  %vm20631_vm14 = vnez %v20569_v43 }
 0x6c4   : > { %v17832_v44 = vpack.c.bf16 %v7409_v38, %v7410_v23  ;;  %v17841_v50 = vsel %vm20630_vm1, %v7354_v61, %v20629_v20  ;;  %vm7166_vm4 = vcmp.ge.f32.partialorder %v7134_v30, 0.0  ;;  %v7198_v18 = vmul.f32 0.2, %v7134_v30  ;;  %vm20632_vm9 = vmmov %vm20627_vm0 }
 0x6c5   : > { %20624 = vst [vmem:[#allocation90_spill] sm:$0xff] %v17819_v53  ;;  %v12983_v0 = vadd.f32 %v17715_v16, %v6990_v58  ;;  %v12986_v13 = vadd.f32 %v17724_v63, %v12773_v28  ;;  %v17848_v38 = vadd.f32 %v12192_v47, %v12191_v60  ;;  %v12989_v23 = vadd.f32 %v17718_v51, %v6993_v11 }
 0x6c6   : > { %20628 = vst [vmem:[#allocation52_spill] sm:$0xff] %v17832_v44  ;;  %12810 = vmatprep.mubr.msk.bf16.mxu1 %vm20631_vm14, %v17832_v44  ;;  %v17851_v20 = vsel %vm7166_vm4, %v7134_v30, %v7198_v18  ;;  %v7405_v43 = vsel %vm20632_vm9, %v7353_v31, %v7354_v61  ;;  %v7406_v16 = vsel %vm20627_vm0, %v7352_v24, %v7353_v31  ;;  %v13579_v31 = vld [vmem:[#allocation10 + $0x90] sm:$0xff]  }
 0x6c7   : > { %v12194_v39 = vpop.f32.mrb[212].mxu0  ;;  %v12776_v42 = vpop.f32.mrb[40].mxu1  ;;  %12811 = vmatmul.mubr.msk.bf16.vlgmr.msra.gmra.mrb[124].mxu1 %vm20235_vm5, %v17819_v53  ;;  %v7262_v11 = vrot.slane %v17851_v20, 7  ;;  %v7132_v30 = vadd.f32 %v12983_v0, %v17747_v34  ;;  %v7135_v60 = vadd.f32 %v12986_v13, %v17747_v34  ;;  %v7133_v61 = vadd.f32 %v12989_v23, %v17747_v34 }
 0x6c8   : > { %v12195_v1 = vpop.f32.mrb[213].mxu0  ;;  %v7006_v2 = vpop.f32.mrb[41].mxu1  ;;  %v12992_v29 = vadd.f32 %v17733_v52, %v12776_v42  ;;  %12843 = vmatpush3.bf16.msra.mxu1 %v17675_v32  ;;  %v17872_v18 = vpack.c.bf16 %v7405_v43, %v7406_v16 }
 0x6c9   : > { %v17861_v47 = vpop.f32.mrb[214].mxu0  ;;  %v12777_v63 = vpop.f32.mrb[42].mxu1  ;;  %v17874_v24 = vadd.f32 %v12195_v1, %v12194_v39  ;;  %12844 = vmatprep.subr.bf16.mxu1 %v13576_v56  ;;  %vm7164_vm1 = vcmp.ge.f32.partialorder %v7132_v30, 0.0  ;;  %v7196_v42 = vmul.f32 0.2, %v7132_v30  ;;  %vm7167_vm4 = vcmp.ge.f32.partialorder %v7135_v60, 0.0 }
 0x6ca   : > { %v12198_v52 = vpop.f32.mrb[215].mxu0  ;;  %v17868_v28 = vpop.f32.mrb[43].mxu1  ;;  %v7138_v58 = vadd.f32 %v12992_v29, %v17747_v34  ;;  %20633 = vst [vmem:[#allocation29_spill] sm:$0xff] %v17872_v18  ;;  %v7199_v0 = vmul.f32 0.2, %v7135_v60  ;;  %vm7165_vm9 = vcmp.ge.f32.partialorder %v7133_v61, 0.0  ;;  %12814 = vmatprep.mubr.msk.bf16.mxu1 %vm20245_vm3, %v17872_v18  ;;  %v12995_v29 = vadd.f32 %v17727_v59, %v7006_v2 }
 0x6cb   : > { %v7197_v13 = vmul.f32 0.2, %v7133_v61  ;;  %v17879_v23 = vsel %vm7164_vm1, %v7132_v30, %v7196_v42  ;;  %v12998_v1 = vadd.f32 %v17736_v62, %v12777_v63  ;;  %v13580_v39 = vld [vmem:[#allocation10 + $0x98] sm:$0xff]   ;;  %v20637_v42 = vrot.slane %v17802_v35, 7 }
 0x6cc   : > { %vm7170_vm0 = vcmp.ge.f32.partialorder %v7138_v58, 0.0  ;;  %v7202_v32 = vmul.f32 0.2, %v7138_v58  ;;  %20634 = vst [vmem:[#allocation30_spill] sm:$0xff] %v17879_v23  ;;  %v17881_v43 = vsel %vm7167_vm4, %v7135_v60, %v7199_v0  ;;  %12845 = vmatpush3.bf16.msra.mxu1 %v13576_v56  ;;  %v7260_v16 = vrot.slane %v17879_v23, 7 }
 0x6cd   : > { %20635 = vst [vmem:[#allocation122_spill] sm:$0xff] %v17881_v43  ;;  %v7356_v51 = vrot.slane %v17879_v23, 1  ;;  %v7263_v10 = vrot.slane %v17881_v43, 7  ;;  %v7359_v53 = vrot.slane %v17881_v43, 1  ;;  %12846 = vmatprep.subr.bf16.mxu1 %v13579_v31  ;;  %v17892_v60 = vsel %vm7165_vm9, %v7133_v61, %v7197_v13 }
 0x6ce   : > { %20636 = vst [vmem:[#allocation50_spill] sm:$0xff] %v17892_v60  ;;  %v17895_v59 = vsel %vm7170_vm0, %v7138_v58, %v7202_v32  ;;  %v7136_v62 = vadd.f32 %v12995_v29, %v17747_v34  ;;  %v7139_v2 = vadd.f32 %v12998_v1, %v17747_v34  ;;  %vm20638_vm1 = vcmp.lt.s32.totalorder %v20614_v9, 1 }
 0x6cf   : > { %v17889_v7 = vpop.f32.mrb[216].mxu0  ;;  %v12780_v30 = vpop.f32.mrb[44].mxu1  ;;  %v7307_v0 = vsel %vm20638_vm1, %v20637_v42, %v7260_v16  ;;  %v20639_v18 = vrot.slane %v17802_v35, 1  ;;  %vm20640_vm4 = vcmp.lt.s32.totalorder %v20614_v9, 7  ;;  %vm20641_vm9 = vmmov %vm20638_vm1  ;;  %v20642_v13 = vrot.slane %v17851_v20, 1 }
 0x6d0   : > { %v12201_v56 = vpop.f32.mrb[217].mxu0  ;;  %v7022_v63 = vpop.f32.mrb[45].mxu1  ;;  %v7304_v58 = vsel %vm20641_vm9, %v7262_v11, %v7263_v10  ;;  %vm20643_vm0 = vmmov %vm20640_vm4  ;;  %v7261_v42 = vrot.slane %v17892_v60, 7  ;;  %v7357_v35 = vrot.slane %v17892_v60, 1  ;;  %12847 = vmatpush3.bf16.msra.mxu1 %v13579_v31  ;;  %vm7168_vm1 = vcmp.ge.f32.partialorder %v7136_v62, 0.0 }
 0x6d1   : > { %v7403_v61 = vsel %vm20640_vm4, %v20639_v18, %v7356_v51  ;;  %v7400_v32 = vsel %vm20643_vm0, %v20642_v13, %v7359_v53  ;;  %v12203_v29 = vpop.f32.mrb[218].mxu0  ;;  %v12781_v1 = vpop.f32.mrb[46].mxu1  ;;  %v7200_v22 = vmul.f32 0.2, %v7136_v62  ;;  %vm7171_vm4 = vcmp.ge.f32.partialorder %v7139_v2, 0.0  ;;  %12848 = vmatprep.subr.bf16.mxu1 %v13580_v39  ;;  %v13583_v13 = vld [vmem:[#allocation10 + $0xa0] sm:$0xff]   ;;  %vm20645_vm0 = vmmov %vm20641_vm9 }
 0x6d2   : > { %v17914_v44 = vpack.c.bf16 %v7403_v61, %v17841_v50  ;;  %v12204_v18 = vpop.f32.mrb[219].mxu0  ;;  %v7025_v43 = vpop.f32.mrb[47].mxu1  ;;  %v7305_v50 = vsel %vm20641_vm9, %v7261_v42, %v7262_v11  ;;  %v7306_v61 = vsel %vm20645_vm0, %v7260_v16, %v7261_v42  ;;  %v7203_v6 = vmul.f32 0.2, %v7139_v2 }
 0x6d3   : > { %v17925_v60 = vadd.f32 %v12198_v52, %v17861_v47  ;;  %v17930_v31 = vpack.c.bf16 %v7306_v61, %v7307_v0  ;;  %v17932_v23 = vpack.c.bf16 %v7304_v58, %v7305_v50  ;;  %v17934_v21 = vsel %vm7168_vm1, %v7136_v62, %v7200_v22 }
 0x6d4   : > { %20644 = vst [vmem:[#allocation125_spill] sm:$0xff] %v17914_v44  ;;  %12815 = vmatmul.mubr.msk.bf16.gmra.mrb[128].mxu1 %vm20255_vm13, %v17914_v44  ;;  %20648 = vst [vmem:[#allocation60_spill] sm:$0xff] %v17934_v21  ;;  %v13001_v11 = vadd.f32 %v17730_v17, %v17868_v28  ;;  %v7264_v26 = vrot.slane %v17934_v21, 7  ;;  %v7360_v16 = vrot.slane %v17934_v21, 1  ;;  %v17940_v42 = vsel %vm7171_vm4, %v7139_v2, %v7203_v6  ;;  %v13584_v6 = vld [vmem:[#allocation10 + $0xa8] sm:$0xff]   ;;  %v13587_v44 = vld [vmem:[#allocation10 + $0xb0] sm:$0xff]  }
 0x6d5   : > { %20646 = vst [vmem:[#allocation32_spill] sm:$0xff] %v17930_v31  ;;  %20647 = vst [vmem:[#allocation42_spill] sm:$0xff] %v17932_v23  ;;  %v13004_v47 = vadd.f32 %v17756_v48, %v12780_v30  ;;  %12849 = vmatpush3.bf16.msra.mxu1 %v13580_v39  ;;  %v19563_v52 = vrot.slane %v17940_v42, 7  ;;  %v19564_v0 = vrot.slane %v17940_v42, 1  ;;  %v20649_v22 = vrot.slane %v17851_v20, 1 }
 0x6d6   : > { %v7137_v58 = vadd.f32 %v13001_v11, %v17747_v34  ;;  %vm20650_vm1 = vcmp.lt.s32.totalorder %v20614_v9, 7  ;;  %12850 = vmatprep.subr.bf16.mxu1 %v13583_v13  ;;  %vm20651_vm4 = vmmov %vm20645_vm0 }
 0x6d7   : > { %v7401_v17 = vsel %vm20650_vm1, %v7357_v35, %v20649_v22  ;;  %v17950_v28 = vpop.f32.mrb[220].mxu0  ;;  %v12784_v62 = vpop.f32.mrb[48].mxu1  ;;  %v7303_v48 = vsel %vm20651_vm4, %v7263_v10, %v7264_v26  ;;  %vm20652_vm9 = vmmov %vm20650_vm1  ;;  %v7142_v30 = vadd.f32 %v13004_v47, %v17747_v34  ;;  %v20655_v22 = vrot.slane %v17895_v59, 7 }
 0x6d8   : > { %v7399_v39 = vsel %vm20652_vm9, %v7359_v53, %v7360_v16  ;;  %vm20653_vm0 = vmmov %vm20650_vm1  ;;  %v12207_v50 = vpop.f32.mrb[221].mxu0  ;;  %v17959_v61 = vpop.f32.mrb[49].mxu1  ;;  %v20657_v53 = vrot.slane %v17895_v59, 1  ;;  %vm7169_vm9 = vcmp.ge.f32.partialorder %v7137_v58, 0.0 }
 0x6d9   : > { %v7402_v2 = vsel %vm20653_vm0, %v7356_v51, %v7357_v35  ;;  %v17961_v11 = vpack.c.bf16 %v7399_v39, %v7400_v32  ;;  %vm20656_vm1 = vmmov %vm20651_vm4  ;;  %v17977_v35 = vpop.f32.mrb[222].mxu0  ;;  %v17979_v51 = vpop.f32.mrb[50].mxu1  ;;  %v7201_v32 = vmul.f32 0.2, %v7137_v58  ;;  %v7206_v39 = vmul.f32 0.2, %v7142_v30  ;;  %12851 = vmatpush3.bf16.msra.mxu1 %v13583_v13 }
 0x6da   : > { %v7300_v10 = vsel %vm20656_vm1, %v20655_v22, %v19563_v52  ;;  %vm20658_vm4 = vmmov %vm20653_vm0  ;;  %vm7174_vm0 = vcmp.ge.f32.partialorder %v7142_v30, 0.0  ;;  %v17981_v23 = vpack.c.bf16 %v7401_v17, %v7402_v2  ;;  %v17983_v31 = vpop.f32.mrb[223].mxu0  ;;  %v17986_v22 = vadd.f32 %v12201_v56, %v17889_v7  ;;  %v17992_v37 = vpop.f32.mrb[51].mxu1  ;;  %12852 = vmatprep.subr.bf16.mxu1 %v13584_v6 }
 0x6db   : > { %20654 = vst [vmem:[#allocation47_spill] sm:$0xff] %v17961_v11  ;;  %v17975_v47 = vsel %vm20658_vm4, %v20657_v53, %v19564_v0  ;;  %v13007_v52 = vadd.f32 %v17739_v4, %v7022_v63  ;;  %v13010_v53 = vadd.f32 %v17761_v45, %v12781_v1  ;;  %v17990_v0 = vadd.f32 %v12204_v18, %v12203_v29  ;;  %vm20661_vm4 = vmmov %vm20656_vm1 }
 0x6dc   : > { %20659 = vst [vmem:[#allocation36_spill] sm:$0xff] %v17981_v23  ;;  %v17995_v21 = vsel %vm7169_vm9, %v7137_v58, %v7201_v32  ;;  %v17997_v17 = vsel %vm7174_vm0, %v7142_v30, %v7206_v39  ;;  %12818 = vmatprep.mubr.msk.bf16.mxu1 %vm20263_vm8, %v17981_v23  ;;  %v13013_v7 = vadd.f32 %v17742_v25, %v7025_v43  ;;  %v20662_v58 = vrot.slane %v17895_v59, 1 }
 0x6dd   : > { %v13015_v4 = vadd.f32 %v17667_v46, %v17834_v12  ;;  %v7265_v45 = vrot.slane %v17995_v21, 7  ;;  %v7361_v56 = vrot.slane %v17995_v21, 1  ;;  %v7270_v63 = vrot.slane %v17997_v17, 7  ;;  %12819 = vmatmul.mubr.msk.bf16.gmra.mrb[132].mxu1 %vm20271_vm15, %v17961_v11 }
 0x6de   : > { %v7140_v1 = vadd.f32 %v13007_v52, %v17747_v34  ;;  %v7143_v18 = vadd.f32 %v13010_v53, %v17747_v34  ;;  %v7141_v25 = vadd.f32 %v13013_v7, %v17747_v34  ;;  %12853 = vmatpush3.bf16.msra.mxu1 %v13584_v6  ;;  %v20660_v46 = vrot.slane %v17895_v59, 7  ;;  %v13588_v6 = vld [vmem:[#allocation10 + $0xb8] sm:$0xff]  }
 0x6df   : > { %v13016_v43 = vadd.f32 %v13015_v4, %v12784_v62  ;;  %v7302_v13 = vsel %vm20661_vm4, %v7264_v26, %v7265_v45  ;;  %vm20663_vm9 = vcmp.lt.s32.totalorder %v20614_v9, 7  ;;  %v18027_v2 = vpop.f32.mrb[224].mxu0  ;;  %v18029_v62 = vpop.f32.mrb[52].mxu1  ;;  %12854 = vmatprep.subr.bf16.mxu1 %v13587_v44 }
 0x6e0   : > { %v7301_v12 = vsel %vm20656_vm1, %v7265_v45, %v20660_v46  ;;  %v7397_v30 = vsel %vm20663_vm9, %v7361_v56, %v20662_v58  ;;  %vm20664_vm0 = vmmov %vm20663_vm9  ;;  %v18031_v32 = vpack.c.bf16 %v7302_v13, %v7303_v48  ;;  %vm7172_vm1 = vcmp.ge.f32.partialorder %v7140_v1, 0.0  ;;  %v12213_v53 = vpop.f32.mrb[225].mxu0  ;;  %v18035_v7 = vpop.f32.mrb[53].mxu1 }
 0x6e1   : > { %v7398_v52 = vsel %vm20664_vm0, %v7360_v16, %v7361_v56  ;;  %v18033_v39 = vpack.c.bf16 %v7300_v10, %v7301_v12  ;;  %v7204_v26 = vmul.f32 0.2, %v7140_v1  ;;  %vm7175_vm4 = vcmp.ge.f32.partialorder %v7143_v18, 0.0  ;;  %v12215_v10 = vpop.f32.mrb[226].mxu0  ;;  %v12789_v12 = vpop.f32.mrb[54].mxu1 }
 0x6e2   : > { %20665 = vst [vmem:[#allocation49_spill] sm:$0xff] %v18031_v32  ;;  %v7207_v4 = vmul.f32 0.2, %v7143_v18  ;;  %vm7173_vm9 = vcmp.ge.f32.partialorder %v7141_v25, 0.0  ;;  %v7205_v45 = vmul.f32 0.2, %v7141_v25  ;;  %v7146_v56 = vadd.f32 %v13016_v43, %v17747_v34  ;;  %12855 = vmatpush3.bf16.msra.mxu1 %v13587_v44 }
 0x6e3   : > { %20666 = vst [vmem:[#allocation51_spill] sm:$0xff] %v18033_v39  ;;  %v18037_v16 = vsel %vm7172_vm1, %v7140_v1, %v7204_v26  ;;  %v18040_v46 = vpack.c.bf16 %v7397_v30, %v7398_v52  ;;  %v18043_v48 = vadd.f32 %v12207_v50, %v17950_v28  ;;  %v12216_v1 = vpop.f32.mrb[227].mxu0  ;;  %v18051_v26 = vpop.f32.mrb[55].mxu1  ;;  %12856 = vmatprep.subr.bf16.mxu1 %v13588_v6  ;;  %v13591_v43 = vld [vmem:[#allocation10 + $0x1c0] sm:$0xff]   ;;  %vm20669_vm0 = vcmp.lt.s32.totalorder %v20614_v9, 1 }
 0x6e4   : > { %v7268_v13 = vrot.slane %v18037_v16, 7  ;;  %v7364_v58 = vrot.slane %v18037_v16, 1  ;;  %v18047_v29 = vsel %vm7175_vm4, %v7143_v18, %v7207_v4  ;;  %v18049_v39 = vsel %vm7173_vm9, %v7141_v25, %v7205_v45  ;;  %vm20672_vm9 = vmmov %vm20669_vm0 }
 0x6e5   : > { %20667 = vst [vmem:[#allocation55_spill] sm:$0xff] %v18040_v46  ;;  %v19576_v30 = vrot.slane %v18047_v29, 7  ;;  %v7269_v50 = vrot.slane %v18049_v39, 7  ;;  %v7365_v44 = vrot.slane %v18049_v39, 1  ;;  %12822 = vmatprep.mubr.msk.bf16.mxu1 %vm20283_vm2, %v18040_v46  ;;  %v20668_v18 = vrot.slane %v17940_v42, 7  ;;  %vm20676_vm2 = vmmov %vm20672_vm9 }
 0x6e6   : > { %v20670_v52 = vrot.slane %v17940_v42, 1  ;;  %vm20671_vm1 = vcmp.lt.s32.totalorder %v20614_v9, 7  ;;  %vm7178_vm4 = vcmp.ge.f32.partialorder %v7146_v56, 0.0  ;;  %v7210_v45 = vmul.f32 0.2, %v7146_v56  ;;  %12857 = vmatpush3.bf16.msra.mxu1 %v13588_v6 }
 0x6e7   : > { %v7299_v25 = vsel %vm20669_vm0, %v20668_v18, %v7268_v13  ;;  %v7296_v32 = vsel %vm20672_vm9, %v7270_v63, %v19576_v30  ;;  %v20673_v36 = vrot.slane %v18047_v29, 1  ;;  %v20674_v46 = vrot.slane %v17997_v17, 1  ;;  %vm20675_vm0 = vmmov %vm20671_vm1  ;;  %v18091_v11 = vpop.f32.mrb[56].mxu1  ;;  %12514 = vmatprep.subr.bf16.mxu1 %v13591_v43 }
 0x6e8   : > { %v7395_v4 = vsel %vm20671_vm1, %v20670_v52, %v7364_v58  ;;  %v7297_v52 = vsel %vm20676_vm2, %v7269_v50, %v7270_v63  ;;  %vm20677_vm1 = vmmov %vm20676_vm2  ;;  %v18087_v8 = vsel %vm7178_vm4, %v7146_v56, %v7210_v45  ;;  %v13018_v30 = vadd.f32 %v17663_v40, %v17764_v19 }
 0x6e9   : > { %v18069_v28 = vpack.c.bf16 %v7395_v4, %v17975_v47  ;;  %v7392_v18 = vsel %vm20675_vm0, %v20674_v46, %v20673_v36  ;;  %v7298_v47 = vsel %vm20677_vm1, %v7268_v13, %v7269_v50  ;;  %v18085_v4 = vpack.c.bf16 %v7296_v32, %v7297_v52  ;;  %v18102_v32 = vpop.f32.mrb[57].mxu1  ;;  %vm20679_vm2 = vmmov %vm20675_vm0 }
 0x6ea   : > { %v18093_v27 = vpack.c.bf16 %v7298_v47, %v7299_v25  ;;  %v7274_v36 = vrot.slane %v18087_v8, 7  ;;  %v7370_v63 = vrot.slane %v18087_v8, 1  ;;  %v13021_v6 = vadd.f32 %v17669_v15, %v17848_v38  ;;  %v18113_v13 = vpop.f32.mrb[58].mxu1  ;;  %vm20680_vm4 = vmmov %vm20675_vm0 }
 0x6eb   : > { %12823 = vmatmul.mubr.msk.bf16.gmra.mrb[136].mxu1 %vm20580_vm11, %v18069_v28  ;;  %v13019_v40 = vadd.f32 %v13018_v30, %v17959_v61  ;;  %v18107_v19 = vadd.f32 %v17983_v31, %v17977_v35  ;;  %v13024_v56 = vadd.f32 %v17665_v14, %v17779_v5  ;;  %v13027_v46 = vadd.f32 %v17678_v33, %v17986_v22  ;;  %v18123_v35 = vpop.f32.mrb[59].mxu1 }
 0x6ec   : > { %v13022_v15 = vadd.f32 %v13021_v6, %v17979_v51  ;;  %v20678_v38 = vrot.slane %v17997_v17, 1  ;;  %v7394_v61 = vsel %vm20680_vm4, %v7364_v58, %v7365_v44  ;;  %v12214_v31 = vadd.f32 %v12213_v53, %v18027_v2 }
 0x6ed   : > { %v7144_v14 = vadd.f32 %v13019_v40, %v17747_v34  ;;  %v13025_v33 = vadd.f32 %v13024_v56, %v17992_v37  ;;  %v13028_v5 = vadd.f32 %v13027_v46, %v18029_v62  ;;  %v13030_v30 = vadd.f32 %v17671_v3, %v17874_v24 }
 0x6ee   : > { %v7393_v43 = vsel %vm20679_vm2, %v7365_v44, %v20678_v38  ;;  %v7147_v51 = vadd.f32 %v13022_v15, %v17747_v34  ;;  %v13033_v58 = vadd.f32 %v17680_v49, %v17990_v0  ;;  %v12217_v50 = vadd.f32 %v12216_v1, %v12215_v10 }
 0x6ef   : > { %v18128_v22 = vpack.c.bf16 %v7393_v43, %v7394_v61  ;;  %vm7176_vm9 = vcmp.ge.f32.partialorder %v7144_v14, 0.0  ;;  %v7208_v2 = vmul.f32 0.2, %v7144_v14  ;;  %v7145_v53 = vadd.f32 %v13025_v33, %v17747_v34 }
 0x6f0   : > { %v7150_v44 = vadd.f32 %v13028_v5, %v17747_v34  ;;  %vm7179_vm0 = vcmp.ge.f32.partialorder %v7147_v51, 0.0  ;;  %v7211_v37 = vmul.f32 0.2, %v7147_v51  ;;  %v13031_v62 = vadd.f32 %v13030_v30, %v18035_v7 }
 0x6f1   : > { %12826 = vmatprep.mubr.msk.bf16.mxu1 %vm20583_vm10, %v18128_v22  ;;  %v13034_v25 = vadd.f32 %v13033_v58, %v12789_v12  ;;  %v18141_v3 = vsel %vm7176_vm9, %v7144_v14, %v7208_v2  ;;  %vm7177_vm1 = vcmp.ge.f32.partialorder %v7145_v53, 0.0  ;;  %v7209_v49 = vmul.f32 0.2, %v7145_v53 }
 0x6f2   : > { %vm7182_vm2 = vcmp.ge.f32.partialorder %v7150_v44, 0.0  ;;  %v7272_v24 = vrot.slane %v18141_v3, 7  ;;  %v7368_v0 = vrot.slane %v18141_v3, 1  ;;  %v18145_v10 = vsel %vm7179_vm0, %v7147_v51, %v7211_v37 }
 0x6f3   : > { %v7214_v1 = vmul.f32 0.2, %v7150_v44  ;;  %v7275_v45 = vrot.slane %v18145_v10, 7  ;;  %v7371_v52 = vrot.slane %v18145_v10, 1  ;;  %v18149_v47 = vsel %vm7177_vm1, %v7145_v53, %v7209_v49 }
 0x6f4   : > { %v7148_v7 = vadd.f32 %v13031_v62, %v17747_v34  ;;  %v20681_v12 = vrot.slane %v18047_v29, 7  ;;  %vm20682_vm4 = vcmp.lt.s32.totalorder %v20614_v9, 1  ;;  %v20683_v40 = vrot.slane %v18047_v29, 1 }
 0x6f5   : > { %vm20684_vm9 = vcmp.lt.s32.totalorder %v20614_v9, 7  ;;  %v7273_v46 = vrot.slane %v18149_v47, 7  ;;  %v7369_v15 = vrot.slane %v18149_v47, 1  ;;  %vm20685_vm0 = vmmov %vm20682_vm4  ;;  %v18171_v14 = vsel %vm7182_vm2, %v7150_v44, %v7214_v1  ;;  %v20691_v44 = vld [vmem:[#allocation38_spill] sm:$0xff] }
 0x6f6   : > { %v7295_v6 = vsel %vm20682_vm4, %v20681_v12, %v7272_v24  ;;  %v7391_v56 = vsel %vm20684_vm9, %v20683_v40, %v7368_v0  ;;  %v7292_v43 = vsel %vm20685_vm0, %v7274_v36, %v7275_v45  ;;  %vm20686_vm1 = vmmov %vm20684_vm9  ;;  %v7374_v51 = vrot.slane %v18171_v14, 1  ;;  %v20693_v1 = vld [vmem:[#allocation34_spill] sm:$0xff] }
 0x6f7   : > { %v18162_v38 = vpack.c.bf16 %v7391_v56, %v7392_v18  ;;  %v7388_v61 = vsel %vm20686_vm1, %v7370_v63, %v7371_v52  ;;  %vm20687_vm4 = vmmov %vm20685_vm0  ;;  %v7278_v18 = vrot.slane %v18171_v14, 7  ;;  %v7212_v2 = vmul.f32 0.2, %v7148_v7 }
 0x6f8   : > { %v7293_v33 = vsel %vm20687_vm4, %v7273_v46, %v7274_v36  ;;  %vm20688_vm9 = vmmov %vm20685_vm0  ;;  %vm7180_vm0 = vcmp.ge.f32.partialorder %v7148_v7, 0.0  ;;  %v7151_v53 = vadd.f32 %v13034_v25, %v17747_v34  ;;  %v13036_v36 = vadd.f32 %v17673_v57, %v17925_v60 }
 0x6f9   : > { %v7294_v5 = vsel %vm20688_vm9, %v7272_v24, %v7273_v46  ;;  %v18181_v58 = vpack.c.bf16 %v7292_v43, %v7293_v33  ;;  %12827 = vmatmul.mubr.msk.bf16.gmra.mrb[140].mxu1 %vm20600_vm12, %v18162_v38  ;;  %v13039_v37 = vadd.f32 %v20691_v44, %v12214_v31  ;;  %vm20692_vm2 = vmmov %vm20686_vm1  ;;  %v18194_v49 = vsel %vm7180_vm0, %v7148_v7, %v7212_v2 }
 0x6fa   : > { %v18179_v30 = vpack.c.bf16 %v7294_v5, %v7295_v6  ;;  %v7389_v62 = vsel %vm20692_vm2, %v7369_v15, %v7370_v63  ;;  %v7390_v24 = vsel %vm20686_vm1, %v7368_v0, %v7369_v15  ;;  %v13042_v12 = vadd.f32 %v20693_v1, %v18043_v48  ;;  %v20694_v6 = vld [vmem:[#allocation58_spill] sm:$0xff]  ;;  %vm20696_vm0 = vmmov %vm20686_vm1 }
 0x6fb   : > { %20690 = vst [vmem:[#allocation57_spill] sm:$0xff] %v18181_v58  ;;  %v13045_v25 = vadd.f32 %v20694_v6, %v12217_v50  ;;  %v7276_v40 = vrot.slane %v18194_v49, 7  ;;  %v7372_v57 = vrot.slane %v18194_v49, 1  ;;  %vm7183_vm4 = vcmp.ge.f32.partialorder %v7151_v53, 0.0  ;;  %vm20700_vm2 = vmmov %vm20688_vm9 }
 0x6fc   : > { %20689 = vst [vmem:[#allocation128_spill] sm:$0xff] %v18179_v30  ;;  %v7215_v60 = vmul.f32 0.2, %v7151_v53  ;;  %v13037_v31 = vadd.f32 %v13036_v36, %v18051_v26  ;;  %v13040_v63 = vadd.f32 %v13039_v37, %v18091_v11  ;;  %v18205_v7 = vpack.c.bf16 %v7389_v62, %v7390_v24  ;;  %vm20701_vm1 = vmmov %vm20696_vm0  ;;  %v20702_v36 = vld [vmem:[#allocation26_spill] sm:$0xff] }
 0x6fd   : > { %v13043_v56 = vadd.f32 %v13042_v12, %v18102_v32  ;;  %v7291_v0 = vsel %vm20688_vm9, %v7275_v45, %v7276_v40  ;;  %v7387_v48 = vsel %vm20696_vm0, %v7371_v52, %v7372_v57  ;;  %v13046_v46 = vadd.f32 %v13045_v25, %v18113_v13  ;;  %v20698_v32 = vld [vmem:[#allocation56_spill] sm:$0xff]  ;;  %v20699_v13 = vld [vmem:[#allocation61_spill] sm:$0xff] }
 0x6fe   : > { %20695 = vst [vmem:[#allocation129_spill] sm:$0xff] %v18205_v7  ;;  %v18212_v50 = vsel %vm7183_vm4, %v7151_v53, %v7215_v60  ;;  %v18215_v15 = vpack.c.bf16 %v7387_v48, %v7388_v61  ;;  %v7149_v43 = vadd.f32 %v13037_v31, %v17747_v34  ;;  %12830 = vmatprep.mubr.msk.bf16.mxu1 %vm20602_vm6, %v18205_v7 }
 0x6ff   : > { %v7279_v26 = vrot.slane %v18212_v50, 7  ;;  %v7375_v11 = vrot.slane %v18212_v50, 1  ;;  %v7154_v45 = vadd.f32 %v13040_v63, %v17747_v34  ;;  %v7152_v52 = vadd.f32 %v13043_v56, %v17747_v34 }
 0x700   : > { %20697 = vst [vmem:[#allocation64_spill] sm:$0xff] %v18215_v15  ;;  %v7155_v33 = vadd.f32 %v13046_v46, %v17747_v34  ;;  %v13048_v61 = vadd.f32 %v20699_v13, %v18107_v19  ;;  %vm7181_vm4 = vcmp.ge.f32.partialorder %v7149_v43, 0.0  ;;  %v7213_v53 = vmul.f32 0.2, %v7149_v43 }
 0x701   : > { %v7288_v5 = vsel %vm20700_vm2, %v7278_v18, %v7279_v26  ;;  %v7384_v2 = vsel %vm20701_vm1, %v7374_v51, %v7375_v11  ;;  %12831 = vmatmul.mubr.msk.bf16.gmra.mrb[144].mxu1 %vm20603_vm7, %v18215_v15  ;;  %vm7186_vm9 = vcmp.ge.f32.partialorder %v7154_v45, 0.0  ;;  %v7218_v44 = vmul.f32 0.2, %v7154_v45  ;;  %vm20703_vm1 = vmmov %vm20700_vm2 }
 0x702   : > { %vm7184_vm0 = vcmp.ge.f32.partialorder %v7152_v52, 0.0  ;;  %v7216_v37 = vmul.f32 0.2, %v7152_v52  ;;  %v18237_v62 = vsel %vm7181_vm4, %v7149_v43, %v7213_v53  ;;  %vm7187_vm6 = vcmp.ge.f32.partialorder %v7155_v33, 0.0  ;;  %vm20706_vm4 = vmmov %vm20703_vm1 }
 0x703   : > { %v7219_v19 = vmul.f32 0.2, %v7155_v33  ;;  %v13049_v24 = vadd.f32 %v13048_v61, %v18123_v35  ;;  %v7277_v1 = vrot.slane %v18237_v62, 7  ;;  %v7373_v12 = vrot.slane %v18237_v62, 1 }
 0x704   : > { %v18242_v6 = vsel %vm7186_vm9, %v7154_v45, %v7218_v44  ;;  %v7248_v25 = vsel %vm7184_vm0, %v7152_v52, %v7216_v37  ;;  %vm20707_vm9 = vcmp.lt.s32.totalorder %v20614_v9, 7  ;;  %v20709_v37 = vld [vmem:[#allocation75_spill] sm:$0xff] }
 0x705   : > { %v7282_v60 = vrot.slane %v18242_v6, 7  ;;  %v7378_v31 = vrot.slane %v18242_v6, 1  ;;  %v7280_v63 = vrot.slane %v7248_v25, 7  ;;  %v7376_v56 = vrot.slane %v7248_v25, 1 }
 0x706   : > { %v7289_v48 = vsel %vm20700_vm2, %v7277_v1, %v7278_v18  ;;  %v7290_v46 = vsel %vm20703_vm1, %v7276_v40, %v7277_v1  ;;  %v7251_v35 = vsel %vm7187_vm6, %v7155_v33, %v7219_v19  ;;  %v7153_v43 = vadd.f32 %v13049_v24, %v17747_v34  ;;  %v20711_v33 = vld [vmem:[#allocation107_spill] sm:$0xff]  ;;  %vm20713_vm6 = vmmov %vm20703_vm1 }
 0x707   : > { %v18251_v13 = vpack.c.bf16 %v7290_v46, %v7291_v0  ;;  %v18253_v45 = vpack.c.bf16 %v7288_v5, %v7289_v48  ;;  %v7287_v52 = vsel %vm20706_vm4, %v7279_v26, %v7280_v63  ;;  %v7383_v61 = vsel %vm20707_vm9, %v7375_v11, %v7376_v56  ;;  %vm20714_vm2 = vmmov %vm20707_vm9 }
 0x708   : > { %v18259_v53 = vpack.c.bf16 %v7383_v61, %v7384_v2  ;;  %v7283_v44 = vrot.slane %v7251_v35, 7  ;;  %v7379_v18 = vrot.slane %v7251_v35, 1  ;;  %vm7185_vm0 = vcmp.ge.f32.partialorder %v7153_v43, 0.0  ;;  %vm20715_vm1 = vmmov %vm20714_vm2  ;;  %v20716_v2 = vld [vmem:[#allocation101_spill] sm:$0xff] }
 0x709   : > { %20704 = vst [vmem:[#allocation131_spill] sm:$0xff] %v18251_v13  ;;  %20705 = vst [vmem:[#allocation108_spill] sm:$0xff] %v18253_v45  ;;  %v20710_v40 = vrot.slane %v20709_v37, 7  ;;  %v20712_v19 = vrot.slane %v20711_v33, 7  ;;  %v7217_v0 = vmul.f32 0.2, %v7153_v43  ;;  %v7385_v26 = vsel %vm20714_vm2, %v7373_v12, %v7374_v51 }
 0x70a   : > { %20708 = vst [vmem:[#allocation66_spill] sm:$0xff] %v18259_v53  ;;  %v7386_v11 = vsel %vm20715_vm1, %v7372_v57, %v7373_v12  ;;  %v7284_v5 = vsel %vm20706_vm4, %v7282_v60, %v7283_v44  ;;  %v20717_v24 = vrot.slane %v20716_v2, 7  ;;  %vm20718_vm9 = vmmov %vm20706_vm4  ;;  %v20720_v46 = vrot.slane %v20716_v2, 1  ;;  %v20722_v51 = vld [vmem:[#allocation48_spill] sm:$0xff]  ;;  %v13590_v45 = vld [vmem:[#allocation10] sm:$0xff]  }
 0x70b   : > { %v7312_v34 = vsel %vm20713_vm6, %v20712_v19, %v20710_v40  ;;  %vm20719_vm7 = vmmov %vm20715_vm1  ;;  %v7249_v12 = vsel %vm7185_vm0, %v7153_v43, %v7217_v0  ;;  %v18290_v19 = vpack.c.bf16 %v7385_v26, %v7386_v11  ;;  %v20725_v13 = vrot.slane %v20711_v33, 7  ;;  %v20731_v43 = vld [vmem:[#allocation80_spill] sm:$0xff]  ;;  %v20733_v0 = vld [vmem:[#allocation30_spill] sm:$0xff] }
 0x70c   : > { %v7315_v1 = vsel %vm20718_vm9, %v7283_v44, %v20717_v24  ;;  %v7380_v48 = vsel %vm20719_vm7, %v7378_v31, %v7379_v18  ;;  %vm20721_vm6 = vmmov %vm20715_vm1  ;;  %v20726_v44 = vld [vmem:[#allocation106_spill] sm:$0xff]  ;;  %v7281_v2 = vrot.slane %v7249_v12, 7  ;;  %v7377_v30 = vrot.slane %v7249_v12, 1 }
 0x70d   : > { %v7411_v61 = vsel %vm20721_vm6, %v7379_v18, %v20720_v46  ;;  %v18286_v40 = vpack.c.bf16 %v20722_v51, %v7315_v1  ;;  %20724 = vst [vmem:[#allocation109_spill] sm:$0xff] %v18290_v19  ;;  %v20727_v24 = vrot.slane %v20726_v44, 7  ;;  %vm20728_vm7 = vmmov %vm20706_vm4  ;;  %v18300_v18 = vpack.c.bf16 %v20709_v37, %v20711_v33  ;;  %v13595_v1 = vld [vmem:[#allocation10 + $0x48] sm:$0xff]  }
 0x70e   : > { %v18288_v57 = vpack.c.bf16 %v7411_v61, %v7380_v48  ;;  %v20729_v48 = vld [vmem:[#allocation27_spill] sm:$0xff]  ;;  %vm20732_vm2 = vnez %v20731_v43  ;;  %v20734_v26 = vld [vmem:[#allocation50_spill] sm:$0xff]  ;;  %v20736_v61 = vld [vmem:[#allocation60_spill] sm:$0xff] }
 0x70f   : > { %v7313_v58 = vsel %vm20728_vm7, %v20727_v24, %v20725_v13  ;;  %vm20730_vm0 = vnez %v20729_v48  ;;  %10552 = vmatmul.mubr.msk.bf16.vlgmr.msra.gmra.mrb[228].mxu0 %vm20732_vm2, %v18286_v40  ;;  %v18310_v11 = vpack.c.bf16 %v20734_v26, %v20733_v0  ;;  %v20735_v13 = vld [vmem:[#allocation122_spill] sm:$0xff]  ;;  %v18318_v33 = vpack.c.bf16 %v17995_v21, %v20736_v61  ;;  %vm20737_vm1 = vmmov %vm20706_vm4  ;;  %v20739_v24 = vld [vmem:[#allocation68_spill] sm:$0xff] }
 0x710   : > { %20723 = vst [vmem:[#allocation132_spill] sm:$0xff] %v18288_v57  ;;  %12834 = vmatprep.mubr.msk.bf16.mxu1 %vm20730_vm0, %v18290_v19  ;;  %v18314_v46 = vpack.c.bf16 %v20735_v13, %v17851_v20  ;;  %v7285_v51 = vsel %vm20737_vm1, %v7281_v2, %v7282_v60  ;;  %vm20738_vm4 = vmmov %vm20737_vm1  ;;  %vm20740_vm9 = vnez %v20739_v24  ;;  %7872 = vmatprep.mubr.bf16.mxu0 %v18300_v18  ;;  %v13596_v60 = vld [vmem:[#allocation10 + $0x8] sm:$0xff]   ;;  %v13601_v13 = vld [vmem:[#allocation10 + $0x50] sm:$0xff]  }
 0x711   : > { %v7286_v44 = vsel %vm20738_vm4, %v7280_v63, %v7281_v2  ;;  %12835 = vmatmul.mubr.msk.bf16.gmra.mrb[148].mxu1 %vm20740_vm9, %v18259_v53  ;;  %v7381_v20 = vsel %vm20721_vm6, %v7377_v30, %v7378_v31  ;;  %v18332_v26 = vpack.c.bf16 %v7284_v5, %v7285_v51  ;;  %vm20741_vm7 = vmmov %vm20721_vm6  ;;  %12379 = vmatpush3.bf16.msra.mxu0 %v13590_v45  ;;  %v13613_v45 = vld [vmem:[#allocation10 + $0x60] sm:$0xff]   ;;  %v20755_v61 = vld [vmem:[#allocation31_spill] sm:$0xff] }
 0x712   : > { %v18330_v0 = vpack.c.bf16 %v7286_v44, %v7287_v52  ;;  %v7382_v21 = vsel %vm20741_vm7, %v7376_v56, %v7377_v30  ;;  %v18338_v63 = vpack.c.bf16 %v17940_v42, %v17895_v59  ;;  %12380 = vmatprep.subr.bf16.mxu0 %v13595_v1  ;;  %v18344_v31 = vpack.c.bf16 %v18049_v39, %v18037_v16  ;;  %v13608_v56 = vld [vmem:[#allocation10 + $0x18] sm:$0xff]   ;;  %v13592_v1 = vld [vmem:[#allocation10 + $0x180] sm:$0xff]   ;;  %v20756_v51 = vld [vmem:[#allocation23_spill] sm:$0xff] }
 0x713   : > { %v18340_v2 = vpack.c.bf16 %v7381_v20, %v7382_v21  ;;  %v18348_v52 = vpack.c.bf16 %v18047_v29, %v17997_v17  ;;  %v18352_v30 = vpack.c.bf16 %v18149_v47, %v18141_v3  ;;  %v18356_v59 = vpack.c.bf16 %v18145_v10, %v18087_v8  ;;  %v20743_v17 = vld [vmem:[#allocation67_spill] sm:$0xff]  ;;  %v13593_v20 = vld [vmem:[#allocation10 + $0x1c8] sm:$0xff]   ;;  %v13614_v21 = vld [vmem:[#allocation10 + $0x20] sm:$0xff]  }
 0x714   : > { %v18360_v42 = vpack.c.bf16 %v18237_v62, %v18194_v49  ;;  %v18364_v39 = vpack.c.bf16 %v18212_v50, %v18171_v14  ;;  %v18366_v16 = vpack.c.bf16 %v7249_v12, %v7248_v25  ;;  %vm20744_vm1 = vnez %v20743_v17  ;;  %v13602_v8 = vld [vmem:[#allocation10 + $0x10] sm:$0xff]   ;;  %v13607_v14 = vld [vmem:[#allocation10 + $0x58] sm:$0xff]   ;;  %v20747_v50 = vld [vmem:[#allocation85_spill] sm:$0xff] }
 0x715   : > { %20742 = vst [vmem:[#allocation70_spill] sm:$0xff] %v18340_v2  ;;  %12838 = vmatprep.mubr.msk.bf16.mxu1 %vm20744_vm1, %v18340_v2  ;;  %v18372_v29 = vpack.c.bf16 %v7251_v35, %v18242_v6  ;;  %v18374_v3 = vpack.c.bf16 %v7312_v34, %v7313_v58  ;;  %12381 = vmatpush3.bf16.msra.mxu0 %v13596_v60  ;;  %v20745_v10 = vld [vmem:[#allocation15_spill] sm:$0xff]  ;;  %vm20748_vm4 = vnez %v20747_v50  ;;  %v20749_v6 = vld [vmem:[#allocation130_spill] sm:$0xff]  ;;  %v20751_v58 = vmov 0   ;;  %v20757_v60 = vld [vmem:[#allocation16_spill] sm:$0xff] }
 0x716   : > { %v7257_v47 = vrot.slane %v20745_v10, 7  ;;  %v20746_v49 = vld [vmem:[#allocation71_spill] sm:$0xff]  ;;  %12382 = vmatprep.subr.bf16.mxu0 %v13601_v13  ;;  %vm20750_vm6 = vnez %v20749_v6  ;;  %vm20752_vm7 = vcmp.lt.s32.totalorder %v20614_v9, 1  ;;  %v20753_v34 = vrot.slane %v20709_v37, 7  ;;  %v13616_v13 = vld [vmem:[#allocation10 + $0x68] sm:$0xff]   ;;  %v20765_v6 = vld [vmem:[#allocation21_spill] sm:$0xff] }
 0x717   : > { %v18379_v62 = vpack.c.bf16 %v20745_v10, %v20746_v49  ;;  %10555 = vmatmul.mubr.msk.bf16.gmra.mrb[232].mxu0 %vm20748_vm4, %v18374_v3  ;;  %v7256_v25 = vrot.slane %v20746_v49, 7  ;;  %vm20754_vm2 = vmmov %vm20752_vm7  ;;  %v18400_v44 = vpack.c.bf16 %v20756_v51, %v20755_v61  ;;  %v7258_v37 = vrot.slane %v20755_v61, 7  ;;  %v20761_v49 = vld [vmem:[#allocation90_spill] sm:$0xff]  ;;  %v13619_v61 = vld [vmem:[#allocation10 + $0x70] sm:$0xff]  }
 0x718   : > { %v13599_v10 = vld [vmem:[#allocation10 + $0x1d8] sm:$0xff]   ;;  %v13618_v48 = vld [vmem:[#allocation10 + $0x208] sm:$0xff]   ;;  %v13621_v17 = vld [vmem:[#allocation10 + $0x210] sm:$0xff]  }
 0x719   : > { %12839 = vmatmul.mubr.msk.bf16.gmra.mrb[152].mxu1 %vm20750_vm6, %v18288_v57  ;;  %7880 = vmatprep.mubr.bf16.mxu0 %v18379_v62  ;;  %v7310_v35 = vsel %vm20752_vm7, %v7256_v25, %v7257_v47  ;;  %v7311_v5 = vsel %vm20754_vm2, %v20753_v34, %v7256_v25  ;;  %vm20758_vm7 = vnez %v20757_v60  ;;  %v13594_v25 = vld [vmem:[#allocation10 + $0x188] sm:$0xff]   ;;  %vm20764_vm6 = vmmov %vm20754_vm2  ;;  %v13597_v34 = vld [vmem:[#allocation10 + $0x1d0] sm:$0xff]  }
 0x71a   : > { %12858 = vmatprep.mubr.bf16.mxu1 %v20751_v58  ;;  %12383 = vmatpush3.bf16.msra.mxu0 %v13602_v8  ;;  %v18396_v12 = vpack.c.bf16 %v7310_v35, %v7311_v5  ;;  %v20759_v8 = vld [vmem:[#allocation52_spill] sm:$0xff]  ;;  %v13617_v5 = vld [vmem:[#allocation10 + $0x28] sm:$0xff]   ;;  %v20798_v24 = vld [vmem:[#allocation57_spill] sm:$0xff] }
 0x71b   : > { %12384 = vmatprep.subr.bf16.mxu0 %v13607_v14  ;;  %v20762_v14 = vld [vmem:[#allocation17_spill] sm:$0xff]  ;;  %v13622_v9 = vld [vmem:[#allocation10 + $0x78] sm:$0xff]   ;;  %v20778_v57 = vld [vmem:[#allocation102_spill] sm:$0xff] }
 0x71e   : > { %12385 = vmatpush3.bf16.msra.mxu0 %v13608_v56  ;;  %v20763_v56 = vrot.slane %v20756_v51, 7  ;;  %v13620_v51 = vld [vmem:[#allocation10 + $0x30] sm:$0xff]  }
 0x71f   : > { %12386 = vmatprep.subr.bf16.mxu0 %v13613_v45  ;;  %10558 = vmatmul.mubr.msk.bf16.gmra.mrb[236].mxu0 %vm20758_vm7, %v18396_v12  ;;  %v7309_v45 = vsel %vm20764_vm6, %v7257_v47, %v7258_v37  ;;  %v20767_v47 = vld [vmem:[#allocation29_spill] sm:$0xff] }
 0x720   : > { %7888 = vmatprep.mubr.bf16.mxu0 %v18400_v44  ;;  %v7308_v35 = vsel %vm20754_vm2, %v7258_v37, %v20763_v56  ;;  %v13600_v37 = vld [vmem:[#allocation10 + $0x198] sm:$0xff]   ;;  %vm20779_vm2 = vnez %v20778_v57 }
 0x721   : > { %12859 = vmatmul.mubr.msk.bf16.vlgmr.msra.gmra.mrb[124].mxu1 %vm20631_vm14, %v20759_v8  ;;  %v13598_v8 = vld [vmem:[#allocation10 + $0x190] sm:$0xff]   ;;  %vm20766_vm14 = vnez %v20765_v6  ;;  %v13623_v56 = vld [vmem:[#allocation10 + $0x38] sm:$0xff]  }
 0x722   : > { %12515 = vmatpush3.bf16.msra.mxu1 %v13592_v1  ;;  %12862 = vmatprep.mubr.msk.bf16.mxu1 %vm20235_vm5, %v20761_v49  ;;  %v18419_v1 = vpack.c.bf16 %v7308_v35, %v7309_v45  ;;  %v13604_v35 = vld [vmem:[#allocation10 + $0x1a0] sm:$0xff]   ;;  %v13605_v45 = vld [vmem:[#allocation10 + $0x1e8] sm:$0xff]   ;;  %vm20812_vm5 = vnez %v20731_v43 }
 0x723   : > { %12516 = vmatprep.subr.bf16.mxu1 %v13593_v20  ;;  %12387 = vmatpush3.bf16.msra.mxu0 %v13614_v21  ;;  %v20768_v20 = vld [vmem:[#allocation25_spill] sm:$0xff] }
 0x724   : > { %12388 = vmatprep.subr.bf16.mxu0 %v13616_v13  ;;  %v20769_v21 = vld [vmem:[#allocation125_spill] sm:$0xff]  ;;  %v20770_v13 = vld [vmem:[#allocation99_spill] sm:$0xff] }
 0x726   : > { %12517 = vmatpush3.bf16.msra.mxu1 %v13594_v25  ;;  %v13603_v25 = vld [vmem:[#allocation10 + $0x1e0] sm:$0xff]  }
 0x727   : > { %12518 = vmatprep.subr.bf16.mxu1 %v13597_v34  ;;  %12389 = vmatpush3.bf16.msra.mxu0 %v13617_v5  ;;  %v20771_v34 = vld [vmem:[#allocation32_spill] sm:$0xff] }
 0x728   : > { %10561 = vmatmul.mubr.msk.bf16.gmra.mrb[240].mxu0 %vm20766_vm14, %v18419_v1  ;;  %12390 = vmatprep.subr.bf16.mxu0 %v13619_v61  ;;  %v20772_v5 = vld [vmem:[#allocation96_spill] sm:$0xff]  ;;  %v20780_v61 = vld [vmem:[#allocation55_spill] sm:$0xff] }
 0x729   : > { %12863 = vmatmul.mubr.msk.bf16.gmra.mrb[128].mxu1 %vm20245_vm3, %v20767_v47  ;;  %7896 = vmatprep.mubr.bf16.mxu0 %v18310_v11  ;;  %vm20773_vm6 = vnez %v20772_v5  ;;  %v20838_v5 = vld [vmem:[#allocation70_spill] sm:$0xff] }
 0x72a   : > { %12866 = vmatprep.mubr.msk.bf16.mxu1 %vm20255_vm13, %v20769_v21  ;;  %12519 = vmatpush3.bf16.msra.mxu1 %v13598_v8  ;;  %v20775_v8 = vld [vmem:[#allocation47_spill] sm:$0xff]  ;;  %vm20790_vm13 = vnez %v20702_v36  ;;  %v20796_v36 = vld [vmem:[#allocation53_spill] sm:$0xff] }
 0x72b   : > { %12520 = vmatprep.subr.bf16.mxu1 %v13599_v10  ;;  %12391 = vmatpush3.bf16.msra.mxu0 %v13620_v51  ;;  %v20776_v10 = vld [vmem:[#allocation118_spill] sm:$0xff] }
 0x72c   : > { %12392 = vmatprep.subr.bf16.mxu0 %v13622_v9  ;;  %v13606_v51 = vld [vmem:[#allocation10 + $0x1a8] sm:$0xff]   ;;  %v13609_v9 = vld [vmem:[#allocation10 + $0x1f0] sm:$0xff]  }
 0x72e   : > { %12521 = vmatpush3.bf16.msra.mxu1 %v13600_v37  ;;  %v13610_v37 = vld [vmem:[#allocation10 + $0x1b0] sm:$0xff]  }
 0x72f   : > { %12522 = vmatprep.subr.bf16.mxu1 %v13603_v25  ;;  %12393 = vmatpush3.bf16.msra.mxu0 %v13623_v56  ;;  %v13611_v25 = vld [vmem:[#allocation10 + $0x1f8] sm:$0xff]   ;;  %v20777_v56 = vld [vmem:[#allocation42_spill] sm:$0xff] }
 0x730   : > { %10564 = vmatmul.mubr.msk.bf16.gmra.mrb[244].mxu0 %vm20773_vm6, %v20771_v34 }
 0x731   : > { %12867 = vmatmul.mubr.msk.bf16.gmra.mrb[132].mxu1 %vm20263_vm8, %v17981_v23  ;;  %7904 = vmatprep.mubr.bf16.mxu0 %v18314_v46  ;;  %v20781_v23 = vld [vmem:[#allocation14_spill] sm:$0xff] }
 0x732   : > { %12870 = vmatprep.mubr.msk.bf16.mxu1 %vm20271_vm15, %v20775_v8  ;;  %12523 = vmatpush3.bf16.msra.mxu1 %v13604_v35  ;;  %vm20782_vm8 = vnez %v20781_v23  ;;  %v13612_v35 = vld [vmem:[#allocation10 + $0x1b8] sm:$0xff]  }
 0x733   : > { %12524 = vmatprep.subr.bf16.mxu1 %v13605_v45  ;;  %v13615_v45 = vld [vmem:[#allocation10 + $0x200] sm:$0xff]  }
 0x736   : > { %12525 = vmatpush3.bf16.msra.mxu1 %v13606_v51  ;;  %v20783_v51 = vld [vmem:[#allocation49_spill] sm:$0xff] }
 0x737   : > { %12526 = vmatprep.subr.bf16.mxu1 %v13609_v9  ;;  %v20784_v9 = vld [vmem:[#allocation112_spill] sm:$0xff] }
 0x738   : > { %10567 = vmatmul.mubr.msk.bf16.gmra.mrb[248].mxu0 %vm20779_vm2, %v20777_v56  ;;  %vm20785_vm15 = vnez %v20784_v9 }
 0x739   : > { %12871 = vmatmul.mubr.msk.bf16.gmra.mrb[136].mxu1 %vm20782_vm8, %v20780_v61  ;;  %7912 = vmatprep.mubr.bf16.mxu0 %v18318_v33  ;;  %vm20789_vm8 = vnez %v20698_v32  ;;  %v20802_v32 = vld [vmem:[#allocation69_spill] sm:$0xff] }
 0x73a   : > { %12874 = vmatprep.mubr.msk.bf16.mxu1 %vm20580_vm11, %v18069_v28  ;;  %12527 = vmatpush3.bf16.msra.mxu1 %v13610_v37  ;;  %v20786_v37 = vld [vmem:[#allocation51_spill] sm:$0xff]  ;;  %vm20788_vm11 = vnez %v20787_v41 }
 0x73b   : > { %12528 = vmatprep.subr.bf16.mxu1 %v13611_v25  ;;  %v20791_v25 = vld [vmem:[#allocation40_spill] sm:$0xff] }
 0x73e   : > { %12529 = vmatpush3.bf16.msra.mxu1 %v13612_v35  ;;  %v20793_v35 = vld [vmem:[#allocation45_spill] sm:$0xff] }
 0x73f   : > { %12890 = vmatprep.subr.bf16.mxu1 %v13615_v45 }
 0x740   : > { %10570 = vmatmul.mubr.msk.bf16.gmra.mrb[252].mxu0 %vm20785_vm15, %v20783_v51 }
 0x741   : > { %12875 = vmatmul.mubr.msk.bf16.gmra.mrb[140].mxu1 %vm20583_vm10, %v18128_v22  ;;  %7920 = vmatprep.mubr.bf16.mxu0 %v18338_v63  ;;  %vm20792_vm10 = vnez %v20791_v25 }
 0x742   : > { %12878 = vmatprep.mubr.msk.bf16.mxu1 %vm20600_vm12, %v18162_v38 }
 0x748   : > { %10573 = vmatmul.mubr.msk.bf16.gmra.mrb[0].mxu0 %vm20788_vm11, %v20786_v37 }
 0x749   : > { %12879 = vmatmul.mubr.msk.bf16.gmra.mrb[144].mxu1 %vm20789_vm8, %v18205_v7  ;;  %7928 = vmatprep.mubr.bf16.mxu0 %v18344_v31  ;;  %vm20794_vm8 = vnez %v20793_v35  ;;  %v20804_v7 = vld [vmem:[#allocation108_spill] sm:$0xff] }
 0x74a   : > { %12882 = vmatprep.mubr.msk.bf16.mxu1 %vm20790_vm13, %v18215_v15  ;;  %v20801_v15 = vld [vmem:[#allocation131_spill] sm:$0xff]  ;;  %vm20806_vm13 = vnez %v20805_v54  ;;  %v20832_v54 = vld [vmem:[#allocation109_spill] sm:$0xff] }
 0x750   : > { %10576 = vmatmul.mubr.msk.bf16.gmra.mrb[4].mxu0 %vm20792_vm10, %v18093_v27 }
 0x751   : > { %12883 = vmatmul.mubr.msk.bf16.gmra.mrb[148].mxu1 %vm20730_vm0, %v18290_v19  ;;  %7936 = vmatprep.mubr.bf16.mxu0 %v18348_v52  ;;  %v20795_v19 = vld [vmem:[#allocation128_spill] sm:$0xff]  ;;  %vm20797_vm0 = vnez %v20796_v36 }
 0x752   : > { %12886 = vmatprep.mubr.msk.bf16.mxu1 %vm20740_vm9, %v18259_v53  ;;  %v20799_v53 = vld [vmem:[#allocation62_spill] sm:$0xff]  ;;  %vm20803_vm9 = vnez %v20802_v32  ;;  %v20821_v36 = vld [vmem:[#allocation124_spill] sm:$0xff] }
 0x758   : > { %10579 = vmatmul.mubr.msk.bf16.gmra.mrb[8].mxu0 %vm20794_vm8, %v18085_v4 }
 0x759   : > { %12887 = vmatmul.mubr.msk.bf16.gmra.mrb[152].mxu1 %vm20744_vm1, %v18340_v2  ;;  %7944 = vmatprep.mubr.bf16.mxu0 %v18352_v30  ;;  %v13624_v2 = vld [vmem:[#allocation10 + $0x218] sm:$0xff]   ;;  %vm20800_vm1 = vnez %v20799_v53 }
 0x75a   : > { %8893 = vmatprep.mubr.bf16.mxu1 %v18300_v18 }
 0x760   : > { %10582 = vmatmul.mubr.msk.bf16.gmra.mrb[12].mxu0 %vm20797_vm0, %v20795_v19 }
 0x761   : > { %10738 = vmatmul.mubr.msk.bf16.vlgmr.msra.gmra.mrb[156].mxu1 %vm20748_vm4, %v18374_v3  ;;  %7952 = vmatprep.mubr.bf16.mxu0 %v18356_v59 }
 0x762   : > { %12891 = vmatpush3.bf16.msra.mxu1 %v13615_v45  ;;  %8901 = vmatprep.mubr.bf16.mxu1 %v18379_v62  ;;  %v13625_v45 = vld [vmem:[#allocation10 + $0x220] sm:$0xff]  }
 0x763   : > { %12892 = vmatprep.subr.bf16.mxu1 %v13618_v48 }
 0x766   : > { %12893 = vmatpush3.bf16.msra.mxu1 %v13618_v48  ;;  %v13626_v48 = vld [vmem:[#allocation10 + $0x228] sm:$0xff]  }
 0x767   : > { %12894 = vmatprep.subr.bf16.mxu1 %v13621_v17 }
 0x768   : > { %10585 = vmatmul.mubr.msk.bf16.gmra.mrb[16].mxu0 %vm20800_vm1, %v20798_v24 }
 0x769   : > { %10741 = vmatmul.mubr.msk.bf16.gmra.mrb[160].mxu1 %vm20758_vm7, %v18396_v12  ;;  %7960 = vmatprep.mubr.bf16.mxu0 %v18360_v42 }
 0x76a   : > { %8909 = vmatprep.mubr.bf16.mxu1 %v18400_v44  ;;  %12895 = vmatpush3.bf16.msra.mxu1 %v13621_v17  ;;  %v13627_v17 = vld [vmem:[#allocation10 + $0x230] sm:$0xff]  }
 0x76b   : > { %12896 = vmatprep.subr.bf16.mxu1 %v13624_v2 }
 0x76e   : > { %12897 = vmatpush3.bf16.msra.mxu1 %v13624_v2  ;;  %v13628_v2 = vld [vmem:[#allocation10 + $0x238] sm:$0xff]  }
 0x76f   : > { %12898 = vmatprep.subr.bf16.mxu1 %v13625_v45 }
 0x770   : > { %10588 = vmatmul.mubr.msk.bf16.gmra.mrb[20].mxu0 %vm20803_vm9, %v20801_v15 }
 0x771   : > { %10744 = vmatmul.mubr.msk.bf16.gmra.mrb[164].mxu1 %vm20766_vm14, %v18419_v1  ;;  %7968 = vmatprep.mubr.bf16.mxu0 %v18364_v39 }
 0x772   : > { %8917 = vmatprep.mubr.bf16.mxu1 %v18310_v11  ;;  %12899 = vmatpush3.bf16.msra.mxu1 %v13625_v45  ;;  %v20807_v45 = vld [vmem:[#allocation77_spill] sm:$0xff] }
 0x773   : > { %12900 = vmatprep.subr.bf16.mxu1 %v13626_v48  ;;  %vm20808_vm12 = vnez %v20807_v45 }
 0x776   : > { %12901 = vmatpush3.bf16.msra.mxu1 %v13626_v48  ;;  %v20809_v48 = vld [vmem:[#allocation82_spill] sm:$0xff] }
 0x777   : > { %12902 = vmatprep.subr.bf16.mxu1 %v13627_v17  ;;  %vm20810_vm3 = vnez %v20809_v48 }
 0x778   : > { %10591 = vmatmul.mubr.msk.bf16.gmra.mrb[24].mxu0 %vm20806_vm13, %v20804_v7 }
 0x779   : > { %10747 = vmatmul.mubr.msk.bf16.gmra.mrb[168].mxu1 %vm20773_vm6, %v20771_v34  ;;  %7976 = vmatprep.mubr.bf16.mxu0 %v18366_v16 }
 0x77a   : > { %8925 = vmatprep.mubr.bf16.mxu1 %v18314_v46  ;;  %12903 = vmatpush3.bf16.msra.mxu1 %v13627_v17  ;;  %v20811_v17 = vld [vmem:[#allocation119_spill] sm:$0xff] }
 0x77b   : > { %12904 = vmatprep.subr.bf16.mxu1 %v13628_v2 }
 0x77e   : > { %12905 = vmatpush3.bf16.msra.mxu1 %v13628_v2 }
 0x780   : > { %10594 = vmatmul.mubr.msk.bf16.gmra.mrb[28].mxu0 %vm20808_vm12, %v18330_v0 }
 0x781   : > { %10750 = vmatmul.mubr.msk.bf16.gmra.mrb[172].mxu1 %vm20779_vm2, %v20777_v56  ;;  %7984 = vmatprep.mubr.bf16.mxu0 %v18372_v29 }
 0x782   : > { %8933 = vmatprep.mubr.bf16.mxu1 %v18318_v33 }
 0x788   : > { %10597 = vmatmul.mubr.msk.bf16.gmra.mrb[32].mxu0 %vm20810_vm3, %v18332_v26 }
 0x789   : > { %10753 = vmatmul.mubr.msk.bf16.gmra.mrb[176].mxu1 %vm20785_vm15, %v20783_v51  ;;  %8330 = vmatprep.mubr.bf16.mxu0 %v20751_v58 }
 0x78a   : > { %8941 = vmatprep.mubr.bf16.mxu1 %v18338_v63 }
 0x790   : > { %8331 = vmatmul.mubr.bf16.vlgmr.msra.gmra.mrb[36].mxu0 %v20751_v58 }
 0x791   : > { %10756 = vmatmul.mubr.msk.bf16.gmra.mrb[180].mxu1 %vm20788_vm11, %v20786_v37  ;;  %8338 = vmatprep.mubr.bf16.mxu0 %v20811_v17 }
 0x792   : > { %8949 = vmatprep.mubr.bf16.mxu1 %v18344_v31 }
 0x798   : > { %10648 = vmatmul.mubr.msk.bf16.gmra.mrb[40].mxu0 %vm20812_vm5, %v18286_v40  ;;  %vm20815_vm5 = vnez %v20770_v13 }
 0x799   : > { %10759 = vmatmul.mubr.msk.bf16.gmra.mrb[184].mxu1 %vm20792_vm10, %v18093_v27  ;;  %8346 = vmatprep.mubr.bf16.mxu0 %v18300_v18 }
 0x79a   : > { %8957 = vmatprep.mubr.bf16.mxu1 %v18348_v52 }
 0x7a0   : > { %10651 = vmatmul.mubr.msk.bf16.gmra.mrb[44].mxu0 %vm20748_vm4, %v18374_v3 }
 0x7a1   : > { %10762 = vmatmul.mubr.msk.bf16.gmra.mrb[188].mxu1 %vm20794_vm8, %v18085_v4  ;;  %8354 = vmatprep.mubr.bf16.mxu0 %v18379_v62 }
 0x7a2   : > { %8965 = vmatprep.mubr.bf16.mxu1 %v18352_v30 }
 0x7a8   : > { %10654 = vmatmul.mubr.msk.bf16.gmra.mrb[48].mxu0 %vm20758_vm7, %v18396_v12 }
 0x7a9   : > { %10765 = vmatmul.mubr.msk.bf16.gmra.mrb[192].mxu1 %vm20797_vm0, %v20795_v19  ;;  %8362 = vmatprep.mubr.bf16.mxu0 %v18400_v44 }
 0x7aa   : > { %8973 = vmatprep.mubr.bf16.mxu1 %v18356_v59 }
 0x7b0   : > { %10657 = vmatmul.mubr.msk.bf16.gmra.mrb[52].mxu0 %vm20766_vm14, %v18419_v1 }
 0x7b1   : > { %10768 = vmatmul.mubr.msk.bf16.gmra.mrb[196].mxu1 %vm20800_vm1, %v20798_v24  ;;  %8370 = vmatprep.mubr.bf16.mxu0 %v18310_v11  ;;  %v20817_v11 = vld [vmem:[#allocation105_spill] sm:$0xff] }
 0x7b2   : > { %8981 = vmatprep.mubr.bf16.mxu1 %v18360_v42 }
 0x7b8   : > { %10660 = vmatmul.mubr.msk.bf16.gmra.mrb[56].mxu0 %vm20773_vm6, %v20771_v34 }
 0x7b9   : > { %10771 = vmatmul.mubr.msk.bf16.gmra.mrb[200].mxu1 %vm20803_vm9, %v20801_v15  ;;  %8378 = vmatprep.mubr.bf16.mxu0 %v18314_v46 }
 0x7ba   : > { %8989 = vmatprep.mubr.bf16.mxu1 %v18364_v39 }
 0x7c0   : > { %10663 = vmatmul.mubr.msk.bf16.gmra.mrb[60].mxu0 %vm20779_vm2, %v20777_v56  ;;  %vm9254_vm2 = vcmask 7168  }
 0x7c1   : > { %10774 = vmatmul.mubr.msk.bf16.gmra.mrb[204].mxu1 %vm20806_vm13, %v20804_v7  ;;  %8386 = vmatprep.mubr.bf16.mxu0 %v18318_v33 }
 0x7c2   : > { %8997 = vmatprep.mubr.bf16.mxu1 %v18366_v16 }
 0x7c8   : > { %10666 = vmatmul.mubr.msk.bf16.gmra.mrb[64].mxu0 %vm20785_vm15, %v20783_v51  ;;  %vm20813_vm15 = vnez %v20762_v14  ;;  %v20836_v14 = vld [vmem:[#allocation68_spill] sm:$0xff] }
 0x7c9   : > { %10777 = vmatmul.mubr.msk.bf16.gmra.mrb[208].mxu1 %vm20808_vm12, %v18330_v0  ;;  %8394 = vmatprep.mubr.bf16.mxu0 %v18338_v63  ;;  %vm20837_vm14 = vnez %v20836_v14 }
 0x7ca   : > { %9005 = vmatprep.mubr.bf16.mxu1 %v18372_v29 }
 0x7d0   : > { %10669 = vmatmul.mubr.msk.bf16.gmra.mrb[68].mxu0 %vm20788_vm11, %v20786_v37  ;;  %vm20819_vm11 = vnez %v20776_v10 }
 0x7d1   : > { %10780 = vmatmul.mubr.msk.bf16.gmra.mrb[212].mxu1 %vm20810_vm3, %v18332_v26  ;;  %8402 = vmatprep.mubr.bf16.mxu0 %v18344_v31  ;;  %vm20814_vm3 = vnez %v20768_v20 }
 0x7d2   : > { %9013 = vmatprep.mubr.bf16.mxu1 %v20751_v58 }
 0x7d8   : > { %10672 = vmatmul.mubr.msk.bf16.gmra.mrb[72].mxu0 %vm20792_vm10, %v18093_v27  ;;  %vm20820_vm10 = vnez %v20781_v23  ;;  %v20824_v23 = vld [vmem:[#allocation44_spill] sm:$0xff] }
 0x7d9   : > { %9014 = vmatmul.mubr.bf16.gmra.mrb[216].mxu1 %v20751_v58  ;;  %8410 = vmatprep.mubr.bf16.mxu0 %v18348_v52  ;;  %vm20825_vm4 = vnez %v20824_v23 }
 0x7da   : > { %12906 = vmatprep.mubr.msk.bf16.mxu1 %vm20813_vm15, %v20761_v49 }
 0x7e0   : > { %10675 = vmatmul.mubr.msk.bf16.gmra.mrb[76].mxu0 %vm20794_vm8, %v18085_v4  ;;  %v20816_v4 = vld [vmem:[#allocation36_spill] sm:$0xff]  ;;  %vm20818_vm8 = vnez %v20817_v11 }
 0x7e1   : > { %12907 = vmatmul.mubr.msk.bf16.vlgmr.msra.gmra.mrb[124].mxu1 %vm20814_vm3, %v20767_v47  ;;  %8418 = vmatprep.mubr.bf16.mxu0 %v18352_v30 }
 0x7e2   : > { %12910 = vmatprep.mubr.msk.bf16.mxu1 %vm20815_vm5, %v20769_v21  ;;  %v12258_v41 = vpop.f32.mrb[228].mxu0 }
 0x7e3   : > { %v12259_v27 = vpop.f32.mrb[229].mxu0 }
 0x7e4   : > { %v18625_v40 = vadd.f32 %v12259_v27, %v12258_v41  ;;  %v12261_v57 = vpop.f32.mrb[230].mxu0 }
 0x7e5   : > { %v12262_v18 = vpop.f32.mrb[231].mxu0 }
 0x7e6   : > { %v18627_v43 = vadd.f32 %v12262_v18, %v12261_v57 }
 0x7e8   : > { %10678 = vmatmul.mubr.msk.bf16.gmra.mrb[80].mxu0 %vm20797_vm0, %v20795_v19  ;;  %vm20822_vm0 = vnez %v20821_v36 }
 0x7e9   : > { %12911 = vmatmul.mubr.msk.bf16.gmra.mrb[128].mxu1 %vm20818_vm8, %v20816_v4  ;;  %8426 = vmatprep.mubr.bf16.mxu0 %v18356_v59 }
 0x7ea   : > { %12914 = vmatprep.mubr.msk.bf16.mxu1 %vm20819_vm11, %v20775_v8  ;;  %v12264_v46 = vpop.f32.mrb[232].mxu0  ;;  %v20842_v8 = vld [vmem:[#allocation130_spill] sm:$0xff] }
 0x7eb   : > { %v12265_v33 = vpop.f32.mrb[233].mxu0 }
 0x7ec   : > { %v18639_v26 = vadd.f32 %v12265_v33, %v12264_v46  ;;  %v12267_v63 = vpop.f32.mrb[234].mxu0 }
 0x7ed   : > { %v12268_v31 = vpop.f32.mrb[235].mxu0 }
 0x7ee   : > { %v18641_v52 = vadd.f32 %v12268_v31, %v12267_v63 }
 0x7f0   : > { %10681 = vmatmul.mubr.msk.bf16.gmra.mrb[84].mxu0 %vm20800_vm1, %v20798_v24  ;;  %vm20823_vm1 = vnez %v20582_v55  ;;  %v20826_v55 = vld [vmem:[#allocation129_spill] sm:$0xff] }
 0x7f1   : > { %12915 = vmatmul.mubr.msk.bf16.gmra.mrb[132].mxu1 %vm20820_vm10, %v20780_v61  ;;  %8434 = vmatprep.mubr.bf16.mxu0 %v18360_v42  ;;  %v20839_v61 = vld [vmem:[#allocation67_spill] sm:$0xff] }
 0x7f2   : > { %12918 = vmatprep.mubr.msk.bf16.mxu1 %vm20822_vm0, %v18069_v28  ;;  %v12270_v19 = vpop.f32.mrb[236].mxu0  ;;  %vm20840_vm6 = vnez %v20839_v61 }
 0x7f3   : > { %v12271_v30 = vpop.f32.mrb[237].mxu0 }
 0x7f4   : > { %v18653_v59 = vadd.f32 %v12271_v30, %v12270_v19  ;;  %v12273_v29 = vpop.f32.mrb[238].mxu0 }
 0x7f5   : > { %v12274_v3 = vpop.f32.mrb[239].mxu0 }
 0x7f6   : > { %v18655_v62 = vadd.f32 %v12274_v3, %v12273_v29 }
 0x7f8   : > { %10684 = vmatmul.mubr.msk.bf16.gmra.mrb[88].mxu0 %vm20803_vm9, %v20801_v15  ;;  %v20829_v15 = vld [vmem:[#allocation64_spill] sm:$0xff] }
 0x7f9   : > { %12919 = vmatmul.mubr.msk.bf16.gmra.mrb[136].mxu1 %vm20823_vm1, %v18128_v22  ;;  %8442 = vmatprep.mubr.bf16.mxu0 %v18364_v39  ;;  %v20827_v22 = vld [vmem:[#allocation56_spill] sm:$0xff] }
 0x7fa   : > { %12922 = vmatprep.mubr.msk.bf16.mxu1 %vm20825_vm4, %v18162_v38  ;;  %vm20828_vm9 = vnez %v20827_v22  ;;  %v20830_v38 = vld [vmem:[#allocation26_spill] sm:$0xff] }
 0x7fb   : > { %v12276_v28 = vpop.f32.mrb[240].mxu0  ;;  %vm20831_vm7 = vnez %v20830_v38 }
 0x7fc   : > { %v12277_v53 = vpop.f32.mrb[241].mxu0 }
 0x7fd   : > { %v18667_v24 = vadd.f32 %v12277_v53, %v12276_v28  ;;  %v12279_v42 = vpop.f32.mrb[242].mxu0 }
 0x7fe   : > { %v12280_v50 = vpop.f32.mrb[243].mxu0 }
 0x7ff   : > { %v18669_v6 = vadd.f32 %v12280_v50, %v12279_v42 }
 0x800   : > { %10687 = vmatmul.mubr.msk.bf16.gmra.mrb[92].mxu0 %vm20806_vm13, %v20804_v7  ;;  %v20833_v7 = vld [vmem:[#allocation27_spill] sm:$0xff] }
 0x801   : > { %12923 = vmatmul.mubr.msk.bf16.gmra.mrb[140].mxu1 %vm20828_vm9, %v20826_v55  ;;  %8450 = vmatprep.mubr.bf16.mxu0 %v18366_v16  ;;  %vm20834_vm13 = vnez %v20833_v7  ;;  %v20835_v16 = vld [vmem:[#allocation66_spill] sm:$0xff] }
 0x802   : > { %12926 = vmatprep.mubr.msk.bf16.mxu1 %vm20831_vm7, %v20829_v15 }
 0x803   : > { %v12282_v32 = vpop.f32.mrb[244].mxu0 }
 0x804   : > { %v12283_v39 = vpop.f32.mrb[245].mxu0 }
 0x805   : > { %v18681_v12 = vadd.f32 %v12283_v39, %v12282_v32  ;;  %v12285_v44 = vpop.f32.mrb[246].mxu0 }
 0x806   : > { %v12286_v60 = vpop.f32.mrb[247].mxu0 }
 0x807   : > { %v18683_v49 = vadd.f32 %v12286_v60, %v12285_v44 }
 0x808   : > { %10690 = vmatmul.mubr.msk.bf16.gmra.mrb[96].mxu0 %vm20808_vm12, %v18330_v0  ;;  %v20841_v0 = vld [vmem:[#allocation132_spill] sm:$0xff]  ;;  %vm20843_vm12 = vnez %v20842_v8 }
 0x809   : > { %12927 = vmatmul.mubr.msk.bf16.gmra.mrb[144].mxu1 %vm20834_vm13, %v20832_v54 }
 0x80a   : > { %12930 = vmatprep.mubr.msk.bf16.mxu1 %vm20837_vm14, %v20835_v16 }
 0x80b   : > { %v12288_v1 = vpop.f32.mrb[248].mxu0 }
 0x80c   : > { %v12289_v47 = vpop.f32.mrb[249].mxu0 }
 0x80d   : > { %v18694_v20 = vadd.f32 %v12289_v47, %v12288_v1  ;;  %v12291_v21 = vpop.f32.mrb[250].mxu0 }
 0x80e   : > { %v12292_v13 = vpop.f32.mrb[251].mxu0 }
 0x80f   : > { %v18696_v34 = vadd.f32 %v12292_v13, %v12291_v21 }
 0x811   : > { %12931 = vmatmul.mubr.msk.bf16.gmra.mrb[148].mxu1 %vm20840_vm6, %v20838_v5 }
 0x812   : > { %12934 = vmatprep.mubr.msk.bf16.mxu1 %vm20843_vm12, %v20841_v0 }
 0x813   : > { %v12294_v10 = vpop.f32.mrb[252].mxu0 }
 0x814   : > { %v12295_v56 = vpop.f32.mrb[253].mxu0 }
 0x815   : > { %v18704_v51 = vadd.f32 %v12295_v56, %v12294_v10  ;;  %v12297_v9 = vpop.f32.mrb[254].mxu0 }
 0x816   : > { %v12298_v37 = vpop.f32.mrb[255].mxu0 }
 0x817   : > { %v18706_v25 = vadd.f32 %v12298_v37, %v12297_v9 }
 0x819   : > { %12935 = vmatmul.mubr.bf16.gmra.mrb[152].mxu1 %v20751_v58 }
 0x81b   : > { %v12300_v35 = vpop.f32.mrb[0].mxu0 }
 0x81c   : > { %v12301_v2 = vpop.f32.mrb[1].mxu0 }
 0x81d   : > { %v18709_v45 = vadd.f32 %v12301_v2, %v12300_v35  ;;  %v12303_v48 = vpop.f32.mrb[2].mxu0 }
 0x81e   : > { %v12304_v17 = vpop.f32.mrb[3].mxu0 }
 0x81f   : > { %v18711_v41 = vadd.f32 %v12304_v17, %v12303_v48 }
 0x823   : > { %v12306_v27 = vpop.f32.mrb[4].mxu0 }
 0x824   : > { %v12307_v57 = vpop.f32.mrb[5].mxu0 }
 0x825   : > { %v18713_v18 = vadd.f32 %v12307_v57, %v12306_v27  ;;  %v12309_v4 = vpop.f32.mrb[6].mxu0 }
 0x826   : > { %v12310_v11 = vpop.f32.mrb[7].mxu0 }
 0x827   : > { %v18715_v46 = vadd.f32 %v12310_v11, %v12309_v4 }
 0x82b   : > { %v12312_v33 = vpop.f32.mrb[8].mxu0 }
 0x82c   : > { %v12313_v63 = vpop.f32.mrb[9].mxu0 }
 0x82d   : > { %v18717_v31 = vadd.f32 %v12313_v63, %v12312_v33  ;;  %v12315_v58 = vpop.f32.mrb[10].mxu0 }
 0x82e   : > { %v12316_v36 = vpop.f32.mrb[11].mxu0 }
 0x82f   : > { %v18719_v19 = vadd.f32 %v12316_v36, %v12315_v58 }
 0x833   : > { %v12318_v30 = vpop.f32.mrb[12].mxu0 }
 0x834   : > { %v12530_v29 = vpop.f32.mrb[156].mxu1  ;;  %v12319_v3 = vpop.f32.mrb[13].mxu0 }
 0x835   : > { %v12531_v23 = vpop.f32.mrb[157].mxu1  ;;  %v18721_v28 = vadd.f32 %v12319_v3, %v12318_v30  ;;  %v12321_v53 = vpop.f32.mrb[14].mxu0 }
 0x836   : > { %v18723_v42 = vadd.f32 %v12531_v23, %v12530_v29  ;;  %v12533_v50 = vpop.f32.mrb[158].mxu1  ;;  %v12322_v55 = vpop.f32.mrb[15].mxu0 }
 0x837   : > { %v12534_v22 = vpop.f32.mrb[159].mxu1  ;;  %v18725_v15 = vadd.f32 %v12322_v55, %v12321_v53 }
 0x838   : > { %v18727_v38 = vadd.f32 %v12534_v22, %v12533_v50 }
 0x83b   : > { %v12324_v32 = vpop.f32.mrb[16].mxu0 }
 0x83c   : > { %v12536_v39 = vpop.f32.mrb[160].mxu1  ;;  %v12325_v44 = vpop.f32.mrb[17].mxu0 }
 0x83d   : > { %v12537_v60 = vpop.f32.mrb[161].mxu1  ;;  %v18729_v54 = vadd.f32 %v12325_v44, %v12324_v32  ;;  %v12327_v7 = vpop.f32.mrb[18].mxu0 }
 0x83e   : > { %v18731_v16 = vadd.f32 %v12537_v60, %v12536_v39  ;;  %v12539_v14 = vpop.f32.mrb[162].mxu1  ;;  %v12328_v1 = vpop.f32.mrb[19].mxu0 }
 0x83f   : > { %v12540_v47 = vpop.f32.mrb[163].mxu1  ;;  %v18733_v21 = vadd.f32 %v12328_v1, %v12327_v7 }
 0x840   : > { %v18735_v13 = vadd.f32 %v12540_v47, %v12539_v14 }
 0x843   : > { %v12330_v5 = vpop.f32.mrb[20].mxu0 }
 0x844   : > { %v12542_v61 = vpop.f32.mrb[164].mxu1  ;;  %v12331_v0 = vpop.f32.mrb[21].mxu0 }
 0x845   : > { %v12543_v8 = vpop.f32.mrb[165].mxu1  ;;  %v18737_v10 = vadd.f32 %v12331_v0, %v12330_v5  ;;  %v12333_v56 = vpop.f32.mrb[22].mxu0 }
 0x846   : > { %v18739_v9 = vadd.f32 %v12543_v8, %v12542_v61  ;;  %v12545_v37 = vpop.f32.mrb[166].mxu1  ;;  %v12334_v35 = vpop.f32.mrb[23].mxu0 }
 0x847   : > { %v12546_v2 = vpop.f32.mrb[167].mxu1  ;;  %v18741_v48 = vadd.f32 %v12334_v35, %v12333_v56 }
 0x848   : > { %v18743_v17 = vadd.f32 %v12546_v2, %v12545_v37 }
 0x84b   : > { %v12336_v27 = vpop.f32.mrb[24].mxu0 }
 0x84c   : > { %v12548_v57 = vpop.f32.mrb[168].mxu1  ;;  %v12337_v4 = vpop.f32.mrb[25].mxu0 }
 0x84d   : > { %v12549_v11 = vpop.f32.mrb[169].mxu1  ;;  %v18745_v33 = vadd.f32 %v12337_v4, %v12336_v27  ;;  %v12339_v63 = vpop.f32.mrb[26].mxu0 }
 0x84e   : > { %v18747_v58 = vadd.f32 %v12549_v11, %v12548_v57  ;;  %v12551_v36 = vpop.f32.mrb[170].mxu1  ;;  %v12340_v30 = vpop.f32.mrb[27].mxu0 }
 0x84f   : > { %v12552_v29 = vpop.f32.mrb[171].mxu1  ;;  %v18749_v3 = vadd.f32 %v12340_v30, %v12339_v63 }
 0x850   : > { %v18751_v23 = vadd.f32 %v12552_v29, %v12551_v36 }
 0x853   : > { %v12342_v53 = vpop.f32.mrb[28].mxu0 }
 0x854   : > { %v12554_v50 = vpop.f32.mrb[172].mxu1  ;;  %v12343_v55 = vpop.f32.mrb[29].mxu0 }
 0x855   : > { %v12555_v22 = vpop.f32.mrb[173].mxu1  ;;  %v18753_v32 = vadd.f32 %v12343_v55, %v12342_v53  ;;  %v12345_v39 = vpop.f32.mrb[30].mxu0 }
 0x856   : > { %v18755_v44 = vadd.f32 %v12555_v22, %v12554_v50  ;;  %v12557_v60 = vpop.f32.mrb[174].mxu1  ;;  %v12346_v7 = vpop.f32.mrb[31].mxu0 }
 0x857   : > { %v12558_v14 = vpop.f32.mrb[175].mxu1  ;;  %v18757_v1 = vadd.f32 %v12346_v7, %v12345_v39 }
 0x858   : > { %v18759_v47 = vadd.f32 %v12558_v14, %v12557_v60 }
 0x85b   : > { %v12348_v5 = vpop.f32.mrb[32].mxu0 }
 0x85c   : > { %v12560_v61 = vpop.f32.mrb[176].mxu1  ;;  %v12349_v0 = vpop.f32.mrb[33].mxu0 }
 0x85d   : > { %v12561_v8 = vpop.f32.mrb[177].mxu1  ;;  %v18761_v56 = vadd.f32 %v12349_v0, %v12348_v5  ;;  %v12351_v37 = vpop.f32.mrb[34].mxu0 }
 0x85e   : > { %v18763_v35 = vadd.f32 %v12561_v8, %v12560_v61  ;;  %v12563_v2 = vpop.f32.mrb[178].mxu1  ;;  %v12352_v27 = vpop.f32.mrb[35].mxu0 }
 0x85f   : > { %v12564_v57 = vpop.f32.mrb[179].mxu1  ;;  %v18765_v4 = vadd.f32 %v12352_v27, %v12351_v37 }
 0x860   : > { %v18767_v11 = vadd.f32 %v12564_v57, %v12563_v2 }
 0x863   : > { %v12394_v63 = vpop.f32.mrb[36].mxu0 }
 0x864   : > { %v12566_v36 = vpop.f32.mrb[180].mxu1  ;;  %v12395_v30 = vpop.f32.mrb[37].mxu0 }
 0x865   : > { %v12567_v29 = vpop.f32.mrb[181].mxu1  ;;  %v12396_v53 = vadd.f32 %v12395_v30, %v12394_v63  ;;  %v12397_v50 = vpop.f32.mrb[38].mxu0 }
 0x866   : > { %v18769_v55 = vadd.f32 %v12567_v29, %v12566_v36  ;;  %v12569_v22 = vpop.f32.mrb[182].mxu1  ;;  %v12398_v39 = vpop.f32.mrb[39].mxu0 }
 0x867   : > { %v13053_v60 = vadd.f32 %v12396_v53, %v18625_v40  ;;  %v12570_v7 = vpop.f32.mrb[183].mxu1  ;;  %v12399_v14 = vadd.f32 %v12398_v39, %v12397_v50 }
 0x868   : > { %v18772_v5 = vadd.f32 %v12570_v7, %v12569_v22 }
 0x869   : > { %v13059_v61 = vadd.f32 %v12399_v14, %v18627_v43  ;;  %v18776_v0 = vadd.f32 %v13053_v60, %v18723_v42 }
 0x86b   : > { %v12400_v8 = vpop.f32.mrb[40].mxu0  ;;  %v18779_v37 = vadd.f32 %v13059_v61, %v18727_v38 }
 0x86c   : > { %v12572_v2 = vpop.f32.mrb[184].mxu1  ;;  %v12401_v27 = vpop.f32.mrb[41].mxu0 }
 0x86d   : > { %v12573_v57 = vpop.f32.mrb[185].mxu1  ;;  %v12402_v63 = vadd.f32 %v12401_v27, %v12400_v8  ;;  %v12403_v36 = vpop.f32.mrb[42].mxu0 }
 0x86e   : > { %v18781_v30 = vadd.f32 %v12573_v57, %v12572_v2  ;;  %v12575_v40 = vpop.f32.mrb[186].mxu1  ;;  %v12404_v29 = vpop.f32.mrb[43].mxu0 }
 0x86f   : > { %v13050_v53 = vadd.f32 %v12402_v63, %v18639_v26  ;;  %v12576_v50 = vpop.f32.mrb[187].mxu1  ;;  %v12405_v43 = vadd.f32 %v12404_v29, %v12403_v36 }
 0x870   : > { %v18784_v22 = vadd.f32 %v12576_v50, %v12575_v40 }
 0x871   : > { %v13056_v42 = vadd.f32 %v12405_v43, %v18641_v52  ;;  %v18788_v38 = vadd.f32 %v13050_v53, %v18731_v16 }
 0x873   : > { %v12406_v39 = vpop.f32.mrb[44].mxu0  ;;  %v18791_v60 = vadd.f32 %v13056_v42, %v18735_v13 }
 0x874   : > { %v12578_v7 = vpop.f32.mrb[188].mxu1  ;;  %v12407_v14 = vpop.f32.mrb[45].mxu0 }
 0x875   : > { %v12579_v61 = vpop.f32.mrb[189].mxu1  ;;  %v12408_v8 = vadd.f32 %v12407_v14, %v12406_v39  ;;  %v12409_v2 = vpop.f32.mrb[46].mxu0 }
 0x876   : > { %v18793_v27 = vadd.f32 %v12579_v61, %v12578_v7  ;;  %v12581_v26 = vpop.f32.mrb[190].mxu1  ;;  %v12410_v57 = vpop.f32.mrb[47].mxu0 }
 0x877   : > { %v13065_v63 = vadd.f32 %v12408_v8, %v18653_v59  ;;  %v12582_v36 = vpop.f32.mrb[191].mxu1  ;;  %v12411_v52 = vadd.f32 %v12410_v57, %v12409_v2 }
 0x878   : > { %v18796_v40 = vadd.f32 %v12582_v36, %v12581_v26 }
 0x879   : > { %v13071_v16 = vadd.f32 %v12411_v52, %v18655_v62  ;;  %v18800_v13 = vadd.f32 %v13065_v63, %v18739_v9 }
 0x87b   : > { %v12412_v29 = vpop.f32.mrb[48].mxu0  ;;  %v18803_v53 = vadd.f32 %v13071_v16, %v18743_v17 }
 0x87c   : > { %v12584_v50 = vpop.f32.mrb[192].mxu1  ;;  %v12413_v43 = vpop.f32.mrb[49].mxu0 }
 0x87d   : > { %v12585_v42 = vpop.f32.mrb[193].mxu1  ;;  %v12414_v39 = vadd.f32 %v12413_v43, %v12412_v29  ;;  %v12415_v7 = vpop.f32.mrb[50].mxu0 }
 0x87e   : > { %v18805_v14 = vadd.f32 %v12585_v42, %v12584_v50  ;;  %v12587_v59 = vpop.f32.mrb[194].mxu1  ;;  %v12416_v61 = vpop.f32.mrb[51].mxu0 }
 0x87f   : > { %v13062_v8 = vadd.f32 %v12414_v39, %v18667_v24  ;;  %v12588_v2 = vpop.f32.mrb[195].mxu1  ;;  %v12417_v62 = vadd.f32 %v12416_v61, %v12415_v7 }
 0x880   : > { %v18808_v26 = vadd.f32 %v12588_v2, %v12587_v59 }
 0x881   : > { %v13068_v9 = vadd.f32 %v12417_v62, %v18669_v6  ;;  %v18812_v17 = vadd.f32 %v13062_v8, %v18747_v58 }
 0x883   : > { %v12418_v57 = vpop.f32.mrb[52].mxu0  ;;  %v18815_v63 = vadd.f32 %v13068_v9, %v18751_v23 }
 0x884   : > { %v12590_v36 = vpop.f32.mrb[196].mxu1  ;;  %v12419_v52 = vpop.f32.mrb[53].mxu0 }
 0x885   : > { %v12591_v16 = vpop.f32.mrb[197].mxu1  ;;  %v12420_v29 = vadd.f32 %v12419_v52, %v12418_v57  ;;  %v12421_v50 = vpop.f32.mrb[54].mxu0 }
 0x886   : > { %v18817_v43 = vadd.f32 %v12591_v16, %v12590_v36  ;;  %v12593_v24 = vpop.f32.mrb[198].mxu1  ;;  %v12422_v42 = vpop.f32.mrb[55].mxu0 }
 0x887   : > { %v13077_v39 = vadd.f32 %v12420_v29, %v18681_v12  ;;  %v12594_v7 = vpop.f32.mrb[199].mxu1  ;;  %v12423_v6 = vadd.f32 %v12422_v42, %v12421_v50 }
 0x888   : > { %v18820_v59 = vadd.f32 %v12594_v7, %v12593_v24 }
 0x889   : > { %v13083_v58 = vadd.f32 %v12423_v6, %v18683_v49  ;;  %v18824_v23 = vadd.f32 %v13077_v39, %v18755_v44 }
 0x88b   : > { %v12424_v61 = vpop.f32.mrb[56].mxu0  ;;  %v18827_v8 = vadd.f32 %v13083_v58, %v18759_v47 }
 0x88c   : > { %v12596_v2 = vpop.f32.mrb[200].mxu1  ;;  %v12425_v62 = vpop.f32.mrb[57].mxu0 }
 0x88d   : > { %v12597_v9 = vpop.f32.mrb[201].mxu1  ;;  %v12426_v57 = vadd.f32 %v12425_v62, %v12424_v61  ;;  %v12427_v36 = vpop.f32.mrb[58].mxu0 }
 0x88e   : > { %v18829_v52 = vadd.f32 %v12597_v9, %v12596_v2  ;;  %v12599_v12 = vpop.f32.mrb[202].mxu1  ;;  %v12428_v16 = vpop.f32.mrb[59].mxu0 }
 0x88f   : > { %v13074_v29 = vadd.f32 %v12426_v57, %v18694_v20  ;;  %v12600_v50 = vpop.f32.mrb[203].mxu1  ;;  %v12429_v49 = vadd.f32 %v12428_v16, %v12427_v36 }
 0x890   : > { %v18832_v24 = vadd.f32 %v12600_v50, %v12599_v12 }
 0x891   : > { %v13080_v44 = vadd.f32 %v12429_v49, %v18696_v34  ;;  %v18836_v47 = vadd.f32 %v13074_v29, %v18763_v35 }
 0x893   : > { %v12430_v42 = vpop.f32.mrb[60].mxu0  ;;  %v18839_v39 = vadd.f32 %v13080_v44, %v18767_v11 }
 0x894   : > { %v12602_v7 = vpop.f32.mrb[204].mxu1  ;;  %v12431_v6 = vpop.f32.mrb[61].mxu0 }
 0x895   : > { %v12603_v58 = vpop.f32.mrb[205].mxu1  ;;  %v12432_v61 = vadd.f32 %v12431_v6, %v12430_v42  ;;  %v12433_v2 = vpop.f32.mrb[62].mxu0 }
 0x896   : > { %v18841_v62 = vadd.f32 %v12603_v58, %v12602_v7  ;;  %v12605_v20 = vpop.f32.mrb[206].mxu1  ;;  %v12434_v9 = vpop.f32.mrb[63].mxu0 }
 0x897   : > { %v13089_v57 = vadd.f32 %v12432_v61, %v18704_v51  ;;  %v12606_v36 = vpop.f32.mrb[207].mxu1  ;;  %v12435_v34 = vadd.f32 %v12434_v9, %v12433_v2 }
 0x898   : > { %v18844_v12 = vadd.f32 %v12606_v36, %v12605_v20 }
 0x899   : > { %v13095_v35 = vadd.f32 %v12435_v34, %v18706_v25  ;;  %v18848_v11 = vadd.f32 %v13089_v57, %v18769_v55 }
 0x89b   : > { %v12436_v16 = vpop.f32.mrb[64].mxu0  ;;  %v18851_v29 = vadd.f32 %v13095_v35, %v18772_v5 }
 0x89c   : > { %v12608_v50 = vpop.f32.mrb[208].mxu1  ;;  %v12437_v49 = vpop.f32.mrb[65].mxu0 }
 0x89d   : > { %v12609_v44 = vpop.f32.mrb[209].mxu1  ;;  %v12438_v42 = vadd.f32 %v12437_v49, %v12436_v16  ;;  %v12439_v7 = vpop.f32.mrb[66].mxu0 }
 0x89e   : > { %v18853_v6 = vadd.f32 %v12609_v44, %v12608_v50  ;;  %v12611_v51 = vpop.f32.mrb[210].mxu1  ;;  %v12440_v58 = vpop.f32.mrb[67].mxu0 }
 0x89f   : > { %v13086_v61 = vadd.f32 %v12438_v42, %v18709_v45  ;;  %v12612_v2 = vpop.f32.mrb[211].mxu1  ;;  %v12441_v25 = vadd.f32 %v12440_v58, %v12439_v7 }
 0x8a0   : > { %v18856_v20 = vadd.f32 %v12612_v2, %v12611_v51 }
 0x8a1   : > { %v13092_v55 = vadd.f32 %v12441_v25, %v18711_v41  ;;  %v18860_v5 = vadd.f32 %v13086_v61, %v18781_v30 }
 0x8a3   : > { %v12442_v9 = vpop.f32.mrb[68].mxu0  ;;  %v18863_v57 = vadd.f32 %v13092_v55, %v18784_v22 }
 0x8a4   : > { %v12614_v36 = vpop.f32.mrb[212].mxu1  ;;  %v12443_v34 = vpop.f32.mrb[69].mxu0 }
 0x8a5   : > { %v12615_v35 = vpop.f32.mrb[213].mxu1  ;;  %v12444_v16 = vadd.f32 %v12443_v34, %v12442_v9  ;;  %v12445_v50 = vpop.f32.mrb[70].mxu0 }
 0x8a6   : > { %v18865_v49 = vadd.f32 %v12615_v35, %v12614_v36  ;;  %v12617_v45 = vpop.f32.mrb[214].mxu1  ;;  %v12446_v44 = vpop.f32.mrb[71].mxu0 }
 0x8a7   : > { %v13101_v42 = vadd.f32 %v12444_v16, %v18713_v18  ;;  %v12618_v7 = vpop.f32.mrb[215].mxu1  ;;  %v12447_v41 = vadd.f32 %v12446_v44, %v12445_v50 }
 0x8a8   : > { %v18868_v51 = vadd.f32 %v12618_v7, %v12617_v45 }
 0x8a9   : > { %v13107_v30 = vadd.f32 %v12447_v41, %v18715_v46  ;;  %v18872_v22 = vadd.f32 %v13101_v42, %v18793_v27  ;;  %v18890_v41 = vld [vmem:[#allocation5] ss:$0 sm:$0xff] }
 0x8ab   : > { %v12448_v58 = vpop.f32.mrb[72].mxu0  ;;  %v18875_v61 = vadd.f32 %v13107_v30, %v18796_v40 }
 0x8ac   : > { %v12620_v2 = vpop.f32.mrb[216].mxu1  ;;  %v12449_v25 = vpop.f32.mrb[73].mxu0 }
 0x8ad   : > { %v12621_v55 = vpop.f32.mrb[217].mxu1  ;;  %v12450_v9 = vadd.f32 %v12449_v25, %v12448_v58  ;;  %v12451_v36 = vpop.f32.mrb[74].mxu0 }
 0x8ae   : > { %v18877_v18 = vadd.f32 %v12621_v55, %v12620_v2  ;;  %v12623_v34 = vpop.f32.mrb[218].mxu1  ;;  %v12452_v35 = vpop.f32.mrb[75].mxu0 }
 0x8af   : > { %v13098_v16 = vadd.f32 %v12450_v9, %v18717_v31  ;;  %v12624_v46 = vpop.f32.mrb[219].mxu1  ;;  %v12453_v50 = vadd.f32 %v12452_v35, %v12451_v36 }
 0x8b0   : > { %v18880_v27 = vadd.f32 %v12624_v46, %v12623_v34 }
 0x8b1   : > { %v13104_v45 = vadd.f32 %v12453_v50, %v18719_v19  ;;  %v18884_v40 = vadd.f32 %v13098_v16, %v18805_v14 }
 0x8b3   : > { %v12454_v44 = vpop.f32.mrb[76].mxu0  ;;  %v18888_v42 = vadd.f32 %v13104_v45, %v18808_v26 }
 0x8b4   : > { %v12908_v7 = vpop.f32.mrb[124].mxu1  ;;  %v12455_v30 = vpop.f32.mrb[77].mxu0 }
 0x8b5   : > { %v13052_v31 = vadd.f32 %v18788_v38, %v12908_v7  ;;  %v9056_v58 = vpop.f32.mrb[125].mxu1  ;;  %v12456_v2 = vadd.f32 %v12455_v30, %v12454_v44  ;;  %v12457_v25 = vpop.f32.mrb[78].mxu0 }
 0x8b6   : > { %v13055_v19 = vadd.f32 %v18776_v0, %v9056_v58  ;;  %v12909_v14 = vpop.f32.mrb[126].mxu1  ;;  %v12458_v26 = vpop.f32.mrb[79].mxu0 }
 0x8b7   : > { %v9224_v55 = vadd.f32 %v13052_v31, %v18890_v41  ;;  %v13113_v38 = vadd.f32 %v12456_v2, %v18721_v28  ;;  %v13058_v9 = vadd.f32 %v18791_v60, %v12909_v14  ;;  %v9059_v36 = vpop.f32.mrb[127].mxu1  ;;  %v12459_v34 = vadd.f32 %v12458_v26, %v12457_v25 }
 0x8b8   : > { %v9222_v35 = vadd.f32 %v13055_v19, %v18890_v41  ;;  %v13061_v16 = vadd.f32 %v18779_v37, %v9059_v36 }
 0x8b9   : > { %9257 = vst.msk [vmem:[%s18896_s30 + $0x10] sm:$0xff] %vm9254_vm2, %v9224_v55  ;;  %v9225_v0 = vadd.f32 %v13058_v9, %v18890_v41  ;;  %v13119_v46 = vadd.f32 %v12459_v34, %v18725_v15  ;;  %v18909_v50 = vadd.f32 %v13113_v38, %v18817_v43 }
 0x8ba   : > { %9255 = vst.msk [vmem:[%s18896_s30] sm:$0xff] %vm9254_vm2, %v9222_v35  ;;  %v9223_v28 = vadd.f32 %v13061_v16, %v18890_v41 }
 0x8bb   : > { %9258 = vst.msk [vmem:[%s18896_s30 + $0x18] sm:$0xff] %vm9254_vm2, %v9225_v0  ;;  %v12460_v60 = vpop.f32.mrb[80].mxu0  ;;  %v18917_v45 = vadd.f32 %v13119_v46, %v18820_v59 }
 0x8bc   : > { %9256 = vst.msk [vmem:[%s18896_s30 + $0x8] sm:$0xff] %vm9254_vm2, %v9223_v28  ;;  %v12912_v37 = vpop.f32.mrb[128].mxu1  ;;  %v12461_v44 = vpop.f32.mrb[81].mxu0 }
 0x8bd   : > { %v13064_v15 = vadd.f32 %v18812_v17, %v12912_v37  ;;  %v9072_v7 = vpop.f32.mrb[129].mxu1  ;;  %v12462_v43 = vadd.f32 %v12461_v44, %v12460_v60  ;;  %v12463_v30 = vpop.f32.mrb[82].mxu0 }
 0x8be   : > { %v13067_v31 = vadd.f32 %v18800_v13, %v9072_v7  ;;  %v12913_v58 = vpop.f32.mrb[130].mxu1  ;;  %v12464_v2 = vpop.f32.mrb[83].mxu0 }
 0x8bf   : > { %v9228_v25 = vadd.f32 %v13064_v15, %v18890_v41  ;;  %v13110_v59 = vadd.f32 %v12462_v43, %v18729_v54  ;;  %v13070_v19 = vadd.f32 %v18815_v63, %v12913_v58  ;;  %v9075_v14 = vpop.f32.mrb[131].mxu1  ;;  %v12465_v26 = vadd.f32 %v12464_v2, %v12463_v30 }
 0x8c0   : > { %v9226_v17 = vadd.f32 %v13067_v31, %v18890_v41  ;;  %v13073_v55 = vadd.f32 %v18803_v53, %v9075_v14 }
 0x8c1   : > { %9261 = vst.msk [vmem:[%s18896_s30 + $0x30] sm:$0xff] %vm9254_vm2, %v9228_v25  ;;  %v9229_v13 = vadd.f32 %v13070_v19, %v18890_v41  ;;  %v13116_v38 = vadd.f32 %v12465_v26, %v18733_v21  ;;  %v18933_v9 = vadd.f32 %v13110_v59, %v18829_v52 }
 0x8c2   : > { %9259 = vst.msk [vmem:[%s18896_s30 + $0x20] sm:$0xff] %vm9254_vm2, %v9226_v17  ;;  %v9227_v54 = vadd.f32 %v13073_v55, %v18890_v41 }
 0x8c3   : > { %9262 = vst.msk [vmem:[%s18896_s30 + $0x38] sm:$0xff] %vm9254_vm2, %v9229_v13  ;;  %v12466_v63 = vpop.f32.mrb[84].mxu0  ;;  %v18941_v36 = vadd.f32 %v13116_v38, %v18832_v24 }
 0x8c4   : > { %9260 = vst.msk [vmem:[%s18896_s30 + $0x28] sm:$0xff] %vm9254_vm2, %v9227_v54  ;;  %v12916_v53 = vpop.f32.mrb[132].mxu1  ;;  %v12467_v34 = vpop.f32.mrb[85].mxu0 }
 0x8c5   : > { %v13076_v21 = vadd.f32 %v18836_v47, %v12916_v53  ;;  %v9088_v35 = vpop.f32.mrb[133].mxu1  ;;  %v12468_v52 = vadd.f32 %v12467_v34, %v12466_v63  ;;  %v12469_v16 = vpop.f32.mrb[86].mxu0 }
 0x8c6   : > { %v13079_v0 = vadd.f32 %v18824_v23, %v9088_v35  ;;  %v12917_v46 = vpop.f32.mrb[134].mxu1  ;;  %v12470_v28 = vpop.f32.mrb[87].mxu0 }
 0x8c7   : > { %v9232_v60 = vadd.f32 %v13076_v21, %v18890_v41  ;;  %v13125_v24 = vadd.f32 %v12468_v52, %v18737_v10  ;;  %v13082_v37 = vadd.f32 %v18839_v39, %v12917_v46  ;;  %v9091_v44 = vpop.f32.mrb[135].mxu1  ;;  %v12471_v15 = vadd.f32 %v12470_v28, %v12469_v16 }
 0x8c8   : > { %v9230_v47 = vadd.f32 %v13079_v0, %v18890_v41  ;;  %v13085_v7 = vadd.f32 %v18827_v8, %v9091_v44 }
 0x8c9   : > { %9265 = vst.msk [vmem:[%s18896_s30 + $0x50] sm:$0xff] %vm9254_vm2, %v9232_v60  ;;  %v9233_v23 = vadd.f32 %v13082_v37, %v18890_v41  ;;  %v13131_v43 = vadd.f32 %v12471_v15, %v18741_v48  ;;  %v18957_v30 = vadd.f32 %v13125_v24, %v18841_v62 }
 0x8ca   : > { %9263 = vst.msk [vmem:[%s18896_s30 + $0x40] sm:$0xff] %vm9254_vm2, %v9230_v47  ;;  %v9231_v10 = vadd.f32 %v13085_v7, %v18890_v41 }
 0x8cb   : > { %9266 = vst.msk [vmem:[%s18896_s30 + $0x58] sm:$0xff] %vm9254_vm2, %v9233_v23  ;;  %v12472_v39 = vpop.f32.mrb[88].mxu0  ;;  %v18965_v31 = vadd.f32 %v13131_v43, %v18844_v12 }
 0x8cc   : > { %9264 = vst.msk [vmem:[%s18896_s30 + $0x48] sm:$0xff] %vm9254_vm2, %v9231_v10  ;;  %v12920_v8 = vpop.f32.mrb[136].mxu1  ;;  %v12473_v58 = vpop.f32.mrb[89].mxu0 }
 0x8cd   : > { %v13088_v48 = vadd.f32 %v18860_v5, %v12920_v8  ;;  %v9104_v2 = vpop.f32.mrb[137].mxu1  ;;  %v12474_v62 = vadd.f32 %v12473_v58, %v12472_v39  ;;  %v12475_v25 = vpop.f32.mrb[90].mxu0 }
 0x8ce   : > { %v13091_v59 = vadd.f32 %v18848_v11, %v9104_v2  ;;  %v12921_v19 = vpop.f32.mrb[138].mxu1  ;;  %v12476_v14 = vpop.f32.mrb[91].mxu0 }
 0x8cf   : > { %v9236_v26 = vadd.f32 %v13088_v48, %v18890_v41  ;;  %v13122_v12 = vadd.f32 %v12474_v62, %v18745_v33  ;;  %v13094_v17 = vadd.f32 %v18863_v57, %v12921_v19  ;;  %v9107_v55 = vpop.f32.mrb[139].mxu1  ;;  %v12477_v13 = vadd.f32 %v12476_v14, %v12475_v25 }
 0x8d0   : > { %v9234_v5 = vadd.f32 %v13091_v59, %v18890_v41  ;;  %v13097_v38 = vadd.f32 %v18851_v29, %v9107_v55 }
 0x8d1   : > { %9269 = vst.msk [vmem:[%s18896_s30 + $0x70] sm:$0xff] %vm9254_vm2, %v9236_v26  ;;  %v9237_v11 = vadd.f32 %v13094_v17, %v18890_v41  ;;  %v13128_v54 = vadd.f32 %v12477_v13, %v18749_v3  ;;  %v13123_v63 = vadd.f32 %v13122_v12, %v18853_v6 }
 0x8d2   : > { %9267 = vst.msk [vmem:[%s18896_s30 + $0x60] sm:$0xff] %vm9254_vm2, %v9234_v5  ;;  %v9235_v33 = vadd.f32 %v13097_v38, %v18890_v41 }
 0x8d3   : > { %9270 = vst.msk [vmem:[%s18896_s30 + $0x78] sm:$0xff] %vm9254_vm2, %v9237_v11  ;;  %v12478_v57 = vpop.f32.mrb[92].mxu0  ;;  %v13129_v53 = vadd.f32 %v13128_v54, %v18856_v20 }
 0x8d4   : > { %9268 = vst.msk [vmem:[%s18896_s30 + $0x68] sm:$0xff] %vm9254_vm2, %v9235_v33  ;;  %v12924_v29 = vpop.f32.mrb[140].mxu1  ;;  %v12479_v34 = vpop.f32.mrb[93].mxu0 }
 0x8d5   : > { %v13100_v21 = vadd.f32 %v18884_v40, %v12924_v29  ;;  %v9120_v35 = vpop.f32.mrb[141].mxu1  ;;  %v12480_v3 = vadd.f32 %v12479_v34, %v12478_v57  ;;  %v12481_v6 = vpop.f32.mrb[94].mxu0 }
 0x8d6   : > { %v13103_v52 = vadd.f32 %v18872_v22, %v9120_v35  ;;  %v12925_v16 = vpop.f32.mrb[142].mxu1  ;;  %v12482_v0 = vpop.f32.mrb[95].mxu0 }
 0x8d7   : > { %v9240_v46 = vadd.f32 %v13100_v21, %v18890_v41  ;;  %v13137_v20 = vadd.f32 %v12480_v3, %v18753_v32  ;;  %v13106_v28 = vadd.f32 %v18888_v42, %v12925_v16  ;;  %v9123_v60 = vpop.f32.mrb[143].mxu1  ;;  %v12483_v24 = vadd.f32 %v12482_v0, %v12481_v6 }
 0x8d8   : > { %v9238_v40 = vadd.f32 %v13103_v52, %v18890_v41  ;;  %v13109_v37 = vadd.f32 %v18875_v61, %v9123_v60 }
 0x8d9   : > { %9273 = vst.msk [vmem:[%s18896_s30 + $0x90] sm:$0xff] %vm9254_vm2, %v9240_v46  ;;  %v9241_v22 = vadd.f32 %v13106_v28, %v18890_v41  ;;  %v13143_v44 = vadd.f32 %v12483_v24, %v18757_v1  ;;  %v13138_v15 = vadd.f32 %v13137_v20, %v18865_v49 }
 0x8da   : > { %9271 = vst.msk [vmem:[%s18896_s30 + $0x80] sm:$0xff] %vm9254_vm2, %v9238_v40  ;;  %v9239_v32 = vadd.f32 %v13109_v37, %v18890_v41 }
 0x8db   : > { %9274 = vst.msk [vmem:[%s18896_s30 + $0x98] sm:$0xff] %vm9254_vm2, %v9241_v22  ;;  %v12484_v42 = vpop.f32.mrb[96].mxu0  ;;  %v13144_v47 = vadd.f32 %v13143_v44, %v18868_v51 }
 0x8dc   : > { %9272 = vst.msk [vmem:[%s18896_s30 + $0x88] sm:$0xff] %vm9254_vm2, %v9239_v32  ;;  %v12928_v61 = vpop.f32.mrb[144].mxu1  ;;  %v12485_v7 = vpop.f32.mrb[97].mxu0 }
 0x8dd   : > { %v13112_v23 = vadd.f32 %v18933_v9, %v12928_v61  ;;  %v9136_v43 = vpop.f32.mrb[145].mxu1  ;;  %v12486_v1 = vadd.f32 %v12485_v7, %v12484_v42  ;;  %v12487_v49 = vpop.f32.mrb[98].mxu0 }
 0x8de   : > { %v13115_v10 = vadd.f32 %v18909_v50, %v9136_v43  ;;  %v12929_v39 = vpop.f32.mrb[146].mxu1  ;;  %v12488_v8 = vpop.f32.mrb[99].mxu0 }
 0x8df   : > { %v9244_v58 = vadd.f32 %v13112_v23, %v18890_v41  ;;  %v13134_v51 = vadd.f32 %v12486_v1, %v18761_v56  ;;  %v13118_v48 = vadd.f32 %v18941_v36, %v12929_v39  ;;  %v9139_v2 = vpop.f32.mrb[147].mxu1  ;;  %v12489_v62 = vadd.f32 %v12488_v8, %v12487_v49 }
 0x8e0   : > { %v9242_v9 = vadd.f32 %v13115_v10, %v18890_v41  ;;  %v13121_v25 = vadd.f32 %v18917_v45, %v9139_v2 }
 0x8e1   : > { %9277 = vst.msk [vmem:[%s18896_s30 + $0xb0] sm:$0xff] %vm9254_vm2, %v9244_v58  ;;  %v9245_v50 = vadd.f32 %v13118_v48, %v18890_v41  ;;  %v13140_v59 = vadd.f32 %v12489_v62, %v18765_v4  ;;  %v13135_v19 = vadd.f32 %v13134_v51, %v18877_v18 }
 0x8e2   : > { %9275 = vst.msk [vmem:[%s18896_s30 + $0xa0] sm:$0xff] %vm9254_vm2, %v9242_v9  ;;  %v9243_v56 = vadd.f32 %v13121_v25, %v18890_v41 }
 0x8e3   : > { %9278 = vst.msk [vmem:[%s18896_s30 + $0xb8] sm:$0xff] %vm9254_vm2, %v9245_v50  ;;  %v13141_v36 = vadd.f32 %v13140_v59, %v18880_v27 }
 0x8e4   : > { %9276 = vst.msk [vmem:[%s18896_s30 + $0xa8] sm:$0xff] %vm9254_vm2, %v9243_v56  ;;  %v12932_v45 = vpop.f32.mrb[148].mxu1 }
 0x8e5   : > { %v13124_v14 = vadd.f32 %v13123_v63, %v12932_v45  ;;  %v9152_v26 = vpop.f32.mrb[149].mxu1 }
 0x8e6   : > { %v13127_v4 = vadd.f32 %v18957_v30, %v9152_v26  ;;  %v12933_v18 = vpop.f32.mrb[150].mxu1 }
 0x8e7   : > { %v9248_v12 = vadd.f32 %v13124_v14, %v18890_v41  ;;  %v13130_v17 = vadd.f32 %v13129_v53, %v12933_v18  ;;  %v9155_v55 = vpop.f32.mrb[151].mxu1 }
 0x8e8   : > { %v9246_v13 = vadd.f32 %v13127_v4, %v18890_v41  ;;  %v13133_v5 = vadd.f32 %v18965_v31, %v9155_v55 }
 0x8e9   : > { %9281 = vst.msk [vmem:[%s18896_s30 + $0xd0] sm:$0xff] %vm9254_vm2, %v9248_v12  ;;  %v9249_v27 = vadd.f32 %v13130_v17, %v18890_v41 }
 0x8ea   : > { %9279 = vst.msk [vmem:[%s18896_s30 + $0xc0] sm:$0xff] %vm9254_vm2, %v9246_v13  ;;  %v9247_v38 = vadd.f32 %v13133_v5, %v18890_v41 }
 0x8eb   : > { %9282 = vst.msk [vmem:[%s18896_s30 + $0xd8] sm:$0xff] %vm9254_vm2, %v9249_v27 }
 0x8ec   : > { %9280 = vst.msk [vmem:[%s18896_s30 + $0xc8] sm:$0xff] %vm9254_vm2, %v9247_v38  ;;  %v12936_v30 = vpop.f32.mrb[152].mxu1 }
 0x8ed   : > { %v13136_v11 = vadd.f32 %v13135_v19, %v12936_v30  ;;  %v9168_v54 = vpop.f32.mrb[153].mxu1 }
 0x8ee   : > { %v13139_v31 = vadd.f32 %v13138_v15, %v9168_v54  ;;  %v12937_v63 = vpop.f32.mrb[154].mxu1 }
 0x8ef   : > { %v9252_v33 = vadd.f32 %v13136_v11, %v18890_v41  ;;  %v13142_v57 = vadd.f32 %v13141_v36, %v12937_v63  ;;  %v9171_v53 = vpop.f32.mrb[155].mxu1 }
 0x8f0   : > { %v9250_v29 = vadd.f32 %v13139_v31, %v18890_v41  ;;  %v13145_v34 = vadd.f32 %v13144_v47, %v9171_v53 }
 0x8f1   : > { %9285 = vst.msk [vmem:[%s18896_s30 + $0xf0] sm:$0xff] %vm9254_vm2, %v9252_v33  ;;  %v9253_v21 = vadd.f32 %v13142_v57, %v18890_v41 }
 0x8f2   : > { %9283 = vst.msk [vmem:[%s18896_s30 + $0xe0] sm:$0xff] %vm9254_vm2, %v9250_v29  ;;  %v9251_v35 = vadd.f32 %v13145_v34, %v18890_v41 }
 0x8f3   : > { %9286 = vst.msk [vmem:[%s18896_s30 + $0xf8] sm:$0xff] %vm9254_vm2, %v9253_v21 }
 0x8f4   : > { %9284 = vst.msk [vmem:[%s18896_s30 + $0xe8] sm:$0xff] %vm9254_vm2, %v9251_v35 }
 0x8f5 PF: > { %s23_s11 = sadd.s32 1, %s13728_s11  }
 0x8f6   : > { %p20_p5 = scmp.ge.s32.totalorder %s23_s11, 4  }
 0x8f8   :  { %22 = sbr.rel (!%p20_p5) target bundleno = 5 (0x5), region = 105 }
 0x8ff   :  { %9308 = vsyncpa [#allocation7], 1 }
 0x900   :  { %9310 = vsyncpa [#allocation7 + $0x1], 1 }
 0x901   :  { %9311 = vsyncpa [#allocation9], 1 }

</bundles_post_ra>
